<compile_context>
chip_gen: v5e
topology: v5e:2x2
jax: 0.10.0
libtpu: 0.0.40
codegen_flags: <defaults>
</compile_context>

<pallas_src>
import itertools
import numpy as np

import jax
import jax.numpy as jnp
from jax import lax
from jax.experimental import pallas as pl
from jax.experimental.pallas import tpu as pltpu

# ----------------------------------------------------------------------------
# Cl(1,3) geometric-algebra tables (host-side numpy, baked into the kernel).
# ----------------------------------------------------------------------------
_METRIC = [1.0, -1.0, -1.0, -1.0]          # e0^2=+1, e1^2=e2^2=e3^2=-1

BLADES = ([()]
          + [(i,) for i in range(4)]
          + [tuple(c) for c in itertools.combinations(range(4), 2)]
          + [tuple(c) for c in itertools.combinations(range(4), 3)]
          + [(0, 1, 2, 3)])
BLADE_INDEX = {b: i for i, b in enumerate(BLADES)}
GRADES = np.array([len(b) for b in BLADES], dtype=np.int32)   # 0..4


def _blade_product(a, b):
    """Product of two basis blades -> (sign, resulting blade tuple)."""
    arr = list(a) + list(b)
    sign = 1.0
    swapped = True
    while swapped:                       # bubble sort, count swaps
        swapped = False
        for i in range(len(arr) - 1):
            if arr[i] > arr[i + 1]:
                arr[i], arr[i + 1] = arr[i + 1], arr[i]
                sign = -sign
                swapped = True
    out = []
    i = 0
    while i < len(arr):                  # contract equal adjacent generators
        if i + 1 < len(arr) and arr[i] == arr[i + 1]:
            sign *= _METRIC[arr[i]]
            i += 2
        else:
            out.append(arr[i])
            i += 1
    return sign, tuple(out)


# GP_TERMS[k] = list of (i, j, sign): blade_i * blade_j = sign * blade_k
GP_TERMS = [[] for _ in range(16)]
for _i in range(16):
    for _j in range(16):
        _s, _br = _blade_product(BLADES[_i], BLADES[_j])
        GP_TERMS[BLADE_INDEX[_br]].append((_i, _j, float(_s)))
assert sum(len(t) for t in GP_TERMS) == 256

# For each output blade k there is exactly one j per i: j = GP_J[k, i].
GP_J = np.zeros((16, 16), np.int32)
GP_SIGN = np.zeros((16, 16), np.float32)
for _k in range(16):
    assert len(GP_TERMS[_k]) == 16
    for (_i, _j, _s) in GP_TERMS[_k]:
        GP_J[_k, _i] = _j
        GP_SIGN[_k, _i] = _s

_METRIC_NP = np.zeros(16, dtype=np.float32)   # invariant bilinear form <~x y>_0
for _i, _bi in enumerate(BLADES):
    _s, _rest = _blade_product(_bi, _bi)
    assert _rest == ()
    _g = len(_bi)
    _METRIC_NP[_i] = ((-1.0) ** (_g * (_g - 1) // 2)) * _s

# ----------------------------------------------------------------------------
# Model configuration (small, deterministic).
# ----------------------------------------------------------------------------
IN_MV, COND_MV, OUT_MV, HID_MV = 4, 4, 4, 8
IN_S, COND_S, OUT_S, HID_S = 4, 4, 4, 16
NUM_BLOCKS = 2
NUM_HEADS = 2
EPS = 1e-6

D_IN = IN_MV * 16 + IN_S           # 68
D_COND = COND_MV * 16 + COND_S     # 68
D_HID = HID_MV * 16 + HID_S        # 144
D_OUT = OUT_MV * 16 + OUT_S        # 68
D_OUT_PAD = 128                    # lane-dense output store

CH = HID_MV // NUM_HEADS           # 4 mv channels / head
SH = HID_S // NUM_HEADS            # 8 scalars / head
DH = CH * 16 + SH                  # 72 true features / head (attention scale)
DHP = 128                          # lane-aligned padded head width
QW = NUM_HEADS * DHP               # 256

MLP_MV = 2 * HID_MV                # 16 hidden mv channels in the geometric MLP
MLP_S = 2 * HID_S                  # 32 hidden scalars in the geometric MLP
RPW = 16 * MLP_MV * 16             # 4096: 16 signed blade-permuted right copies
D_LR = RPW + MLP_MV * 16 + MLP_S   # 4384

# Head-major feature permutation of the packed hidden layout (72 per head).
HEAD_PERM = np.concatenate([
    np.concatenate([np.arange(h * CH * 16, (h + 1) * CH * 16),
                    HID_MV * 16 + np.arange(h * SH, (h + 1) * SH)])
    for h in range(NUM_HEADS)]).astype(np.int32)

# Per-head attention metric (blade metric on mv features, 1 on scalars) / sqrt(DH).
METRIC_HEAD = (np.concatenate([
    np.concatenate([np.tile(_METRIC_NP, CH), np.ones(SH, np.float32)])
    for _ in range(NUM_HEADS)]) / np.sqrt(DH)).astype(np.float32)

# Padded head-major layout: head h occupies lanes [h*128, h*128+72), rest zero.
HEADP_SRC = np.zeros(QW, np.int32)
HEADP_VALID = np.zeros(QW, np.float32)
METRIC_HEADP = np.zeros(QW, np.float32)
for _h in range(NUM_HEADS):
    HEADP_SRC[_h * DHP:_h * DHP + DH] = HEAD_PERM[_h * DH:(_h + 1) * DH]
    HEADP_VALID[_h * DHP:_h * DHP + DH] = 1.0
    METRIC_HEADP[_h * DHP:_h * DHP + DH] = METRIC_HEAD[_h * DH:(_h + 1) * DH]

# 16 signed blade-permutations of the right-operand mv columns (channel-major):
# RP column k*256 + c*16 + i  <-  sign(i,k) * right column (c*16 + j(i,k)).
RP_SRC = np.zeros((16, MLP_MV, 16), np.int32)
RP_SGN = np.zeros((16, MLP_MV, 16), np.float32)
for _k in range(16):
    for _c in range(MLP_MV):
        RP_SRC[_k, _c, :] = _c * 16 + GP_J[_k]
        RP_SGN[_k, _c, :] = GP_SIGN[_k]
RP_SRC = RP_SRC.reshape(-1)
RP_SGN = RP_SGN.reshape(-1)

# Blade-major row permutation for the MLP output projection.
MVBM_PERM = np.array([(g % MLP_MV) * 16 + g // MLP_MV
                      for g in range(MLP_MV * 16)], dtype=np.int32)
MO_ROWS = np.concatenate([MVBM_PERM,
                          np.arange(MLP_MV * 16, MLP_MV * 16 + MLP_S)]).astype(np.int32)

# Layer-norm stats matrix: (x*x) @ NMAT gives per-mv-channel Minkowski square
# norms (cols 0..HID_MV-1, metric folded in) and the scalar mean-square (col HID_MV).
_NMAT = np.zeros((D_HID, 16), dtype=np.float32)
for _c in range(HID_MV):
    _NMAT[_c * 16:(_c + 1) * 16, _c] = _METRIC_NP
_NMAT[HID_MV * 16:, HID_MV] = 1.0 / HID_S
NMAT = jnp.asarray(_NMAT)

# Block-sum matrix: sums groups of 16 lanes (per channel) -> (M, 16).
_SMAT = np.zeros((MLP_MV * 16, MLP_MV), dtype=np.float32)
for _c in range(MLP_MV):
    _SMAT[_c * 16:(_c + 1) * 16, _c] = 1.0
SMAT = jnp.asarray(_SMAT)

# ----------------------------------------------------------------------------
# EquiLinear parameters: Pin(1,3)-equivariant linear layer as a dense matrix.
# ----------------------------------------------------------------------------
def init_equilinear(key, c_in, c_out, s_in, s_out):
    k1, k2, k3, k4 = jax.random.split(key, 4)
    w_mv = jax.random.normal(k1, (5, c_out, c_in), jnp.float32) / np.sqrt(c_in)
    w_s2mv = jax.random.normal(k2, (s_in, c_out), jnp.float32) / np.sqrt(max(s_in, 1))
    w_mv2s = jax.random.normal(k3, (c_in, s_out), jnp.float32) / np.sqrt(c_in)
    w_s2s = jax.random.normal(k4, (s_in, s_out), jnp.float32) / np.sqrt(max(s_in, 1))

    d_in = c_in * 16 + s_in
    d_out = c_out * 16 + s_out
    W = jnp.zeros((d_in, d_out), jnp.float32)

    # multivector -> multivector: grade-wise channel mixing (5 basis maps)
    w_blade = w_mv[GRADES]                                   # (16, c_out, c_in)
    dense = jnp.zeros((c_in, 16, c_out, 16), jnp.float32)
    for b in range(16):
        dense = dense.at[:, b, :, b].set(w_blade[b].T)
    W = W.at[:c_in * 16, :c_out * 16].set(dense.reshape(c_in * 16, c_out * 16))

    if s_in > 0:   # scalars -> scalar blade of output multivectors
        W = W.at[c_in * 16:, 0:c_out * 16:16].set(w_s2mv)
    if s_out > 0:  # scalar blade of input multivectors -> output scalars
        W = W.at[0:c_in * 16:16, c_out * 16:].set(w_mv2s)
    if s_in > 0 and s_out > 0:
        W = W.at[c_in * 16:, c_out * 16:].set(w_s2s)

    bias = jnp.zeros((d_out,), jnp.float32)
    return {'w': W, 'b': bias, 'c_out': c_out, 's_out': s_out}


def init_params(key):
    keys = jax.random.split(key, 2 + NUM_BLOCKS)
    params = {
        'linear_in': init_equilinear(keys[0], IN_MV, HID_MV, IN_S, HID_S),
        'linear_out': init_equilinear(keys[1], HID_MV, OUT_MV, HID_S, OUT_S),
        'blocks': [],
    }
    for b in range(NUM_BLOCKS):
        bk = jax.random.split(keys[2 + b], 11)
        blk = {
            'attn': {
                'q': init_equilinear(bk[0], HID_MV, HID_MV, HID_S, HID_S),
                'k': init_equilinear(bk[1], HID_MV, HID_MV, HID_S, HID_S),
                'v': init_equilinear(bk[2], HID_MV, HID_MV, HID_S, HID_S),
                'out': init_equilinear(bk[3], HID_MV, HID_MV, HID_S, HID_S),
            },
            'cross': {
                'q': init_equilinear(bk[4], HID_MV, HID_MV, HID_S, HID_S),
                'k': init_equilinear(bk[5], COND_MV, HID_MV, COND_S, HID_S),
                'v': init_equilinear(bk[6], COND_MV, HID_MV, COND_S, HID_S),
                'out': init_equilinear(bk[7], HID_MV, HID_MV, HID_S, HID_S),
            },
            'mlp': {
                'left': init_equilinear(bk[8], HID_MV, 2 * HID_MV, HID_S, 2 * HID_S),
                'right': init_equilinear(bk[9], HID_MV, 2 * HID_MV, HID_S, 2 * HID_S),
                'out': init_equilinear(bk[10], 2 * HID_MV, HID_MV, 2 * HID_S, HID_S),
            },
        }
        params['blocks'].append(blk)
    return params


# ----------------------------------------------------------------------------
# Parameter packing: head padding, metric/scale folding, GP permutation bake,
# bf16 weight stacks with a leading block axis.
# ----------------------------------------------------------------------------
def pack_params(params):
    headp_valid = jnp.asarray(HEADP_VALID)
    metric_headp = jnp.asarray(METRIC_HEADP)
    rp_sgn = jnp.asarray(RP_SGN)

    def head_cols(p, with_metric=False):
        w = p['w'][:, HEADP_SRC] * headp_valid[None, :]
        b = p['b'][HEADP_SRC] * headp_valid
        if with_metric:
            w = w * metric_headp[None, :]
            b = b * metric_headp
        return w, b

    def head_rows(p):
        w = p['w'][HEADP_SRC, :] * headp_valid[:, None]
        return w, p['b']

    w_qkv, b_qkv, w_ao, b_ao = [], [], [], []
    w_cq, b_cq, w_ckv, b_ckv, w_co, b_co = [], [], [], [], [], []
    w_lr, b_lr, w_mo, b_mo = [], [], [], []
    for blk in params['blocks']:
        wq, bq = head_cols(blk['attn']['q'], with_metric=True)
        wk, bk = head_cols(blk['attn']['k'])
        wv, bv = head_cols(blk['attn']['v'])
        w_qkv.append(jnp.concatenate([wq, wk, wv], axis=1))       # (144, 768)
        b_qkv.append(jnp.concatenate([bq, bk, bv]))
        wo, bo = head_rows(blk['attn']['out'])
        w_ao.append(wo)                                           # (256, 144)
        b_ao.append(bo)

        wq, bq = head_cols(blk['cross']['q'], with_metric=True)
        w_cq.append(wq)                                           # (144, 256)
        b_cq.append(bq)
        wk, bk = head_cols(blk['cross']['k'])
        wv, bv = head_cols(blk['cross']['v'])
        w_ckv.append(jnp.concatenate([wk, wv], axis=1))           # (68, 512)
        b_ckv.append(jnp.concatenate([bk, bv]))
        wo, bo = head_rows(blk['cross']['out'])
        w_co.append(wo)                                           # (256, 144)
        b_co.append(bo)

        # Geometric MLP:  columns = [RP (4096) | left mv (256) | left s (32)],
        # all section offsets multiples of 128.
        wl = blk['mlp']['left']['w']                              # (144, 288)
        bl = blk['mlp']['left']['b']
        wr = blk['mlp']['right']['w'][:, :MLP_MV * 16]            # mv part only
        br = blk['mlp']['right']['b'][:MLP_MV * 16]
        w_rp = wr[:, RP_SRC] * rp_sgn[None, :]                    # (144, 4096)
        b_rp = br[RP_SRC] * rp_sgn
        w_lr.append(jnp.concatenate([w_rp, wl], axis=1))          # (144, 4384)
        b_lr.append(jnp.concatenate([b_rp, bl]))
        w_mo.append(blk['mlp']['out']['w'][MO_ROWS, :])           # (288, 144)
        b_mo.append(blk['mlp']['out']['b'])

    def stack_w(ws):
        return jnp.stack(ws).astype(jnp.bfloat16)

    def stack_b(bs):
        return jnp.stack(bs)[:, None, :].astype(jnp.float32)

    w_out = params['linear_out']['w']
    b_out = params['linear_out']['b']
    w_out_p = jnp.zeros((D_HID, D_OUT_PAD), jnp.float32).at[:, :D_OUT].set(w_out)
    b_out_p = jnp.zeros((1, D_OUT_PAD), jnp.float32).at[:, :D_OUT].set(b_out[None, :])

    return {
        'w_in': params['linear_in']['w'].astype(jnp.bfloat16),
        'b_in': params['linear_in']['b'][None, :].astype(jnp.float32),
        'w_qkv': stack_w(w_qkv), 'b_qkv': stack_b(b_qkv),
        'w_ao': stack_w(w_ao), 'b_ao': stack_b(b_ao),
        'w_cq': stack_w(w_cq), 'b_cq': stack_b(b_cq),
        'w_ckv': stack_w(w_ckv), 'b_ckv': stack_b(b_ckv),
        'w_co': stack_w(w_co), 'b_co': stack_b(b_co),
        'w_lr': stack_w(w_lr), 'b_lr': stack_b(b_lr),
        'w_mo': stack_w(w_mo), 'b_mo': stack_b(b_mo),
        'w_out': w_out_p.astype(jnp.bfloat16), 'b_out': b_out_p,
    }


# ----------------------------------------------------------------------------
# Fused Pallas kernel: grid over transformer blocks, hidden state in VMEM.
# ----------------------------------------------------------------------------
def _make_fused_kernel(B, N, nc_pad, nc_valid):
    del B  # captured below via closure in mha's static python loops

    def kernel(x_ref, cond_ref, nmat_ref, smat_ref,
               w_in_ref, b_in_ref,
               w_qkv_ref, b_qkv_ref, w_ao_ref, b_ao_ref,
               w_cq_ref, b_cq_ref, w_ckv_ref, b_ckv_ref, w_co_ref, b_co_ref,
               w_lr_ref, b_lr_ref, w_mo_ref, b_mo_ref,
               w_out_ref, b_out_ref,
               o_ref, h_ref):
        f32 = jnp.float32
        blk = pl.program_id(0)
        nb = x_ref.shape[0] // N                  # batch count (static)

        def mmw(a, w):
            # weight matmul: bf16 operands on the MXU, f32 accumulation
            return jnp.dot(a.astype(jnp.bfloat16), w, preferred_element_type=f32)

        nmat = nmat_ref[...]
        smat = smat_ref[...]
        is_mv_col = lax.broadcasted_iota(jnp.int32, (1, D_HID), 1) < HID_MV * 16

        def equi_layer_norm(h):
            stats = jnp.dot(h * h, nmat, preferred_element_type=f32)   # (M, 16)
            sq = stats[:, 0:HID_MV]                                    # Minkowski |x_c|^2
            s_ms = stats[:, HID_MV:HID_MV + 1]                         # mean(s^2)
            inv_mv = lax.rsqrt(jnp.mean(jnp.abs(sq), axis=-1, keepdims=True) + EPS)
            inv_s = lax.rsqrt(s_ms + EPS)
            return h * jnp.where(is_mv_col, inv_mv, inv_s)

        def gelu(t):   # tanh approximation (matches lgatr's gated_gelu)
            return 0.5 * t * (1.0 + jnp.tanh(0.7978845608028654
                                             * (t + 0.044715 * t * t * t)))

        # additive bias masking padded condition rows in cross-attention
        kv_bias = jnp.where(
            lax.broadcasted_iota(jnp.int32, (1, nc_pad), 1) < nc_valid,
            0.0, -1e30).astype(f32)

        def mha(q, k, v, n_q, n_kv, bias=None):
            # q already carries the blade metric and 1/sqrt(DH) (folded into
            # W_q); head h is the lane-aligned slice [h*128, (h+1)*128).
            rows = []
            for b in range(nb):
                heads = []
                for hh in range(NUM_HEADS):
                    c0 = hh * DHP
                    qh = q[b * n_q:(b + 1) * n_q, c0:c0 + DHP]
                    kh = k[b * n_kv:(b + 1) * n_kv, c0:c0 + DHP]
                    vh = v[b * n_kv:(b + 1) * n_kv, c0:c0 + DHP]
                    s = lax.dot_general(qh, kh, (((1,), (1,)), ((), ())),
                                        preferred_element_type=f32)     # (n_q, n_kv)
                    if bias is not None:
                        s = s + bias
                    s = s - jnp.max(s, axis=-1, keepdims=True)
                    p = jnp.exp(s)
                    p = p / jnp.sum(p, axis=-1, keepdims=True)
                    heads.append(jnp.dot(p, vh, preferred_element_type=f32))
                rows.append(jnp.concatenate(heads, axis=-1))
            return jnp.concatenate(rows, axis=0)                         # (M, QW)

        @pl.when(blk == 0)
        def _():
            h_ref[...] = mmw(x_ref[...], w_in_ref[...]) + b_in_ref[...]

        h = h_ref[...]
        cond = cond_ref[...]

        # ---- geometric self-attention + residual ----
        hn = equi_layer_norm(h)
        qkv = mmw(hn, w_qkv_ref[0]) + b_qkv_ref[0]                       # (M, 3*QW)
        ctx = mha(qkv[:, 0:QW], qkv[:, QW:2 * QW], qkv[:, 2 * QW:3 * QW], N, N)
        h = h + mmw(ctx, w_ao_ref[0]) + b_ao_ref[0]

        # ---- geometric cross-attention on the condition + residual ----
        hn = equi_layer_norm(h)
        cq = mmw(hn, w_cq_ref[0]) + b_cq_ref[0]                          # (M, QW)
        ckv = mmw(cond, w_ckv_ref[0]) + b_ckv_ref[0]                     # (B*nc_pad, 2*QW)
        ctx = mha(cq, ckv[:, 0:QW], ckv[:, QW:2 * QW], N, nc_pad, bias=kv_bias)
        h = h + mmw(ctx, w_co_ref[0]) + b_co_ref[0]

        # ---- geometric MLP (bilinear geometric product + gated GELU) ----
        hn = equi_layer_norm(h)
        lr = mmw(hn, w_lr_ref[0]) + b_lr_ref[0]                          # (M, 4384)
        lmv = lr[:, RPW:RPW + MLP_MV * 16]                               # left mv (channel-major)
        ls = lr[:, RPW + MLP_MV * 16:]                                   # left scalars
        w_mo = w_mo_ref[0]

        # scalar blade of the channel-wise geometric product -> gate
        blade0 = jnp.dot(lmv * lr[:, 0:MLP_MV * 16], smat,
                         preferred_element_type=f32)                     # (M, 16)
        gate = gelu(blade0)

        acc = mmw(gelu(ls), w_mo[MLP_MV * 16:, :])                       # scalar rows
        acc = acc + mmw(blade0 * gate, w_mo[0:16, :])
        for kk in range(1, 16):
            rpk = lr[:, kk * MLP_MV * 16:(kk + 1) * MLP_MV * 16]         # aligned 256-slice
            bladek = jnp.dot(lmv * rpk, smat, preferred_element_type=f32)
            acc = acc + mmw(bladek * gate, w_mo[kk * 16:(kk + 1) * 16, :])
        h = h + acc + b_mo_ref[0]

        h_ref[...] = h

        # linear_out + lane-dense (M, 128) store; cheap enough to do every
        # block so the revisited output block is always valid.
        o_ref[...] = (mmw(h, w_out_ref[...]) + b_out_ref[...]).astype(o_ref.dtype)

    return kernel


def conditional_lgatr_forward(packed, multivectors, multivectors_condition,
                              scalars, scalars_condition):
    B, N = multivectors.shape[:2]
    Nc = multivectors_condition.shape[1]
    M = B * N
    nc_pad = ((Nc + 7) // 8) * 8                      # sublane-aligned cond rows

    x = jnp.concatenate([multivectors.reshape(B, N, IN_MV * 16), scalars],
                        axis=-1).reshape(M, D_IN).astype(jnp.float32)
    cond = jnp.concatenate([multivectors_condition.reshape(B, Nc, COND_MV * 16),
                            scalars_condition], axis=-1).astype(jnp.float32)
    cond = jnp.pad(cond, ((0, 0), (0, nc_pad - Nc), (0, 0)))
    cond = cond.reshape(B * nc_pad, D_COND)

    shared = [x, cond, NMAT, SMAT, packed['w_in'], packed['b_in']]
    per_block = [packed[k] for k in
                 ('w_qkv', 'b_qkv', 'w_ao', 'b_ao',
                  'w_cq', 'b_cq', 'w_ckv', 'b_ckv', 'w_co', 'b_co',
                  'w_lr', 'b_lr', 'w_mo', 'b_mo')]
    tail = [packed['w_out'], packed['b_out']]

    def shared_spec(a):
        nd = a.ndim
        return pl.BlockSpec(tuple(a.shape), lambda b, _nd=nd: (0,) * _nd)

    def block_spec(a):
        nd = a.ndim
        return pl.BlockSpec((1,) + tuple(a.shape[1:]),
                            lambda b, _nd=nd: (b,) + (0,) * (_nd - 1))

    in_specs = ([shared_spec(a) for a in shared]
                + [block_spec(a) for a in per_block]
                + [shared_spec(a) for a in tail])

    out = pl.pallas_call(
        _make_fused_kernel(B, N, nc_pad, Nc),
        grid=(NUM_BLOCKS,),
        out_shape=jax.ShapeDtypeStruct((M, D_OUT_PAD), jnp.float32),
        in_specs=in_specs,
        out_specs=pl.BlockSpec((M, D_OUT_PAD), lambda b: (0, 0)),
        scratch_shapes=[pltpu.VMEM((M, D_HID), jnp.float32)],
        compiler_params=pltpu.CompilerParams(
            dimension_semantics=("arbitrary",)),
    )(*(shared + per_block + tail))

    out_mv = out[:, :OUT_MV * 16].reshape(B, N, OUT_MV, 16)
    out_s = out[:, OUT_MV * 16:D_OUT].reshape(B, N, OUT_S)
    return out_mv, out_s


# ----------------------------------------------------------------------------
if __name__ == "__main__":
    key = jax.random.PRNGKey(0)
    k_mv, k_cmv, k_s, k_cs = jax.random.split(key, 4)

    B, N, Nc = 2, 8, 6
    multivectors = jax.random.normal(k_mv, (B, N, IN_MV, 16), jnp.float32)
    multivectors_condition = jax.random.normal(k_cmv, (B, Nc, COND_MV, 16), jnp.float32)
    scalars = jax.random.normal(k_s, (B, N, IN_S), jnp.float32)
    scalars_condition = jax.random.normal(k_cs, (B, Nc, COND_S), jnp.float32)

    params = init_params(jax.random.PRNGKey(42))
    packed = pack_params(params)

    out_mv, out_s = conditional_lgatr_forward(
        packed, multivectors, multivectors_condition, scalars, scalars_condition)
    jax.block_until_ready((out_mv, out_s))

    assert out_mv.shape == (B, N, OUT_MV, 16), out_mv.shape
    assert out_s.shape == (B, N, OUT_S), out_s.shape
    assert bool(jnp.all(jnp.isfinite(out_mv))) and bool(jnp.all(jnp.isfinite(out_s)))
    print("KERNEL_OK")
</pallas_src>

<mosaic_0001>
module attributes {stable_mosaic.version = 11 : i64} {
  func.func @kernel(%arg0: i32, %arg1: memref<16x68xf32, #tpu.memory_space<vmem>>, %arg2: memref<16x68xf32, #tpu.memory_space<vmem>>, %arg3: memref<144x16xf32, #tpu.memory_space<vmem>>, %arg4: memref<256x16xf32, #tpu.memory_space<vmem>>, %arg5: memref<68x144xbf16, #tpu.memory_space<vmem>>, %arg6: memref<1x144xf32, #tpu.memory_space<vmem>>, %arg7: memref<1x144x768xbf16, #tpu.memory_space<vmem>>, %arg8: memref<1x1x768xf32, #tpu.memory_space<vmem>>, %arg9: memref<1x256x144xbf16, #tpu.memory_space<vmem>>, %arg10: memref<1x1x144xf32, #tpu.memory_space<vmem>>, %arg11: memref<1x144x256xbf16, #tpu.memory_space<vmem>>, %arg12: memref<1x1x256xf32, #tpu.memory_space<vmem>>, %arg13: memref<1x68x512xbf16, #tpu.memory_space<vmem>>, %arg14: memref<1x1x512xf32, #tpu.memory_space<vmem>>, %arg15: memref<1x256x144xbf16, #tpu.memory_space<vmem>>, %arg16: memref<1x1x144xf32, #tpu.memory_space<vmem>>, %arg17: memref<1x144x4384xbf16, #tpu.memory_space<vmem>>, %arg18: memref<1x1x4384xf32, #tpu.memory_space<vmem>>, %arg19: memref<1x288x144xbf16, #tpu.memory_space<vmem>>, %arg20: memref<1x1x144xf32, #tpu.memory_space<vmem>>, %arg21: memref<144x128xbf16, #tpu.memory_space<vmem>>, %arg22: memref<1x128xf32, #tpu.memory_space<vmem>>, %arg23: memref<16x128xf32, #tpu.memory_space<vmem>>, %arg24: memref<16x144xf32, #tpu.memory_space<vmem>>) attributes {dimension_semantics = [#tpu.dimension_semantics<arbitrary>], iteration_bounds = array<i64: 2>, scalar_prefetch = 0 : i64, scratch_operands = 1 : i64, tpu.core_type = #tpu.core_type<tc>, window_params = [{pipeline_mode = #tpu.pipeline_mode<synchronous>, transform_indices = @transform_0, window_bounds = array<i64: 16, 68>}, {pipeline_mode = #tpu.pipeline_mode<synchronous>, transform_indices = @transform_1, window_bounds = array<i64: 16, 68>}, {pipeline_mode = #tpu.pipeline_mode<synchronous>, transform_indices = @transform_2, window_bounds = array<i64: 144, 16>}, {pipeline_mode = #tpu.pipeline_mode<synchronous>, transform_indices = @transform_3, window_bounds = array<i64: 256, 16>}, {pipeline_mode = #tpu.pipeline_mode<synchronous>, transform_indices = @transform_4, window_bounds = array<i64: 68, 144>}, {pipeline_mode = #tpu.pipeline_mode<synchronous>, transform_indices = @transform_5, window_bounds = array<i64: 1, 144>}, {transform_indices = @transform_6, window_bounds = array<i64: 1, 144, 768>}, {transform_indices = @transform_7, window_bounds = array<i64: 1, 1, 768>}, {transform_indices = @transform_8, window_bounds = array<i64: 1, 256, 144>}, {transform_indices = @transform_9, window_bounds = array<i64: 1, 1, 144>}, {transform_indices = @transform_10, window_bounds = array<i64: 1, 144, 256>}, {transform_indices = @transform_11, window_bounds = array<i64: 1, 1, 256>}, {transform_indices = @transform_12, window_bounds = array<i64: 1, 68, 512>}, {transform_indices = @transform_13, window_bounds = array<i64: 1, 1, 512>}, {transform_indices = @transform_14, window_bounds = array<i64: 1, 256, 144>}, {transform_indices = @transform_15, window_bounds = array<i64: 1, 1, 144>}, {transform_indices = @transform_16, window_bounds = array<i64: 1, 144, 4384>}, {transform_indices = @transform_17, window_bounds = array<i64: 1, 1, 4384>}, {transform_indices = @transform_18, window_bounds = array<i64: 1, 288, 144>}, {transform_indices = @transform_19, window_bounds = array<i64: 1, 1, 144>}, {pipeline_mode = #tpu.pipeline_mode<synchronous>, transform_indices = @transform_20, window_bounds = array<i64: 144, 128>}, {pipeline_mode = #tpu.pipeline_mode<synchronous>, transform_indices = @transform_21, window_bounds = array<i64: 1, 128>}, {pipeline_mode = #tpu.pipeline_mode<synchronous>, transform_indices = @transform_22, window_bounds = array<i64: 16, 128>}]} {
    %c0 = arith.constant 0 : index
    %c0_0 = arith.constant 0 : index
    %0 = vector.load %arg3[%c0, %c0_0] : memref<144x16xf32, #tpu.memory_space<vmem>>, vector<144x16xf32>
    %c0_1 = arith.constant 0 : index
    %c0_2 = arith.constant 0 : index
    %1 = vector.load %arg4[%c0_1, %c0_2] : memref<256x16xf32, #tpu.memory_space<vmem>>, vector<256x16xf32>
    %2 = tpu.iota {dimensions = array<i32: 1>} : vector<1x144xi32>
    %c128_i32 = arith.constant 128 : i32
    %3 = vector.broadcast %c128_i32 : i32 to vector<1x144xi32>
    %4 = arith.cmpi slt, %2, %3 : vector<1x144xi32>
    %5 = tpu.iota {dimensions = array<i32: 1>} : vector<1x8xi32>
    %c6_i32 = arith.constant 6 : i32
    %6 = vector.broadcast %c6_i32 : i32 to vector<1x8xi32>
    %7 = arith.cmpi slt, %5, %6 : vector<1x8xi32>
    %cst = arith.constant 0.000000e+00 : f32
    %cst_3 = arith.constant -1.000000e+30 : f32
    %8 = vector.broadcast %cst : f32 to vector<1x8xf32>
    %9 = vector.broadcast %cst_3 : f32 to vector<1x8xf32>
    %10 = arith.select %7, %8, %9 : vector<1x8xi1>, vector<1x8xf32>
    %c0_i32 = arith.constant 0 : i32
    %11 = arith.cmpi eq, %arg0, %c0_i32 : i32
    %12 = arith.extui %11 : i1 to i32
    %c0_i32_4 = arith.constant 0 : i32
    %13 = arith.cmpi ne, %12, %c0_i32_4 : i32
    scf.if %13 {
      %c0_154 = arith.constant 0 : index
      %c0_155 = arith.constant 0 : index
      %440 = vector.load %arg1[%c0_154, %c0_155] : memref<16x68xf32, #tpu.memory_space<vmem>>, vector<16x68xf32>
      %c0_156 = arith.constant 0 : index
      %c0_157 = arith.constant 0 : index
      %441 = vector.load %arg5[%c0_156, %c0_157] : memref<68x144xbf16, #tpu.memory_space<vmem>>, vector<68x144xbf16>
      %442 = arith.truncf %440 : vector<16x68xf32> to vector<16x68xbf16>
      %cst_158 = arith.constant dense<0.000000e+00> : vector<16x144xf32>
      %443 = tpu.matmul %442, %441, %cst_158 {dimension_numbers = #tpu.dot_dimension_numbers<[1], [0], [0], [1], [0, 0, 1, 1], [], []>} : vector<16x68xbf16>, vector<68x144xbf16>, vector<16x144xf32> -> vector<16x144xf32>
      %c0_159 = arith.constant 0 : index
      %c0_160 = arith.constant 0 : index
      %444 = vector.load %arg6[%c0_159, %c0_160] : memref<1x144xf32, #tpu.memory_space<vmem>>, vector<1x144xf32>
      %445 = vector.broadcast %444 : vector<1x144xf32> to vector<16x144xf32>
      %446 = arith.addf %443, %445 : vector<16x144xf32>
      %c0_161 = arith.constant 0 : index
      %c0_162 = arith.constant 0 : index
      %447 = vector.load %arg24[%c0_161, %c0_162] : memref<16x144xf32, #tpu.memory_space<vmem>>, vector<16x144xf32>
      tpu.vector_store %arg24[%c0_161, %c0_162], %446 {strides = array<i32>} : memref<16x144xf32, #tpu.memory_space<vmem>>, vector<16x144xf32>,
    } else {
    }
    %c0_5 = arith.constant 0 : index
    %c0_6 = arith.constant 0 : index
    %14 = vector.load %arg24[%c0_5, %c0_6] : memref<16x144xf32, #tpu.memory_space<vmem>>, vector<16x144xf32>
    %c0_7 = arith.constant 0 : index
    %c0_8 = arith.constant 0 : index
    %15 = vector.load %arg2[%c0_7, %c0_8] : memref<16x68xf32, #tpu.memory_space<vmem>>, vector<16x68xf32>
    %16 = arith.mulf %14, %14 : vector<16x144xf32>
    %cst_9 = arith.constant dense<0.000000e+00> : vector<16x16xf32>
    %17 = tpu.matmul %16, %0, %cst_9 {dimension_numbers = #tpu.dot_dimension_numbers<[1], [0], [0], [1], [0, 0, 1, 1], [], []>} : vector<16x144xf32>, vector<144x16xf32>, vector<16x16xf32> -> vector<16x16xf32>
    %18 = vector.extract_strided_slice %17 {offsets = [0, 0], sizes = [16, 8], strides = [1, 1]} : vector<16x16xf32> to vector<16x8xf32>
    %19 = vector.extract_strided_slice %17 {offsets = [0, 8], sizes = [16, 1], strides = [1, 1]} : vector<16x16xf32> to vector<16x1xf32>
    %20 = math.absf %18 : vector<16x8xf32>
    %cst_10 = arith.constant dense<0.000000e+00> : vector<16xf32>
    %21 = vector.multi_reduction <add>, %20, %cst_10 [1] : vector<16x8xf32> to vector<16xf32>
    %22 = vector.shape_cast %21 : vector<16xf32> to vector<16x1xf32>
    %cst_11 = arith.constant 8.000000e+00 : f32
    %23 = vector.broadcast %cst_11 : f32 to vector<16x1xf32>
    %24 = arith.divf %22, %23 : vector<16x1xf32>
    %cst_12 = arith.constant 9.99999997E-7 : f32
    %25 = vector.broadcast %cst_12 : f32 to vector<16x1xf32>
    %26 = arith.addf %24, %25 : vector<16x1xf32>
    %27 = math.rsqrt %26 : vector<16x1xf32>
    %cst_13 = arith.constant 9.99999997E-7 : f32
    %28 = vector.broadcast %cst_13 : f32 to vector<16x1xf32>
    %29 = arith.addf %19, %28 : vector<16x1xf32>
    %30 = math.rsqrt %29 : vector<16x1xf32>
    %31 = vector.shape_cast %4 : vector<1x144xi1> to vector<1x144xi1>
    %32 = vector.broadcast %31 : vector<1x144xi1> to vector<16x144xi1>
    %33 = vector.shape_cast %27 : vector<16x1xf32> to vector<16x1xf32>
    %34 = vector.broadcast %33 : vector<16x1xf32> to vector<16x144xf32>
    %35 = vector.shape_cast %30 : vector<16x1xf32> to vector<16x1xf32>
    %36 = vector.broadcast %35 : vector<16x1xf32> to vector<16x144xf32>
    %37 = arith.select %32, %34, %36 : vector<16x144xi1>, vector<16x144xf32>
    %38 = arith.mulf %14, %37 : vector<16x144xf32>
    %c0_14 = arith.constant 0 : index
    %c0_15 = arith.constant 0 : index
    %c0_16 = arith.constant 0 : index
    %39 = vector.load %arg7[%c0_14, %c0_15, %c0_16] : memref<1x144x768xbf16, #tpu.memory_space<vmem>>, vector<1x144x768xbf16>
    %40 = vector.shape_cast %39 : vector<1x144x768xbf16> to vector<144x768xbf16>
    %41 = arith.truncf %38 : vector<16x144xf32> to vector<16x144xbf16>
    %cst_17 = arith.constant dense<0.000000e+00> : vector<16x768xf32>
    %42 = tpu.matmul %41, %40, %cst_17 {dimension_numbers = #tpu.dot_dimension_numbers<[1], [0], [0], [1], [0, 0, 1, 1], [], []>} : vector<16x144xbf16>, vector<144x768xbf16>, vector<16x768xf32> -> vector<16x768xf32>
    %c0_18 = arith.constant 0 : index
    %c0_19 = arith.constant 0 : index
    %c0_20 = arith.constant 0 : index
    %43 = vector.load %arg8[%c0_18, %c0_19, %c0_20] : memref<1x1x768xf32, #tpu.memory_space<vmem>>, vector<1x1x768xf32>
    %44 = vector.shape_cast %43 : vector<1x1x768xf32> to vector<1x768xf32>
    %45 = vector.broadcast %44 : vector<1x768xf32> to vector<16x768xf32>
    %46 = arith.addf %42, %45 : vector<16x768xf32>
    %47 = vector.extract_strided_slice %46 {offsets = [0, 0], sizes = [16, 256], strides = [1, 1]} : vector<16x768xf32> to vector<16x256xf32>
    %48 = vector.extract_strided_slice %46 {offsets = [0, 256], sizes = [16, 256], strides = [1, 1]} : vector<16x768xf32> to vector<16x256xf32>
    %49 = vector.extract_strided_slice %46 {offsets = [0, 512], sizes = [16, 256], strides = [1, 1]} : vector<16x768xf32> to vector<16x256xf32>
    %50 = vector.extract_strided_slice %47 {offsets = [0, 0], sizes = [8, 128], strides = [1, 1]} : vector<16x256xf32> to vector<8x128xf32>
    %51 = vector.extract_strided_slice %48 {offsets = [0, 0], sizes = [8, 128], strides = [1, 1]} : vector<16x256xf32> to vector<8x128xf32>
    %52 = vector.extract_strided_slice %49 {offsets = [0, 0], sizes = [8, 128], strides = [1, 1]} : vector<16x256xf32> to vector<8x128xf32>
    %cst_21 = arith.constant dense<0.000000e+00> : vector<8x8xf32>
    %53 = tpu.matmul %50, %51, %cst_21 {dimension_numbers = #tpu.dot_dimension_numbers<[1], [1], [0], [0], [0, 0, 1, 0], [], []>} : vector<8x128xf32>, vector<8x128xf32>, vector<8x8xf32> -> vector<8x8xf32>
    %cst_22 = arith.constant dense<0xFF800000> : vector<8xf32>
    %54 = vector.multi_reduction <maximumf>, %53, %cst_22 [1] : vector<8x8xf32> to vector<8xf32>
    %55 = vector.shape_cast %54 : vector<8xf32> to vector<8x1xf32>
    %56 = vector.broadcast %55 : vector<8x1xf32> to vector<8x8xf32>
    %57 = arith.subf %53, %56 : vector<8x8xf32>
    %58 = math.exp %57 : vector<8x8xf32>
    %cst_23 = arith.constant dense<0.000000e+00> : vector<8xf32>
    %59 = vector.multi_reduction <add>, %58, %cst_23 [1] : vector<8x8xf32> to vector<8xf32>
    %60 = vector.shape_cast %59 : vector<8xf32> to vector<8x1xf32>
    %61 = vector.broadcast %60 : vector<8x1xf32> to vector<8x8xf32>
    %62 = arith.divf %58, %61 : vector<8x8xf32>
    %cst_24 = arith.constant dense<0.000000e+00> : vector<8x128xf32>
    %63 = tpu.matmul %62, %52, %cst_24 {dimension_numbers = #tpu.dot_dimension_numbers<[1], [0], [0], [1], [0, 0, 1, 1], [], []>} : vector<8x8xf32>, vector<8x128xf32>, vector<8x128xf32> -> vector<8x128xf32>
    %64 = vector.extract_strided_slice %47 {offsets = [0, 128], sizes = [8, 128], strides = [1, 1]} : vector<16x256xf32> to vector<8x128xf32>
    %65 = vector.extract_strided_slice %48 {offsets = [0, 128], sizes = [8, 128], strides = [1, 1]} : vector<16x256xf32> to vector<8x128xf32>
    %66 = vector.extract_strided_slice %49 {offsets = [0, 128], sizes = [8, 128], strides = [1, 1]} : vector<16x256xf32> to vector<8x128xf32>
    %cst_25 = arith.constant dense<0.000000e+00> : vector<8x8xf32>
    %67 = tpu.matmul %64, %65, %cst_25 {dimension_numbers = #tpu.dot_dimension_numbers<[1], [1], [0], [0], [0, 0, 1, 0], [], []>} : vector<8x128xf32>, vector<8x128xf32>, vector<8x8xf32> -> vector<8x8xf32>
    %cst_26 = arith.constant dense<0xFF800000> : vector<8xf32>
    %68 = vector.multi_reduction <maximumf>, %67, %cst_26 [1] : vector<8x8xf32> to vector<8xf32>
    %69 = vector.shape_cast %68 : vector<8xf32> to vector<8x1xf32>
    %70 = vector.broadcast %69 : vector<8x1xf32> to vector<8x8xf32>
    %71 = arith.subf %67, %70 : vector<8x8xf32>
    %72 = math.exp %71 : vector<8x8xf32>
    %cst_27 = arith.constant dense<0.000000e+00> : vector<8xf32>
    %73 = vector.multi_reduction <add>, %72, %cst_27 [1] : vector<8x8xf32> to vector<8xf32>
    %74 = vector.shape_cast %73 : vector<8xf32> to vector<8x1xf32>
    %75 = vector.broadcast %74 : vector<8x1xf32> to vector<8x8xf32>
    %76 = arith.divf %72, %75 : vector<8x8xf32>
    %cst_28 = arith.constant dense<0.000000e+00> : vector<8x128xf32>
    %77 = tpu.matmul %76, %66, %cst_28 {dimension_numbers = #tpu.dot_dimension_numbers<[1], [0], [0], [1], [0, 0, 1, 1], [], []>} : vector<8x8xf32>, vector<8x128xf32>, vector<8x128xf32> -> vector<8x128xf32>
    %78 = tpu.concatenate %63, %77 in 1 : vector<8x128xf32>, vector<8x128xf32> -> vector<8x256xf32>
    %79 = vector.extract_strided_slice %47 {offsets = [8, 0], sizes = [8, 128], strides = [1, 1]} : vector<16x256xf32> to vector<8x128xf32>
    %80 = vector.extract_strided_slice %48 {offsets = [8, 0], sizes = [8, 128], strides = [1, 1]} : vector<16x256xf32> to vector<8x128xf32>
    %81 = vector.extract_strided_slice %49 {offsets = [8, 0], sizes = [8, 128], strides = [1, 1]} : vector<16x256xf32> to vector<8x128xf32>
    %cst_29 = arith.constant dense<0.000000e+00> : vector<8x8xf32>
    %82 = tpu.matmul %79, %80, %cst_29 {dimension_numbers = #tpu.dot_dimension_numbers<[1], [1], [0], [0], [0, 0, 1, 0], [], []>} : vector<8x128xf32>, vector<8x128xf32>, vector<8x8xf32> -> vector<8x8xf32>
    %cst_30 = arith.constant dense<0xFF800000> : vector<8xf32>
    %83 = vector.multi_reduction <maximumf>, %82, %cst_30 [1] : vector<8x8xf32> to vector<8xf32>
    %84 = vector.shape_cast %83 : vector<8xf32> to vector<8x1xf32>
    %85 = vector.broadcast %84 : vector<8x1xf32> to vector<8x8xf32>
    %86 = arith.subf %82, %85 : vector<8x8xf32>
    %87 = math.exp %86 : vector<8x8xf32>
    %cst_31 = arith.constant dense<0.000000e+00> : vector<8xf32>
    %88 = vector.multi_reduction <add>, %87, %cst_31 [1] : vector<8x8xf32> to vector<8xf32>
    %89 = vector.shape_cast %88 : vector<8xf32> to vector<8x1xf32>
    %90 = vector.broadcast %89 : vector<8x1xf32> to vector<8x8xf32>
    %91 = arith.divf %87, %90 : vector<8x8xf32>
    %cst_32 = arith.constant dense<0.000000e+00> : vector<8x128xf32>
    %92 = tpu.matmul %91, %81, %cst_32 {dimension_numbers = #tpu.dot_dimension_numbers<[1], [0], [0], [1], [0, 0, 1, 1], [], []>} : vector<8x8xf32>, vector<8x128xf32>, vector<8x128xf32> -> vector<8x128xf32>
    %93 = vector.extract_strided_slice %47 {offsets = [8, 128], sizes = [8, 128], strides = [1, 1]} : vector<16x256xf32> to vector<8x128xf32>
    %94 = vector.extract_strided_slice %48 {offsets = [8, 128], sizes = [8, 128], strides = [1, 1]} : vector<16x256xf32> to vector<8x128xf32>
    %95 = vector.extract_strided_slice %49 {offsets = [8, 128], sizes = [8, 128], strides = [1, 1]} : vector<16x256xf32> to vector<8x128xf32>
    %cst_33 = arith.constant dense<0.000000e+00> : vector<8x8xf32>
    %96 = tpu.matmul %93, %94, %cst_33 {dimension_numbers = #tpu.dot_dimension_numbers<[1], [1], [0], [0], [0, 0, 1, 0], [], []>} : vector<8x128xf32>, vector<8x128xf32>, vector<8x8xf32> -> vector<8x8xf32>
    %cst_34 = arith.constant dense<0xFF800000> : vector<8xf32>
    %97 = vector.multi_reduction <maximumf>, %96, %cst_34 [1] : vector<8x8xf32> to vector<8xf32>
    %98 = vector.shape_cast %97 : vector<8xf32> to vector<8x1xf32>
    %99 = vector.broadcast %98 : vector<8x1xf32> to vector<8x8xf32>
    %100 = arith.subf %96, %99 : vector<8x8xf32>
    %101 = math.exp %100 : vector<8x8xf32>
    %cst_35 = arith.constant dense<0.000000e+00> : vector<8xf32>
    %102 = vector.multi_reduction <add>, %101, %cst_35 [1] : vector<8x8xf32> to vector<8xf32>
    %103 = vector.shape_cast %102 : vector<8xf32> to vector<8x1xf32>
    %104 = vector.broadcast %103 : vector<8x1xf32> to vector<8x8xf32>
    %105 = arith.divf %101, %104 : vector<8x8xf32>
    %cst_36 = arith.constant dense<0.000000e+00> : vector<8x128xf32>
    %106 = tpu.matmul %105, %95, %cst_36 {dimension_numbers = #tpu.dot_dimension_numbers<[1], [0], [0], [1], [0, 0, 1, 1], [], []>} : vector<8x8xf32>, vector<8x128xf32>, vector<8x128xf32> -> vector<8x128xf32>
    %107 = tpu.concatenate %92, %106 in 1 : vector<8x128xf32>, vector<8x128xf32> -> vector<8x256xf32>
    %108 = tpu.concatenate %78, %107 in 0 : vector<8x256xf32>, vector<8x256xf32> -> vector<16x256xf32>
    %c0_37 = arith.constant 0 : index
    %c0_38 = arith.constant 0 : index
    %c0_39 = arith.constant 0 : index
    %109 = vector.load %arg9[%c0_37, %c0_38, %c0_39] : memref<1x256x144xbf16, #tpu.memory_space<vmem>>, vector<1x256x144xbf16>
    %110 = vector.shape_cast %109 : vector<1x256x144xbf16> to vector<256x144xbf16>
    %111 = arith.truncf %108 : vector<16x256xf32> to vector<16x256xbf16>
    %cst_40 = arith.constant dense<0.000000e+00> : vector<16x144xf32>
    %112 = tpu.matmul %111, %110, %cst_40 {dimension_numbers = #tpu.dot_dimension_numbers<[1], [0], [0], [1], [0, 0, 1, 1], [], []>} : vector<16x256xbf16>, vector<256x144xbf16>, vector<16x144xf32> -> vector<16x144xf32>
    %113 = arith.addf %14, %112 : vector<16x144xf32>
    %c0_41 = arith.constant 0 : index
    %c0_42 = arith.constant 0 : index
    %c0_43 = arith.constant 0 : index
    %114 = vector.load %arg10[%c0_41, %c0_42, %c0_43] : memref<1x1x144xf32, #tpu.memory_space<vmem>>, vector<1x1x144xf32>
    %115 = vector.shape_cast %114 : vector<1x1x144xf32> to vector<1x144xf32>
    %116 = vector.broadcast %115 : vector<1x144xf32> to vector<16x144xf32>
    %117 = arith.addf %113, %116 : vector<16x144xf32>
    %118 = arith.mulf %117, %117 : vector<16x144xf32>
    %cst_44 = arith.constant dense<0.000000e+00> : vector<16x16xf32>
    %119 = tpu.matmul %118, %0, %cst_44 {dimension_numbers = #tpu.dot_dimension_numbers<[1], [0], [0], [1], [0, 0, 1, 1], [], []>} : vector<16x144xf32>, vector<144x16xf32>, vector<16x16xf32> -> vector<16x16xf32>
    %120 = vector.extract_strided_slice %119 {offsets = [0, 0], sizes = [16, 8], strides = [1, 1]} : vector<16x16xf32> to vector<16x8xf32>
    %121 = vector.extract_strided_slice %119 {offsets = [0, 8], sizes = [16, 1], strides = [1, 1]} : vector<16x16xf32> to vector<16x1xf32>
    %122 = math.absf %120 : vector<16x8xf32>
    %cst_45 = arith.constant dense<0.000000e+00> : vector<16xf32>
    %123 = vector.multi_reduction <add>, %122, %cst_45 [1] : vector<16x8xf32> to vector<16xf32>
    %124 = vector.shape_cast %123 : vector<16xf32> to vector<16x1xf32>
    %cst_46 = arith.constant 8.000000e+00 : f32
    %125 = vector.broadcast %cst_46 : f32 to vector<16x1xf32>
    %126 = arith.divf %124, %125 : vector<16x1xf32>
    %cst_47 = arith.constant 9.99999997E-7 : f32
    %127 = vector.broadcast %cst_47 : f32 to vector<16x1xf32>
    %128 = arith.addf %126, %127 : vector<16x1xf32>
    %129 = math.rsqrt %128 : vector<16x1xf32>
    %cst_48 = arith.constant 9.99999997E-7 : f32
    %130 = vector.broadcast %cst_48 : f32 to vector<16x1xf32>
    %131 = arith.addf %121, %130 : vector<16x1xf32>
    %132 = math.rsqrt %131 : vector<16x1xf32>
    %133 = vector.shape_cast %4 : vector<1x144xi1> to vector<1x144xi1>
    %134 = vector.broadcast %133 : vector<1x144xi1> to vector<16x144xi1>
    %135 = vector.shape_cast %129 : vector<16x1xf32> to vector<16x1xf32>
    %136 = vector.broadcast %135 : vector<16x1xf32> to vector<16x144xf32>
    %137 = vector.shape_cast %132 : vector<16x1xf32> to vector<16x1xf32>
    %138 = vector.broadcast %137 : vector<16x1xf32> to vector<16x144xf32>
    %139 = arith.select %134, %136, %138 : vector<16x144xi1>, vector<16x144xf32>
    %140 = arith.mulf %117, %139 : vector<16x144xf32>
    %c0_49 = arith.constant 0 : index
    %c0_50 = arith.constant 0 : index
    %c0_51 = arith.constant 0 : index
    %141 = vector.load %arg11[%c0_49, %c0_50, %c0_51] : memref<1x144x256xbf16, #tpu.memory_space<vmem>>, vector<1x144x256xbf16>
    %142 = vector.shape_cast %141 : vector<1x144x256xbf16> to vector<144x256xbf16>
    %143 = arith.truncf %140 : vector<16x144xf32> to vector<16x144xbf16>
    %cst_52 = arith.constant dense<0.000000e+00> : vector<16x256xf32>
    %144 = tpu.matmul %143, %142, %cst_52 {dimension_numbers = #tpu.dot_dimension_numbers<[1], [0], [0], [1], [0, 0, 1, 1], [], []>} : vector<16x144xbf16>, vector<144x256xbf16>, vector<16x256xf32> -> vector<16x256xf32>
    %c0_53 = arith.constant 0 : index
    %c0_54 = arith.constant 0 : index
    %c0_55 = arith.constant 0 : index
    %145 = vector.load %arg12[%c0_53, %c0_54, %c0_55] : memref<1x1x256xf32, #tpu.memory_space<vmem>>, vector<1x1x256xf32>
    %146 = vector.shape_cast %145 : vector<1x1x256xf32> to vector<1x256xf32>
    %147 = vector.broadcast %146 : vector<1x256xf32> to vector<16x256xf32>
    %148 = arith.addf %144, %147 : vector<16x256xf32>
    %c0_56 = arith.constant 0 : index
    %c0_57 = arith.constant 0 : index
    %c0_58 = arith.constant 0 : index
    %149 = vector.load %arg13[%c0_56, %c0_57, %c0_58] : memref<1x68x512xbf16, #tpu.memory_space<vmem>>, vector<1x68x512xbf16>
    %150 = vector.shape_cast %149 : vector<1x68x512xbf16> to vector<68x512xbf16>
    %151 = arith.truncf %15 : vector<16x68xf32> to vector<16x68xbf16>
    %cst_59 = arith.constant dense<0.000000e+00> : vector<16x512xf32>
    %152 = tpu.matmul %151, %150, %cst_59 {dimension_numbers = #tpu.dot_dimension_numbers<[1], [0], [0], [1], [0, 0, 1, 1], [], []>} : vector<16x68xbf16>, vector<68x512xbf16>, vector<16x512xf32> -> vector<16x512xf32>
    %c0_60 = arith.constant 0 : index
    %c0_61 = arith.constant 0 : index
    %c0_62 = arith.constant 0 : index
    %153 = vector.load %arg14[%c0_60, %c0_61, %c0_62] : memref<1x1x512xf32, #tpu.memory_space<vmem>>, vector<1x1x512xf32>
    %154 = vector.shape_cast %153 : vector<1x1x512xf32> to vector<1x512xf32>
    %155 = vector.broadcast %154 : vector<1x512xf32> to vector<16x512xf32>
    %156 = arith.addf %152, %155 : vector<16x512xf32>
    %157 = vector.extract_strided_slice %156 {offsets = [0, 0], sizes = [16, 256], strides = [1, 1]} : vector<16x512xf32> to vector<16x256xf32>
    %158 = vector.extract_strided_slice %156 {offsets = [0, 256], sizes = [16, 256], strides = [1, 1]} : vector<16x512xf32> to vector<16x256xf32>
    %159 = vector.extract_strided_slice %148 {offsets = [0, 0], sizes = [8, 128], strides = [1, 1]} : vector<16x256xf32> to vector<8x128xf32>
    %160 = vector.extract_strided_slice %157 {offsets = [0, 0], sizes = [8, 128], strides = [1, 1]} : vector<16x256xf32> to vector<8x128xf32>
    %161 = vector.extract_strided_slice %158 {offsets = [0, 0], sizes = [8, 128], strides = [1, 1]} : vector<16x256xf32> to vector<8x128xf32>
    %cst_63 = arith.constant dense<0.000000e+00> : vector<8x8xf32>
    %162 = tpu.matmul %159, %160, %cst_63 {dimension_numbers = #tpu.dot_dimension_numbers<[1], [1], [0], [0], [0, 0, 1, 0], [], []>} : vector<8x128xf32>, vector<8x128xf32>, vector<8x8xf32> -> vector<8x8xf32>
    %163 = vector.broadcast %10 : vector<1x8xf32> to vector<8x8xf32>
    %164 = arith.addf %162, %163 : vector<8x8xf32>
    %cst_64 = arith.constant dense<0xFF800000> : vector<8xf32>
    %165 = vector.multi_reduction <maximumf>, %164, %cst_64 [1] : vector<8x8xf32> to vector<8xf32>
    %166 = vector.shape_cast %165 : vector<8xf32> to vector<8x1xf32>
    %167 = vector.broadcast %166 : vector<8x1xf32> to vector<8x8xf32>
    %168 = arith.subf %164, %167 : vector<8x8xf32>
    %169 = math.exp %168 : vector<8x8xf32>
    %cst_65 = arith.constant dense<0.000000e+00> : vector<8xf32>
    %170 = vector.multi_reduction <add>, %169, %cst_65 [1] : vector<8x8xf32> to vector<8xf32>
    %171 = vector.shape_cast %170 : vector<8xf32> to vector<8x1xf32>
    %172 = vector.broadcast %171 : vector<8x1xf32> to vector<8x8xf32>
    %173 = arith.divf %169, %172 : vector<8x8xf32>
    %cst_66 = arith.constant dense<0.000000e+00> : vector<8x128xf32>
    %174 = tpu.matmul %173, %161, %cst_66 {dimension_numbers = #tpu.dot_dimension_numbers<[1], [0], [0], [1], [0, 0, 1, 1], [], []>} : vector<8x8xf32>, vector<8x128xf32>, vector<8x128xf32> -> vector<8x128xf32>
    %175 = vector.extract_strided_slice %148 {offsets = [0, 128], sizes = [8, 128], strides = [1, 1]} : vector<16x256xf32> to vector<8x128xf32>
    %176 = vector.extract_strided_slice %157 {offsets = [0, 128], sizes = [8, 128], strides = [1, 1]} : vector<16x256xf32> to vector<8x128xf32>
    %177 = vector.extract_strided_slice %158 {offsets = [0, 128], sizes = [8, 128], strides = [1, 1]} : vector<16x256xf32> to vector<8x128xf32>
    %cst_67 = arith.constant dense<0.000000e+00> : vector<8x8xf32>
    %178 = tpu.matmul %175, %176, %cst_67 {dimension_numbers = #tpu.dot_dimension_numbers<[1], [1], [0], [0], [0, 0, 1, 0], [], []>} : vector<8x128xf32>, vector<8x128xf32>, vector<8x8xf32> -> vector<8x8xf32>
    %179 = vector.broadcast %10 : vector<1x8xf32> to vector<8x8xf32>
    %180 = arith.addf %178, %179 : vector<8x8xf32>
    %cst_68 = arith.constant dense<0xFF800000> : vector<8xf32>
    %181 = vector.multi_reduction <maximumf>, %180, %cst_68 [1] : vector<8x8xf32> to vector<8xf32>
    %182 = vector.shape_cast %181 : vector<8xf32> to vector<8x1xf32>
    %183 = vector.broadcast %182 : vector<8x1xf32> to vector<8x8xf32>
    %184 = arith.subf %180, %183 : vector<8x8xf32>
    %185 = math.exp %184 : vector<8x8xf32>
    %cst_69 = arith.constant dense<0.000000e+00> : vector<8xf32>
    %186 = vector.multi_reduction <add>, %185, %cst_69 [1] : vector<8x8xf32> to vector<8xf32>
    %187 = vector.shape_cast %186 : vector<8xf32> to vector<8x1xf32>
    %188 = vector.broadcast %187 : vector<8x1xf32> to vector<8x8xf32>
    %189 = arith.divf %185, %188 : vector<8x8xf32>
    %cst_70 = arith.constant dense<0.000000e+00> : vector<8x128xf32>
    %190 = tpu.matmul %189, %177, %cst_70 {dimension_numbers = #tpu.dot_dimension_numbers<[1], [0], [0], [1], [0, 0, 1, 1], [], []>} : vector<8x8xf32>, vector<8x128xf32>, vector<8x128xf32> -> vector<8x128xf32>
    %191 = tpu.concatenate %174, %190 in 1 : vector<8x128xf32>, vector<8x128xf32> -> vector<8x256xf32>
    %192 = vector.extract_strided_slice %148 {offsets = [8, 0], sizes = [8, 128], strides = [1, 1]} : vector<16x256xf32> to vector<8x128xf32>
    %193 = vector.extract_strided_slice %157 {offsets = [8, 0], sizes = [8, 128], strides = [1, 1]} : vector<16x256xf32> to vector<8x128xf32>
    %194 = vector.extract_strided_slice %158 {offsets = [8, 0], sizes = [8, 128], strides = [1, 1]} : vector<16x256xf32> to vector<8x128xf32>
    %cst_71 = arith.constant dense<0.000000e+00> : vector<8x8xf32>
    %195 = tpu.matmul %192, %193, %cst_71 {dimension_numbers = #tpu.dot_dimension_numbers<[1], [1], [0], [0], [0, 0, 1, 0], [], []>} : vector<8x128xf32>, vector<8x128xf32>, vector<8x8xf32> -> vector<8x8xf32>
    %196 = vector.broadcast %10 : vector<1x8xf32> to vector<8x8xf32>
    %197 = arith.addf %195, %196 : vector<8x8xf32>
    %cst_72 = arith.constant dense<0xFF800000> : vector<8xf32>
    %198 = vector.multi_reduction <maximumf>, %197, %cst_72 [1] : vector<8x8xf32> to vector<8xf32>
    %199 = vector.shape_cast %198 : vector<8xf32> to vector<8x1xf32>
    %200 = vector.broadcast %199 : vector<8x1xf32> to vector<8x8xf32>
    %201 = arith.subf %197, %200 : vector<8x8xf32>
    %202 = math.exp %201 : vector<8x8xf32>
    %cst_73 = arith.constant dense<0.000000e+00> : vector<8xf32>
    %203 = vector.multi_reduction <add>, %202, %cst_73 [1] : vector<8x8xf32> to vector<8xf32>
    %204 = vector.shape_cast %203 : vector<8xf32> to vector<8x1xf32>
    %205 = vector.broadcast %204 : vector<8x1xf32> to vector<8x8xf32>
    %206 = arith.divf %202, %205 : vector<8x8xf32>
    %cst_74 = arith.constant dense<0.000000e+00> : vector<8x128xf32>
    %207 = tpu.matmul %206, %194, %cst_74 {dimension_numbers = #tpu.dot_dimension_numbers<[1], [0], [0], [1], [0, 0, 1, 1], [], []>} : vector<8x8xf32>, vector<8x128xf32>, vector<8x128xf32> -> vector<8x128xf32>
    %208 = vector.extract_strided_slice %148 {offsets = [8, 128], sizes = [8, 128], strides = [1, 1]} : vector<16x256xf32> to vector<8x128xf32>
    %209 = vector.extract_strided_slice %157 {offsets = [8, 128], sizes = [8, 128], strides = [1, 1]} : vector<16x256xf32> to vector<8x128xf32>
    %210 = vector.extract_strided_slice %158 {offsets = [8, 128], sizes = [8, 128], strides = [1, 1]} : vector<16x256xf32> to vector<8x128xf32>
    %cst_75 = arith.constant dense<0.000000e+00> : vector<8x8xf32>
    %211 = tpu.matmul %208, %209, %cst_75 {dimension_numbers = #tpu.dot_dimension_numbers<[1], [1], [0], [0], [0, 0, 1, 0], [], []>} : vector<8x128xf32>, vector<8x128xf32>, vector<8x8xf32> -> vector<8x8xf32>
    %212 = vector.broadcast %10 : vector<1x8xf32> to vector<8x8xf32>
    %213 = arith.addf %211, %212 : vector<8x8xf32>
    %cst_76 = arith.constant dense<0xFF800000> : vector<8xf32>
    %214 = vector.multi_reduction <maximumf>, %213, %cst_76 [1] : vector<8x8xf32> to vector<8xf32>
    %215 = vector.shape_cast %214 : vector<8xf32> to vector<8x1xf32>
    %216 = vector.broadcast %215 : vector<8x1xf32> to vector<8x8xf32>
    %217 = arith.subf %213, %216 : vector<8x8xf32>
    %218 = math.exp %217 : vector<8x8xf32>
    %cst_77 = arith.constant dense<0.000000e+00> : vector<8xf32>
    %219 = vector.multi_reduction <add>, %218, %cst_77 [1] : vector<8x8xf32> to vector<8xf32>
    %220 = vector.shape_cast %219 : vector<8xf32> to vector<8x1xf32>
    %221 = vector.broadcast %220 : vector<8x1xf32> to vector<8x8xf32>
    %222 = arith.divf %218, %221 : vector<8x8xf32>
    %cst_78 = arith.constant dense<0.000000e+00> : vector<8x128xf32>
    %223 = tpu.matmul %222, %210, %cst_78 {dimension_numbers = #tpu.dot_dimension_numbers<[1], [0], [0], [1], [0, 0, 1, 1], [], []>} : vector<8x8xf32>, vector<8x128xf32>, vector<8x128xf32> -> vector<8x128xf32>
    %224 = tpu.concatenate %207, %223 in 1 : vector<8x128xf32>, vector<8x128xf32> -> vector<8x256xf32>
    %225 = tpu.concatenate %191, %224 in 0 : vector<8x256xf32>, vector<8x256xf32> -> vector<16x256xf32>
    %c0_79 = arith.constant 0 : index
    %c0_80 = arith.constant 0 : index
    %c0_81 = arith.constant 0 : index
    %226 = vector.load %arg15[%c0_79, %c0_80, %c0_81] : memref<1x256x144xbf16, #tpu.memory_space<vmem>>, vector<1x256x144xbf16>
    %227 = vector.shape_cast %226 : vector<1x256x144xbf16> to vector<256x144xbf16>
    %228 = arith.truncf %225 : vector<16x256xf32> to vector<16x256xbf16>
    %cst_82 = arith.constant dense<0.000000e+00> : vector<16x144xf32>
    %229 = tpu.matmul %228, %227, %cst_82 {dimension_numbers = #tpu.dot_dimension_numbers<[1], [0], [0], [1], [0, 0, 1, 1], [], []>} : vector<16x256xbf16>, vector<256x144xbf16>, vector<16x144xf32> -> vector<16x144xf32>
    %230 = arith.addf %117, %229 : vector<16x144xf32>
    %c0_83 = arith.constant 0 : index
    %c0_84 = arith.constant 0 : index
    %c0_85 = arith.constant 0 : index
    %231 = vector.load %arg16[%c0_83, %c0_84, %c0_85] : memref<1x1x144xf32, #tpu.memory_space<vmem>>, vector<1x1x144xf32>
    %232 = vector.shape_cast %231 : vector<1x1x144xf32> to vector<1x144xf32>
    %233 = vector.broadcast %232 : vector<1x144xf32> to vector<16x144xf32>
    %234 = arith.addf %230, %233 : vector<16x144xf32>
    %235 = arith.mulf %234, %234 : vector<16x144xf32>
    %cst_86 = arith.constant dense<0.000000e+00> : vector<16x16xf32>
    %236 = tpu.matmul %235, %0, %cst_86 {dimension_numbers = #tpu.dot_dimension_numbers<[1], [0], [0], [1], [0, 0, 1, 1], [], []>} : vector<16x144xf32>, vector<144x16xf32>, vector<16x16xf32> -> vector<16x16xf32>
    %237 = vector.extract_strided_slice %236 {offsets = [0, 0], sizes = [16, 8], strides = [1, 1]} : vector<16x16xf32> to vector<16x8xf32>
    %238 = vector.extract_strided_slice %236 {offsets = [0, 8], sizes = [16, 1], strides = [1, 1]} : vector<16x16xf32> to vector<16x1xf32>
    %239 = math.absf %237 : vector<16x8xf32>
    %cst_87 = arith.constant dense<0.000000e+00> : vector<16xf32>
    %240 = vector.multi_reduction <add>, %239, %cst_87 [1] : vector<16x8xf32> to vector<16xf32>
    %241 = vector.shape_cast %240 : vector<16xf32> to vector<16x1xf32>
    %cst_88 = arith.constant 8.000000e+00 : f32
    %242 = vector.broadcast %cst_88 : f32 to vector<16x1xf32>
    %243 = arith.divf %241, %242 : vector<16x1xf32>
    %cst_89 = arith.constant 9.99999997E-7 : f32
    %244 = vector.broadcast %cst_89 : f32 to vector<16x1xf32>
    %245 = arith.addf %243, %244 : vector<16x1xf32>
    %246 = math.rsqrt %245 : vector<16x1xf32>
    %cst_90 = arith.constant 9.99999997E-7 : f32
    %247 = vector.broadcast %cst_90 : f32 to vector<16x1xf32>
    %248 = arith.addf %238, %247 : vector<16x1xf32>
    %249 = math.rsqrt %248 : vector<16x1xf32>
    %250 = vector.shape_cast %4 : vector<1x144xi1> to vector<1x144xi1>
    %251 = vector.broadcast %250 : vector<1x144xi1> to vector<16x144xi1>
    %252 = vector.shape_cast %246 : vector<16x1xf32> to vector<16x1xf32>
    %253 = vector.broadcast %252 : vector<16x1xf32> to vector<16x144xf32>
    %254 = vector.shape_cast %249 : vector<16x1xf32> to vector<16x1xf32>
    %255 = vector.broadcast %254 : vector<16x1xf32> to vector<16x144xf32>
    %256 = arith.select %251, %253, %255 : vector<16x144xi1>, vector<16x144xf32>
    %257 = arith.mulf %234, %256 : vector<16x144xf32>
    %c0_91 = arith.constant 0 : index
    %c0_92 = arith.constant 0 : index
    %c0_93 = arith.constant 0 : index
    %258 = vector.load %arg17[%c0_91, %c0_92, %c0_93] : memref<1x144x4384xbf16, #tpu.memory_space<vmem>>, vector<1x144x4384xbf16>
    %259 = vector.shape_cast %258 : vector<1x144x4384xbf16> to vector<144x4384xbf16>
    %260 = arith.truncf %257 : vector<16x144xf32> to vector<16x144xbf16>
    %cst_94 = arith.constant dense<0.000000e+00> : vector<16x4384xf32>
    %261 = tpu.matmul %260, %259, %cst_94 {dimension_numbers = #tpu.dot_dimension_numbers<[1], [0], [0], [1], [0, 0, 1, 1], [], []>} : vector<16x144xbf16>, vector<144x4384xbf16>, vector<16x4384xf32> -> vector<16x4384xf32>
    %c0_95 = arith.constant 0 : index
    %c0_96 = arith.constant 0 : index
    %c0_97 = arith.constant 0 : index
    %262 = vector.load %arg18[%c0_95, %c0_96, %c0_97] : memref<1x1x4384xf32, #tpu.memory_space<vmem>>, vector<1x1x4384xf32>
    %263 = vector.shape_cast %262 : vector<1x1x4384xf32> to vector<1x4384xf32>
    %264 = vector.broadcast %263 : vector<1x4384xf32> to vector<16x4384xf32>
    %265 = arith.addf %261, %264 : vector<16x4384xf32>
    %266 = vector.extract_strided_slice %265 {offsets = [0, 4096], sizes = [16, 256], strides = [1, 1]} : vector<16x4384xf32> to vector<16x256xf32>
    %267 = vector.extract_strided_slice %265 {offsets = [0, 4352], sizes = [16, 32], strides = [1, 1]} : vector<16x4384xf32> to vector<16x32xf32>
    %c0_98 = arith.constant 0 : index
    %c0_99 = arith.constant 0 : index
    %c0_100 = arith.constant 0 : index
    %268 = vector.load %arg19[%c0_98, %c0_99, %c0_100] : memref<1x288x144xbf16, #tpu.memory_space<vmem>>, vector<1x288x144xbf16>
    %269 = vector.shape_cast %268 : vector<1x288x144xbf16> to vector<288x144xbf16>
    %270 = vector.extract_strided_slice %265 {offsets = [0, 0], sizes = [16, 256], strides = [1, 1]} : vector<16x4384xf32> to vector<16x256xf32>
    %271 = arith.mulf %266, %270 : vector<16x256xf32>
    %cst_101 = arith.constant dense<0.000000e+00> : vector<16x16xf32>
    %272 = tpu.matmul %271, %1, %cst_101 {dimension_numbers = #tpu.dot_dimension_numbers<[1], [0], [0], [1], [0, 0, 1, 1], [], []>} : vector<16x256xf32>, vector<256x16xf32>, vector<16x16xf32> -> vector<16x16xf32>
    %cst_102 = arith.constant 5.000000e-01 : f32
    %273 = vector.broadcast %cst_102 : f32 to vector<16x16xf32>
    %274 = arith.mulf %273, %272 : vector<16x16xf32>
    %cst_103 = arith.constant 4.471500e-02 : f32
    %275 = vector.broadcast %cst_103 : f32 to vector<16x16xf32>
    %276 = arith.mulf %275, %272 : vector<16x16xf32>
    %277 = arith.mulf %276, %272 : vector<16x16xf32>
    %278 = arith.mulf %277, %272 : vector<16x16xf32>
    %279 = arith.addf %272, %278 : vector<16x16xf32>
    %cst_104 = arith.constant 0.797884583 : f32
    %280 = vector.broadcast %cst_104 : f32 to vector<16x16xf32>
    %281 = arith.mulf %280, %279 : vector<16x16xf32>
    %282 = math.tanh %281 : vector<16x16xf32>
    %cst_105 = arith.constant 1.000000e+00 : f32
    %283 = vector.broadcast %cst_105 : f32 to vector<16x16xf32>
    %284 = arith.addf %283, %282 : vector<16x16xf32>
    %285 = arith.mulf %274, %284 : vector<16x16xf32>
    %cst_106 = arith.constant 5.000000e-01 : f32
    %286 = vector.broadcast %cst_106 : f32 to vector<16x32xf32>
    %287 = arith.mulf %286, %267 : vector<16x32xf32>
    %cst_107 = arith.constant 4.471500e-02 : f32
    %288 = vector.broadcast %cst_107 : f32 to vector<16x32xf32>
    %289 = arith.mulf %288, %267 : vector<16x32xf32>
    %290 = arith.mulf %289, %267 : vector<16x32xf32>
    %291 = arith.mulf %290, %267 : vector<16x32xf32>
    %292 = arith.addf %267, %291 : vector<16x32xf32>
    %cst_108 = arith.constant 0.797884583 : f32
    %293 = vector.broadcast %cst_108 : f32 to vector<16x32xf32>
    %294 = arith.mulf %293, %292 : vector<16x32xf32>
    %295 = math.tanh %294 : vector<16x32xf32>
    %cst_109 = arith.constant 1.000000e+00 : f32
    %296 = vector.broadcast %cst_109 : f32 to vector<16x32xf32>
    %297 = arith.addf %296, %295 : vector<16x32xf32>
    %298 = arith.mulf %287, %297 : vector<16x32xf32>
    %299 = vector.extract_strided_slice %269 {offsets = [256, 0], sizes = [32, 144], strides = [1, 1]} : vector<288x144xbf16> to vector<32x144xbf16>
    %300 = arith.truncf %298 : vector<16x32xf32> to vector<16x32xbf16>
    %cst_110 = arith.constant dense<0.000000e+00> : vector<16x144xf32>
    %301 = tpu.matmul %300, %299, %cst_110 {dimension_numbers = #tpu.dot_dimension_numbers<[1], [0], [0], [1], [0, 0, 1, 1], [], []>} : vector<16x32xbf16>, vector<32x144xbf16>, vector<16x144xf32> -> vector<16x144xf32>
    %302 = arith.mulf %272, %285 : vector<16x16xf32>
    %303 = vector.extract_strided_slice %269 {offsets = [0, 0], sizes = [16, 144], strides = [1, 1]} : vector<288x144xbf16> to vector<16x144xbf16>
    %304 = arith.truncf %302 : vector<16x16xf32> to vector<16x16xbf16>
    %cst_111 = arith.constant dense<0.000000e+00> : vector<16x144xf32>
    %305 = tpu.matmul %304, %303, %cst_111 {dimension_numbers = #tpu.dot_dimension_numbers<[1], [0], [0], [1], [0, 0, 1, 1], [], []>} : vector<16x16xbf16>, vector<16x144xbf16>, vector<16x144xf32> -> vector<16x144xf32>
    %306 = arith.addf %301, %305 : vector<16x144xf32>
    %307 = vector.extract_strided_slice %265 {offsets = [0, 256], sizes = [16, 256], strides = [1, 1]} : vector<16x4384xf32> to vector<16x256xf32>
    %308 = arith.mulf %266, %307 : vector<16x256xf32>
    %cst_112 = arith.constant dense<0.000000e+00> : vector<16x16xf32>
    %309 = tpu.matmul %308, %1, %cst_112 {dimension_numbers = #tpu.dot_dimension_numbers<[1], [0], [0], [1], [0, 0, 1, 1], [], []>} : vector<16x256xf32>, vector<256x16xf32>, vector<16x16xf32> -> vector<16x16xf32>
    %310 = arith.mulf %309, %285 : vector<16x16xf32>
    %311 = vector.extract_strided_slice %269 {offsets = [16, 0], sizes = [16, 144], strides = [1, 1]} : vector<288x144xbf16> to vector<16x144xbf16>
    %312 = arith.truncf %310 : vector<16x16xf32> to vector<16x16xbf16>
    %cst_113 = arith.constant dense<0.000000e+00> : vector<16x144xf32>
    %313 = tpu.matmul %312, %311, %cst_113 {dimension_numbers = #tpu.dot_dimension_numbers<[1], [0], [0], [1], [0, 0, 1, 1], [], []>} : vector<16x16xbf16>, vector<16x144xbf16>, vector<16x144xf32> -> vector<16x144xf32>
    %314 = arith.addf %306, %313 : vector<16x144xf32>
    %315 = vector.extract_strided_slice %265 {offsets = [0, 512], sizes = [16, 256], strides = [1, 1]} : vector<16x4384xf32> to vector<16x256xf32>
    %316 = arith.mulf %266, %315 : vector<16x256xf32>
    %cst_114 = arith.constant dense<0.000000e+00> : vector<16x16xf32>
    %317 = tpu.matmul %316, %1, %cst_114 {dimension_numbers = #tpu.dot_dimension_numbers<[1], [0], [0], [1], [0, 0, 1, 1], [], []>} : vector<16x256xf32>, vector<256x16xf32>, vector<16x16xf32> -> vector<16x16xf32>
    %318 = arith.mulf %317, %285 : vector<16x16xf32>
    %319 = vector.extract_strided_slice %269 {offsets = [32, 0], sizes = [16, 144], strides = [1, 1]} : vector<288x144xbf16> to vector<16x144xbf16>
    %320 = arith.truncf %318 : vector<16x16xf32> to vector<16x16xbf16>
    %cst_115 = arith.constant dense<0.000000e+00> : vector<16x144xf32>
    %321 = tpu.matmul %320, %319, %cst_115 {dimension_numbers = #tpu.dot_dimension_numbers<[1], [0], [0], [1], [0, 0, 1, 1], [], []>} : vector<16x16xbf16>, vector<16x144xbf16>, vector<16x144xf32> -> vector<16x144xf32>
    %322 = arith.addf %314, %321 : vector<16x144xf32>
    %323 = vector.extract_strided_slice %265 {offsets = [0, 768], sizes = [16, 256], strides = [1, 1]} : vector<16x4384xf32> to vector<16x256xf32>
    %324 = arith.mulf %266, %323 : vector<16x256xf32>
    %cst_116 = arith.constant dense<0.000000e+00> : vector<16x16xf32>
    %325 = tpu.matmul %324, %1, %cst_116 {dimension_numbers = #tpu.dot_dimension_numbers<[1], [0], [0], [1], [0, 0, 1, 1], [], []>} : vector<16x256xf32>, vector<256x16xf32>, vector<16x16xf32> -> vector<16x16xf32>
    %326 = arith.mulf %325, %285 : vector<16x16xf32>
    %327 = vector.extract_strided_slice %269 {offsets = [48, 0], sizes = [16, 144], strides = [1, 1]} : vector<288x144xbf16> to vector<16x144xbf16>
    %328 = arith.truncf %326 : vector<16x16xf32> to vector<16x16xbf16>
    %cst_117 = arith.constant dense<0.000000e+00> : vector<16x144xf32>
    %329 = tpu.matmul %328, %327, %cst_117 {dimension_numbers = #tpu.dot_dimension_numbers<[1], [0], [0], [1], [0, 0, 1, 1], [], []>} : vector<16x16xbf16>, vector<16x144xbf16>, vector<16x144xf32> -> vector<16x144xf32>
    %330 = arith.addf %322, %329 : vector<16x144xf32>
    %331 = vector.extract_strided_slice %265 {offsets = [0, 1024], sizes = [16, 256], strides = [1, 1]} : vector<16x4384xf32> to vector<16x256xf32>
    %332 = arith.mulf %266, %331 : vector<16x256xf32>
    %cst_118 = arith.constant dense<0.000000e+00> : vector<16x16xf32>
    %333 = tpu.matmul %332, %1, %cst_118 {dimension_numbers = #tpu.dot_dimension_numbers<[1], [0], [0], [1], [0, 0, 1, 1], [], []>} : vector<16x256xf32>, vector<256x16xf32>, vector<16x16xf32> -> vector<16x16xf32>
    %334 = arith.mulf %333, %285 : vector<16x16xf32>
    %335 = vector.extract_strided_slice %269 {offsets = [64, 0], sizes = [16, 144], strides = [1, 1]} : vector<288x144xbf16> to vector<16x144xbf16>
    %336 = arith.truncf %334 : vector<16x16xf32> to vector<16x16xbf16>
    %cst_119 = arith.constant dense<0.000000e+00> : vector<16x144xf32>
    %337 = tpu.matmul %336, %335, %cst_119 {dimension_numbers = #tpu.dot_dimension_numbers<[1], [0], [0], [1], [0, 0, 1, 1], [], []>} : vector<16x16xbf16>, vector<16x144xbf16>, vector<16x144xf32> -> vector<16x144xf32>
    %338 = arith.addf %330, %337 : vector<16x144xf32>
    %339 = vector.extract_strided_slice %265 {offsets = [0, 1280], sizes = [16, 256], strides = [1, 1]} : vector<16x4384xf32> to vector<16x256xf32>
    %340 = arith.mulf %266, %339 : vector<16x256xf32>
    %cst_120 = arith.constant dense<0.000000e+00> : vector<16x16xf32>
    %341 = tpu.matmul %340, %1, %cst_120 {dimension_numbers = #tpu.dot_dimension_numbers<[1], [0], [0], [1], [0, 0, 1, 1], [], []>} : vector<16x256xf32>, vector<256x16xf32>, vector<16x16xf32> -> vector<16x16xf32>
    %342 = arith.mulf %341, %285 : vector<16x16xf32>
    %343 = vector.extract_strided_slice %269 {offsets = [80, 0], sizes = [16, 144], strides = [1, 1]} : vector<288x144xbf16> to vector<16x144xbf16>
    %344 = arith.truncf %342 : vector<16x16xf32> to vector<16x16xbf16>
    %cst_121 = arith.constant dense<0.000000e+00> : vector<16x144xf32>
    %345 = tpu.matmul %344, %343, %cst_121 {dimension_numbers = #tpu.dot_dimension_numbers<[1], [0], [0], [1], [0, 0, 1, 1], [], []>} : vector<16x16xbf16>, vector<16x144xbf16>, vector<16x144xf32> -> vector<16x144xf32>
    %346 = arith.addf %338, %345 : vector<16x144xf32>
    %347 = vector.extract_strided_slice %265 {offsets = [0, 1536], sizes = [16, 256], strides = [1, 1]} : vector<16x4384xf32> to vector<16x256xf32>
    %348 = arith.mulf %266, %347 : vector<16x256xf32>
    %cst_122 = arith.constant dense<0.000000e+00> : vector<16x16xf32>
    %349 = tpu.matmul %348, %1, %cst_122 {dimension_numbers = #tpu.dot_dimension_numbers<[1], [0], [0], [1], [0, 0, 1, 1], [], []>} : vector<16x256xf32>, vector<256x16xf32>, vector<16x16xf32> -> vector<16x16xf32>
    %350 = arith.mulf %349, %285 : vector<16x16xf32>
    %351 = vector.extract_strided_slice %269 {offsets = [96, 0], sizes = [16, 144], strides = [1, 1]} : vector<288x144xbf16> to vector<16x144xbf16>
    %352 = arith.truncf %350 : vector<16x16xf32> to vector<16x16xbf16>
    %cst_123 = arith.constant dense<0.000000e+00> : vector<16x144xf32>
    %353 = tpu.matmul %352, %351, %cst_123 {dimension_numbers = #tpu.dot_dimension_numbers<[1], [0], [0], [1], [0, 0, 1, 1], [], []>} : vector<16x16xbf16>, vector<16x144xbf16>, vector<16x144xf32> -> vector<16x144xf32>
    %354 = arith.addf %346, %353 : vector<16x144xf32>
    %355 = vector.extract_strided_slice %265 {offsets = [0, 1792], sizes = [16, 256], strides = [1, 1]} : vector<16x4384xf32> to vector<16x256xf32>
    %356 = arith.mulf %266, %355 : vector<16x256xf32>
    %cst_124 = arith.constant dense<0.000000e+00> : vector<16x16xf32>
    %357 = tpu.matmul %356, %1, %cst_124 {dimension_numbers = #tpu.dot_dimension_numbers<[1], [0], [0], [1], [0, 0, 1, 1], [], []>} : vector<16x256xf32>, vector<256x16xf32>, vector<16x16xf32> -> vector<16x16xf32>
    %358 = arith.mulf %357, %285 : vector<16x16xf32>
    %359 = vector.extract_strided_slice %269 {offsets = [112, 0], sizes = [16, 144], strides = [1, 1]} : vector<288x144xbf16> to vector<16x144xbf16>
    %360 = arith.truncf %358 : vector<16x16xf32> to vector<16x16xbf16>
    %cst_125 = arith.constant dense<0.000000e+00> : vector<16x144xf32>
    %361 = tpu.matmul %360, %359, %cst_125 {dimension_numbers = #tpu.dot_dimension_numbers<[1], [0], [0], [1], [0, 0, 1, 1], [], []>} : vector<16x16xbf16>, vector<16x144xbf16>, vector<16x144xf32> -> vector<16x144xf32>
    %362 = arith.addf %354, %361 : vector<16x144xf32>
    %363 = vector.extract_strided_slice %265 {offsets = [0, 2048], sizes = [16, 256], strides = [1, 1]} : vector<16x4384xf32> to vector<16x256xf32>
    %364 = arith.mulf %266, %363 : vector<16x256xf32>
    %cst_126 = arith.constant dense<0.000000e+00> : vector<16x16xf32>
    %365 = tpu.matmul %364, %1, %cst_126 {dimension_numbers = #tpu.dot_dimension_numbers<[1], [0], [0], [1], [0, 0, 1, 1], [], []>} : vector<16x256xf32>, vector<256x16xf32>, vector<16x16xf32> -> vector<16x16xf32>
    %366 = arith.mulf %365, %285 : vector<16x16xf32>
    %367 = vector.extract_strided_slice %269 {offsets = [128, 0], sizes = [16, 144], strides = [1, 1]} : vector<288x144xbf16> to vector<16x144xbf16>
    %368 = arith.truncf %366 : vector<16x16xf32> to vector<16x16xbf16>
    %cst_127 = arith.constant dense<0.000000e+00> : vector<16x144xf32>
    %369 = tpu.matmul %368, %367, %cst_127 {dimension_numbers = #tpu.dot_dimension_numbers<[1], [0], [0], [1], [0, 0, 1, 1], [], []>} : vector<16x16xbf16>, vector<16x144xbf16>, vector<16x144xf32> -> vector<16x144xf32>
    %370 = arith.addf %362, %369 : vector<16x144xf32>
    %371 = vector.extract_strided_slice %265 {offsets = [0, 2304], sizes = [16, 256], strides = [1, 1]} : vector<16x4384xf32> to vector<16x256xf32>
    %372 = arith.mulf %266, %371 : vector<16x256xf32>
    %cst_128 = arith.constant dense<0.000000e+00> : vector<16x16xf32>
    %373 = tpu.matmul %372, %1, %cst_128 {dimension_numbers = #tpu.dot_dimension_numbers<[1], [0], [0], [1], [0, 0, 1, 1], [], []>} : vector<16x256xf32>, vector<256x16xf32>, vector<16x16xf32> -> vector<16x16xf32>
    %374 = arith.mulf %373, %285 : vector<16x16xf32>
    %375 = vector.extract_strided_slice %269 {offsets = [144, 0], sizes = [16, 144], strides = [1, 1]} : vector<288x144xbf16> to vector<16x144xbf16>
    %376 = arith.truncf %374 : vector<16x16xf32> to vector<16x16xbf16>
    %cst_129 = arith.constant dense<0.000000e+00> : vector<16x144xf32>
    %377 = tpu.matmul %376, %375, %cst_129 {dimension_numbers = #tpu.dot_dimension_numbers<[1], [0], [0], [1], [0, 0, 1, 1], [], []>} : vector<16x16xbf16>, vector<16x144xbf16>, vector<16x144xf32> -> vector<16x144xf32>
    %378 = arith.addf %370, %377 : vector<16x144xf32>
    %379 = vector.extract_strided_slice %265 {offsets = [0, 2560], sizes = [16, 256], strides = [1, 1]} : vector<16x4384xf32> to vector<16x256xf32>
    %380 = arith.mulf %266, %379 : vector<16x256xf32>
    %cst_130 = arith.constant dense<0.000000e+00> : vector<16x16xf32>
    %381 = tpu.matmul %380, %1, %cst_130 {dimension_numbers = #tpu.dot_dimension_numbers<[1], [0], [0], [1], [0, 0, 1, 1], [], []>} : vector<16x256xf32>, vector<256x16xf32>, vector<16x16xf32> -> vector<16x16xf32>
    %382 = arith.mulf %381, %285 : vector<16x16xf32>
    %383 = vector.extract_strided_slice %269 {offsets = [160, 0], sizes = [16, 144], strides = [1, 1]} : vector<288x144xbf16> to vector<16x144xbf16>
    %384 = arith.truncf %382 : vector<16x16xf32> to vector<16x16xbf16>
    %cst_131 = arith.constant dense<0.000000e+00> : vector<16x144xf32>
    %385 = tpu.matmul %384, %383, %cst_131 {dimension_numbers = #tpu.dot_dimension_numbers<[1], [0], [0], [1], [0, 0, 1, 1], [], []>} : vector<16x16xbf16>, vector<16x144xbf16>, vector<16x144xf32> -> vector<16x144xf32>
    %386 = arith.addf %378, %385 : vector<16x144xf32>
    %387 = vector.extract_strided_slice %265 {offsets = [0, 2816], sizes = [16, 256], strides = [1, 1]} : vector<16x4384xf32> to vector<16x256xf32>
    %388 = arith.mulf %266, %387 : vector<16x256xf32>
    %cst_132 = arith.constant dense<0.000000e+00> : vector<16x16xf32>
    %389 = tpu.matmul %388, %1, %cst_132 {dimension_numbers = #tpu.dot_dimension_numbers<[1], [0], [0], [1], [0, 0, 1, 1], [], []>} : vector<16x256xf32>, vector<256x16xf32>, vector<16x16xf32> -> vector<16x16xf32>
    %390 = arith.mulf %389, %285 : vector<16x16xf32>
    %391 = vector.extract_strided_slice %269 {offsets = [176, 0], sizes = [16, 144], strides = [1, 1]} : vector<288x144xbf16> to vector<16x144xbf16>
    %392 = arith.truncf %390 : vector<16x16xf32> to vector<16x16xbf16>
    %cst_133 = arith.constant dense<0.000000e+00> : vector<16x144xf32>
    %393 = tpu.matmul %392, %391, %cst_133 {dimension_numbers = #tpu.dot_dimension_numbers<[1], [0], [0], [1], [0, 0, 1, 1], [], []>} : vector<16x16xbf16>, vector<16x144xbf16>, vector<16x144xf32> -> vector<16x144xf32>
    %394 = arith.addf %386, %393 : vector<16x144xf32>
    %395 = vector.extract_strided_slice %265 {offsets = [0, 3072], sizes = [16, 256], strides = [1, 1]} : vector<16x4384xf32> to vector<16x256xf32>
    %396 = arith.mulf %266, %395 : vector<16x256xf32>
    %cst_134 = arith.constant dense<0.000000e+00> : vector<16x16xf32>
    %397 = tpu.matmul %396, %1, %cst_134 {dimension_numbers = #tpu.dot_dimension_numbers<[1], [0], [0], [1], [0, 0, 1, 1], [], []>} : vector<16x256xf32>, vector<256x16xf32>, vector<16x16xf32> -> vector<16x16xf32>
    %398 = arith.mulf %397, %285 : vector<16x16xf32>
    %399 = vector.extract_strided_slice %269 {offsets = [192, 0], sizes = [16, 144], strides = [1, 1]} : vector<288x144xbf16> to vector<16x144xbf16>
    %400 = arith.truncf %398 : vector<16x16xf32> to vector<16x16xbf16>
    %cst_135 = arith.constant dense<0.000000e+00> : vector<16x144xf32>
    %401 = tpu.matmul %400, %399, %cst_135 {dimension_numbers = #tpu.dot_dimension_numbers<[1], [0], [0], [1], [0, 0, 1, 1], [], []>} : vector<16x16xbf16>, vector<16x144xbf16>, vector<16x144xf32> -> vector<16x144xf32>
    %402 = arith.addf %394, %401 : vector<16x144xf32>
    %403 = vector.extract_strided_slice %265 {offsets = [0, 3328], sizes = [16, 256], strides = [1, 1]} : vector<16x4384xf32> to vector<16x256xf32>
    %404 = arith.mulf %266, %403 : vector<16x256xf32>
    %cst_136 = arith.constant dense<0.000000e+00> : vector<16x16xf32>
    %405 = tpu.matmul %404, %1, %cst_136 {dimension_numbers = #tpu.dot_dimension_numbers<[1], [0], [0], [1], [0, 0, 1, 1], [], []>} : vector<16x256xf32>, vector<256x16xf32>, vector<16x16xf32> -> vector<16x16xf32>
    %406 = arith.mulf %405, %285 : vector<16x16xf32>
    %407 = vector.extract_strided_slice %269 {offsets = [208, 0], sizes = [16, 144], strides = [1, 1]} : vector<288x144xbf16> to vector<16x144xbf16>
    %408 = arith.truncf %406 : vector<16x16xf32> to vector<16x16xbf16>
    %cst_137 = arith.constant dense<0.000000e+00> : vector<16x144xf32>
    %409 = tpu.matmul %408, %407, %cst_137 {dimension_numbers = #tpu.dot_dimension_numbers<[1], [0], [0], [1], [0, 0, 1, 1], [], []>} : vector<16x16xbf16>, vector<16x144xbf16>, vector<16x144xf32> -> vector<16x144xf32>
    %410 = arith.addf %402, %409 : vector<16x144xf32>
    %411 = vector.extract_strided_slice %265 {offsets = [0, 3584], sizes = [16, 256], strides = [1, 1]} : vector<16x4384xf32> to vector<16x256xf32>
    %412 = arith.mulf %266, %411 : vector<16x256xf32>
    %cst_138 = arith.constant dense<0.000000e+00> : vector<16x16xf32>
    %413 = tpu.matmul %412, %1, %cst_138 {dimension_numbers = #tpu.dot_dimension_numbers<[1], [0], [0], [1], [0, 0, 1, 1], [], []>} : vector<16x256xf32>, vector<256x16xf32>, vector<16x16xf32> -> vector<16x16xf32>
    %414 = arith.mulf %413, %285 : vector<16x16xf32>
    %415 = vector.extract_strided_slice %269 {offsets = [224, 0], sizes = [16, 144], strides = [1, 1]} : vector<288x144xbf16> to vector<16x144xbf16>
    %416 = arith.truncf %414 : vector<16x16xf32> to vector<16x16xbf16>
    %cst_139 = arith.constant dense<0.000000e+00> : vector<16x144xf32>
    %417 = tpu.matmul %416, %415, %cst_139 {dimension_numbers = #tpu.dot_dimension_numbers<[1], [0], [0], [1], [0, 0, 1, 1], [], []>} : vector<16x16xbf16>, vector<16x144xbf16>, vector<16x144xf32> -> vector<16x144xf32>
    %418 = arith.addf %410, %417 : vector<16x144xf32>
    %419 = vector.extract_strided_slice %265 {offsets = [0, 3840], sizes = [16, 256], strides = [1, 1]} : vector<16x4384xf32> to vector<16x256xf32>
    %420 = arith.mulf %266, %419 : vector<16x256xf32>
    %cst_140 = arith.constant dense<0.000000e+00> : vector<16x16xf32>
    %421 = tpu.matmul %420, %1, %cst_140 {dimension_numbers = #tpu.dot_dimension_numbers<[1], [0], [0], [1], [0, 0, 1, 1], [], []>} : vector<16x256xf32>, vector<256x16xf32>, vector<16x16xf32> -> vector<16x16xf32>
    %422 = arith.mulf %421, %285 : vector<16x16xf32>
    %423 = vector.extract_strided_slice %269 {offsets = [240, 0], sizes = [16, 144], strides = [1, 1]} : vector<288x144xbf16> to vector<16x144xbf16>
    %424 = arith.truncf %422 : vector<16x16xf32> to vector<16x16xbf16>
    %cst_141 = arith.constant dense<0.000000e+00> : vector<16x144xf32>
    %425 = tpu.matmul %424, %423, %cst_141 {dimension_numbers = #tpu.dot_dimension_numbers<[1], [0], [0], [1], [0, 0, 1, 1], [], []>} : vector<16x16xbf16>, vector<16x144xbf16>, vector<16x144xf32> -> vector<16x144xf32>
    %426 = arith.addf %418, %425 : vector<16x144xf32>
    %427 = arith.addf %234, %426 : vector<16x144xf32>
    %c0_142 = arith.constant 0 : index
    %c0_143 = arith.constant 0 : index
    %c0_144 = arith.constant 0 : index
    %428 = vector.load %arg20[%c0_142, %c0_143, %c0_144] : memref<1x1x144xf32, #tpu.memory_space<vmem>>, vector<1x1x144xf32>
    %429 = vector.shape_cast %428 : vector<1x1x144xf32> to vector<1x144xf32>
    %430 = vector.broadcast %429 : vector<1x144xf32> to vector<16x144xf32>
    %431 = arith.addf %427, %430 : vector<16x144xf32>
    %c0_145 = arith.constant 0 : index
    %c0_146 = arith.constant 0 : index
    %432 = vector.load %arg24[%c0_145, %c0_146] : memref<16x144xf32, #tpu.memory_space<vmem>>, vector<16x144xf32>
    tpu.vector_store %arg24[%c0_145, %c0_146], %431 {strides = array<i32>} : memref<16x144xf32, #tpu.memory_space<vmem>>, vector<16x144xf32>,
    %c0_147 = arith.constant 0 : index
    %c0_148 = arith.constant 0 : index
    %433 = vector.load %arg21[%c0_147, %c0_148] : memref<144x128xbf16, #tpu.memory_space<vmem>>, vector<144x128xbf16>
    %434 = arith.truncf %431 : vector<16x144xf32> to vector<16x144xbf16>
    %cst_149 = arith.constant dense<0.000000e+00> : vector<16x128xf32>
    %435 = tpu.matmul %434, %433, %cst_149 {dimension_numbers = #tpu.dot_dimension_numbers<[1], [0], [0], [1], [0, 0, 1, 1], [], []>} : vector<16x144xbf16>, vector<144x128xbf16>, vector<16x128xf32> -> vector<16x128xf32>
    %c0_150 = arith.constant 0 : index
    %c0_151 = arith.constant 0 : index
    %436 = vector.load %arg22[%c0_150, %c0_151] : memref<1x128xf32, #tpu.memory_space<vmem>>, vector<1x128xf32>
    %437 = vector.broadcast %436 : vector<1x128xf32> to vector<16x128xf32>
    %438 = arith.addf %435, %437 : vector<16x128xf32>
    %c0_152 = arith.constant 0 : index
    %c0_153 = arith.constant 0 : index
    %439 = vector.load %arg23[%c0_152, %c0_153] : memref<16x128xf32, #tpu.memory_space<vmem>>, vector<16x128xf32>
    tpu.vector_store %arg23[%c0_152, %c0_153], %438 {strides = array<i32>} : memref<16x128xf32, #tpu.memory_space<vmem>>, vector<16x128xf32>,
    return
  }
  func.func @transform_0(%arg0: i32) -> (i32, i32) {
    %c0_i32 = arith.constant 0 : i32
    %c0_i32_0 = arith.constant 0 : i32
    %c0_i32_1 = arith.constant 0 : i32
    return %c0_i32, %c0_i32_0 : i32, i32
  }
  func.func @transform_1(%arg0: i32) -> (i32, i32) {
    %c0_i32 = arith.constant 0 : i32
    %c0_i32_0 = arith.constant 0 : i32
    %c0_i32_1 = arith.constant 0 : i32
    return %c0_i32, %c0_i32_0 : i32, i32
  }
  func.func @transform_2(%arg0: i32) -> (i32, i32) {
    %c0_i32 = arith.constant 0 : i32
    %c0_i32_0 = arith.constant 0 : i32
    %c0_i32_1 = arith.constant 0 : i32
    return %c0_i32, %c0_i32_0 : i32, i32
  }
  func.func @transform_3(%arg0: i32) -> (i32, i32) {
    %c0_i32 = arith.constant 0 : i32
    %c0_i32_0 = arith.constant 0 : i32
    %c0_i32_1 = arith.constant 0 : i32
    return %c0_i32, %c0_i32_0 : i32, i32
  }
  func.func @transform_4(%arg0: i32) -> (i32, i32) {
    %c0_i32 = arith.constant 0 : i32
    %c0_i32_0 = arith.constant 0 : i32
    %c0_i32_1 = arith.constant 0 : i32
    return %c0_i32, %c0_i32_0 : i32, i32
  }
  func.func @transform_5(%arg0: i32) -> (i32, i32) {
    %c0_i32 = arith.constant 0 : i32
    %c0_i32_0 = arith.constant 0 : i32
    %c0_i32_1 = arith.constant 0 : i32
    return %c0_i32, %c0_i32_0 : i32, i32
  }
  func.func @transform_6(%arg0: i32) -> (i32, i32, i32) {
    %c0_i32 = arith.constant 0 : i32
    %c0_i32_0 = arith.constant 0 : i32
    %c0_i32_1 = arith.constant 0 : i32
    return %arg0, %c0_i32, %c0_i32_0 : i32, i32, i32
  }
  func.func @transform_7(%arg0: i32) -> (i32, i32, i32) {
    %c0_i32 = arith.constant 0 : i32
    %c0_i32_0 = arith.constant 0 : i32
    %c0_i32_1 = arith.constant 0 : i32
    return %arg0, %c0_i32, %c0_i32_0 : i32, i32, i32
  }
  func.func @transform_8(%arg0: i32) -> (i32, i32, i32) {
    %c0_i32 = arith.constant 0 : i32
    %c0_i32_0 = arith.constant 0 : i32
    %c0_i32_1 = arith.constant 0 : i32
    return %arg0, %c0_i32, %c0_i32_0 : i32, i32, i32
  }
  func.func @transform_9(%arg0: i32) -> (i32, i32, i32) {
    %c0_i32 = arith.constant 0 : i32
    %c0_i32_0 = arith.constant 0 : i32
    %c0_i32_1 = arith.constant 0 : i32
    return %arg0, %c0_i32, %c0_i32_0 : i32, i32, i32
  }
  func.func @transform_10(%arg0: i32) -> (i32, i32, i32) {
    %c0_i32 = arith.constant 0 : i32
    %c0_i32_0 = arith.constant 0 : i32
    %c0_i32_1 = arith.constant 0 : i32
    return %arg0, %c0_i32, %c0_i32_0 : i32, i32, i32
  }
  func.func @transform_11(%arg0: i32) -> (i32, i32, i32) {
    %c0_i32 = arith.constant 0 : i32
    %c0_i32_0 = arith.constant 0 : i32
    %c0_i32_1 = arith.constant 0 : i32
    return %arg0, %c0_i32, %c0_i32_0 : i32, i32, i32
  }
  func.func @transform_12(%arg0: i32) -> (i32, i32, i32) {
    %c0_i32 = arith.constant 0 : i32
    %c0_i32_0 = arith.constant 0 : i32
    %c0_i32_1 = arith.constant 0 : i32
    return %arg0, %c0_i32, %c0_i32_0 : i32, i32, i32
  }
  func.func @transform_13(%arg0: i32) -> (i32, i32, i32) {
    %c0_i32 = arith.constant 0 : i32
    %c0_i32_0 = arith.constant 0 : i32
    %c0_i32_1 = arith.constant 0 : i32
    return %arg0, %c0_i32, %c0_i32_0 : i32, i32, i32
  }
  func.func @transform_14(%arg0: i32) -> (i32, i32, i32) {
    %c0_i32 = arith.constant 0 : i32
    %c0_i32_0 = arith.constant 0 : i32
    %c0_i32_1 = arith.constant 0 : i32
    return %arg0, %c0_i32, %c0_i32_0 : i32, i32, i32
  }
  func.func @transform_15(%arg0: i32) -> (i32, i32, i32) {
    %c0_i32 = arith.constant 0 : i32
    %c0_i32_0 = arith.constant 0 : i32
    %c0_i32_1 = arith.constant 0 : i32
    return %arg0, %c0_i32, %c0_i32_0 : i32, i32, i32
  }
  func.func @transform_16(%arg0: i32) -> (i32, i32, i32) {
    %c0_i32 = arith.constant 0 : i32
    %c0_i32_0 = arith.constant 0 : i32
    %c0_i32_1 = arith.constant 0 : i32
    return %arg0, %c0_i32, %c0_i32_0 : i32, i32, i32
  }
  func.func @transform_17(%arg0: i32) -> (i32, i32, i32) {
    %c0_i32 = arith.constant 0 : i32
    %c0_i32_0 = arith.constant 0 : i32
    %c0_i32_1 = arith.constant 0 : i32
    return %arg0, %c0_i32, %c0_i32_0 : i32, i32, i32
  }
  func.func @transform_18(%arg0: i32) -> (i32, i32, i32) {
    %c0_i32 = arith.constant 0 : i32
    %c0_i32_0 = arith.constant 0 : i32
    %c0_i32_1 = arith.constant 0 : i32
    return %arg0, %c0_i32, %c0_i32_0 : i32, i32, i32
  }
  func.func @transform_19(%arg0: i32) -> (i32, i32, i32) {
    %c0_i32 = arith.constant 0 : i32
    %c0_i32_0 = arith.constant 0 : i32
    %c0_i32_1 = arith.constant 0 : i32
    return %arg0, %c0_i32, %c0_i32_0 : i32, i32, i32
  }
  func.func @transform_20(%arg0: i32) -> (i32, i32) {
    %c0_i32 = arith.constant 0 : i32
    %c0_i32_0 = arith.constant 0 : i32
    %c0_i32_1 = arith.constant 0 : i32
    return %c0_i32, %c0_i32_0 : i32, i32
  }
  func.func @transform_21(%arg0: i32) -> (i32, i32) {
    %c0_i32 = arith.constant 0 : i32
    %c0_i32_0 = arith.constant 0 : i32
    %c0_i32_1 = arith.constant 0 : i32
    return %c0_i32, %c0_i32_0 : i32, i32
  }
  func.func @transform_22(%arg0: i32) -> (i32, i32) {
    %c0_i32 = arith.constant 0 : i32
    %c0_i32_0 = arith.constant 0 : i32
    %c0_i32_1 = arith.constant 0 : i32
    return %c0_i32, %c0_i32_0 : i32, i32
  }
}

</mosaic_0001>

<bundles_post_ra>
// kernel: tpu_custom_call.1
= control target key start
LH: loop header
LB: loop body
LE: loop exit
PB: predicated region body
PF: predicated region fallthrough
CT: control target
= control target key end

     0   :  { %s16003_s0 = inlined_call_operand.hbm [shape: f32[16,68], index: 0, kind: input, shape index: {}]   ;;  %s16004_s1 = inlined_call_operand.hbm [shape: f32[16,68], index: 1, kind: input, shape index: {}]   ;;  %s16005_s2 = inlined_call_operand.vmem [shape: f32[144,16], index: 2, kind: input, shape index: {}]   ;;  %s16006_s3 = inlined_call_operand.vmem [shape: f32[256,16], index: 3, kind: input, shape index: {}]   ;;  %s16007_s4 = inlined_call_operand.hbm [shape: bf16[68,144], index: 4, kind: input, shape index: {}]   ;;  %s16008_s5 = inlined_call_operand.hbm [shape: f32[1,144], index: 5, kind: input, shape index: {}]   ;;  %s16009_s6 = inlined_call_operand.hbm [shape: bf16[2,144,768], index: 6, kind: input, shape index: {}]   ;;  %s16010_s7 = inlined_call_operand.hbm [shape: f32[2,1,768], index: 7, kind: input, shape index: {}]   ;;  %s16011_s8 = inlined_call_operand.vmem [shape: bf16[2,256,144], index: 8, kind: input, shape index: {}]   ;;  %s16012_s9 = inlined_call_operand.hbm [shape: f32[2,1,144], index: 9, kind: input, shape index: {}]   ;;  %s16013_s10 = inlined_call_operand.hbm [shape: bf16[2,144,256], index: 10, kind: input, shape index: {}]   ;;  %s16014_s11 = inlined_call_operand.hbm [shape: f32[2,1,256], index: 11, kind: input, shape index: {}]   ;;  %s16015_s12 = inlined_call_operand.vmem [shape: bf16[2,68,512], index: 12, kind: input, shape index: {}]   ;;  %s16016_s13 = inlined_call_operand.hbm [shape: f32[2,1,512], index: 13, kind: input, shape index: {}]   ;;  %s16017_s14 = inlined_call_operand.vmem [shape: bf16[2,256,144], index: 14, kind: input, shape index: {}]   ;;  %s16018_s15 = inlined_call_operand.hbm [shape: f32[2,1,144], index: 15, kind: input, shape index: {}]   ;;  %s16019_s16 = inlined_call_operand.hbm [shape: bf16[2,144,4384], index: 16, kind: input, shape index: {}]   ;;  %s16020_s17 = inlined_call_operand.hbm [shape: f32[2,1,4384], index: 17, kind: input, shape index: {}]   ;;  %s16021_s18 = inlined_call_operand.vmem [shape: bf16[2,288,144], index: 18, kind: input, shape index: {}]   ;;  %s16022_s19 = inlined_call_operand.hbm [shape: f32[2,1,144], index: 19, kind: input, shape index: {}]   ;;  %s16023_s20 = inlined_call_operand.hbm [shape: bf16[144,128], index: 20, kind: input, shape index: {}]   ;;  %s16024_s21 = inlined_call_operand.hbm [shape: f32[1,128], index: 21, kind: input, shape index: {}]   ;;  %s16025_s22 = inlined_call_operand.hbm [shape: f32[16,128], index: 22, kind: output, shape index: {}]  }
   0x1   :  { %16109 = sst [smem:[#allocation139_spill]] %s16003_s0 }
   0x2   :  { %16110 = sst [smem:[#allocation140_spill]] %s16004_s1 }
   0x3   :  { %16111 = sst [smem:[#allocation141_spill]] %s16005_s2 }
   0x4   :  { %16112 = sst [smem:[#allocation142_spill]] %s16006_s3 }
   0x5   :  { %16113 = sst [smem:[#allocation143_spill]] %s16007_s4 }
   0x6   :  { %16114 = sst [smem:[#allocation144_spill]] %s16008_s5 }
   0x7   :  { %16115 = sst [smem:[#allocation145_spill]] %s16009_s6 }
   0x8   :  { %16116 = sst [smem:[#allocation146_spill]] %s16010_s7 }
   0x9   :  { %16117 = sst [smem:[#allocation147_spill]] %s16011_s8 }
   0xa   :  { %16118 = sst [smem:[#allocation148_spill]] %s16012_s9 }
   0xb   :  { %16119 = sst [smem:[#allocation149_spill]] %s16013_s10 }
   0xc   :  { %16120 = sst [smem:[#allocation150_spill]] %s16014_s11 }
   0xd   :  { %16121 = sst [smem:[#allocation151_spill]] %s16015_s12 }
   0xe   :  { %16122 = sst [smem:[#allocation152_spill]] %s16016_s13 }
   0xf   :  { %16123 = sst [smem:[#allocation153_spill]] %s16017_s14 }
  0x10   :  { %16124 = sst [smem:[#allocation154_spill]] %s16021_s18 }
  0x11   :  { %16125 = sst [smem:[#allocation155_spill]] %s16022_s19 }
  0x12   :  { %16126 = sst [smem:[#allocation156_spill]] %s16024_s21 }
  0x13   :  { %16127 = sst [smem:[#allocation157_spill]] %s16025_s22 }
  0x14   :  { %27 = vsyncpa [#allocation4], 0 }
  0x15   :  { %28 = vsyncpa [#allocation7], 0 }
  0x16   :  { %29 = vsyncpa [#allocation10], 0 }
  0x17   :  { %30 = vsyncpa [#allocation5], 0  ;;  %s12551_s3 = smov 0   ;;  %s12553_s28 = smov 0  }
  0x18   :  { %s12555_s29 = smov 0   ;;  %s12557_s30 = smov 0  }
  0x19 LB: > { %16128 = sst [smem:[#allocation31_spill]] %s12406_s28  ;;  %s12570_s4 = sadd.s32 4294967295, %s12414_s30   ;;  %s12414_s30 = sphi %s12557_s30, %s16427_s30   ;;  %s12410_s29 = sphi %s12555_s29, %s16430_s29   ;;  %s12406_s28 = sphi %s12553_s28, %s16429_s28   ;;  %s12402_s3 = sphi %s12551_s3, %s16428_s3  }
  0x1a   : > { %16129 = sst [smem:[#allocation32_spill]] %s12410_s29  ;;  %p182_p0 = scmp.ne.s32.totalorder %s12406_s28, %s12402_s3 }
  0x1b   : > { %16130 = sst [smem:[#allocation33_spill]] %s12570_s4  ;;  %p183_p1 = scmp.eq.s32.totalorder %s12570_s4, 0 }
  0x1c   : > { %p8845_p2 = scmp.ge.s32.totalorder %s12414_s30, 1  ;;  %p594_p3 = scmp.lt.s32.totalorder %s12414_s30, 3 }
  0x1d   : > { %p8846_p4 = scmp.ne.s32.totalorder %s12570_s4, 0  ;;  %p12579_p5 = por %p183_p1, %p182_p0 }
  0x1e   : > { %s16133_s5 = sld [smem:[#allocation139_spill]]  ;;  %p12586_p6 = pnand %p8845_p2, %p594_p3 }
  0x1f   : > { %s16131_s0 = scalar_select %p12579_p5, 1, 0 }
  0x20   : > { %s16134_s6 = scalar_select %p12586_p6, 1, 0 }
  0x21   : > { %16132 = sst [smem:[#allocation34_spill]] %s16131_s0  ;;  %p11654_p7 = pneg %p12586_p6 }
  0x22   : > { %16135 = sst [smem:[#allocation35_spill]] %s16134_s6  ;;  %s12416_s25 = smov [#allocation3]  }
  0x23   : > { %s607_s26 = sshll.u32 %s12416_s25, 4  ;;  %p12594_p8 = pnand %p11654_p7, %p183_p1  ;;  %s608_s26 = int_to_ptr.vmem [resolvable:$true] %s607_s26 }
  0x24   : > { %s605_s24 = sshll.u32 %s16133_s5, 4  ;;  %s12599_s27 = sadd.s32 1, %s12414_s30   ;;  %s606_s24 = int_to_ptr.hbm [resolvable:$true] %s605_s24 }
  0x25   : > { %16137 = sst [smem:[#allocation36_spill]] %s12599_s27  ;;  %s16029_s3 = smov 128  }
  0x26   : > { %s16031_s23 = smov 8   ;;  %s166_s1 = ssub.s32 %s12414_s30, %s12599_s27 }
  0x27   : > { %11657 = dma.hbm_to_vmem [thread:$0]  (!%p12594_p8), %s606_s24, 256, %s608_s26, [#allocation4], %s16029_s3, %s16029_s3, %s16031_s23  }
  0x28   : > { %s169_s5 = sadd.s32 1, %s12410_s29  ;;  %p167_p9 = scmp.eq.s32.totalorder %s166_s1, 0 }
  0x29   : > { %p176_p10 = scmp.ne.s32.totalorder %s12410_s29, %s12406_s28  ;;  %p177_p11 = scmp.eq.s32.totalorder %s12414_s30, 0 }
  0x2a   : > { %p11710_p12 = scmp.lt.s32.totalorder %s12414_s30, 2  ;;  %s693_s22 = sand.u32 1, %s12414_s30  }
  0x2b   : > { %s12614_s25 = scalar_select %p167_p9, %s12410_s29, %s169_s5  }
  0x2c   : > { %p178_p13 = por %p177_p11, %p176_p10  ;;  %s12618_s18 = sand.u32 1, %s12410_s29  }
  0x2d   : > { %16138 = sst [smem:[#allocation37_spill]] %s12614_s25  ;;  %s11589_s12 = smul.u32 432, %s12618_s18 }
  0x2e   : > { %p12621_p0 = pnand %p11710_p12, %p178_p13  ;;  %s11590_s24 = smul.u32 432, %s12414_s30 }
  0x2f   : > { %s16140_s1 = sld [smem:[#allocation145_spill]]  ;;  %s697_s27 = scalar_lea.vmem [#allocation11], %s11589_s12 }
  0x30   : > { %s705_s8 = sshll.u32 %s697_s27, 4  ;;  %s12629_s25 = scalar_lea.sflag [#allocation4], %s693_s22  ;;  %s706_s8 = int_to_ptr.vmem [resolvable:$true] %s705_s8 }
  0x31   : > { %p12633_p3 = pneg %p12621_p0 }
  0x35   : > { %s702_s23 = scalar_lea.hbm %s16140_s1, %s11590_s24  ;;  %s11885_s3 = scalar_lea.hbm %s16140_s1, 864 }
  0x36   : > { %s703_s5 = sshll.u32 %s702_s23, 4  ;;  %s704_s5 = int_to_ptr.hbm [resolvable:$true] %s703_s5 }
  0x37   : > { %s11878_s29 = sshra.s32 %s704_s5, 4  ;;  %s11879_s29 = int_to_ptr.hbm [resolvable:$true] %s11878_s29 }
  0x38   : > { %s11880_s0 = scalar_lea.hbm %s11879_s29, 432  ;;  %p11886_p10 = scmp.lt.s32.totalorder %s11879_s29, %s16140_s1 }
  0x39   : > { %p11881_p2 = scmp.ne.s32.totalorder %s11879_s29, %s11880_s0  ;;  %p11887_p11 = scmp.lt.s32.totalorder %s11885_s3, %s11880_s0 }
  0x3b   : > { %p11883_p7 = pnand %p12633_p3, %p11881_p2  ;;  %p11888_p12 = por %p11887_p11, %p11886_p10 }
  0x3d   : > { %p11884_p9 = pneg %p11883_p7 }
  0x3f   : > { %p11889_p13 = pnand %p11888_p12, %p11884_p9 }
  0x41   : > { %11892 = shalt.err (!%p11889_p13)
}
  0x42   : > { %s12419_s24 = smov 384   ;;  %s12420_s26 = smov 24  }
  0x43   : > { %11676 = dma.hbm_to_vmem [thread:$0]  (!%p12621_p0), %s704_s5, 6912, %s706_s8, %s12629_s25, %s12419_s24, %s12419_s24, %s12420_s26  }
  0x44   : > { %s11591_s12 = smul.u32 6, %s12618_s18  ;;  %s12650_s27 = sshll.u32 %s12618_s18, 1 }
  0x45   : > { %s11592_s23 = smul.u32 6, %s12414_s30  ;;  %s12654_s29 = sshll.u32 %s12414_s30, 1 }
  0x46   : > { %s16142_s7 = sld [smem:[#allocation146_spill]]  ;;  %s719_s1 = scalar_lea.vmem [#allocation12], %s11591_s12 }
  0x47   : > { %s727_s4 = sshll.u32 %s719_s1, 4  ;;  %s16143_s9 = sld [smem:[#allocation148_spill]]  ;;  %s728_s4 = int_to_ptr.vmem [resolvable:$true] %s727_s4 }
  0x4c   : > { %s723_s22 = scalar_lea.hbm %s16142_s7, %s11592_s23  ;;  %s11915_s23 = scalar_lea.hbm %s16142_s7, 12 }
  0x4d   : > { %s725_s6 = sshll.u32 %s723_s22, 4  ;;  %s750_s8 = scalar_lea.hbm %s16143_s9, %s12654_s29  ;;  %s726_s6 = int_to_ptr.hbm [resolvable:$true] %s725_s6 }
  0x4e   : > { %s11908_s5 = sshra.s32 %s726_s6, 4  ;;  %s11909_s5 = int_to_ptr.hbm [resolvable:$true] %s11908_s5 }
  0x4f   : > { %s11910_s24 = scalar_lea.hbm %s11909_s5, 6  ;;  %p11916_p10 = scmp.lt.s32.totalorder %s11909_s5, %s16142_s7 }
  0x50   : > { %p11911_p2 = scmp.ne.s32.totalorder %s11909_s5, %s11910_s24  ;;  %p11917_p11 = scmp.lt.s32.totalorder %s11915_s23, %s11910_s24 }
  0x52   : > { %p11913_p7 = pnand %p11911_p2, %p12633_p3  ;;  %p11918_p12 = por %p11917_p11, %p11916_p10 }
  0x54   : > { %p11914_p9 = pneg %p11913_p7 }
  0x56   : > { %p11919_p13 = pnand %p11918_p12, %p11914_p9 }
  0x58   : > { %11922 = shalt.err (!%p11919_p13)
}
  0x59   : > { %11679 = dma.hbm_to_vmem [thread:$0]  (!%p12621_p0), %s726_s6, 96, %s728_s4, %s12629_s25  }
  0x5a   : > { %s752_s19 = sshll.u32 %s750_s8, 4  ;;  %s746_s21 = scalar_lea.vmem [#allocation13], %s12650_s27  ;;  %s753_s19 = int_to_ptr.hbm [resolvable:$true] %s752_s19 }
  0x5b   : > { %s754_s3 = sshll.u32 %s746_s21, 4  ;;  %s11938_s22 = sshra.s32 %s753_s19, 4  ;;  %s755_s3 = int_to_ptr.vmem [resolvable:$true] %s754_s3  ;;  %s11939_s22 = int_to_ptr.hbm [resolvable:$true] %s11938_s22 }
  0x5c   : > { %s11940_s26 = scalar_lea.hbm %s11939_s22, 2  ;;  %s11945_s0 = scalar_lea.hbm %s16143_s9, 4 }
  0x5d   : > { %p11941_p2 = scmp.ne.s32.totalorder %s11939_s22, %s11940_s26  ;;  %p11946_p9 = scmp.lt.s32.totalorder %s11939_s22, %s16143_s9 }
  0x5e   : > { %p11947_p11 = scmp.lt.s32.totalorder %s11945_s0, %s11940_s26 }
  0x5f   : > { %p11943_p7 = pnand %p11941_p2, %p12633_p3 }
  0x60   : > { %p11948_p12 = por %p11947_p11, %p11946_p9 }
  0x61   : > { %p11944_p10 = pneg %p11943_p7 }
  0x63   : > { %p11949_p13 = pnand %p11948_p12, %p11944_p10 }
  0x65   : > { %11952 = shalt.err (!%p11949_p13)
}
  0x66   : > { %11682 = dma.hbm_to_vmem [thread:$0]  (!%p12621_p0), %s753_s19, 32, %s755_s3, %s12629_s25  }
  0x67   : > { %s11593_s4 = smul.u32 144, %s12618_s18  ;;  %s16144_s11 = sld [smem:[#allocation150_spill]] }
  0x68   : > { %s11594_s6 = smul.u32 144, %s12414_s30  ;;  %s16145_s10 = sld [smem:[#allocation149_spill]] }
  0x69   : > { %s765_s0 = scalar_lea.vmem [#allocation14], %s11593_s4 }
  0x6a   : > { %s773_s23 = sshll.u32 %s765_s0, 4  ;;  %s774_s23 = int_to_ptr.vmem [resolvable:$true] %s773_s23 }
  0x6d   : > { %s791_s21 = scalar_lea.hbm %s16144_s11, %s12654_s29 }
  0x6e   : > { %s12692_s5 = sshll.u32 %s791_s21, 4  ;;  %s770_s24 = scalar_lea.hbm %s16145_s10, %s11594_s6  ;;  %s794_s5 = int_to_ptr.hbm [resolvable:$true] %s12692_s5 }
  0x6f   : > { %s771_s12 = sshll.u32 %s770_s24, 4  ;;  %s11975_s21 = scalar_lea.hbm %s16145_s10, 288  ;;  %s772_s12 = int_to_ptr.hbm [resolvable:$true] %s771_s12 }
  0x70   : > { %s11968_s19 = sshra.s32 %s772_s12, 4  ;;  %s11969_s19 = int_to_ptr.hbm [resolvable:$true] %s11968_s19 }
  0x71   : > { %s11970_s3 = scalar_lea.hbm %s11969_s19, 144  ;;  %p11976_p9 = scmp.lt.s32.totalorder %s11969_s19, %s16145_s10 }
  0x72   : > { %p11971_p2 = scmp.ne.s32.totalorder %s11969_s19, %s11970_s3  ;;  %p11977_p11 = scmp.lt.s32.totalorder %s11975_s21, %s11970_s3 }
  0x74   : > { %p11973_p7 = pnand %p11971_p2, %p12633_p3  ;;  %p11978_p12 = por %p11977_p11, %p11976_p9 }
  0x76   : > { %p11974_p10 = pneg %p11973_p7 }
  0x78   : > { %p11979_p13 = pnand %p11978_p12, %p11974_p10 }
  0x7a   : > { %11982 = shalt.err (!%p11979_p13)
}
  0x7b   : > { %s16146_s4 = smov 8   ;;  %s16147_s6 = smov 128  }
  0x7c   : > { %11685 = dma.hbm_to_vmem [thread:$0]  (!%p12621_p0), %s772_s12, 2304, %s774_s23, %s12629_s25, %s16147_s6, %s16147_s6, %s16146_s4  }
  0x7d   : > { %s787_s24 = scalar_lea.vmem [#allocation15], %s12650_s27  ;;  %s8859_s8 = sshll.u32 %s12618_s18, 2 }
  0x7e   : > { %s795_s0 = sshll.u32 %s787_s24, 4  ;;  %s11998_s19 = sshra.s32 %s794_s5, 4  ;;  %s796_s0 = int_to_ptr.vmem [resolvable:$true] %s795_s0  ;;  %s11999_s19 = int_to_ptr.hbm [resolvable:$true] %s11998_s19 }
  0x7f   : > { %s12000_s3 = scalar_lea.hbm %s11999_s19, 2  ;;  %s12005_s22 = scalar_lea.hbm %s16144_s11, 4 }
  0x80   : > { %p12001_p2 = scmp.ne.s32.totalorder %s11999_s19, %s12000_s3  ;;  %p12006_p9 = scmp.lt.s32.totalorder %s11999_s19, %s16144_s11 }
  0x81   : > { %p12007_p11 = scmp.lt.s32.totalorder %s12005_s22, %s12000_s3 }
  0x82   : > { %p12003_p7 = pnand %p12001_p2, %p12633_p3 }
  0x83   : > { %p12008_p12 = por %p12007_p11, %p12006_p9 }
  0x84   : > { %p12004_p10 = pneg %p12003_p7 }
  0x86   : > { %p12009_p13 = pnand %p12008_p12, %p12004_p10 }
  0x88   : > { %12012 = shalt.err (!%p12009_p13)
}
  0x89   : > { %11688 = dma.hbm_to_vmem [thread:$0]  (!%p12621_p0), %s794_s5, 32, %s796_s0, %s12629_s25  }
  0x8a   : > { %s8860_s23 = sshll.u32 %s12414_s30, 2  ;;  %s814_s12 = scalar_lea.vmem [#allocation16], %s8859_s8 }
  0x8b   : > { %s822_s24 = sshll.u32 %s814_s12, 4  ;;  %s16148_s13 = sld [smem:[#allocation152_spill]]  ;;  %s823_s24 = int_to_ptr.vmem [resolvable:$true] %s822_s24 }
  0x8c   : > { %s845_s26 = scalar_lea.hbm %s16018_s15, %s12654_s29 }
  0x91   : > { %s818_s7 = scalar_lea.hbm %s16148_s13, %s8860_s23  ;;  %s12035_s8 = scalar_lea.hbm %s16148_s13, 8 }
  0x92   : > { %s820_s19 = sshll.u32 %s818_s7, 4  ;;  %s821_s19 = int_to_ptr.hbm [resolvable:$true] %s820_s19 }
  0x93   : > { %s12028_s9 = sshra.s32 %s821_s19, 4  ;;  %s12029_s9 = int_to_ptr.hbm [resolvable:$true] %s12028_s9 }
  0x94   : > { %s12030_s10 = scalar_lea.hbm %s12029_s9, 4  ;;  %p12036_p9 = scmp.lt.s32.totalorder %s12029_s9, %s16148_s13 }
  0x95   : > { %p12031_p2 = scmp.ne.s32.totalorder %s12029_s9, %s12030_s10  ;;  %p12037_p11 = scmp.lt.s32.totalorder %s12035_s8, %s12030_s10 }
  0x97   : > { %p12033_p7 = pnand %p12031_p2, %p12633_p3  ;;  %p12038_p12 = por %p12037_p11, %p12036_p9 }
  0x99   : > { %p12034_p10 = pneg %p12033_p7 }
  0x9b   : > { %p12039_p13 = pnand %p12038_p12, %p12034_p10 }
  0x9d   : > { %12042 = shalt.err (!%p12039_p13)
}
  0x9e   : > { %11691 = dma.hbm_to_vmem [thread:$0]  (!%p12621_p0), %s821_s19, 64, %s823_s24, %s12629_s25  }
  0x9f   : > { %s847_s1 = sshll.u32 %s845_s26, 4  ;;  %s841_s21 = scalar_lea.vmem [#allocation17], %s12650_s27  ;;  %s848_s1 = int_to_ptr.hbm [resolvable:$true] %s847_s1 }
  0xa0   : > { %s849_s7 = sshll.u32 %s841_s21, 4  ;;  %s12058_s3 = sshra.s32 %s848_s1, 4  ;;  %s850_s7 = int_to_ptr.vmem [resolvable:$true] %s849_s7  ;;  %s12059_s3 = int_to_ptr.hbm [resolvable:$true] %s12058_s3 }
  0xa1   : > { %s12060_s22 = scalar_lea.hbm %s12059_s3, 2  ;;  %s12065_s5 = scalar_lea.hbm %s16018_s15, 4 }
  0xa2   : > { %p12061_p2 = scmp.ne.s32.totalorder %s12059_s3, %s12060_s22  ;;  %p12066_p10 = scmp.lt.s32.totalorder %s12059_s3, %s16018_s15 }
  0xa3   : > { %p12067_p11 = scmp.lt.s32.totalorder %s12065_s5, %s12060_s22 }
  0xa4   : > { %p12063_p7 = pnand %p12061_p2, %p12633_p3 }
  0xa5   : > { %p12068_p12 = por %p12067_p11, %p12066_p10 }
  0xa6   : > { %p12064_p9 = pneg %p12063_p7 }
  0xa8   : > { %p12069_p13 = pnand %p12068_p12, %p12064_p9 }
  0xaa   : > { %12072 = shalt.err (!%p12069_p13)
}
  0xab   : > { %11694 = dma.hbm_to_vmem [thread:$0]  (!%p12621_p0), %s848_s1, 32, %s850_s7, %s12629_s25  }
  0xac   : > { %s16149_s26 = sld [smem:[#allocation140_spill]]  ;;  %s12421_s23 = smov [#allocation6]  }
  0xad   : > { %s621_s21 = sshll.u32 %s12421_s23, 4  ;;  %s11595_s3 = smul.u32 2520, %s12618_s18  ;;  %s622_s21 = int_to_ptr.vmem [resolvable:$true] %s621_s21 }
  0xae   : > { %s11596_s22 = smul.u32 2520, %s12414_s30  ;;  %s16150_s19 = sld [smem:[#allocation143_spill]] }
  0xaf   : > { %s860_s9 = scalar_lea.vmem [#allocation18], %s11595_s3  ;;  %s12125_s3 = scalar_lea.hbm %s16019_s16, 5040 }
  0xb0   : > { %s868_s10 = sshll.u32 %s860_s9, 4  ;;  %s865_s7 = scalar_lea.hbm %s16019_s16, %s11596_s22  ;;  %s869_s10 = int_to_ptr.vmem [resolvable:$true] %s868_s10 }
  0xb1   : > { %s866_s0 = sshll.u32 %s865_s7, 4  ;;  %s867_s0 = int_to_ptr.hbm [resolvable:$true] %s866_s0 }
  0xb2   : > { %s619_s12 = sshll.u32 %s16149_s26, 4  ;;  %s12118_s23 = sshra.s32 %s867_s0, 4  ;;  %s620_s12 = int_to_ptr.hbm [resolvable:$true] %s619_s12  ;;  %s12119_s23 = int_to_ptr.hbm [resolvable:$true] %s12118_s23 }
  0xb3   : > { %11660 = dma.hbm_to_vmem [thread:$0]  (!%p12594_p8), %s620_s12, 256, %s622_s21, [#allocation7], %s16147_s6, %s16147_s6, %s16146_s4  }
  0xb4   : > { %s639_s26 = sshll.u32 %s16150_s19, 4  ;;  %s12120_s11 = scalar_lea.hbm %s12119_s23, 2520  ;;  %s640_s26 = int_to_ptr.hbm [resolvable:$true] %s639_s26 }
  0xb5   : > { %p12121_p2 = scmp.ne.s32.totalorder %s12119_s23, %s12120_s11  ;;  %p12126_p10 = scmp.lt.s32.totalorder %s12119_s23, %s16019_s16 }
  0xb6   : > { %p12127_p11 = scmp.lt.s32.totalorder %s12125_s3, %s12120_s11 }
  0xb7   : > { %p12123_p7 = pnand %p12121_p2, %p12633_p3 }
  0xb8   : > { %p12128_p12 = por %p12127_p11, %p12126_p10 }
  0xb9   : > { %p12124_p9 = pneg %p12123_p7 }
  0xbb   : > { %p12129_p13 = pnand %p12128_p12, %p12124_p9 }
  0xbd   : > { %12132 = shalt.err (!%p12129_p13)
}
  0xbe   : > { %s12422_s5 = smov 2240   ;;  %s12423_s1 = smov 140  }
  0xbf   : > { %11697 = dma.hbm_to_vmem [thread:$0]  (!%p12621_p0), %s867_s0, 40320, %s869_s10, %s12629_s25, %s12422_s5, %s12422_s5, %s12423_s1  }
  0xc0   : > { %s12424_s7 = smov [#allocation8]   ;;  %s16151_s23 = sld [smem:[#allocation144_spill]] }
  0xc1   : > { %s641_s8 = sshll.u32 %s12424_s7, 4  ;;  %s11597_s12 = smul.u32 35, %s12618_s18  ;;  %s642_s8 = int_to_ptr.vmem [resolvable:$true] %s641_s8 }
  0xc2   : > { %11663 = dma.hbm_to_vmem [thread:$0]  (!%p12594_p8), %s640_s26, 1152, %s642_s8, [#allocation7], %s16147_s6, %s16147_s6, %s16146_s4  }
  0xc3   : > { %s12425_s21 = smov [#allocation9]   ;;  %s11598_s9 = smul.u32 35, %s12414_s30 }
  0xc4   : > { %s656_s3 = sshll.u32 %s12425_s21, 4  ;;  %s882_s5 = scalar_lea.vmem [#allocation19], %s11597_s12  ;;  %s657_s3 = int_to_ptr.vmem [resolvable:$true] %s656_s3 }
  0xc5   : > { %s886_s22 = scalar_lea.hbm %s16020_s17, %s11598_s9  ;;  %s890_s1 = sshll.u32 %s882_s5, 4  ;;  %s891_s1 = int_to_ptr.vmem [resolvable:$true] %s890_s1 }
  0xc6   : > { %s654_s11 = sshll.u32 %s16151_s23, 4  ;;  %s888_s7 = sshll.u32 %s886_s22, 4  ;;  %s655_s11 = int_to_ptr.hbm [resolvable:$true] %s654_s11  ;;  %s889_s7 = int_to_ptr.hbm [resolvable:$true] %s888_s7 }
  0xc7   : > { %11666 = dma.hbm_to_vmem [thread:$0]  (!%p12594_p8), %s655_s11, 32, %s657_s3, [#allocation10]  }
  0xc8   : > { %s665_s18 = sshll.u32 %s16023_s20, 4  ;;  %s12208_s4 = sshra.s32 %s889_s7, 4  ;;  %s12209_s4 = int_to_ptr.hbm [resolvable:$true] %s12208_s4  ;;  %s666_s18 = int_to_ptr.hbm [resolvable:$true] %s665_s18 }
  0xc9   : > { %s12210_s6 = scalar_lea.hbm %s12209_s4, 35  ;;  %s12215_s8 = scalar_lea.hbm %s16020_s17, 70 }
  0xca   : > { %p12211_p2 = scmp.ne.s32.totalorder %s12209_s4, %s12210_s6  ;;  %p12216_p10 = scmp.lt.s32.totalorder %s12209_s4, %s16020_s17 }
  0xcb   : > { %p12217_p11 = scmp.lt.s32.totalorder %s12215_s8, %s12210_s6 }
  0xcc   : > { %p12213_p7 = pnand %p12211_p2, %p12633_p3 }
  0xcd   : > { %p12218_p12 = por %p12217_p11, %p12216_p10 }
  0xce   : > { %p12214_p9 = pneg %p12213_p7 }
  0xd0   : > { %p12219_p13 = pnand %p12218_p12, %p12214_p9 }
  0xd2   : > { %12222 = shalt.err (!%p12219_p13)
}
  0xd3   : > { %11700 = dma.hbm_to_vmem [thread:$0]  (!%p12621_p0), %s889_s7, 560, %s891_s1, %s12629_s25  }
  0xd4   : > { %s12426_s12 = smov [#allocation21]   ;;  %s12427_s3 = smov 64  }
  0xd5   : > { %s667_s21 = sshll.u32 %s12426_s12, 4  ;;  %s12428_s9 = smov 4   ;;  %s668_s21 = int_to_ptr.vmem [resolvable:$true] %s667_s21 }
  0xd6   : > { %11669 = dma.hbm_to_vmem [thread:$0]  (!%p12594_p8), %s666_s18, 1152, %s668_s21, [#allocation7], %s12427_s3, %s12427_s3, %s12428_s9  }
  0xd7   : > { %s16152_s22 = sld [smem:[#allocation156_spill]]  ;;  %s12429_s24 = smov [#allocation22]  }
  0xd8   : > { %s682_s19 = sshll.u32 %s12429_s24, 4  ;;  %s16153_s4 = sld [smem:[#allocation155_spill]]  ;;  %s683_s19 = int_to_ptr.vmem [resolvable:$true] %s682_s19 }
  0xd9   : > { %s909_s30 = scalar_lea.vmem [#allocation20], %s12650_s27 }
  0xda   : > { %s917_s26 = sshll.u32 %s909_s30, 4  ;;  %s918_s26 = int_to_ptr.vmem [resolvable:$true] %s917_s26 }
  0xdd   : > { %s680_s5 = sshll.u32 %s16152_s22, 4  ;;  %s681_s5 = int_to_ptr.hbm [resolvable:$true] %s680_s5 }
  0xde   : > { %11672 = dma.hbm_to_vmem [thread:$0]  (!%p12594_p8), %s681_s5, 16, %s683_s19, [#allocation10]  }
  0xdf   : > { %s913_s6 = scalar_lea.hbm %s16153_s4, %s12654_s29  ;;  %s12305_s2 = scalar_lea.hbm %s16153_s4, 4 }
  0xe0   : > { %s915_s8 = sshll.u32 %s913_s6, 4  ;;  %s916_s8 = int_to_ptr.hbm [resolvable:$true] %s915_s8 }
  0xe1   : > { %s12298_s18 = sshra.s32 %s916_s8, 4  ;;  %s12299_s18 = int_to_ptr.hbm [resolvable:$true] %s12298_s18 }
  0xe2   : > { %s12300_s23 = scalar_lea.hbm %s12299_s18, 2  ;;  %p12306_p8 = scmp.lt.s32.totalorder %s12299_s18, %s16153_s4 }
  0xe3   : > { %p12301_p2 = scmp.ne.s32.totalorder %s12299_s18, %s12300_s23  ;;  %p12307_p10 = scmp.lt.s32.totalorder %s12305_s2, %s12300_s23 }
  0xe5   : > { %p12303_p7 = pnand %p12301_p2, %p12633_p3  ;;  %p12308_p11 = por %p12307_p10, %p12306_p8 }
  0xe7   : > { %p12304_p9 = pneg %p12303_p7 }
  0xe9   : > { %p12309_p12 = pnand %p12308_p11, %p12304_p9 }
  0xeb   : > { %12312 = shalt.err (!%p12309_p12)
}
  0xec   : > { %11703 = dma.hbm_to_vmem [thread:$0]  (!%p12621_p0), %s916_s8, 32, %s918_s26, %s12629_s25  }
  0xed   : > { %926 = sbr.rel (%p12586_p6) target bundleno = 7125 (0x1bd5), region = 108 }
  0xf2   : > { %s16155_s28 = sld [smem:[#allocation33_spill]] }
  0xf3   : > { %12373 = dma.done.wait (%p183_p1), [#allocation4], 256  }
  0xf4   : > { %12375 = vsyncadd (%p183_p1), [#allocation4], 4294967040 }
  0xf5   : > { %12377 = dma.done.wait (%p183_p1), [#allocation7], 1408  }
  0xf6   : > { %12379 = vsyncadd (%p183_p1), [#allocation7], 4294965888 }
  0xf7   : > { %12381 = dma.done.wait (%p183_p1), [#allocation10], 32  }
  0xf8   : > { %12383 = vsyncadd (%p183_p1), [#allocation10], 4294967264  ;;  %s16156_s14 = sld [smem:[#allocation31_spill]]  ;;  %s948_s29 = sand.u32 1, %s16155_s28  }
  0xf9   : > { %s949_s0 = scalar_lea.sflag [#allocation4], %s948_s29 }
  0xfe   : > { %s950_s9 = sand.u32 1, %s16156_s14  }
  0xff   : > { %s11599_s10 = smul.u32 432, %s950_s9 }
 0x101   : > { %s12855_s22 = scalar_lea.vmem [#allocation11], %s11599_s10 }
 0x102   : > { %12385 = dma.done.wait (%p12579_p5), %s949_s0, 50384  }
 0x103   : > { %12387 = vsyncadd (%p12579_p5), %s949_s0, 4294916912  ;;  %s11600_s5 = smul.u32 6, %s950_s9  ;;  %s12861_s24 = sshll.u32 %s950_s9, 1 }
 0x104   : > { %s11601_s19 = smul.u32 144, %s950_s9  ;;  %s8873_s1 = sshll.u32 %s950_s9, 2 }
 0x105   : > { %s11602_s7 = smul.u32 2520, %s950_s9  ;;  %s12863_s30 = scalar_lea.vmem [#allocation12], %s11600_s5 }
 0x106   : > { %s11603_s6 = smul.u32 35, %s950_s9  ;;  %s12866_s8 = scalar_lea.vmem [#allocation14], %s11601_s19 }
 0x107   : > { %s12869_s23 = scalar_lea.vmem [#allocation16], %s8873_s1  ;;  %s12872_s12 = scalar_lea.vmem [#allocation18], %s11602_s7 }
 0x108   : > { %s12874_s2 = scalar_lea.vmem [#allocation19], %s11603_s6 }
 0x109   : > { %12389 = dma.done.wait (%p183_p1), [#allocation7], 1152  }
 0x10a   : > { %12391 = vsyncadd (%p183_p1), [#allocation7], 4294966144 }
 0x10b   : > { %12393 = dma.done.wait (%p183_p1), [#allocation10], 16  }
 0x10c   : > { %12395 = vsyncadd (%p183_p1), [#allocation10], 4294967280  ;;  %p1174_p5 = scmp.lt.s32.totalorder %s16155_s28, 1  ;;  %v1245_v0 = vlaneseq  ;;  %s16158_s9 = sld [smem:[#allocation147_spill]]  ;;  %v12430_v2 = vmov -1e+30  }
 0x10d   : > { %s16159_s19 = sld [smem:[#allocation153_spill]] }
 0x10e   : > { %s1175_s3 = scalar_select %p1174_p5, %s16155_s28, 1  ;;  %v1246_v1 = vand.u32 127, %v1245_v0 }
 0x10f   : > { %s16160_s21 = sld [smem:[#allocation151_spill]] }
 0x110   : > { %s11067_s27 = sshll.u32 %s1175_s3, 8  ;;  %s11604_s14 = smul.u32 144, %s1175_s3  ;;  %vm1250_vm0 = vcmp.lt.s32.totalorder %v1246_v1, 6 }
 0x111   : > { %v12897_v3 = vsel %vm1250_vm0, 0.0, %v12430_v2  ;;  %s11605_s18 = smul.u32 288, %s1175_s3  ;;  %s16161_s13 = sld [smem:[#allocation141_spill]] }
 0x112   : > { %s12890_s10 = scalar_lea.vmem %s16158_s9, %s11067_s27  ;;  %s16163_s7 = sld [smem:[#allocation142_spill]] }
 0x113   : > { %s12895_s1 = scalar_lea.vmem %s16159_s19, %s11067_s27 }
 0x115   : > { %s12902_s11 = scalar_lea.vmem %s16160_s21, %s11604_s14  ;;  %s16162_s21 = sld [smem:[#allocation154_spill]] }
 0x117   : > { %v12907_v4 = vld [vmem:[%s16161_s13] sm:$0xff]  ;;  %v12912_v5 = vld [vmem:[%s16161_s13 + $0x8] sm:$0xff]  ;;  %v12917_v6 = vld [vmem:[%s16161_s13 + $0x10] sm:$0xff] }
 0x118   : > { %v12927_v7 = vld [vmem:[%s16161_s13 + $0x18] sm:$0xff]  ;;  %v12932_v8 = vld [vmem:[%s16161_s13 + $0x20] sm:$0xff]  ;;  %v12937_v9 = vld [vmem:[%s16161_s13 + $0x28] sm:$0xff] }
 0x119   : > { %v12942_v10 = vld [vmem:[%s16161_s13 + $0x30] sm:$0xff]  ;;  %v12947_v11 = vld [vmem:[%s16161_s13 + $0x38] sm:$0xff]  ;;  %v12952_v12 = vld [vmem:[%s16161_s13 + $0x40] sm:$0xff] }
 0x11a   : > { %v12957_v13 = vld [vmem:[%s16161_s13 + $0x48] sm:$0xff]  ;;  %v12962_v14 = vld [vmem:[%s16161_s13 + $0x50] sm:$0xff]  ;;  %v12967_v15 = vld [vmem:[%s16161_s13 + $0x58] sm:$0xff] }
 0x11b   : > { %s12922_s14 = scalar_lea.vmem %s16162_s21, %s11605_s18  ;;  %v12972_v16 = vld [vmem:[%s16161_s13 + $0x60] sm:$0xff]  ;;  %v12977_v17 = vld [vmem:[%s16161_s13 + $0x68] sm:$0xff]  ;;  %v12982_v18 = vld [vmem:[%s16161_s13 + $0x70] sm:$0xff] }
 0x11c   : > { %v12987_v19 = vld [vmem:[%s16161_s13 + $0x78] sm:$0xff]  ;;  %v12992_v20 = vld [vmem:[%s16161_s13 + $0x80] sm:$0xff]  ;;  %v12997_v21 = vld [vmem:[%s16161_s13 + $0x88] sm:$0xff] }
 0x11d   : > { %v13002_v22 = vld [vmem:[%s16163_s7] sm:$0xff]  ;;  %v13007_v23 = vld [vmem:[%s16163_s7 + $0x8] sm:$0xff]  ;;  %v13012_v24 = vld [vmem:[%s16163_s7 + $0x10] sm:$0xff] }
 0x11e   : > { %16164 = vst [vmem:[#allocation38_spill] sm:$0xff] %v13002_v22  ;;  %v13017_v25 = vld [vmem:[%s16163_s7 + $0x18] sm:$0xff]  ;;  %v13022_v26 = vld [vmem:[%s16163_s7 + $0x20] sm:$0xff]  ;;  %v13027_v27 = vld [vmem:[%s16163_s7 + $0x28] sm:$0xff] }
 0x11f   : > { %16165 = vst [vmem:[#allocation39_spill] sm:$0xff] %v13007_v23  ;;  %v13032_v28 = vld [vmem:[%s16163_s7 + $0x30] sm:$0xff]  ;;  %v13037_v29 = vld [vmem:[%s16163_s7 + $0x38] sm:$0xff]  ;;  %v13042_v30 = vld [vmem:[%s16163_s7 + $0x40] sm:$0xff] }
 0x120   : > { %16166 = vst [vmem:[#allocation40_spill] sm:$0xff] %v13012_v24  ;;  %v13047_v31 = vld [vmem:[%s16163_s7 + $0x48] sm:$0xff]  ;;  %v13052_v32 = vld [vmem:[%s16163_s7 + $0x50] sm:$0xff]  ;;  %v13057_v33 = vld [vmem:[%s16163_s7 + $0x58] sm:$0xff] }
 0x121   : > { %16167 = vst [vmem:[#allocation41_spill] sm:$0xff] %v13017_v25  ;;  %v13062_v34 = vld [vmem:[%s16163_s7 + $0x60] sm:$0xff]  ;;  %v13067_v35 = vld [vmem:[%s16163_s7 + $0x68] sm:$0xff]  ;;  %v13072_v36 = vld [vmem:[%s16163_s7 + $0x70] sm:$0xff] }
 0x122   : > { %16168 = vst [vmem:[#allocation42_spill] sm:$0xff] %v13022_v26  ;;  %v13077_v37 = vld [vmem:[%s16163_s7 + $0x78] sm:$0xff]  ;;  %v13082_v38 = vld [vmem:[%s16163_s7 + $0x80] sm:$0xff]  ;;  %v13087_v39 = vld [vmem:[%s16163_s7 + $0x88] sm:$0xff] }
 0x123   : > { %16169 = vst [vmem:[#allocation43_spill] sm:$0xff] %v13027_v27  ;;  %v13092_v40 = vld [vmem:[%s16163_s7 + $0x90] sm:$0xff]  ;;  %v13097_v41 = vld [vmem:[%s16163_s7 + $0x98] sm:$0xff]  ;;  %v13102_v42 = vld [vmem:[%s16163_s7 + $0xa0] sm:$0xff] }
 0x124   : > { %16170 = vst [vmem:[#allocation44_spill] sm:$0xff] %v13032_v28  ;;  %v13107_v43 = vld [vmem:[%s16163_s7 + $0xa8] sm:$0xff]  ;;  %v13112_v44 = vld [vmem:[%s16163_s7 + $0xb0] sm:$0xff]  ;;  %v13117_v45 = vld [vmem:[%s16163_s7 + $0xb8] sm:$0xff] }
 0x125   : > { %16171 = vst [vmem:[#allocation45_spill] sm:$0xff] %v13037_v29  ;;  %v13122_v46 = vld [vmem:[%s16163_s7 + $0xc0] sm:$0xff]  ;;  %v13127_v47 = vld [vmem:[%s16163_s7 + $0xc8] sm:$0xff]  ;;  %v13132_v48 = vld [vmem:[%s16163_s7 + $0xd0] sm:$0xff] }
 0x126   : > { %16172 = vst [vmem:[#allocation46_spill] sm:$0xff] %v13042_v30  ;;  %v13137_v49 = vld [vmem:[%s16163_s7 + $0xd8] sm:$0xff]  ;;  %v13142_v50 = vld [vmem:[%s16163_s7 + $0xe0] sm:$0xff]  ;;  %v13147_v51 = vld [vmem:[%s16163_s7 + $0xe8] sm:$0xff] }
 0x127   : > { %16173 = vst [vmem:[#allocation47_spill] sm:$0xff] %v13047_v31  ;;  %v13152_v52 = vld [vmem:[%s16163_s7 + $0xf0] sm:$0xff]  ;;  %v13157_v53 = vld [vmem:[%s16163_s7 + $0xf8] sm:$0xff] }
 0x128   : > { %16174 = vst [vmem:[#allocation48_spill] sm:$0xff] %v13052_v32 }
 0x129   : > { %16175 = vst [vmem:[#allocation49_spill] sm:$0xff] %v13082_v38 }
 0x12a   : > { %16176 = vst [vmem:[#allocation50_spill] sm:$0xff] %v13087_v39 }
 0x12b   : > { %16177 = vst [vmem:[#allocation51_spill] sm:$0xff] %v13092_v40 }
 0x12c   : > { %16178 = vst [vmem:[#allocation52_spill] sm:$0xff] %v13097_v41 }
 0x12d   : > { %16179 = vst [vmem:[#allocation53_spill] sm:$0xff] %v13102_v42 }
 0x12e   : > { %16180 = vst [vmem:[#allocation54_spill] sm:$0xff] %v13107_v43 }
 0x12f   : > { %16181 = vst [vmem:[#allocation55_spill] sm:$0xff] %v13112_v44 }
 0x130   : > { %16182 = vst [vmem:[#allocation56_spill] sm:$0xff] %v13117_v45 }
 0x131   : > { %16183 = vst [vmem:[#allocation57_spill] sm:$0xff] %v13122_v46  ;;  %1255 = sbr.rel (%p8846_p4) target bundleno = 473 (0x1d9), region = 176 }
 0x132   : > { %16184 = vst [vmem:[#allocation58_spill] sm:$0xff] %v13127_v47 }
 0x133   : > { %16185 = vst [vmem:[#allocation59_spill] sm:$0xff] %v13132_v48 }
 0x134   : > { %16186 = vst [vmem:[#allocation60_spill] sm:$0xff] %v13137_v49 }
 0x135   : > { %16187 = vst [vmem:[#allocation61_spill] sm:$0xff] %v13142_v50 }
 0x136   : > { %v1266_v54 = vld [vmem:[#allocation8 + $0x40] sm:$0x33]  ;;  %vm1323_vm1 = vcmask 1041408   ;;  %v8911_v57 = vld [vmem:[#allocation8 + $0x30] sm:$0xf]  ;;  %vm1319_vm2 = vcmask 556032  }
 0x137   : > { %v1299_v55 = vunpack.c.l.b16 %v1266_v54  ;;  %v1300_v56 = vunpack.c.h.b16 %v1266_v54  ;;  %v11076_v60 = vld [vmem:[#allocation8 + $0x34] sm:$0xf0]  ;;  %v11075_v61 = vld [vmem:[#allocation8 + $0x34] sm:$0xf]  ;;  %v8913_v62 = vld [vmem:[#allocation8 + $0x38] sm:$0xf0] }
 0x138   : > { %v8912_v1 = vor.u32 %v11076_v60, %v8911_v57  ;;  %v8916_v2 = vor.u32 %v11075_v61, %v8913_v62  ;;  %v8903_v38 = vld [vmem:[#allocation8 + $0x20] sm:$0xf]  ;;  %v11074_v39 = vld [vmem:[#allocation8 + $0x24] sm:$0xf0]  ;;  %v11073_v22 = vld [vmem:[#allocation8 + $0x24] sm:$0xf] }
 0x139   : > { %v1309_v58 = vpack.c.b16 %v1299_v55, %v1299_v55  ;;  %v1310_v59 = vpack.c.b16 %v1300_v56, %v1300_v56  ;;  %v8905_v40 = vld [vmem:[#allocation8 + $0x28] sm:$0xf0]  ;;  %v8904_v54 = vor.u32 %v11074_v39, %v8903_v38  ;;  %v8895_v41 = vld [vmem:[#allocation8 + $0x10] sm:$0xf]  ;;  %v11072_v55 = vld [vmem:[#allocation8 + $0x14] sm:$0xf0] }
 0x13a   : > { %v8908_v23 = vor.u32 %v11073_v22, %v8905_v40  ;;  %v11071_v56 = vld [vmem:[#allocation8 + $0x14] sm:$0xf]  ;;  %v8897_v24 = vld [vmem:[#allocation8 + $0x18] sm:$0xf0]  ;;  %v11069_v57 = vld [vmem:[#allocation8 + $0x4] sm:$0xf] }
 0x13b   : > { %v1325_v63 = vsel %vm1323_vm1, %v1309_v58, 0  ;;  %v1328_v0 = vsel %vm1323_vm1, %v1310_v59, 0  ;;  %v8896_v58 = vor.u32 %v11072_v55, %v8895_v41  ;;  %v8900_v59 = vor.u32 %v11071_v56, %v8897_v24  ;;  %v8889_v60 = vld [vmem:[#allocation8 + $0x8] sm:$0xf0]  ;;  %v1268_v22 = vld [vmem:[#allocation9] sm:$0x3] }
 0x13c   : > { %1333 = vmatpush.bf16.msra.mxu0 %v1325_v63  ;;  %1347 = vmatpush.bf16.msra.mxu1 %v1328_v0  ;;  %v8887_v63 = vld [vmem:[#allocation8] sm:$0xf]  ;;  %v11070_v0 = vld [vmem:[#allocation8 + $0x4] sm:$0xf0]  ;;  %v8892_v62 = vor.u32 %v11069_v57, %v8889_v60  ;;  %v1271_v39 = vperm.slane %v1268_v22, 1  ;;  %vm1359_vm3 = vcmask 130048  }
 0x13d   : > { %v8888_v61 = vor.u32 %v11070_v0, %v8887_v63 }
 0x140   : > { %1334 = vmatpush.bf16.msra.mxu0 %v8912_v1  ;;  %1348 = vmatpush.bf16.msra.mxu1 %v8916_v2  ;;  %v1256_v1 = vld [vmem:[#allocation3] sm:$0xff]  ;;  %v1257_v2 = vld [vmem:[#allocation3 + $0x8] sm:$0xff] }
 0x141   : > { %v1267_v38 = vpack.c.bf16 %v1257_v2, %v1256_v1 }
 0x144   : > { %1335 = vmatpush.bf16.msra.mxu0 %v8904_v54  ;;  %1349 = vmatpush.bf16.msra.mxu1 %v8908_v23  ;;  %v1270_v23 = vperm.slane %v1268_v22, 0 }
 0x148   : > { %1336 = vmatpush.bf16.msra.mxu0 %v8896_v58  ;;  %1350 = vmatpush.bf16.msra.mxu1 %v8900_v59 }
 0x14c   : > { %1337 = vmatpush.bf16.msra.mxu0 %v8888_v61  ;;  %1351 = vmatpush.bf16.msra.mxu1 %v8892_v62 }
 0x14f   : > { %8917 = vmatmul.msk.bf16.vlgmr.msra.gmra.mxu0 %vm1319_vm2, %v1267_v38  ;;  %8918 = vmatmul.msk.bf16.vlgmr.msra.gmra.mxu1 %vm1319_vm2, %v1267_v38 }
 0x1cc   : > { %v1339_v24 = vpop.f32.mrf.mxu0  ;;  %v1353_v40 = vpop.f32.mrf.mxu1 }
 0x1cd   : > { %v1340_v41 = vadd.f32 %v1339_v24, %v1270_v23  ;;  %v1354_v54 = vadd.f32 %v1353_v40, %v1271_v39 }
 0x1cf   : > { %1358 = vst [vmem:[#allocation2] sm:$0xff] %v1340_v41 }
 0x1d0   : > { %1360 = vst.msk [vmem:[#allocation2 + $0x8] sm:$0xff] %vm1359_vm3, %v1354_v54 }
 0x1d4   : > { %v1341_v55 = vpop.f32.mrf.mxu0  ;;  %v1355_v56 = vpop.f32.mrf.mxu1 }
 0x1d5   : > { %v1342_v58 = vadd.f32 %v1341_v55, %v1270_v23  ;;  %v1356_v59 = vadd.f32 %v1355_v56, %v1271_v39 }
 0x1d7   : > { %1361 = vst [vmem:[#allocation2 + $0x10] sm:$0xff] %v1342_v58 }
 0x1d8   : > { %1362 = vst.msk [vmem:[#allocation2 + $0x18] sm:$0xff] %vm1359_vm3, %v1356_v59 }
 0x1d9 PF: > { %1380 = vmatpush.msra.mxu0 %v12987_v19  ;;  %1417 = vmatpush.msra.mxu2 %v12997_v21  ;;  %v13163_v63 = vld [vmem:[#allocation2 + $0x8] sm:$0xff]  ;;  %vm1373_vm4 = vcmask 130048   ;;  %v13186_v61 = vld [vmem:[#allocation2] sm:$0xff]  ;;  %v12431_v38 = vmov 8   ;;  %vm1428_vm5 = vcmask 64512   ;;  %s16190_s28 = scalar_lea.vmem [#allocation13], %s12861_s24 }
 0x1da   : > { %v1370_v0 = vmul.f32 %v13163_v63, %v13163_v63  ;;  %v1369_v62 = vmul.f32 %v13186_v61, %v13186_v61  ;;  %11771 = vset.pattern.permute.xlu0 %v12431_v38  ;;  %11772 = vset.pattern.permute.xlu2 %v12431_v38  ;;  %v9091_v23 = vld [vmem:[%s12855_s22 + $0x150] sm:$0xf]  ;;  %v11122_v39 = vld [vmem:[%s12855_s22 + $0x164] sm:$0xf0]  ;;  %v9067_v24 = vld [vmem:[%s12855_s22 + $0x120] sm:$0xf] }
 0x1db   : > { %1381 = vmatpush.msra.mxu0 %v12982_v18  ;;  %1418 = vmatpush.msra.mxu2 %v12992_v20  ;;  %v9092_v41 = vor.u32 %v11122_v39, %v9091_v23  ;;  %v11116_v54 = vld [vmem:[%s12855_s22 + $0x134] sm:$0xf0]  ;;  %v9043_v58 = vld [vmem:[%s12855_s22 + $0xf0] sm:$0xf]  ;;  %s12435_s19 = smov 8  }
 0x1dc   : > { %8919 = vmatmul.msk.f32.vlgmr.msra.gmra.mxu2 %vm1373_vm4, %v1370_v0  ;;  %11773 = vset.pattern.permute.xlu1 %v12431_v38  ;;  %v9068_v56 = vor.u32 %v11116_v54, %v9067_v24 }
 0x1dd   : > { %1382 = vmatpush.msra.mxu0 %v12977_v17  ;;  %1853 = vmatpush.bf16.msrb.mxu2 %v9092_v41 }
 0x1de   : > { %v13193_v1 = vld [vmem:[#allocation2 + $0x10] sm:$0xff] }
 0x1df   : > { %v13171_v57 = vld [vmem:[#allocation2 + $0x18] sm:$0xff]  ;;  %1383 = vmatpush.msra.mxu0 %v12972_v16  ;;  %v1371_v2 = vmul.f32 %v13193_v1, %v13193_v1 }
 0x1e0   : > { %v1372_v60 = vmul.f32 %v13171_v57, %v13171_v57 }
 0x1e1   : > { %1384 = vmatpush.msra.mxu0 %v12967_v15  ;;  %1854 = vmatpush.bf16.msrb.mxu2 %v9068_v56 }
 0x1e3   : > { %1385 = vmatpush.msra.mxu0 %v12962_v14 }
 0x1e4   : > { %8920 = vmatmul.msk.f32.gmra.mxu2 %vm1373_vm4, %v1372_v60  ;;  %v11110_v60 = vld [vmem:[%s12855_s22 + $0x104] sm:$0xf0] }
 0x1e5   : > { %1386 = vmatpush.msra.mxu0 %v12957_v13  ;;  %v9044_v38 = vor.u32 %v11110_v60, %v9043_v58 }
 0x1e7   : > { %1387 = vmatpush.msra.mxu0 %v12952_v12  ;;  %1855 = vmatpush.bf16.msrb.mxu2 %v9044_v38 }
 0x1e9   : > { %1388 = vmatpush.msra.mxu0 %v12947_v11 }
 0x1eb   : > { %1389 = vmatpush.msra.mxu0 %v12942_v10 }
 0x1ed   : > { %1390 = vmatpush.msra.mxu0 %v12937_v9 }
 0x1ef   : > { %1391 = vmatpush.msra.mxu0 %v12932_v8 }
 0x1f1   : > { %1392 = vmatpush.msra.mxu0 %v12927_v7 }
 0x1f3   : > { %1393 = vmatpush.msra.mxu0 %v12917_v6 }
 0x1f5   : > { %1394 = vmatpush.msra.mxu0 %v12912_v5 }
 0x1f7   : > { %1395 = vmatpush.msra.mxu0 %v12907_v4 }
 0x1f8   : > { %1396 = vmatmul.f32.vlgmr.msra.gmra.mxu0 %v1369_v62 }
 0x200   : > { %1399 = vmatmul.f32.gmra.mxu0 %v1371_v2 }
 0x25f   : > { %v1420_v22 = vpop.f32.mrf.mxu2 }
 0x267   : > { %v1423_v2 = vpop.f32.mrf.mxu2 }
 0x275   : > { %v1397_v40 = vpop.f32.mrf.mxu0 }
 0x276   : > { %v1421_v55 = vadd.f32 %v1420_v22, %v1397_v40 }
 0x278   : > { %v1466_v59 = vadd.f32 1e-06, %v1421_v55  ;;  %v1426_v0 = vand.u32 2147483647, %v1421_v55 }
 0x27a   : > { %11775 = vrsqrt.f32 %v1466_v59  ;;  %v1429_v62 = vsel %vm1428_vm5, %v1426_v0, 0.0  ;;  %vm1474_vm7 = vweird.f32 %v1466_v59 }
 0x27b   : > { %1430 = vadd.xlane.f32.xlu1 %v1429_v62 }
 0x27d   : > { %v1400_v42 = vpop.f32.mrf.mxu0 }
 0x27e   : > { %v1424_v25 = vadd.f32 %v1423_v2, %v1400_v42 }
 0x280   : > { %v11776_v23 = vpop.eup %11775  ;;  %v1467_v39 = vadd.f32 1e-06, %v1424_v25  ;;  %v1427_v22 = vand.u32 2147483647, %v1424_v25 }
 0x281   : > { %v1469_v40 = vmul.f32 %v11776_v23, %v1466_v59  ;;  %vm1475_vm6 = vweird.f32 %v11776_v23  ;;  %v11104_v59 = vld [vmem:[%s12855_s22 + $0xd4] sm:$0xf0] }
 0x282   : > { %11777 = vrsqrt.f32 %v1467_v39  ;;  %v1432_v24 = vsel %vm1428_vm5, %v1427_v22, 0.0  ;;  %vm1476_vm8 = vmor %vm1474_vm7, %vm1475_vm6  ;;  %vm1484_vm10 = vweird.f32 %v1467_v39  ;;  %v9019_v22 = vld [vmem:[%s12855_s22 + $0xc0] sm:$0xf] }
 0x283   : > { %1433 = vadd.xlane.f32.xlu1 %v1432_v24  ;;  %v1470_v41 = vmul.f32 %v11776_v23, %v1469_v40  ;;  %v9020_v40 = vor.u32 %v11104_v59, %v9019_v22  ;;  %v11119_v24 = vld [vmem:[%s12855_s22 + $0x154] sm:$0xf]  ;;  %v9123_v59 = vld [vmem:[%s12855_s22 + $0x188] sm:$0xf] }
 0x285   : > { %v1471_v54 = vmul.f32 0.5, %v1470_v41  ;;  %1856 = vmatpush.bf16.msrb.mxu2 %v9020_v40  ;;  %v11129_v40 = vld [vmem:[%s12855_s22 + $0x19c] sm:$0xf0] }
 0x287   : > { %v1472_v55 = vsub.f32 1.5, %v1471_v54  ;;  %v8995_v54 = vld [vmem:[%s12855_s22 + $0x90] sm:$0xf] }
 0x288   : > { %v11778_v0 = vpop.eup %11777 }
 0x289   : > { %v1479_v62 = vmul.f32 %v11778_v0, %v1467_v39  ;;  %v1473_v56 = vmul.f32 %v11776_v23, %v1472_v55  ;;  %vm1485_vm9 = vweird.f32 %v11778_v0  ;;  %v11098_v39 = vld [vmem:[%s12855_s22 + $0xa4] sm:$0xf0]  ;;  %v12432_v55 = vmov 8.0  }
 0x28a   : > { %vm1486_vm11 = vmor %vm1484_vm10, %vm1485_vm9  ;;  %11779 = vrcp.f32 %v12432_v55  ;;  %v8947_v55 = vld [vmem:[%s12855_s22 + $0x30] sm:$0xf] }
 0x28b   : > { %v1477_v42 = vsel %vm1476_vm8, %v11776_v23, %v1473_v56  ;;  %v1480_v25 = vmul.f32 %v11778_v0, %v1479_v62  ;;  %v9093_v23 = vld [vmem:[%s12855_s22 + $0x168] sm:$0xf0]  ;;  %v11113_v62 = vld [vmem:[%s12855_s22 + $0x124] sm:$0xf]  ;;  %v9069_v56 = vld [vmem:[%s12855_s22 + $0x138] sm:$0xf0] }
 0x28c   : > { %1494 = vperm.xlu0 %11771, %v1477_v42   ;;  %v9096_v41 = vor.u32 %v11119_v24, %v9093_v23  ;;  %v9072_v42 = vor.u32 %v11113_v62, %v9069_v56  ;;  %v9124_v23 = vor.u32 %v11129_v40, %v9123_v59  ;;  %v11101_v56 = vld [vmem:[%s12855_s22 + $0xc4] sm:$0xf]  ;;  %v11080_v59 = vld [vmem:[%s12855_s22 + $0x14] sm:$0xf0] }
 0x28d   : > { %v1481_v58 = vmul.f32 0.5, %v1480_v25  ;;  %v8971_v25 = vld [vmem:[%s12855_s22 + $0x60] sm:$0xf] }
 0x28e   : > { %1881 = vmatpush.bf16.msra.mxu1 %v9096_v41  ;;  %v9107_v41 = vld [vmem:[%s12855_s22 + $0x160] sm:$0xf]  ;;  %1930 = vmatpush.bf16.msrb.mxu0 %v9124_v23  ;;  %v11095_v23 = vld [vmem:[%s12855_s22 + $0x94] sm:$0xf] }
 0x28f   : > { %v1482_v60 = vsub.f32 1.5, %v1481_v58  ;;  %v11092_v58 = vld [vmem:[%s12855_s22 + $0x74] sm:$0xf0] }
 0x290   : > { %v13219_v24 = vpop.eup %11779 }
 0x291   : > { %v1483_v2 = vmul.f32 %v11778_v0, %v1482_v60  ;;  %v8972_v60 = vor.u32 %v11092_v58, %v8971_v25  ;;  %v1436_v25 = vmul.f32 8.0, %v13219_v24  ;;  %vm1440_vm12 = vweird.f32 %v13219_v24 }
 0x292   : > { %1882 = vmatpush.bf16.msra.mxu1 %v9072_v42  ;;  %v9021_v42 = vld [vmem:[%s12855_s22 + $0xd8] sm:$0xf0] }
 0x293   : > { %v1487_v38 = vsel %vm1486_vm11, %v11778_v0, %v1483_v2  ;;  %v8996_v0 = vor.u32 %v11098_v39, %v8995_v54  ;;  %v11107_v2 = vld [vmem:[%s12855_s22 + $0xf4] sm:$0xf]  ;;  %v11124_v54 = vld [vmem:[%s12855_s22 + $0x174] sm:$0xf0]  ;;  %v9024_v58 = vor.u32 %v11101_v56, %v9021_v42  ;;  %v9059_v56 = vld [vmem:[%s12855_s22 + $0x100] sm:$0xf] }
 0x294   : > { %1499 = vperm.xlu0 %11771, %v1487_v38   ;;  %v9045_v38 = vld [vmem:[%s12855_s22 + $0x108] sm:$0xf0]  ;;  %v9108_v39 = vor.u32 %v11124_v54, %v9107_v41  ;;  %v11120_v54 = vld [vmem:[%s12855_s22 + $0x15c] sm:$0xf]  ;;  %v11112_v42 = vld [vmem:[%s12855_s22 + $0x114] sm:$0xf0] }
 0x295   : > { %1857 = vmatpush.bf16.msrb.mxu2 %v8996_v0  ;;  %v9048_v22 = vor.u32 %v11107_v2, %v9045_v38  ;;  %v11086_v0 = vld [vmem:[%s12855_s22 + $0x44] sm:$0xf0]  ;;  %v8997_v41 = vld [vmem:[%s12855_s22 + $0xa8] sm:$0xf0] }
 0x296   : > { %v8948_v62 = vor.u32 %v11086_v0, %v8947_v55  ;;  %1965 = vmatpush.bf16.msra.mxu0 %v9108_v39  ;;  %v11118_v2 = vld [vmem:[%s12855_s22 + $0x144] sm:$0xf0]  ;;  %v1437_v55 = vsub.f32 1.0, %v1436_v25  ;;  %v9000_v39 = vor.u32 %v11095_v23, %v8997_v41  ;;  %v9101_v0 = vld [vmem:[%s12855_s22 + $0x170] sm:$0xf0] }
 0x297   : > { %1883 = vmatpush.bf16.msra.mxu1 %v9048_v22  ;;  %v8923_v22 = vld [vmem:[%s12855_s22] sm:$0xf]  ;;  %v11128_v23 = vld [vmem:[%s12855_s22 + $0x194] sm:$0xf0] }
 0x298   : > { %v8924_v40 = vor.u32 %v11080_v59, %v8923_v22  ;;  %v11114_v22 = vld [vmem:[%s12855_s22 + $0x12c] sm:$0xf]  ;;  %v1438_v25 = vmul.f32 %v13219_v24, %v1437_v55  ;;  %v9077_v59 = vld [vmem:[%s12855_s22 + $0x140] sm:$0xf0]  ;;  %v11083_v55 = vld [vmem:[%s12855_s22 + $0x34] sm:$0xf] }
 0x299   : > { %1858 = vmatpush.bf16.msrb.mxu2 %v8972_v60  ;;  %v9083_v60 = vld [vmem:[%s12855_s22 + $0x130] sm:$0xf]  ;;  %v9080_v41 = vor.u32 %v11114_v22, %v9077_v59  ;;  %v11108_v22 = vld [vmem:[%s12855_s22 + $0xfc] sm:$0xf]  ;;  %v9053_v59 = vld [vmem:[%s12855_s22 + $0x110] sm:$0xf0] }
 0x29a   : > { %v9084_v38 = vor.u32 %v11118_v2, %v9083_v60  ;;  %v11089_v60 = vld [vmem:[%s12855_s22 + $0x64] sm:$0xf]  ;;  %v8973_v2 = vld [vmem:[%s12855_s22 + $0x78] sm:$0xf0] }
 0x29b   : > { %1884 = vmatpush.bf16.msra.mxu1 %v9024_v58  ;;  %v9060_v58 = vor.u32 %v11112_v42, %v9059_v56  ;;  %v8949_v56 = vld [vmem:[%s12855_s22 + $0x48] sm:$0xf0]  ;;  %v11125_v42 = vld [vmem:[%s12855_s22 + $0x184] sm:$0xf] }
 0x29c   : > { %1966 = vmatpush.bf16.msra.mxu0 %v9084_v38  ;;  %v8976_v38 = vor.u32 %v11089_v60, %v8973_v2  ;;  %v8952_v60 = vor.u32 %v11083_v55, %v8949_v56  ;;  %v9117_v2 = vld [vmem:[%s12855_s22 + $0x198] sm:$0xf0]  ;;  %v9029_v56 = vld [vmem:[%s12855_s22 + $0xe0] sm:$0xf0] }
 0x29d   : > { %1859 = vmatpush.bf16.msrb.mxu2 %v8948_v62  ;;  %v9104_v62 = vor.u32 %v11120_v54, %v9101_v0  ;;  %v11106_v0 = vld [vmem:[%s12855_s22 + $0xe4] sm:$0xf0] }
 0x29f   : > { %1885 = vmatpush.bf16.msra.mxu1 %v9000_v39  ;;  %v9035_v39 = vld [vmem:[%s12855_s22 + $0xd0] sm:$0xf] }
 0x2a0   : > { %1967 = vmatpush.bf16.msra.mxu0 %v9060_v58  ;;  %v1439_v58 = vadd.f32 %v13219_v24, %v1438_v25 }
 0x2a1   : > { %1860 = vmatpush.bf16.msrb.mxu2 %v8924_v40  ;;  %v9115_v40 = vld [vmem:[%s12855_s22 + $0x180] sm:$0xf] }
 0x2a2   : > { %v9116_v54 = vor.u32 %v11128_v23, %v9115_v40  ;;  %v9056_v40 = vor.u32 %v11108_v22, %v9053_v59  ;;  %v9011_v23 = vld [vmem:[%s12855_s22 + $0xa0] sm:$0xf]  ;;  %v11094_v22 = vld [vmem:[%s12855_s22 + $0x84] sm:$0xf0] }
 0x2a3   : > { %1886 = vmatpush.bf16.msra.mxu1 %v8976_v38  ;;  %v9120_v38 = vor.u32 %v11125_v42, %v9117_v2  ;;  %v8987_v2 = vld [vmem:[%s12855_s22 + $0x70] sm:$0xf] }
 0x2a4   : > { %1874 = vmatpush.bf16.msra.mxu3 %v9116_v54  ;;  %v13258_v54 = vsel %vm1440_vm12, %v13219_v24, %v1439_v58  ;;  %v8988_v24 = vor.u32 %v11094_v22, %v8987_v2  ;;  %v11096_v58 = vld [vmem:[%s12855_s22 + $0x9c] sm:$0xf] }
 0x2a5   : > { %1937 = vmatpush.bf16.msra.mxu2 %v9104_v62  ;;  %v9036_v62 = vor.u32 %v11106_v0, %v9035_v39  ;;  %v11077_v39 = vld [vmem:[%s12855_s22 + $0x4] sm:$0xf]  ;;  %v8925_v0 = vld [vmem:[%s12855_s22 + $0x18] sm:$0xf0] }
 0x2a6   : > { %v8928_v55 = vor.u32 %v11077_v39, %v8925_v0  ;;  %v11090_v0 = vld [vmem:[%s12855_s22 + $0x6c] sm:$0xf] }
 0x2a7   : > { %1968 = vmatpush.bf16.msra.mxu0 %v9036_v62  ;;  %1887 = vmatpush.bf16.msra.mxu1 %v8952_v60  ;;  %v11102_v62 = vld [vmem:[%s12855_s22 + $0xcc] sm:$0xf] }
 0x2a8   : > { %1902 = vmatpush.bf16.msrb.mxu3 %v9120_v38  ;;  %v9032_v60 = vor.u32 %v11102_v62, %v9029_v56  ;;  %v9005_v38 = vld [vmem:[%s12855_s22 + $0xb0] sm:$0xf0]  ;;  %v8981_v62 = vld [vmem:[%s12855_s22 + $0x80] sm:$0xf0] }
 0x2a9   : > { %1938 = vmatpush.bf16.msra.mxu2 %v9080_v41  ;;  %v11100_v41 = vld [vmem:[%s12855_s22 + $0xb4] sm:$0xf0] }
 0x2aa   : > { %v9012_v25 = vor.u32 %v11100_v41, %v9011_v23  ;;  %v9008_v23 = vor.u32 %v11096_v58, %v9005_v38  ;;  %v8963_v41 = vld [vmem:[%s12855_s22 + $0x40] sm:$0xf] }
 0x2ab   : > { %1888 = vmatpush.bf16.msra.mxu1 %v8928_v55  ;;  %v8984_v55 = vor.u32 %v11090_v0, %v8981_v62  ;;  %v8933_v0 = vld [vmem:[%s12855_s22 + $0x20] sm:$0xf0]  ;;  %v11126_v62 = vld [vmem:[%s12855_s22 + $0x18c] sm:$0xf] }
 0x2ac   : > { %1969 = vmatpush.bf16.msra.mxu0 %v9012_v25  ;;  %v11088_v25 = vld [vmem:[%s12855_s22 + $0x54] sm:$0xf0] }
 0x2ad   : > { %1939 = vmatpush.bf16.msra.mxu2 %v9056_v40  ;;  %v8964_v39 = vor.u32 %v11088_v25, %v8963_v41 }
 0x2b0   : > { %1970 = vmatpush.bf16.msra.mxu0 %v8988_v24  ;;  %v8957_v24 = vld [vmem:[%s12855_s22 + $0x50] sm:$0xf0] }
 0x2b1   : > { %1940 = vmatpush.bf16.msra.mxu2 %v9032_v60  ;;  %v11082_v60 = vld [vmem:[%s12855_s22 + $0x24] sm:$0xf0] }
 0x2b4   : > { %1971 = vmatpush.bf16.msra.mxu0 %v8964_v39  ;;  %v11078_v39 = vld [vmem:[%s12855_s22 + $0xc] sm:$0xf] }
 0x2b5   : > { %1941 = vmatpush.bf16.msra.mxu2 %v9008_v23  ;;  %v8936_v43 = vor.u32 %v11078_v39, %v8933_v0 }
 0x2b9   : > { %1942 = vmatpush.bf16.msra.mxu2 %v8984_v55 }
 0x2ee   : > { %v1431_v42 = vpop.xlane.xlu1 %1430 }
 0x2ef   : > { %v1442_v59 = vmul.f32 %v13258_v54, %v1431_v42  ;;  %v8939_v42 = vld [vmem:[%s12855_s22 + $0x10] sm:$0xf] }
 0x2f0   : > { %v8940_v22 = vor.u32 %v11082_v60, %v8939_v42 }
 0x2f1   : > { %v1444_v40 = vadd.f32 1e-06, %v1442_v59  ;;  %v11084_v59 = vld [vmem:[%s12855_s22 + $0x3c] sm:$0xf] }
 0x2f2   : > { %1972 = vmatpush.bf16.msra.mxu0 %v8940_v22  ;;  %v8960_v23 = vor.u32 %v11084_v59, %v8957_v24  ;;  %v9099_v24 = vld [vmem:[%s12855_s22 + $0x158] sm:$0xf] }
 0x2f3   : > { %11781 = vrsqrt.f32 %v1444_v40  ;;  %vm1452_vm14 = vweird.f32 %v1444_v40 }
 0x2f4   : > { %1943 = vmatpush.bf16.msra.mxu2 %v8960_v23 }
 0x2f6   : > { %v1434_v56 = vpop.xlane.xlu1 %1433 }
 0x2f7   : > { %v1443_v2 = vmul.f32 %v13258_v54, %v1434_v56  ;;  %v9125_v56 = vld [vmem:[%s12855_s22 + $0x1a0] sm:$0xf0] }
 0x2f8   : > { %v9128_v55 = vor.u32 %v11126_v62, %v9125_v56  ;;  %1944 = vmatpush.bf16.msra.mxu2 %v8936_v43 }
 0x2f9   : > { %v11782_v58 = vpop.eup %11781  ;;  %v1445_v38 = vadd.f32 1e-06, %v1443_v2 }
 0x2fa   : > { %v1447_v41 = vmul.f32 %v11782_v58, %v1444_v40  ;;  %1958 = vmatpush.bf16.msrb.mxu1 %v9128_v55  ;;  %vm1453_vm13 = vweird.f32 %v11782_v58  ;;  %v11117_v55 = vld [vmem:[%s12855_s22 + $0x13c] sm:$0xf0]  ;;  %v9131_v40 = vld [vmem:[%s12855_s22 + $0x190] sm:$0xf] }
 0x2fb   : > { %11783 = vrsqrt.f32 %v1445_v38  ;;  %vm13286_vm0 = vmor %vm1452_vm14, %vm1453_vm13  ;;  %vm1462_vm1 = vweird.f32 %v1445_v38 }
 0x2fc   : > { %v1448_v25 = vmul.f32 %v11782_v58, %v1447_v41  ;;  %v11123_v41 = vld [vmem:[%s12855_s22 + $0x16c] sm:$0xf0] }
 0x2fd   : > { %v9100_v43 = vor.u32 %v11123_v41, %v9099_v24  ;;  %v9133_v24 = vld [vmem:[%s12855_s22 + $0x1a8] sm:$0xf0] }
 0x2fe   : > { %v1449_v42 = vmul.f32 0.5, %v1448_v25  ;;  %v1495_v60 = vpop.permute.xlu0 %1494 }
 0x2ff   : > { %v1507_v39 = vmul.f32 %v1495_v60, %v13163_v63  ;;  %v11130_v60 = vld [vmem:[%s12855_s22 + $0x1a4] sm:$0xf0] }
 0x300   : > { %v1450_v2 = vsub.f32 1.5, %v1449_v42  ;;  %v9075_v42 = vld [vmem:[%s12855_s22 + $0x128] sm:$0xf]  ;;  %v9132_v41 = vor.u32 %v11130_v60, %v9131_v40  ;;  %v11081_v60 = vld [vmem:[%s12855_s22 + $0x1c] sm:$0xf0] }
 0x301   : > { %v11784_v26 = vpop.eup %11783  ;;  %v8931_v40 = vld [vmem:[%s12855_s22 + $0x8] sm:$0xf] }
 0x302   : > { %v1457_v22 = vmul.f32 %v11784_v26, %v1445_v38  ;;  %v1451_v23 = vmul.f32 %v11782_v58, %v1450_v2  ;;  %vm1463_vm15 = vweird.f32 %v11784_v26  ;;  %v11127_v2 = vld [vmem:[%s12855_s22 + $0x194] sm:$0xf]  ;;  %v9051_v38 = vld [vmem:[%s12855_s22 + $0xf8] sm:$0xf] }
 0x303   : > { %vm1464_vm2 = vmor %vm1462_vm1, %vm1463_vm15 }
 0x304   : > { %v1458_v59 = vmul.f32 %v11784_v26, %v1457_v22 }
 0x306   : > { %v1459_v44 = vmul.f32 0.5, %v1458_v59  ;;  %v1500_v27 = vpop.permute.xlu0 %1499  ;;  %v11111_v59 = vld [vmem:[%s12855_s22 + $0x10c] sm:$0xf0] }
 0x307   : > { %v1509_v25 = vmul.f32 %v1500_v27, %v13171_v57  ;;  %v1455_v27 = vsel %vm13286_vm0, %v11782_v58, %v1451_v23  ;;  %v9076_v57 = vor.u32 %v11117_v55, %v9075_v42  ;;  %v9136_v23 = vor.u32 %v11127_v2, %v9133_v24  ;;  %v8979_v42 = vld [vmem:[%s12855_s22 + $0x68] sm:$0xf]  ;;  %v11093_v55 = vld [vmem:[%s12855_s22 + $0x7c] sm:$0xf0]  ;;  %v11121_v2 = vld [vmem:[%s12855_s22 + $0x164] sm:$0xf] }
 0x308   : > { %v1460_v0 = vsub.f32 1.5, %v1459_v44  ;;  %v1506_v58 = vmul.f32 %v1455_v27, %v13186_v61  ;;  %v9027_v61 = vld [vmem:[%s12855_s22 + $0xc8] sm:$0xf]  ;;  %v8980_v27 = vor.u32 %v11093_v55, %v8979_v42  ;;  %v9085_v24 = vld [vmem:[%s12855_s22 + $0x148] sm:$0xf0] }
 0x309   : > { %v13290_v56 = vpack.c.bf16 %v1509_v25, %v1507_v39  ;;  %v9052_v39 = vor.u32 %v11111_v59, %v9051_v38  ;;  %v11115_v59 = vld [vmem:[%s12855_s22 + $0x134] sm:$0xf] }
 0x30a   : > { %v1461_v44 = vmul.f32 %v11784_v26, %v1460_v0  ;;  %v9003_v0 = vld [vmem:[%s12855_s22 + $0x98] sm:$0xf]  ;;  %v11091_v55 = vld [vmem:[%s12855_s22 + $0x74] sm:$0xf] }
 0x30b   : > { %9137 = vmatmul.msk.bf16.vlgmr.msra.gmra.mxu3 %vm1373_vm4, %v13290_v56  ;;  %9139 = vmatmul.msk.bf16.vlgmr.msrb.gmra.mxu0 %vm1373_vm4, %v13290_v56 }
 0x30c   : > { %v1465_v63 = vsel %vm1464_vm2, %v11784_v26, %v1461_v44  ;;  %1909 = vmatpush.bf16.msra.mxu3 %v9100_v43  ;;  %v11099_v43 = vld [vmem:[%s12855_s22 + $0xac] sm:$0xf0]  ;;  %v8955_v44 = vld [vmem:[%s12855_s22 + $0x38] sm:$0xf] }
 0x30d   : > { %v1508_v22 = vmul.f32 %v1465_v63, %v13193_v1  ;;  %v11105_v1 = vld [vmem:[%s12855_s22 + $0xdc] sm:$0xf0]  ;;  %v9004_v62 = vor.u32 %v11099_v43, %v9003_v0  ;;  %v11087_v63 = vld [vmem:[%s12855_s22 + $0x4c] sm:$0xf0]  ;;  %v11097_v43 = vld [vmem:[%s12855_s22 + $0xa4] sm:$0xf] }
 0x30e   : > { %v9028_v25 = vor.u32 %v11105_v1, %v9027_v61  ;;  %v11103_v1 = vld [vmem:[%s12855_s22 + $0xd4] sm:$0xf] }
 0x30f   : > { %v13308_v26 = vpack.c.bf16 %v1508_v22, %v1506_v58  ;;  %v9109_v58 = vld [vmem:[%s12855_s22 + $0x178] sm:$0xf0]  ;;  %v8932_v22 = vor.u32 %v11081_v60, %v8931_v40  ;;  %v11079_v60 = vld [vmem:[%s12855_s22 + $0x14] sm:$0xf] }
 0x310   : > { %1910 = vmatpush.bf16.msra.mxu3 %v9076_v57  ;;  %v8956_v57 = vor.u32 %v11087_v63, %v8955_v44  ;;  %v9112_v38 = vor.u32 %v11121_v2, %v9109_v58  ;;  %v11085_v63 = vld [vmem:[%s12855_s22 + $0x44] sm:$0xf]  ;;  %v8941_v2 = vld [vmem:[%s12855_s22 + $0x28] sm:$0xf0] }
 0x311   : > { %1861 = vmatmul.bf16.vlgmr.msrb.gmra.mxu2 %v13308_v26  ;;  %1889 = vmatmul.bf16.vlgmr.msra.gmra.mxu1 %v13308_v26  ;;  %v8944_v58 = vor.u32 %v11079_v60, %v8941_v2 }
 0x312   : > { %1986 = vmatpush.bf16.msra.mxu1 %v9132_v41  ;;  %2014 = vmatpush.bf16.msrb.mxu2 %v9136_v23  ;;  %v9088_v41 = vor.u32 %v11115_v59, %v9085_v24  ;;  %v11109_v23 = vld [vmem:[%s12855_s22 + $0x104] sm:$0xf] }
 0x314   : > { %1911 = vmatpush.bf16.msra.mxu3 %v9052_v39  ;;  %v9061_v39 = vld [vmem:[%s12855_s22 + $0x118] sm:$0xf0] }
 0x315   : > { %v9064_v61 = vor.u32 %v11109_v23, %v9061_v39 }
 0x318   : > { %1912 = vmatpush.bf16.msra.mxu3 %v9028_v25  ;;  %v9037_v25 = vld [vmem:[%s12855_s22 + $0xe8] sm:$0xf0] }
 0x319   : > { %v9040_v0 = vor.u32 %v11103_v1, %v9037_v25 }
 0x31b   : > { %9138 = vmatmul.msk.bf16.vlgmr.msrb.gmra.mxu3 %vm1373_vm4, %v13290_v56  ;;  %1973 = vmatmul.bf16.vlgmr.msra.gmra.mxu0 %v13308_v26 }
 0x31c   : > { %1913 = vmatpush.bf16.msra.mxu3 %v9004_v62  ;;  %v9013_v62 = vld [vmem:[%s12855_s22 + $0xb8] sm:$0xf0] }
 0x31d   : > { %v9016_v42 = vor.u32 %v11097_v43, %v9013_v62  ;;  %v13355_v62 = vld [vmem:[%s12863_s30] sm:$0x3f]  ;;  %s16192_s30 = scalar_lea.vmem [#allocation17], %s12861_s24 }
 0x320   : > { %1914 = vmatpush.bf16.msra.mxu3 %v8980_v27  ;;  %v8989_v27 = vld [vmem:[%s12855_s22 + $0x88] sm:$0xf0] }
 0x321   : > { %1945 = vmatmul.bf16.vlgmr.msra.gmra.mxu2 %v13308_v26  ;;  %9140 = vmatmul.msk.bf16.vlgmr.msrb.gmra.mxu1 %vm1373_vm4, %v13290_v56  ;;  %v8992_v44 = vor.u32 %v11091_v55, %v8989_v27  ;;  %v1571_v55 = vperm.slane %v13355_v62, 3  ;;  %v1570_v27 = vperm.slane %v13355_v62, 2 }
 0x324   : > { %1915 = vmatpush.bf16.msra.mxu3 %v8956_v57  ;;  %v8965_v57 = vld [vmem:[%s12855_s22 + $0x58] sm:$0xf0]  ;;  %s16191_s22 = scalar_lea.vmem [#allocation15], %s12861_s24 }
 0x325   : > { %v8968_v40 = vor.u32 %v11085_v63, %v8965_v57 }
 0x328   : > { %1916 = vmatpush.bf16.msra.mxu3 %v8932_v22 }
 0x32b   : > { %1917 = vmatmul.bf16.vlgmr.msra.gmra.mxu3 %v13308_v26 }
 0x32c   : > { %1993 = vmatpush.bf16.msrb.mxu3 %v9112_v38 }
 0x330   : > { %1994 = vmatpush.bf16.msrb.mxu3 %v9088_v41 }
 0x331   : > { %9141 = vmatmul.msk.bf16.vlgmr.msra.gmra.mxu1 %vm1373_vm4, %v13290_v56  ;;  %9142 = vmatmul.msk.bf16.vlgmr.msrb.gmra.mxu2 %vm1373_vm4, %v13290_v56 }
 0x334   : > { %1995 = vmatpush.bf16.msrb.mxu3 %v9064_v61 }
 0x338   : > { %1996 = vmatpush.bf16.msrb.mxu3 %v9040_v0 }
 0x33c   : > { %1997 = vmatpush.bf16.msrb.mxu3 %v9016_v42 }
 0x340   : > { %1998 = vmatpush.bf16.msrb.mxu3 %v8992_v44  ;;  %v1568_v44 = vperm.slane %v13355_v62, 0 }
 0x344   : > { %1999 = vmatpush.bf16.msrb.mxu3 %v8968_v40 }
 0x348   : > { %2000 = vmatpush.bf16.msrb.mxu3 %v8944_v58 }
 0x34b   : > { %2001 = vmatmul.bf16.vlgmr.msrb.gmra.mxu3 %v13308_v26  ;;  %v1572_v26 = vperm.slane %v13355_v62, 4 }
 0x388   : > { %v1932_v38 = vpop.f32.mrf.mxu0 }
 0x38e   : > { %v1876_v56 = vpop.f32.mrf.mxu3  ;;  %v1890_v22 = vpop.f32.mrf.mxu1 }
 0x390   : > { %v1934_v39 = vpop.f32.mrf.mxu0 }
 0x394   : > { %v1862_v59 = vpop.f32.mrf.mxu2 }
 0x395   : > { %v1863_v28 = vadd.f32 %v1862_v59, %v1568_v44 }
 0x396   : > { %v13350_v24 = vpop.f32.mrf.mxu3  ;;  %v1892_v41 = vpop.f32.mrf.mxu1 }
 0x397   : > { %v1877_v48 = vadd.f32 %v1876_v56, %v1863_v28  ;;  %v1573_v28 = vperm.slane %v13355_v62, 5 }
 0x398   : > { %v1974_v42 = vpop.f32.mrf.mxu0 }
 0x399   : > { %v1975_v63 = vadd.f32 %v1974_v42, %v1572_v26  ;;  %v1569_v42 = vperm.slane %v13355_v62, 1 }
 0x39b   : > { %v1891_v59 = vadd.f32 %v1890_v22, %v1569_v42 }
 0x39c   : > { %v13352_v23 = vpop.f32.mrf.mxu2 }
 0x39e   : > { %v1904_v61 = vpop.f32.mrf.mxu3  ;;  %v1960_v1 = vpop.f32.mrf.mxu1 }
 0x3a0   : > { %v1976_v47 = vpop.f32.mrf.mxu0 }
 0x3a1   : > { %v1977_v31 = vadd.f32 %v1976_v47, %v1572_v26 }
 0x3a4   : > { %v1946_v25 = vpop.f32.mrf.mxu2 }
 0x3a5   : > { %v1947_v40 = vadd.f32 %v1946_v25, %v1571_v55 }
 0x3a6   : > { %v1906_v0 = vpop.f32.mrf.mxu3  ;;  %v1962_v43 = vpop.f32.mrf.mxu1 }
 0x3a7   : > { %v1961_v30 = vadd.f32 %v1960_v1, %v1947_v40 }
 0x3ac   : > { %v1948_v57 = vpop.f32.mrf.mxu2 }
 0x3ad   : > { %v1949_v46 = vadd.f32 %v1948_v57, %v1571_v55 }
 0x3ae   : > { %v1918_v60 = vpop.f32.mrf.mxu3  ;;  %v1988_v2 = vpop.f32.mrf.mxu1 }
 0x3af   : > { %v1919_v58 = vadd.f32 %v1918_v60, %v1570_v27  ;;  %v1989_v45 = vadd.f32 %v1988_v2, %v1975_v63  ;;  %v1963_v49 = vadd.f32 %v1962_v43, %v1949_v46 }
 0x3b1   : > { %v1933_v29 = vadd.f32 %v1932_v38, %v1919_v58  ;;  %2083 = vmatpush.msrb.mxu1 %v1989_v45  ;;  %v1905_v45 = vadd.f32 %v1904_v61, %v1891_v59  ;;  %v1893_v38 = vadd.f32 %v1892_v41, %v1569_v42 }
 0x3b3   : > { %2036 = vmatpush.xpose.msrb.mxu0 %v1933_v29  ;;  %v1907_v29 = vadd.f32 %v1906_v0, %v1893_v38 }
 0x3b6   : > { %v1920_v25 = vpop.f32.mrf.mxu3  ;;  %v1990_v32 = vpop.f32.mrf.mxu1  ;;  %2037 = vmatmul.f32.vlgmr.msrb.gmra.mxu0 %v1877_v48 }
 0x3b7   : > { %2103 = vmatpush.xpose.msra.mxu0 %v1961_v30  ;;  %v1921_v60 = vadd.f32 %v1920_v25, %v1570_v27  ;;  %v1991_v63 = vadd.f32 %v1990_v32, %v1977_v31  ;;  %v2016_v30 = vpop.f32.mrf.mxu2 }
 0x3b9   : > { %v1935_v2 = vadd.f32 %v1934_v39, %v1921_v60  ;;  %2217 = vmatpush.msra.mxu3 %v1991_v63 }
 0x3bb   : > { %2237 = vmatpush.xpose.msrb.mxu0 %v1963_v49  ;;  %2170 = vmatpush.xpose.msra.mxu1 %v1935_v2 }
 0x3be   : > { %2104 = vmatmul.f32.vlgmr.msra.gmra.mxu0 %v1905_v45 }
 0x3bf   : > { %v2018_v31 = vpop.f32.mrf.mxu2 }
 0x3c6   : > { %2238 = vmatmul.f32.vlgmr.msrb.gmra.mxu0 %v1907_v29 }
 0x3ce   : > { %v2002_v46 = vpop.f32.mrf.mxu3 }
 0x3cf   : > { %v2003_v47 = vadd.f32 %v2002_v46, %v1573_v28 }
 0x3d1   : > { %v2017_v56 = vadd.f32 %v2016_v30, %v2003_v47 }
 0x3d3   : > { %2150 = vmatpush.msra.mxu2 %v2017_v56 }
 0x3d6   : > { %v2004_v48 = vpop.f32.mrf.mxu3 }
 0x3d7   : > { %v2005_v1 = vadd.f32 %v2004_v48, %v1573_v28 }
 0x3d9   : > { %v2019_v32 = vadd.f32 %v2018_v31, %v2005_v1 }
 0x3db   : > { %2284 = vmatpush.msrb.mxu2 %v2019_v32 }
 0x433   : > { %v2038_v49 = vpop.f32.mrf.mxu0 }
 0x434   : > { %v2041_v22 = vsel %vm1428_vm5, %v2038_v49, -inf }
 0x435   : > { %2042 = vmax.xlane.f32.xlu2 %v2041_v22 }
 0x43b   : > { %v2105_v39 = vpop.f32.mrf.mxu0 }
 0x43c   : > { %v2108_v41 = vsel %vm1428_vm5, %v2105_v39, -inf }
 0x43d   : > { %2109 = vmax.xlane.f32.xlu0 %v2108_v41 }
 0x443   : > { %v2239_v61 = vpop.f32.mrf.mxu0 }
 0x444   : > { %v2242_v0 = vsel %vm1428_vm5, %v2239_v61, -inf }
 0x445   : > { %2243 = vmax.xlane.f32.xlu1 %v2242_v0 }
 0x4a8   : > { %v2043_v43 = vpop.xlane.xlu2 %2042 }
 0x4a9   : > { %v2044_v26 = vsub.f32 %v2038_v49, %v2043_v43  ;;  %v1865_v43 = vadd.f32 %v13352_v23, %v1568_v44 }
 0x4ab   : > { %v2045_v55 = vmul.f32 1.442695, %v2044_v26 }
 0x4ad   : > { %11785 = vpow2.f32 %v2045_v55 }
 0x4b0   : > { %v2110_v27 = vpop.xlane.xlu0 %2109 }
 0x4b1   : > { %v2111_v57 = vsub.f32 %v2105_v39, %v2110_v27 }
 0x4b3   : > { %v11786_v40 = vpop.eup %11785  ;;  %v2112_v58 = vmul.f32 1.442695, %v2111_v57 }
 0x4b4   : > { %v2047_v42 = vsel %vm1428_vm5, %v11786_v40, 0.0 }
 0x4b5   : > { %11787 = vpow2.f32 %v2112_v58  ;;  %2048 = vadd.xlane.f32.xlu2 %v2047_v42  ;;  %v1879_v58 = vadd.f32 %v13350_v24, %v1865_v43  ;;  %v9271_v43 = vld [vmem:[%s12890_s10 + $0xf8] sm:$0xf0] }
 0x4b8   : > { %v2244_v63 = vpop.xlane.xlu1 %2243 }
 0x4b9   : > { %v2245_v42 = vsub.f32 %v2239_v61, %v2244_v63 }
 0x4bb   : > { %v11788_v25 = vpop.eup %11787 }
 0x4bc   : > { %v2114_v60 = vsel %vm1428_vm5, %v11788_v25, 0.0 }
 0x4bd   : > { %2115 = vadd.xlane.f32.xlu1 %v2114_v60 }
 0x528   : > { %v2049_v2 = vpop.xlane.xlu2 %2048 }
 0x529   : > { %11789 = vrcp.f32 %v2049_v2  ;;  %v2061_v28 = vand.u32 2147483648, %v2049_v2  ;;  %v2059_v46 = vand.u32 2147483647, %v2049_v2  ;;  %vm2055_vm6 = vweird.f32 %v2049_v2 }
 0x52b   : > { %v2062_v48 = vor.u32 1.1754944e-38, %v2061_v28  ;;  %vm2060_vm8 = vcmp.eq.f32.partialorder %v2059_v46, 8.507059e+37 }
 0x52f   : > { %v11790_v59 = vpop.eup %11789 }
 0x530   : > { %v2051_v45 = vmul.f32 %v11790_v59, %v2049_v2  ;;  %v2116_v38 = vpop.xlane.xlu1 %2115  ;;  %vm2056_vm3 = vweird.f32 %v11790_v59  ;;  %v2246_v2 = vmul.f32 1.442695, %v2245_v42 }
 0x531   : > { %11791 = vrcp.f32 %v2116_v38  ;;  %vm2057_vm7 = vmor %vm2055_vm6, %vm2056_vm3  ;;  %v2128_v39 = vand.u32 2147483648, %v2116_v38  ;;  %v2126_v0 = vand.u32 2147483647, %v2116_v38  ;;  %vm2122_vm10 = vweird.f32 %v2116_v38 }
 0x532   : > { %v2052_v29 = vsub.f32 1.0, %v2051_v45  ;;  %11793 = vpow2.f32 %v2246_v2  ;;  %v9253_v2 = vld [vmem:[%s12890_s10 + $0xd0] sm:$0xf] }
 0x533   : > { %v2129_v55 = vor.u32 1.1754944e-38, %v2128_v39  ;;  %vm2127_vm12 = vcmp.eq.f32.partialorder %v2126_v0, 8.507059e+37  ;;  %v11162_v39 = vld [vmem:[%s12890_s10 + $0xf4] sm:$0xf0] }
 0x534   : > { %v2053_v30 = vmul.f32 %v11790_v59, %v2052_v29 }
 0x536   : > { %v2054_v47 = vadd.f32 %v11790_v59, %v2053_v30 }
 0x537   : > { %v11792_v56 = vpop.eup %11791 }
 0x538   : > { %v2058_v1 = vsel %vm2057_vm7, %v11790_v59, %v2054_v47  ;;  %v2118_v31 = vmul.f32 %v11792_v56, %v2116_v38  ;;  %vm2123_vm9 = vweird.f32 %v11792_v56  ;;  %v11794_v44 = vpop.eup %11793 }
 0x539   : > { %v2063_v32 = vsel %vm2060_vm8, %v2062_v48, %v2058_v1  ;;  %vm2124_vm11 = vmor %vm2122_vm10, %vm2123_vm9  ;;  %v2248_v59 = vsel %vm1428_vm5, %v11794_v44, 0.0 }
 0x53a   : > { %v2119_v49 = vsub.f32 1.0, %v2118_v31  ;;  %v2064_v22 = vmul.f32 %v11786_v40, %v2063_v32 }
 0x53c   : > { %v2120_v41 = vmul.f32 %v11792_v56, %v2119_v49  ;;  %9143 = vmatmul.msk.f32.vlgmr.msrb.gmra.mxu1 %vm1428_vm5, %v2064_v22  ;;  %v9269_v22 = vld [vmem:[%s12890_s10 + $0xf0] sm:$0xf] }
 0x53d   : > { %v9270_v0 = vor.u32 %v11162_v39, %v9269_v22  ;;  %v9231_v39 = vld [vmem:[%s12890_s10 + $0xa8] sm:$0xf0] }
 0x53e   : > { %v2121_v26 = vadd.f32 %v11792_v56, %v2120_v41  ;;  %v11161_v41 = vld [vmem:[%s12890_s10 + $0xf4] sm:$0xf] }
 0x53f   : > { %2497 = vmatpush.bf16.msrb.mxu3 %v9270_v0  ;;  %v11150_v0 = vld [vmem:[%s12890_s10 + $0x94] sm:$0xf0] }
 0x540   : > { %v2125_v27 = vsel %vm2124_vm11, %v11792_v56, %v2121_v26  ;;  %v9274_v26 = vor.u32 %v11161_v41, %v9271_v43  ;;  %v9221_v41 = vld [vmem:[%s12890_s10 + $0x90] sm:$0xf] }
 0x541   : > { %v2130_v57 = vsel %vm2127_vm12, %v2129_v55, %v2125_v27  ;;  %v9261_v55 = vld [vmem:[%s12890_s10 + $0xe0] sm:$0xf]  ;;  %v11160_v27 = vld [vmem:[%s12890_s10 + $0xe4] sm:$0xf0] }
 0x542   : > { %v2131_v40 = vmul.f32 %v11788_v25, %v2130_v57  ;;  %v11159_v57 = vld [vmem:[%s12890_s10 + $0xe4] sm:$0xf] }
 0x544   : > { %9144 = vmatmul.msk.f32.vlgmr.msra.gmra.mxu2 %vm1428_vm5, %v2131_v40  ;;  %2171 = vmatmul.f32.vlgmr.msra.gmra.mxu1 %v1879_v58  ;;  %v9262_v58 = vor.u32 %v11160_v27, %v9261_v55  ;;  %v9263_v40 = vld [vmem:[%s12890_s10 + $0xe8] sm:$0xf0]  ;;  %v9223_v55 = vld [vmem:[%s12890_s10 + $0x98] sm:$0xf0]  ;;  %v9222_v27 = vor.u32 %v11150_v0, %v9221_v41 }
 0x545   : > { %2525 = vmatpush.bf16.msra.mxu2 %v9274_v26  ;;  %v9266_v42 = vor.u32 %v11159_v57, %v9263_v40  ;;  %v11149_v26 = vld [vmem:[%s12890_s10 + $0x94] sm:$0xf]  ;;  %v11148_v40 = vld [vmem:[%s12890_s10 + $0x84] sm:$0xf0] }
 0x546   : > { %2498 = vmatpush.bf16.msrb.mxu3 %v9262_v58  ;;  %v9226_v57 = vor.u32 %v11149_v26, %v9223_v55  ;;  %v9213_v58 = vld [vmem:[%s12890_s10 + $0x80] sm:$0xf]  ;;  %v11140_v26 = vld [vmem:[%s12890_s10 + $0x44] sm:$0xf0] }
 0x549   : > { %2526 = vmatpush.bf16.msra.mxu2 %v9266_v42  ;;  %v11147_v42 = vld [vmem:[%s12890_s10 + $0x84] sm:$0xf] }
 0x5b9   : > { %v13376_v60 = vpop.f32.mrf.mxu1 }
 0x5c1   : > { %v2172_v62 = vpop.f32.mrf.mxu1 }
 0x5c2   : > { %v2175_v23 = vsel %vm1428_vm5, %v2172_v62, -inf }
 0x5c3   : > { %2176 = vmax.xlane.f32.xlu2 %v2175_v23  ;;  %v11157_v23 = vld [vmem:[%s12890_s10 + $0xd4] sm:$0xf] }
 0x5cb   : > { %2249 = vadd.xlane.f32.xlu2 %v2248_v59  ;;  %v9255_v59 = vld [vmem:[%s12890_s10 + $0xd8] sm:$0xf0] }
 0x636   : > { %v2177_v45 = vpop.xlane.xlu2 %2176 }
 0x637   : > { %v2178_v38 = vsub.f32 %v2172_v62, %v2177_v45  ;;  %v11158_v62 = vld [vmem:[%s12890_s10 + $0xd4] sm:$0xf0]  ;;  %v9258_v45 = vor.u32 %v11157_v23, %v9255_v59  ;;  %v9205_v59 = vld [vmem:[%s12890_s10 + $0x70] sm:$0xf] }
 0x639   : > { %v2179_v24 = vmul.f32 1.442695, %v2178_v38  ;;  %2527 = vmatpush.bf16.msra.mxu2 %v9258_v45  ;;  %v9245_v38 = vld [vmem:[%s12890_s10 + $0xc0] sm:$0xf]  ;;  %v11146_v45 = vld [vmem:[%s12890_s10 + $0x74] sm:$0xf0] }
 0x63b   : > { %11795 = vpow2.f32 %v2179_v24  ;;  %v11156_v24 = vld [vmem:[%s12890_s10 + $0xc4] sm:$0xf0] }
 0x63e   : > { %v2250_v25 = vpop.xlane.xlu2 %2249 }
 0x63f   : > { %11797 = vrcp.f32 %v2250_v25  ;;  %v2262_v46 = vand.u32 2147483648, %v2250_v25  ;;  %v2260_v56 = vand.u32 2147483647, %v2250_v25  ;;  %vm2256_vm14 = vweird.f32 %v2250_v25 }
 0x641   : > { %v13380_v29 = vpop.eup %11795  ;;  %v2263_v1 = vor.u32 1.1754944e-38, %v2262_v46  ;;  %vm2261_vm0 = vcmp.eq.f32.partialorder %v2260_v56, 8.507059e+37  ;;  %v11154_v46 = vld [vmem:[%s12890_s10 + $0xb4] sm:$0xf0] }
 0x642   : > { %v2181_v61 = vsel %vm1428_vm5, %v13380_v29, 0.0 }
 0x643   : > { %2182 = vadd.xlane.f32.xlu1 %v2181_v61  ;;  %v9246_v61 = vor.u32 %v11156_v24, %v9245_v38  ;;  %v11145_v38 = vld [vmem:[%s12890_s10 + $0x74] sm:$0xf]  ;;  %v9206_v24 = vor.u32 %v11146_v45, %v9205_v59  ;;  %v11138_v59 = vld [vmem:[%s12890_s10 + $0x34] sm:$0xf0] }
 0x645   : > { %v11798_v63 = vpop.eup %11797  ;;  %2483 = vmatpush.bf16.msrb.mxu1 %v9206_v24  ;;  %v9175_v24 = vld [vmem:[%s12890_s10 + $0x38] sm:$0xf0] }
 0x646   : > { %v2252_v28 = vmul.f32 %v11798_v63, %v2250_v25  ;;  %vm2257_vm13 = vweird.f32 %v11798_v63  ;;  %v11155_v25 = vld [vmem:[%s12890_s10 + $0xc4] sm:$0xf] }
 0x647   : > { %vm2258_vm15 = vmor %vm2256_vm14, %vm2257_vm13  ;;  %vm2979_vm13 = vcmask 1041408   ;;  %vm2975_vm14 = vcmask 556032  }
 0x648   : > { %v2253_v30 = vsub.f32 1.0, %v2252_v28 }
 0x64a   : > { %v2254_v47 = vmul.f32 %v11798_v63, %v2253_v30  ;;  %v9237_v30 = vld [vmem:[%s12890_s10 + $0xb0] sm:$0xf] }
 0x64b   : > { %v9238_v56 = vor.u32 %v11154_v46, %v9237_v30  ;;  %v11143_v30 = vld [vmem:[%s12890_s10 + $0x64] sm:$0xf]  ;;  %v9199_v46 = vld [vmem:[%s12890_s10 + $0x68] sm:$0xf0] }
 0x64c   : > { %v2255_v48 = vadd.f32 %v11798_v63, %v2254_v47  ;;  %v11153_v47 = vld [vmem:[%s12890_s10 + $0xb4] sm:$0xf] }
 0x64e   : > { %v2259_v31 = vsel %vm2258_vm15, %v11798_v63, %v2255_v48  ;;  %v9247_v63 = vld [vmem:[%s12890_s10 + $0xc8] sm:$0xf0]  ;;  %v9239_v48 = vld [vmem:[%s12890_s10 + $0xb8] sm:$0xf0] }
 0x64f   : > { %v2264_v32 = vsel %vm2261_vm0, %v2263_v1, %v2259_v31  ;;  %v9250_v28 = vor.u32 %v11155_v25, %v9247_v63  ;;  %v9242_v1 = vor.u32 %v11153_v47, %v9239_v48  ;;  %v9229_v31 = vld [vmem:[%s12890_s10 + $0xa0] sm:$0xf]  ;;  %v9207_v25 = vld [vmem:[%s12890_s10 + $0x78] sm:$0xf0]  ;;  %v9189_v48 = vld [vmem:[%s12890_s10 + $0x50] sm:$0xf] }
 0x650   : > { %v2265_v49 = vmul.f32 %v11794_v44, %v2264_v32  ;;  %v9254_v44 = vor.u32 %v11158_v62, %v9253_v2  ;;  %v11152_v32 = vld [vmem:[%s12890_s10 + $0xa4] sm:$0xf0]  ;;  %v9214_v2 = vor.u32 %v11148_v40, %v9213_v58  ;;  %v9215_v62 = vld [vmem:[%s12890_s10 + $0x88] sm:$0xf0]  ;;  %v9210_v63 = vor.u32 %v11145_v38, %v9207_v25  ;;  %v11137_v38 = vld [vmem:[%s12890_s10 + $0x34] sm:$0xf] }
 0x651   : > { %2528 = vmatpush.bf16.msra.mxu2 %v9250_v28  ;;  %v9230_v22 = vor.u32 %v11152_v32, %v9229_v31  ;;  %v9218_v23 = vor.u32 %v11147_v42, %v9215_v62  ;;  %v11144_v28 = vld [vmem:[%s12890_s10 + $0x64] sm:$0xf0]  ;;  %v11141_v32 = vld [vmem:[%s12890_s10 + $0x54] sm:$0xf] }
 0x652   : > { %9146 = vmatmul.msk.f32.vlgmr.msrb.gmra.mxu2 %vm1428_vm5, %v2265_v49  ;;  %2499 = vmatpush.bf16.msrb.mxu3 %v9254_v44  ;;  %v11151_v49 = vld [vmem:[%s12890_s10 + $0xa4] sm:$0xf] }
 0x653   : > { %v9234_v43 = vor.u32 %v11151_v49, %v9231_v39  ;;  %2511 = vmatpush.bf16.msra.mxu0 %v9210_v63  ;;  %v9191_v49 = vld [vmem:[%s12890_s10 + $0x58] sm:$0xf0] }
 0x654   : > { %v9194_v0 = vor.u32 %v11141_v32, %v9191_v49  ;;  %v11134_v32 = vld [vmem:[%s12890_s10 + $0x14] sm:$0xf0]  ;;  %v11133_v49 = vld [vmem:[%s12890_s10 + $0x14] sm:$0xf] }
 0x655   : > { %2529 = vmatpush.bf16.msra.mxu2 %v9242_v1  ;;  %v11142_v1 = vld [vmem:[%s12890_s10 + $0x54] sm:$0xf0] }
 0x656   : > { %2500 = vmatpush.bf16.msrb.mxu3 %v9246_v61  ;;  %v9197_v61 = vld [vmem:[%s12890_s10 + $0x60] sm:$0xf]  ;;  %v9190_v39 = vor.u32 %v11142_v1, %v9189_v48 }
 0x657   : > { %v9198_v47 = vor.u32 %v11144_v28, %v9197_v61  ;;  %v9178_v28 = vor.u32 %v11137_v38, %v9175_v24 }
 0x659   : > { %2530 = vmatpush.bf16.msra.mxu2 %v9234_v43  ;;  %2484 = vmatpush.bf16.msrb.mxu1 %v9198_v47  ;;  %v9181_v43 = vld [vmem:[%s12890_s10 + $0x40] sm:$0xf]  ;;  %v11135_v47 = vld [vmem:[%s12890_s10 + $0x24] sm:$0xf] }
 0x65a   : > { %2501 = vmatpush.bf16.msrb.mxu3 %v9238_v56  ;;  %v9202_v56 = vor.u32 %v11143_v30, %v9199_v46  ;;  %v9182_v42 = vor.u32 %v11140_v26, %v9181_v43  ;;  %v9165_v30 = vld [vmem:[%s12890_s10 + $0x20] sm:$0xf]  ;;  %v11136_v46 = vld [vmem:[%s12890_s10 + $0x24] sm:$0xf0] }
 0x65b   : > { %v9166_v48 = vor.u32 %v11136_v46, %v9165_v30  ;;  %v9149_v26 = vld [vmem:[%s12890_s10] sm:$0xf]  ;;  %v11842_v30 = vld [vmem:[#allocation2 + $0x8] sm:$0xff] }
 0x65c   : > { %2512 = vmatpush.bf16.msra.mxu0 %v9202_v56  ;;  %v9167_v56 = vld [vmem:[%s12890_s10 + $0x28] sm:$0xf0] }
 0x65d   : > { %2531 = vmatpush.bf16.msra.mxu2 %v9226_v57  ;;  %v9183_v57 = vld [vmem:[%s12890_s10 + $0x48] sm:$0xf0]  ;;  %2485 = vmatpush.bf16.msrb.mxu1 %v9190_v39  ;;  %v9170_v1 = vor.u32 %v11135_v47, %v9167_v56 }
 0x65e   : > { %2502 = vmatpush.bf16.msrb.mxu3 %v9230_v22 }
 0x660   : > { %2513 = vmatpush.bf16.msra.mxu0 %v9194_v0 }
 0x661   : > { %2532 = vmatpush.bf16.msra.mxu2 %v9218_v23  ;;  %v9173_v23 = vld [vmem:[%s12890_s10 + $0x30] sm:$0xf]  ;;  %2486 = vmatpush.bf16.msrb.mxu1 %v9182_v42 }
 0x662   : > { %2503 = vmatpush.bf16.msrb.mxu3 %v9222_v27  ;;  %v11139_v27 = vld [vmem:[%s12890_s10 + $0x44] sm:$0xf]  ;;  %v9174_v63 = vor.u32 %v11138_v59, %v9173_v23  ;;  %v2543_v59 = vld [vmem:[%s16190_s28] sm:$0x3] }
 0x663   : > { %v9186_v62 = vor.u32 %v11139_v27, %v9183_v57  ;;  %v11131_v27 = vld [vmem:[%s12890_s10 + $0x4] sm:$0xf] }
 0x665   : > { %2514 = vmatpush.bf16.msra.mxu0 %v9186_v62  ;;  %2487 = vmatpush.bf16.msrb.mxu1 %v9174_v63  ;;  %v2546_v63 = vperm.slane %v2543_v59, 1 }
 0x666   : > { %2504 = vmatpush.bf16.msrb.mxu3 %v9214_v2 }
 0x669   : > { %2515 = vmatpush.bf16.msra.mxu0 %v9178_v28  ;;  %2488 = vmatpush.bf16.msrb.mxu1 %v9166_v48 }
 0x66d   : > { %2516 = vmatpush.bf16.msra.mxu0 %v9170_v1 }
 0x6b6   : > { %v2183_v44 = vpop.xlane.xlu1 %2182 }
 0x6b7   : > { %11799 = vrcp.f32 %v2183_v44  ;;  %v2195_v55 = vand.u32 2147483648, %v2183_v44  ;;  %v2193_v40 = vand.u32 2147483647, %v2183_v44  ;;  %vm2189_vm2 = vweird.f32 %v2183_v44 }
 0x6b9   : > { %v2196_v45 = vor.u32 1.1754944e-38, %v2195_v55  ;;  %vm2194_vm6 = vcmp.eq.f32.partialorder %v2193_v40, 8.507059e+37  ;;  %v11132_v55 = vld [vmem:[%s12890_s10 + $0x4] sm:$0xf0] }
 0x6ba   : > { %v9150_v57 = vor.u32 %v11132_v55, %v9149_v26 }
 0x6bd   : > { %v11800_v31 = vpop.eup %11799 }
 0x6be   : > { %v2185_v22 = vmul.f32 %v11800_v31, %v2183_v44  ;;  %vm2190_vm1 = vweird.f32 %v11800_v31 }
 0x6bf   : > { %vm2191_vm3 = vmor %vm2189_vm2, %vm2190_vm1 }
 0x6c0   : > { %v2186_v41 = vsub.f32 1.0, %v2185_v22  ;;  %v9159_v22 = vld [vmem:[%s12890_s10 + $0x18] sm:$0xf0] }
 0x6c2   : > { %v2187_v58 = vmul.f32 %v11800_v31, %v2186_v41  ;;  %v9162_v41 = vor.u32 %v11133_v49, %v9159_v22 }
 0x6c4   : > { %v2188_v2 = vadd.f32 %v11800_v31, %v2187_v58  ;;  %2517 = vmatpush.bf16.msra.mxu0 %v9162_v41  ;;  %v9151_v58 = vld [vmem:[%s12890_s10 + $0x8] sm:$0xf0] }
 0x6c5   : > { %v9154_v40 = vor.u32 %v11131_v27, %v9151_v58 }
 0x6c6   : > { %v2192_v25 = vsel %vm2191_vm3, %v11800_v31, %v2188_v2  ;;  %v9157_v31 = vld [vmem:[%s12890_s10 + $0x10] sm:$0xf]  ;;  %s16426_s10 = sld [smem:[#allocation157_spill]] }
 0x6c7   : > { %v2197_v61 = vsel %vm2194_vm6, %v2196_v45, %v2192_v25  ;;  %v9158_v39 = vor.u32 %v11134_v32, %v9157_v31  ;;  %v2545_v25 = vperm.slane %v2543_v59, 0 }
 0x6c8   : > { %v2198_v44 = vmul.f32 %v13380_v29, %v2197_v61  ;;  %v2152_v29 = vpop.f32.mrf.mxu2  ;;  %2518 = vmatpush.bf16.msra.mxu0 %v9154_v40 }
 0x6c9   : > { %2489 = vmatpush.bf16.msrb.mxu1 %v9158_v39  ;;  %v11843_v39 = vld [vmem:[#allocation2 + $0x10] sm:$0xff] }
 0x6ca   : > { %9145 = vmatmul.msk.f32.vlgmr.msra.gmra.mxu3 %vm1428_vm5, %v2198_v44  ;;  %v11841_v44 = vld [vmem:[#allocation2] sm:$0xff] }
 0x6cb   : > { %2600 = vmatpush.msra.mxu3 %v12997_v21 }
 0x6cd   : > { %2601 = vmatpush.msra.mxu3 %v12992_v20  ;;  %2490 = vmatpush.bf16.msrb.mxu1 %v9150_v57 }
 0x6d1   : > { %2563 = vmatpush.msra.mxu1 %v12987_v19 }
 0x6d3   : > { %2564 = vmatpush.msra.mxu1 %v12982_v18 }
 0x6d5   : > { %v2286_v0 = vpop.f32.mrf.mxu2  ;;  %2565 = vmatpush.msra.mxu1 %v12977_v17 }
 0x6d6   : > { %v2322_v43 = vpack.c.bf16 %v2286_v0, %v2152_v29  ;;  %v11844_v0 = vld [vmem:[#allocation2 + $0x18] sm:$0xff] }
 0x6d7   : > { %2566 = vmatpush.msra.mxu1 %v12972_v16 }
 0x6d8   : > { %2505 = vmatmul.bf16.vlgmr.msrb.gmra.mxu3 %v2322_v43  ;;  %2533 = vmatmul.bf16.vlgmr.msra.gmra.mxu2 %v2322_v43 }
 0x6d9   : > { %2567 = vmatpush.msra.mxu1 %v12967_v15 }
 0x6db   : > { %2568 = vmatpush.msra.mxu1 %v12962_v14 }
 0x6dd   : > { %2569 = vmatpush.msra.mxu1 %v12957_v13 }
 0x6df   : > { %2570 = vmatpush.msra.mxu1 %v12952_v12 }
 0x6e1   : > { %2571 = vmatpush.msra.mxu1 %v12947_v11 }
 0x6e3   : > { %2572 = vmatpush.msra.mxu1 %v12942_v10 }
 0x6e5   : > { %2573 = vmatpush.msra.mxu1 %v12937_v9 }
 0x6e7   : > { %2574 = vmatpush.msra.mxu1 %v12932_v8 }
 0x6e9   : > { %2575 = vmatpush.msra.mxu1 %v12927_v7 }
 0x6eb   : > { %2576 = vmatpush.msra.mxu1 %v12917_v6 }
 0x6ed   : > { %2577 = vmatpush.msra.mxu1 %v12912_v5 }
 0x6ef   : > { %2578 = vmatpush.msra.mxu1 %v12907_v4 }
 0x74d   : > { %v2219_v42 = vpop.f32.mrf.mxu3 }
 0x74e   : > { %v2321_v2 = vpack.c.bf16 %v2219_v42, %v13376_v60 }
 0x750   : > { %2491 = vmatmul.bf16.vlgmr.msrb.gmra.mxu1 %v2321_v2  ;;  %2519 = vmatmul.bf16.vlgmr.msra.gmra.mxu0 %v2321_v2 }
 0x75b   : > { %v2506_v62 = vpop.f32.mrf.mxu3  ;;  %v2534_v23 = vpop.f32.mrf.mxu2 }
 0x763   : > { %v2508_v60 = vpop.f32.mrf.mxu3  ;;  %v2536_v48 = vpop.f32.mrf.mxu2 }
 0x7cd   : > { %v2492_v45 = vpop.f32.mrf.mxu1  ;;  %v2520_v38 = vpop.f32.mrf.mxu0 }
 0x7ce   : > { %v2507_v24 = vadd.f32 %v2506_v62, %v2492_v45  ;;  %v2535_v61 = vadd.f32 %v2534_v23, %v2520_v38 }
 0x7d0   : > { %v2539_v28 = vadd.f32 %v11841_v44, %v2507_v24  ;;  %v2540_v46 = vadd.f32 %v11842_v30, %v2535_v61 }
 0x7d2   : > { %v13472_v47 = vadd.f32 %v2545_v25, %v2539_v28  ;;  %v13474_v56 = vadd.f32 %v2546_v63, %v2540_v46 }
 0x7d4   : > { %v2554_v1 = vmul.f32 %v13474_v56, %v13474_v56  ;;  %v2553_v31 = vmul.f32 %v13472_v47, %v13472_v47 }
 0x7d5   : > { %v2494_v32 = vpop.f32.mrf.mxu1  ;;  %v2522_v29 = vpop.f32.mrf.mxu0 }
 0x7d6   : > { %v2509_v49 = vadd.f32 %v2508_v60, %v2494_v32  ;;  %v2537_v22 = vadd.f32 %v2536_v48, %v2522_v29  ;;  %2579 = vmatmul.f32.vlgmr.msra.gmra.mxu1 %v2553_v31  ;;  %9275 = vmatmul.msk.f32.vlgmr.msra.gmra.mxu3 %vm1373_vm4, %v2554_v1 }
 0x7d8   : > { %v2541_v41 = vadd.f32 %v11843_v39, %v2509_v49  ;;  %v2542_v43 = vadd.f32 %v11844_v0, %v2537_v22  ;;  %v11178_v0 = vld [vmem:[%s12866_s8 + $0x74] sm:$0xf0] }
 0x7da   : > { %v13481_v26 = vadd.f32 %v2545_v25, %v2541_v41  ;;  %v13483_v55 = vadd.f32 %v2546_v63, %v2542_v43  ;;  %v9335_v41 = vld [vmem:[%s12866_s8 + $0x70] sm:$0xf] }
 0x7db   : > { %v9336_v43 = vor.u32 %v11178_v0, %v9335_v41 }
 0x7dc   : > { %v2555_v27 = vmul.f32 %v13481_v26, %v13481_v26  ;;  %v2556_v57 = vmul.f32 %v13483_v55, %v13483_v55 }
 0x7dd   : > { %2800 = vmatpush.bf16.msrb.mxu0 %v9336_v43 }
 0x7de   : > { %2582 = vmatmul.f32.gmra.mxu1 %v2555_v27  ;;  %9276 = vmatmul.msk.f32.gmra.mxu3 %vm1373_vm4, %v2556_v57  ;;  %v11177_v27 = vld [vmem:[%s12866_s8 + $0x74] sm:$0xf]  ;;  %v9337_v57 = vld [vmem:[%s12866_s8 + $0x78] sm:$0xf0] }
 0x853   : > { %v2580_v58 = vpop.f32.mrf.mxu1 }
 0x859   : > { %v2603_v40 = vpop.f32.mrf.mxu3 }
 0x85a   : > { %v2604_v42 = vadd.f32 %v2603_v40, %v2580_v58  ;;  %v9340_v58 = vor.u32 %v11177_v27, %v9337_v57  ;;  %v9327_v40 = vld [vmem:[%s12866_s8 + $0x60] sm:$0xf]  ;;  %v11168_v57 = vld [vmem:[%s12866_s8 + $0x24] sm:$0xf0] }
 0x85b   : > { %v2583_v59 = vpop.f32.mrf.mxu1  ;;  %v9295_v27 = vld [vmem:[%s12866_s8 + $0x20] sm:$0xf] }
 0x85c   : > { %v2641_v2 = vadd.f32 1e-06, %v2604_v42  ;;  %v2609_v62 = vand.u32 2147483647, %v2604_v42  ;;  %2828 = vmatpush.bf16.msrb.mxu3 %v9340_v58  ;;  %v11176_v42 = vld [vmem:[%s12866_s8 + $0x64] sm:$0xf0]  ;;  %v9296_v58 = vor.u32 %v11168_v57, %v9295_v27 }
 0x85e   : > { %11801 = vrsqrt.f32 %v2641_v2  ;;  %v2611_v23 = vsel %vm1428_vm5, %v2609_v62, 0.0  ;;  %vm2649_vm8 = vweird.f32 %v2641_v2  ;;  %v11175_v62 = vld [vmem:[%s12866_s8 + $0x64] sm:$0xf] }
 0x85f   : > { %2612 = vadd.xlane.f32.xlu2 %v2611_v23  ;;  %v9329_v23 = vld [vmem:[%s12866_s8 + $0x68] sm:$0xf0] }
 0x861   : > { %v2606_v45 = vpop.f32.mrf.mxu3 }
 0x862   : > { %v2607_v38 = vadd.f32 %v2606_v45, %v2583_v59  ;;  %v9332_v59 = vor.u32 %v11175_v62, %v9329_v23  ;;  %v9319_v45 = vld [vmem:[%s12866_s8 + $0x50] sm:$0xf]  ;;  %v9401_v62 = vld [vmem:[%s12902_s11 + $0x60] sm:$0xf]  ;;  %v11195_v23 = vld [vmem:[%s12902_s11 + $0x6c] sm:$0xf0] }
 0x864   : > { %v11802_v24 = vpop.eup %11801  ;;  %v2642_v25 = vadd.f32 1e-06, %v2607_v38  ;;  %v2610_v61 = vand.u32 2147483647, %v2607_v38  ;;  %2829 = vmatpush.bf16.msrb.mxu3 %v9332_v59  ;;  %v11174_v38 = vld [vmem:[%s12866_s8 + $0x54] sm:$0xf0]  ;;  %v9402_v59 = vor.u32 %v11195_v23, %v9401_v62 }
 0x865   : > { %v2644_v63 = vmul.f32 %v11802_v24, %v2641_v2  ;;  %vm2650_vm7 = vweird.f32 %v11802_v24  ;;  %v9328_v2 = vor.u32 %v11176_v42, %v9327_v40  ;;  %v11167_v40 = vld [vmem:[%s12866_s8 + $0x24] sm:$0xf]  ;;  %v9297_v42 = vld [vmem:[%s12866_s8 + $0x28] sm:$0xf0] }
 0x866   : > { %11803 = vrsqrt.f32 %v2642_v25  ;;  %v2614_v44 = vsel %vm1428_vm5, %v2610_v61, 0.0  ;;  %vm2651_vm9 = vmor %vm2649_vm8, %vm2650_vm7  ;;  %vm2659_vm11 = vweird.f32 %v2642_v25  ;;  %v9321_v61 = vld [vmem:[%s12866_s8 + $0x58] sm:$0xf0] }
 0x867   : > { %2615 = vadd.xlane.f32.xlu1 %v2614_v44  ;;  %v2645_v28 = vmul.f32 %v11802_v24, %v2644_v63  ;;  %2801 = vmatpush.bf16.msrb.mxu0 %v9328_v2  ;;  %v9311_v44 = vld [vmem:[%s12866_s8 + $0x40] sm:$0xf]  ;;  %v9300_v2 = vor.u32 %v11167_v40, %v9297_v42  ;;  %v11180_v42 = vld [vmem:[%s12866_s8 + $0x84] sm:$0xf0] }
 0x868   : > { %v9343_v40 = vld [vmem:[%s12866_s8 + $0x80] sm:$0xf] }
 0x869   : > { %v2646_v30 = vmul.f32 0.5, %v2645_v28  ;;  %v11172_v28 = vld [vmem:[%s12866_s8 + $0x44] sm:$0xf0]  ;;  %v9344_v23 = vor.u32 %v11180_v42, %v9343_v40  ;;  %v11179_v42 = vld [vmem:[%s12866_s8 + $0x84] sm:$0xf] }
 0x86b   : > { %v2647_v48 = vsub.f32 1.5, %v2646_v30  ;;  %v9312_v30 = vor.u32 %v11172_v28, %v9311_v44  ;;  %v9385_v44 = vld [vmem:[%s12902_s11 + $0x40] sm:$0xf]  ;;  %v11191_v28 = vld [vmem:[%s12902_s11 + $0x4c] sm:$0xf0]  ;;  %2821 = vmatpush.bf16.msrb.mxu2 %v9344_v23 }
 0x86c   : > { %v11804_v46 = vpop.eup %11803  ;;  %v9355_v23 = vld [vmem:[%s12902_s11 + $0x10] sm:$0xf0] }
 0x86d   : > { %v2654_v60 = vmul.f32 %v11804_v46, %v2642_v25  ;;  %v2648_v31 = vmul.f32 %v11802_v24, %v2647_v48  ;;  %vm2660_vm10 = vweird.f32 %v11804_v46  ;;  %v11173_v25 = vld [vmem:[%s12866_s8 + $0x54] sm:$0xf] }
 0x86e   : > { %vm2661_vm12 = vmor %vm2659_vm11, %vm2660_vm10  ;;  %v9324_v63 = vor.u32 %v11173_v25, %v9321_v61  ;;  %v11165_v25 = vld [vmem:[%s12866_s8 + $0x14] sm:$0xf]  ;;  %v9289_v61 = vld [vmem:[%s12866_s8 + $0x18] sm:$0xf0] }
 0x86f   : > { %v2655_v1 = vmul.f32 %v11804_v46, %v2654_v60  ;;  %v2652_v29 = vsel %vm2651_vm9, %v11802_v24, %v2648_v31  ;;  %v9320_v24 = vor.u32 %v11174_v38, %v9319_v45  ;;  %v9313_v60 = vld [vmem:[%s12866_s8 + $0x48] sm:$0xf0]  ;;  %v9303_v31 = vld [vmem:[%s12866_s8 + $0x30] sm:$0xf]  ;;  %v11166_v38 = vld [vmem:[%s12866_s8 + $0x14] sm:$0xf0] }
 0x870   : > { %2830 = vmatpush.bf16.msrb.mxu3 %v9324_v63  ;;  %v9287_v45 = vld [vmem:[%s12866_s8 + $0x10] sm:$0xf]  ;;  %v9292_v63 = vor.u32 %v11165_v25, %v9289_v61  ;;  %v9353_v25 = vld [vmem:[%s12902_s11] sm:$0xf]  ;;  %v11183_v61 = vld [vmem:[%s12902_s11 + $0xc] sm:$0xf0] }
 0x871   : > { %v2656_v32 = vmul.f32 0.5, %v2655_v1  ;;  %2802 = vmatpush.bf16.msrb.mxu0 %v9320_v24  ;;  %v2872_v1 = vld [vmem:[%s12902_s11 + $0x80] sm:$0x33]  ;;  %v9288_v24 = vor.u32 %v11166_v38, %v9287_v45  ;;  %v9403_v45 = vld [vmem:[%s12902_s11 + $0x70] sm:$0xf0] }
 0x873   : > { %v2657_v49 = vsub.f32 1.5, %v2656_v32  ;;  %v11170_v32 = vld [vmem:[%s12866_s8 + $0x34] sm:$0xf0] }
 0x875   : > { %v2658_v22 = vmul.f32 %v11804_v46, %v2657_v49  ;;  %2803 = vmatpush.bf16.msrb.mxu0 %v9312_v30  ;;  %v9304_v49 = vor.u32 %v11170_v32, %v9303_v31  ;;  %v9386_v30 = vor.u32 %v11191_v28, %v9385_v44  ;;  %v11164_v31 = vld [vmem:[%s12866_s8 + $0x4] sm:$0xf0]  ;;  %v11194_v44 = vld [vmem:[%s12902_s11 + $0x6c] sm:$0xf]  ;;  %v9411_v28 = vld [vmem:[%s12902_s11 + $0x78] sm:$0xf0] }
 0x877   : > { %2665 = vperm.xlu2 %11772, %v2652_v29   ;;  %v2662_v39 = vsel %vm2661_vm12, %v11804_v46, %v2658_v22  ;;  %v11171_v46 = vld [vmem:[%s12866_s8 + $0x44] sm:$0xf]  ;;  %v2935_v29 = vunpack.c.l.b16 %v2872_v1  ;;  %v11169_v22 = vld [vmem:[%s12866_s8 + $0x34] sm:$0xf] }
 0x878   : > { %v9316_v48 = vor.u32 %v11171_v46, %v9313_v60  ;;  %v2936_v46 = vunpack.c.h.b16 %v2872_v1  ;;  %v13527_v60 = vld [vmem:[%s12902_s11 + $0x88] sm:$0x33] }
 0x879   : > { %v2955_v0 = vpack.c.b16 %v2935_v29, %v2935_v29  ;;  %2804 = vmatpush.bf16.msrb.mxu0 %v9304_v49  ;;  %v2938_v32 = vunpack.c.h.b16 %v13527_v60  ;;  %v11163_v49 = vld [vmem:[%s12866_s8 + $0x4] sm:$0xf] }
 0x87a   : > { %2831 = vmatpush.bf16.msrb.mxu3 %v9316_v48  ;;  %v9279_v48 = vld [vmem:[%s12866_s8] sm:$0xf] }
 0x87b   : > { %v2981_v43 = vsel %vm2979_vm13, %v2955_v0, 0  ;;  %v9280_v29 = vor.u32 %v11164_v31, %v9279_v48  ;;  %v9369_v0 = vld [vmem:[%s12902_s11 + $0x20] sm:$0xf]  ;;  %v2958_v1 = vpack.c.b16 %v2938_v32, %v2938_v32  ;;  %v1368_v48 = vld [vmem:[#allocation6 + $0x8] sm:$0xff]  ;;  %v11189_v31 = vld [vmem:[%s12902_s11 + $0x44] sm:$0xf] }
 0x87c   : > { %2995 = vmatpush.bf16.msrb.mxu1 %v2981_v43  ;;  %v11187_v43 = vld [vmem:[%s12902_s11 + $0x2c] sm:$0xf0] }
 0x87d   : > { %2805 = vmatpush.bf16.msrb.mxu0 %v9296_v58  ;;  %v9370_v58 = vor.u32 %v11187_v43, %v9369_v0  ;;  %v2990_v62 = vsel %vm2979_vm13, %v2958_v1, 0  ;;  %v11185_v0 = vld [vmem:[%s12902_s11 + $0x24] sm:$0xf]  ;;  %v9371_v43 = vld [vmem:[%s12902_s11 + $0x30] sm:$0xf0] }
 0x87e   : > { %v9374_v40 = vor.u32 %v11185_v0, %v9371_v43  ;;  %v2937_v43 = vunpack.c.l.b16 %v13527_v60 }
 0x880   : > { %2670 = vperm.xlu1 %11773, %v2662_v39   ;;  %v9305_v39 = vld [vmem:[%s12866_s8 + $0x38] sm:$0xf0]  ;;  %2996 = vmatpush.bf16.msrb.mxu1 %v9402_v59 }
 0x881   : > { %v9308_v41 = vor.u32 %v11169_v22, %v9305_v39  ;;  %2806 = vmatpush.bf16.msrb.mxu0 %v9288_v24  ;;  %v9281_v22 = vld [vmem:[%s12866_s8 + $0x8] sm:$0xf0]  ;;  %v2956_v39 = vpack.c.b16 %v2936_v46, %v2936_v46 }
 0x882   : > { %v11193_v59 = vld [vmem:[%s12902_s11 + $0x64] sm:$0xf]  ;;  %v1367_v46 = vld [vmem:[#allocation6] sm:$0xff] }
 0x883   : > { %2832 = vmatpush.bf16.msrb.mxu3 %v9308_v41  ;;  %v9284_v41 = vor.u32 %v11163_v49, %v9281_v22  ;;  %v2984_v57 = vsel %vm2979_vm13, %v2956_v39, 0  ;;  %v9406_v24 = vor.u32 %v11193_v59, %v9403_v45  ;;  %v13551_v32 = vpack.c.bf16 %v1368_v48, %v1367_v46  ;;  %v11190_v49 = vld [vmem:[%s12902_s11 + $0x4c] sm:$0xf]  ;;  %v9395_v22 = vld [vmem:[%s12902_s11 + $0x58] sm:$0xf0] }
 0x884   : > { %2997 = vmatpush.bf16.msrb.mxu1 %v9386_v30  ;;  %v9414_v30 = vor.u32 %v11194_v44, %v9411_v28  ;;  %v9363_v44 = vld [vmem:[%s12902_s11 + $0x18] sm:$0xf0] }
 0x885   : > { %2807 = vmatpush.bf16.msrb.mxu0 %v9280_v29  ;;  %v9387_v29 = vld [vmem:[%s12902_s11 + $0x50] sm:$0xf0] }
 0x886   : > { %v9390_v39 = vor.u32 %v11189_v31, %v9387_v29 }
 0x887   : > { %2833 = vmatpush.bf16.msrb.mxu3 %v9300_v2 }
 0x888   : > { %2998 = vmatpush.bf16.msrb.mxu1 %v9370_v58 }
 0x889   : > { %3009 = vmatpush.bf16.msra.mxu0 %v2984_v57  ;;  %v9379_v57 = vld [vmem:[%s12902_s11 + $0x38] sm:$0xf0] }
 0x88b   : > { %2834 = vmatpush.bf16.msrb.mxu3 %v9292_v63  ;;  %v9354_v63 = vor.u32 %v11183_v61, %v9353_v25 }
 0x88d   : > { %3010 = vmatpush.bf16.msra.mxu0 %v9406_v24  ;;  %2999 = vmatpush.bf16.msrb.mxu1 %v9354_v63  ;;  %v11182_v63 = vld [vmem:[%s12902_s11 + $0xc] sm:$0xf] }
 0x88e   : > { %v9366_v46 = vor.u32 %v11182_v63, %v9363_v44  ;;  %v9393_v63 = vld [vmem:[%s12902_s11 + $0x48] sm:$0xf]  ;;  %v11192_v44 = vld [vmem:[%s12902_s11 + $0x54] sm:$0xf0] }
 0x88f   : > { %2835 = vmatpush.bf16.msrb.mxu3 %v9284_v41  ;;  %v9398_v41 = vor.u32 %v11190_v49, %v9395_v22 }
 0x890   : > { %9415 = vmatmul.msk.bf16.vlgmr.msrb.gmra.mxu1 %vm2975_vm14, %v13551_v32 }
 0x891   : > { %3011 = vmatpush.bf16.msra.mxu0 %v9390_v39 }
 0x893   : > { %3037 = vmatpush.bf16.msra.mxu3 %v2990_v62  ;;  %v11181_v62 = vld [vmem:[%s12902_s11 + $0x4] sm:$0xf] }
 0x894   : > { %v9358_v28 = vor.u32 %v11181_v62, %v9355_v23 }
 0x895   : > { %3012 = vmatpush.bf16.msra.mxu0 %v9374_v40 }
 0x897   : > { %3038 = vmatpush.bf16.msra.mxu3 %v9414_v30 }
 0x899   : > { %3013 = vmatpush.bf16.msra.mxu0 %v9358_v28  ;;  %v9394_v28 = vor.u32 %v11192_v44, %v9393_v63 }
 0x89b   : > { %3039 = vmatpush.bf16.msra.mxu3 %v9398_v41 }
 0x8d2   : > { %v2613_v27 = vpop.xlane.xlu2 %2612 }
 0x8d3   : > { %v2617_v2 = vmul.f32 %v2613_v27, %v13258_v54  ;;  %v11186_v27 = vld [vmem:[%s12902_s11 + $0x2c] sm:$0xf] }
 0x8d4   : > { %v9382_v25 = vor.u32 %v11186_v27, %v9379_v57 }
 0x8d5   : > { %v13543_v38 = vadd.f32 1e-06, %v2617_v2  ;;  %v9345_v2 = vld [vmem:[%s12866_s8 + $0x88] sm:$0xf0]  ;;  %s16420_s8 = scalar_lea.vmem [#allocation20], %s12861_s24  ;;  %s16425_s24 = sld [smem:[#allocation33_spill]] }
 0x8d6   : > { %v9348_v59 = vor.u32 %v11179_v42, %v9345_v2  ;;  %3040 = vmatpush.bf16.msra.mxu3 %v9382_v25  ;;  %v11196_v25 = vld [vmem:[%s12902_s11 + $0x74] sm:$0xf0] }
 0x8d7   : > { %11805 = vrsqrt.f32 %v13543_v38  ;;  %vm2627_vm0 = vweird.f32 %v13543_v38 }
 0x8d8   : > { %2849 = vmatpush.bf16.msra.mxu2 %v9348_v59 }
 0x8da   : > { %v2616_v1 = vpop.xlane.xlu1 %2615  ;;  %3041 = vmatpush.bf16.msra.mxu3 %v9366_v46  ;;  %v2666_v57 = vpop.permute.xlu2 %2665  ;;  %v11188_v46 = vld [vmem:[%s12902_s11 + $0x34] sm:$0xf0] }
 0x8db   : > { %v2618_v58 = vmul.f32 %v2616_v1, %v13258_v54  ;;  %v2678_v62 = vmul.f32 %v2666_v57, %v13474_v56  ;;  %p11717_p1 = scmp.eq.s32.totalorder %s16425_s24, 1 }
 0x8dd   : > { %v11806_v45 = vpop.eup %11805  ;;  %v2620_v24 = vadd.f32 1e-06, %v2618_v58 }
 0x8de   : > { %v2622_v61 = vmul.f32 %v11806_v45, %v13543_v38  ;;  %vm2628_vm15 = vweird.f32 %v11806_v45  ;;  %v2957_v38 = vpack.c.b16 %v2937_v43, %v2937_v43  ;;  %v13599_v43 = vld [vmem:[%s16191_s22] sm:$0x3] }
 0x8df   : > { %11807 = vrsqrt.f32 %v2620_v24  ;;  %vm2629_vm2 = vmor %vm2627_vm0, %vm2628_vm15  ;;  %vm2637_vm3 = vweird.f32 %v2620_v24 }
 0x8e0   : > { %v2623_v30 = vmul.f32 %v11806_v45, %v2622_v61 }
 0x8e2   : > { %v2624_v48 = vmul.f32 0.5, %v2623_v30  ;;  %v9377_v30 = vld [vmem:[%s12902_s11 + $0x28] sm:$0xf] }
 0x8e4   : > { %v2625_v29 = vsub.f32 1.5, %v2624_v48  ;;  %v9378_v48 = vor.u32 %v11188_v46, %v9377_v30 }
 0x8e5   : > { %v11808_v31 = vpop.eup %11807 }
 0x8e6   : > { %v2632_v49 = vmul.f32 %v11808_v31, %v2620_v24  ;;  %v2626_v39 = vmul.f32 %v11806_v45, %v2625_v29  ;;  %vm2638_vm1 = vweird.f32 %v11808_v31  ;;  %v9409_v24 = vld [vmem:[%s12902_s11 + $0x68] sm:$0xf]  ;;  %v11184_v29 = vld [vmem:[%s12902_s11 + $0x14] sm:$0xf0] }
 0x8e7   : > { %vm2639_vm6 = vmor %vm2637_vm3, %vm2638_vm1  ;;  %v9410_v61 = vor.u32 %v11196_v25, %v9409_v24 }
 0x8e8   : > { %v2633_v22 = vmul.f32 %v11808_v31, %v2632_v49  ;;  %v2630_v1 = vsel %vm2629_vm2, %v11806_v45, %v2626_v39  ;;  %v2987_v45 = vsel %vm2979_vm13, %v2957_v38, 0  ;;  %v2704_v38 = vperm.slane %v13599_v43, 1 }
 0x8e9   : > { %v2677_v40 = vmul.f32 %v2630_v1, %v13472_v47 }
 0x8ea   : > { %v2634_v41 = vmul.f32 0.5, %v2633_v22  ;;  %v13594_v22 = vld [vmem:[%s12869_s23] sm:$0xf]  ;;  %s12433_s23 = smov [#allocation23]  }
 0x8eb   : > { %v2877_v39 = vperm.slane %v13594_v22, 0  ;;  %v2880_v24 = vperm.slane %v13594_v22, 3 }
 0x8ec   : > { %v2635_v0 = vsub.f32 1.5, %v2634_v41 }
 0x8ee   : > { %v2636_v27 = vmul.f32 %v11808_v31, %v2635_v0 }
 0x8f0   : > { %v2640_v58 = vsel %vm2639_vm6, %v11808_v31, %v2636_v27  ;;  %v9361_v31 = vld [vmem:[%s12902_s11 + $0x8] sm:$0xf]  ;;  %v2703_v27 = vperm.slane %v13599_v43, 0  ;;  %s8504_s11 = sshll.u32 %s12433_s23, 4  ;;  %s8505_s11 = int_to_ptr.vmem [resolvable:$true] %s8504_s11 }
 0x8f1   : > { %v2679_v42 = vmul.f32 %v2640_v58, %v13481_v26  ;;  %v9362_v49 = vor.u32 %v11184_v29, %v9361_v31  ;;  %v2879_v31 = vperm.slane %v13594_v22, 2 }
 0x8f2   : > { %v2671_v2 = vpop.permute.xlu1 %2670 }
 0x8f3   : > { %v2680_v60 = vmul.f32 %v2671_v2, %v13483_v55  ;;  %v2699_v23 = vpack.c.bf16 %v2679_v42, %v2677_v40  ;;  %v2878_v2 = vperm.slane %v13594_v22, 1 }
 0x8f5   : > { %v2700_v59 = vpack.c.bf16 %v2680_v60, %v2678_v62  ;;  %2808 = vmatmul.bf16.vlgmr.msrb.gmra.mxu0 %v2699_v23  ;;  %2836 = vmatmul.bf16.vlgmr.msrb.gmra.mxu3 %v2699_v23 }
 0x8f7   : > { %9349 = vmatmul.msk.bf16.vlgmr.msrb.gmra.mxu2 %vm1373_vm4, %v2700_v59 }
 0x8f8   : > { %3023 = vmatpush.bf16.msrb.mxu2 %v2987_v45 }
 0x8fc   : > { %3024 = vmatpush.bf16.msrb.mxu2 %v9410_v61 }
 0x900   : > { %3025 = vmatpush.bf16.msrb.mxu2 %v9394_v28 }
 0x904   : > { %3026 = vmatpush.bf16.msrb.mxu2 %v9378_v48 }
 0x905   : > { %9416 = vmatmul.msk.bf16.vlgmr.msra.gmra.mxu0 %vm2975_vm14, %v13551_v32  ;;  %9418 = vmatmul.msk.bf16.vlgmr.msra.gmra.mxu3 %vm2975_vm14, %v13551_v32 }
 0x907   : > { %9350 = vmatmul.msk.bf16.vlgmr.msra.gmra.mxu2 %vm1373_vm4, %v2700_v59 }
 0x908   : > { %3027 = vmatpush.bf16.msrb.mxu2 %v9362_v49 }
 0x90d   : > { %v3001_v41 = vpop.f32.mrf.mxu1 }
 0x90e   : > { %v3002_v0 = vadd.f32 %v3001_v41, %v2877_v39 }
 0x910   : > { %3063 = vmatpush.xpose.msra.mxu1 %v3002_v0 }
 0x915   : > { %v3003_v29 = vpop.f32.mrf.mxu1 }
 0x916   : > { %v3004_v0 = vadd.f32 %v3003_v29, %v2877_v39 }
 0x917   : > { %9417 = vmatmul.msk.bf16.vlgmr.msrb.gmra.mxu2 %vm2975_vm14, %v13551_v32 }
 0x972   : > { %v2809_v1 = vpop.f32.mrf.mxu0 }
 0x973   : > { %v2810_v58 = vadd.f32 %v2809_v1, %v2703_v27 }
 0x978   : > { %v2837_v57 = vpop.f32.mrf.mxu3 }
 0x979   : > { %v2838_v61 = vadd.f32 %v2837_v57, %v2704_v38 }
 0x97a   : > { %v13604_v40 = vpop.f32.mrf.mxu0  ;;  %v2823_v32 = vpop.f32.mrf.mxu2 }
 0x97b   : > { %v2824_v42 = vadd.f32 %v2823_v32, %v2810_v58 }
 0x97d   : > { %3064 = vmatmul.f32.vlgmr.msra.gmra.mxu1 %v2824_v42 }
 0x980   : > { %v2839_v62 = vpop.f32.mrf.mxu3 }
 0x981   : > { %v13608_v60 = vadd.f32 %v2839_v62, %v2704_v38 }
 0x982   : > { %v13610_v23 = vpop.f32.mrf.mxu2  ;;  %v3015_v59 = vpop.f32.mrf.mxu0 }
 0x983   : > { %v3016_v45 = vadd.f32 %v3015_v59, %v2878_v2 }
 0x985   : > { %3130 = vmatpush.xpose.msra.mxu2 %v3016_v45 }
 0x988   : > { %v3043_v25 = vpop.f32.mrf.mxu3 }
 0x989   : > { %v3044_v63 = vadd.f32 %v3043_v25, %v2880_v24 }
 0x98a   : > { %v2851_v44 = vpop.f32.mrf.mxu2  ;;  %v3017_v28 = vpop.f32.mrf.mxu0 }
 0x98b   : > { %v2852_v30 = vadd.f32 %v2851_v44, %v2838_v61  ;;  %v3018_v46 = vadd.f32 %v3017_v28, %v2878_v2  ;;  %3177 = vmatpush.msrb.mxu1 %v3044_v63 }
 0x98d   : > { %3131 = vmatmul.f32.vlgmr.msra.gmra.mxu2 %v2852_v30  ;;  %3264 = vmatpush.xpose.msra.mxu1 %v3018_v46 }
 0x990   : > { %v3045_v29 = vpop.f32.mrf.mxu3 }
 0x992   : > { %v13613_v48 = vpop.f32.mrf.mxu2 }
 0x99a   : > { %v3029_v49 = vpop.f32.mrf.mxu2 }
 0x99b   : > { %v3030_v41 = vadd.f32 %v3029_v49, %v2879_v31 }
 0x99d   : > { %3110 = vmatpush.msrb.mxu0 %v3030_v41  ;;  %v3046_v41 = vadd.f32 %v3045_v29, %v2880_v24  ;;  %v2812_v24 = vadd.f32 %v13604_v40, %v2703_v27  ;;  %v2854_v27 = vadd.f32 %v13613_v48, %v13608_v60 }
 0x99f   : > { %3197 = vmatpush.xpose.msra.mxu0 %v3004_v0  ;;  %3311 = vmatpush.msrb.mxu3 %v3046_v41 }
 0x9a2   : > { %v3031_v1 = vpop.f32.mrf.mxu2 }
 0x9a3   : > { %v3032_v57 = vadd.f32 %v3031_v1, %v2879_v31 }
 0x9a5   : > { %3244 = vmatpush.msrb.mxu2 %v3032_v57 }
 0x9fa   : > { %v3065_v58 = vpop.f32.mrf.mxu1 }
 0x9fb   : > { %v3066_v32 = vadd.f32 %v3065_v58, %v12897_v3 }
 0x9fd   : > { %v3068_v42 = vsel %vm1428_vm5, %v3066_v32, -inf }
 0x9fe   : > { %3069 = vmax.xlane.f32.xlu2 %v3068_v42 }
 0xa10   : > { %v3132_v38 = vpop.f32.mrf.mxu2 }
 0xa11   : > { %v3133_v2 = vadd.f32 %v3132_v38, %v12897_v3 }
 0xa13   : > { %v3135_v22 = vsel %vm1428_vm5, %v3133_v2, -inf }
 0xa14   : > { %3136 = vmax.xlane.f32.xlu0 %v3135_v22 }
 0xa71   : > { %v3070_v62 = vpop.xlane.xlu2 %3069 }
 0xa72   : > { %v3071_v59 = vsub.f32 %v3066_v32, %v3070_v62 }
 0xa74   : > { %v3072_v39 = vmul.f32 1.442695, %v3071_v59  ;;  %v2826_v59 = vadd.f32 %v13610_v23, %v2812_v24  ;;  %v9545_v24 = vld [vmem:[%s12895_s1 + $0xf0] sm:$0xf] }
 0xa76   : > { %11809 = vpow2.f32 %v3072_v39 }
 0xa7c   : > { %v11810_v45 = vpop.eup %11809 }
 0xa7d   : > { %v3074_v25 = vsel %vm1428_vm5, %v11810_v45, 0.0 }
 0xa7e   : > { %3075 = vadd.xlane.f32.xlu1 %v3074_v25 }
 0xa87   : > { %v3137_v61 = vpop.xlane.xlu0 %3136 }
 0xa88   : > { %v3138_v63 = vsub.f32 %v3133_v2, %v3137_v61 }
 0xa8a   : > { %v3139_v44 = vmul.f32 1.442695, %v3138_v63 }
 0xa8c   : > { %11811 = vpow2.f32 %v3139_v44 }
 0xa92   : > { %v11812_v28 = vpop.eup %11811 }
 0xa93   : > { %v3141_v30 = vsel %vm1428_vm5, %v11812_v28, 0.0 }
 0xa94   : > { %3142 = vadd.xlane.f32.xlu0 %v3141_v30 }
 0xaf1   : > { %v3076_v46 = vpop.xlane.xlu1 %3075 }
 0xaf2   : > { %11813 = vrcp.f32 %v3076_v46  ;;  %v3088_v1 = vand.u32 2147483648, %v3076_v46  ;;  %v3086_v58 = vand.u32 2147483647, %v3076_v46  ;;  %vm3082_vm8 = vweird.f32 %v3076_v46 }
 0xaf4   : > { %v3089_v42 = vor.u32 1.1754944e-38, %v3088_v1  ;;  %vm3087_vm10 = vcmp.eq.f32.partialorder %v3086_v58, 8.507059e+37 }
 0xaf8   : > { %v11814_v31 = vpop.eup %11813 }
 0xaf9   : > { %v3078_v49 = vmul.f32 %v11814_v31, %v3076_v46  ;;  %vm3083_vm7 = vweird.f32 %v11814_v31 }
 0xafa   : > { %vm3084_vm9 = vmor %vm3082_vm8, %vm3083_vm7 }
 0xafb   : > { %v3079_v0 = vsub.f32 1.0, %v3078_v49 }
 0xafd   : > { %v3080_v57 = vmul.f32 %v11814_v31, %v3079_v0 }
 0xaff   : > { %v3081_v32 = vadd.f32 %v11814_v31, %v3080_v57 }
 0xb01   : > { %v3085_v38 = vsel %vm3084_vm9, %v11814_v31, %v3081_v32 }
 0xb02   : > { %v3090_v2 = vsel %vm3087_vm10, %v3089_v42, %v3085_v38 }
 0xb03   : > { %v3091_v22 = vmul.f32 %v11810_v45, %v3090_v2 }
 0xb05   : > { %9419 = vmatmul.msk.f32.vlgmr.msrb.gmra.mxu0 %vm1428_vm5, %v3091_v22 }
 0xb07   : > { %v3143_v62 = vpop.xlane.xlu0 %3142 }
 0xb08   : > { %11815 = vrcp.f32 %v3143_v62  ;;  %v3155_v63 = vand.u32 2147483648, %v3143_v62  ;;  %v3153_v30 = vand.u32 2147483647, %v3143_v62  ;;  %vm3149_vm12 = vweird.f32 %v3143_v62 }
 0xb0a   : > { %v3156_v45 = vor.u32 1.1754944e-38, %v3155_v63  ;;  %vm3154_vm14 = vcmp.eq.f32.partialorder %v3153_v30, 8.507059e+37  ;;  %v9537_v63 = vld [vmem:[%s12895_s1 + $0xe0] sm:$0xf] }
 0xb0d   : > { %3198 = vmatmul.f32.vlgmr.msra.gmra.mxu0 %v2826_v59  ;;  %v11228_v59 = vld [vmem:[%s12895_s1 + $0xf4] sm:$0xf0] }
 0xb0e   : > { %v11816_v39 = vpop.eup %11815 }
 0xb0f   : > { %v3145_v25 = vmul.f32 %v11816_v39, %v3143_v62  ;;  %vm3150_vm11 = vweird.f32 %v11816_v39 }
 0xb10   : > { %vm3151_vm13 = vmor %vm3149_vm12, %vm3150_vm11 }
 0xb11   : > { %v3146_v61 = vsub.f32 1.0, %v3145_v25  ;;  %v9546_v25 = vor.u32 %v11228_v59, %v9545_v24  ;;  %v11209_v24 = vld [vmem:[%s12895_s1 + $0x64] sm:$0xf] }
 0xb13   : > { %v3147_v44 = vmul.f32 %v11816_v39, %v3146_v61  ;;  %v9547_v61 = vld [vmem:[%s12895_s1 + $0xf8] sm:$0xf0]  ;;  %3524 = vmatpush.bf16.msra.mxu2 %v9546_v25  ;;  %v9475_v25 = vld [vmem:[%s12895_s1 + $0x68] sm:$0xf0] }
 0xb15   : > { %v3148_v46 = vadd.f32 %v11816_v39, %v3147_v44  ;;  %v11226_v44 = vld [vmem:[%s12895_s1 + $0xe4] sm:$0xf0] }
 0xb17   : > { %v3152_v31 = vsel %vm3151_vm13, %v11816_v39, %v3148_v46  ;;  %v11227_v39 = vld [vmem:[%s12895_s1 + $0xf4] sm:$0xf]  ;;  %v11225_v46 = vld [vmem:[%s12895_s1 + $0xe4] sm:$0xf] }
 0xb18   : > { %v3157_v29 = vsel %vm3154_vm14, %v3156_v45, %v3152_v31  ;;  %v9550_v30 = vor.u32 %v11227_v39, %v9547_v61  ;;  %v9539_v45 = vld [vmem:[%s12895_s1 + $0xe8] sm:$0xf0]  ;;  %v9481_v31 = vld [vmem:[%s12895_s1 + $0x70] sm:$0xf]  ;;  %v11222_v39 = vld [vmem:[%s12895_s1 + $0xc4] sm:$0xf0] }
 0xb19   : > { %v3158_v43 = vmul.f32 %v11812_v28, %v3157_v29  ;;  %v9538_v29 = vor.u32 %v11226_v44, %v9537_v63  ;;  %v11221_v61 = vld [vmem:[%s12895_s1 + $0xc4] sm:$0xf]  ;;  %v9478_v63 = vor.u32 %v11209_v24, %v9475_v25  ;;  %v9523_v44 = vld [vmem:[%s12895_s1 + $0xc8] sm:$0xf0] }
 0xb1a   : > { %3552 = vmatpush.bf16.msra.mxu3 %v9550_v30  ;;  %v9465_v30 = vld [vmem:[%s12895_s1 + $0x50] sm:$0xf]  ;;  %v9459_v24 = vld [vmem:[%s12895_s1 + $0x48] sm:$0xf0] }
 0xb1b   : > { %9420 = vmatmul.msk.f32.vlgmr.msrb.gmra.mxu1 %vm1428_vm5, %v3158_v43  ;;  %v11212_v43 = vld [vmem:[%s12895_s1 + $0x74] sm:$0xf0]  ;;  %3525 = vmatpush.bf16.msra.mxu2 %v9538_v29  ;;  %v9467_v29 = vld [vmem:[%s12895_s1 + $0x58] sm:$0xf0] }
 0xb23   : > { %3265 = vmatmul.f32.vlgmr.msra.gmra.mxu1 %v2854_v27  ;;  %v9529_v27 = vld [vmem:[%s12895_s1 + $0xd0] sm:$0xf] }
 0xb82   : > { %v13632_v23 = vpop.f32.mrf.mxu0 }
 0xb8a   : > { %v3199_v1 = vpop.f32.mrf.mxu0 }
 0xb8b   : > { %v3200_v57 = vadd.f32 %v3199_v1, %v12897_v3  ;;  %v11224_v1 = vld [vmem:[%s12895_s1 + $0xd4] sm:$0xf0] }
 0xb8d   : > { %v3202_v28 = vsel %vm1428_vm5, %v3200_v57, -inf }
 0xb98   : > { %v13630_v40 = vpop.f32.mrf.mxu1 }
 0xba0   : > { %v3266_v49 = vpop.f32.mrf.mxu1 }
 0xba1   : > { %v3267_v41 = vadd.f32 %v3266_v49, %v12897_v3 }
 0xba3   : > { %v3269_v0 = vsel %vm1428_vm5, %v3267_v41, -inf }
 0xba4   : > { %3270 = vmax.xlane.f32.xlu0 %v3269_v0  ;;  %v9482_v0 = vor.u32 %v11212_v43, %v9481_v31  ;;  %v11207_v31 = vld [vmem:[%s12895_s1 + $0x54] sm:$0xf] }
 0xba6   : > { %3510 = vmatpush.bf16.msrb.mxu0 %v9482_v0 }
 0xbac   : > { %3203 = vmax.xlane.f32.xlu0 %v3202_v28  ;;  %v9483_v28 = vld [vmem:[%s12895_s1 + $0x78] sm:$0xf0] }
 0xc17   : > { %v3271_v60 = vpop.xlane.xlu0 %3270 }
 0xc18   : > { %v3272_v48 = vsub.f32 %v3267_v41, %v3271_v60  ;;  %v9542_v41 = vor.u32 %v11225_v46, %v9539_v45  ;;  %v11223_v60 = vld [vmem:[%s12895_s1 + $0xd4] sm:$0xf]  ;;  %v11208_v46 = vld [vmem:[%s12895_s1 + $0x54] sm:$0xf0] }
 0xc19   : > { %v9466_v45 = vor.u32 %v11208_v46, %v9465_v30  ;;  %v9505_v30 = vld [vmem:[%s12895_s1 + $0xa0] sm:$0xf]  ;;  %v11218_v46 = vld [vmem:[%s12895_s1 + $0xa4] sm:$0xf0] }
 0xc1a   : > { %v3273_v58 = vmul.f32 1.442695, %v3272_v48  ;;  %v9531_v48 = vld [vmem:[%s12895_s1 + $0xd8] sm:$0xf0]  ;;  %3553 = vmatpush.bf16.msra.mxu3 %v9542_v41  ;;  %v9457_v41 = vld [vmem:[%s12895_s1 + $0x40] sm:$0xf] }
 0xc1b   : > { %v9534_v59 = vor.u32 %v11223_v60, %v9531_v48  ;;  %v11220_v60 = vld [vmem:[%s12895_s1 + $0xb4] sm:$0xf0]  ;;  %v9470_v48 = vor.u32 %v11207_v31, %v9467_v29  ;;  %v11203_v29 = vld [vmem:[%s12895_s1 + $0x34] sm:$0xf] }
 0xc1c   : > { %11817 = vpow2.f32 %v3273_v58  ;;  %v11204_v31 = vld [vmem:[%s12895_s1 + $0x34] sm:$0xf0] }
 0xc1e   : > { %3554 = vmatpush.bf16.msra.mxu3 %v9534_v59 }
 0xc1f   : > { %v3204_v32 = vpop.xlane.xlu0 %3203 }
 0xc20   : > { %v3205_v42 = vsub.f32 %v3200_v57, %v3204_v32  ;;  %v11211_v57 = vld [vmem:[%s12895_s1 + $0x74] sm:$0xf]  ;;  %v9473_v32 = vld [vmem:[%s12895_s1 + $0x60] sm:$0xf] }
 0xc21   : > { %v9486_v58 = vor.u32 %v11211_v57, %v9483_v28  ;;  %v9526_v57 = vor.u32 %v11221_v61, %v9523_v44  ;;  %v9513_v28 = vld [vmem:[%s12895_s1 + $0xb0] sm:$0xf] }
 0xc22   : > { %v13638_v38 = vpop.eup %11817  ;;  %v3206_v2 = vmul.f32 1.442695, %v3205_v42  ;;  %v11210_v42 = vld [vmem:[%s12895_s1 + $0x64] sm:$0xf0]  ;;  %v9514_v25 = vor.u32 %v11220_v60, %v9513_v28  ;;  %v9449_v61 = vld [vmem:[%s12895_s1 + $0x30] sm:$0xf] }
 0xc23   : > { %v3275_v3 = vsel %vm1428_vm5, %v13638_v38, 0.0  ;;  %3538 = vmatpush.bf16.msrb.mxu1 %v9486_v58  ;;  %v11206_v58 = vld [vmem:[%s12895_s1 + $0x44] sm:$0xf0]  ;;  %3555 = vmatpush.bf16.msra.mxu3 %v9526_v57  ;;  %v9507_v28 = vld [vmem:[%s12895_s1 + $0xa8] sm:$0xf0]  ;;  %v9450_v60 = vor.u32 %v11204_v31, %v9449_v61 }
 0xc24   : > { %11819 = vpow2.f32 %v3206_v2  ;;  %3276 = vadd.xlane.f32.xlu0 %v3275_v3  ;;  %v9530_v2 = vor.u32 %v11224_v1, %v9529_v27  ;;  %v9474_v3 = vor.u32 %v11210_v42, %v9473_v32  ;;  %v11219_v32 = vld [vmem:[%s12895_s1 + $0xb4] sm:$0xf]  ;;  %v9515_v42 = vld [vmem:[%s12895_s1 + $0xb8] sm:$0xf0] }
 0xc25   : > { %v9518_v44 = vor.u32 %v11219_v32, %v9515_v42  ;;  %v9499_v31 = vld [vmem:[%s12895_s1 + $0x98] sm:$0xf0] }
 0xc26   : > { %3511 = vmatpush.bf16.msrb.mxu0 %v9474_v3  ;;  %3526 = vmatpush.bf16.msra.mxu2 %v9530_v2  ;;  %v11205_v2 = vld [vmem:[%s12895_s1 + $0x44] sm:$0xf] }
 0xc27   : > { %3539 = vmatpush.bf16.msrb.mxu1 %v9478_v63  ;;  %3556 = vmatpush.bf16.msra.mxu3 %v9518_v44 }
 0xc2a   : > { %v13642_v22 = vpop.eup %11819  ;;  %3512 = vmatpush.bf16.msrb.mxu0 %v9466_v45  ;;  %v9462_v45 = vor.u32 %v11205_v2, %v9459_v24  ;;  %v11216_v2 = vld [vmem:[%s12895_s1 + $0x94] sm:$0xf0] }
 0xc2b   : > { %v3208_v62 = vsel %vm1428_vm5, %v13642_v22, 0.0  ;;  %3540 = vmatpush.bf16.msrb.mxu1 %v9470_v48  ;;  %v9506_v48 = vor.u32 %v11218_v46, %v9505_v30 }
 0xc2c   : > { %3209 = vadd.xlane.f32.xlu0 %v3208_v62  ;;  %v9521_v62 = vld [vmem:[%s12895_s1 + $0xc0] sm:$0xf] }
 0xc2d   : > { %v9522_v27 = vor.u32 %v11222_v39, %v9521_v62  ;;  %v9458_v62 = vor.u32 %v11206_v58, %v9457_v41  ;;  %v9451_v41 = vld [vmem:[%s12895_s1 + $0x38] sm:$0xf0] }
 0xc2f   : > { %3527 = vmatpush.bf16.msra.mxu2 %v9522_v27  ;;  %3513 = vmatpush.bf16.msrb.mxu0 %v9458_v62  ;;  %v11217_v27 = vld [vmem:[%s12895_s1 + $0xa4] sm:$0xf] }
 0xc30   : > { %3541 = vmatpush.bf16.msrb.mxu1 %v9462_v45  ;;  %v9510_v24 = vor.u32 %v11217_v27, %v9507_v28  ;;  %v11202_v27 = vld [vmem:[%s12895_s1 + $0x24] sm:$0xf0] }
 0xc32   : > { %3557 = vmatpush.bf16.msra.mxu3 %v9510_v24 }
 0xc33   : > { %3528 = vmatpush.bf16.msra.mxu2 %v9514_v25  ;;  %3514 = vmatpush.bf16.msrb.mxu0 %v9450_v60  ;;  %v11214_v60 = vld [vmem:[%s12895_s1 + $0x84] sm:$0xf0] }
 0xc37   : > { %3529 = vmatpush.bf16.msra.mxu2 %v9506_v48  ;;  %v9443_v48 = vld [vmem:[%s12895_s1 + $0x28] sm:$0xf0] }
 0xc97   : > { %v13657_v49 = vpop.xlane.xlu0 %3276 }
 0xc98   : > { %11821 = vrcp.f32 %v13657_v49  ;;  %v3287_v59 = vand.u32 2147483647, %v13657_v49  ;;  %v3289_v39 = vand.u32 2147483648, %v13657_v49  ;;  %vm3283_vm0 = vweird.f32 %v13657_v49 }
 0xc9a   : > { %v3290_v57 = vor.u32 1.1754944e-38, %v3289_v39  ;;  %vm3288_vm2 = vcmp.eq.f32.partialorder %v3287_v59, 8.507059e+37  ;;  %v11215_v39 = vld [vmem:[%s12895_s1 + $0x94] sm:$0xf] }
 0xc9b   : > { %v9502_v30 = vor.u32 %v11215_v39, %v9499_v31  ;;  %v9425_v39 = vld [vmem:[%s12895_s1] sm:$0xf]  ;;  %v11198_v31 = vld [vmem:[%s12895_s1 + $0x4] sm:$0xf0] }
 0xc9d   : > { %3558 = vmatpush.bf16.msra.mxu3 %v9502_v30 }
 0xc9e   : > { %v11822_v43 = vpop.eup %11821 }
 0xc9f   : > { %v3279_v0 = vmul.f32 %v11822_v43, %v13657_v49  ;;  %v13679_v1 = vpop.xlane.xlu0 %3209  ;;  %vm3284_vm15 = vweird.f32 %v11822_v43  ;;  %v9497_v49 = vld [vmem:[%s12895_s1 + $0x90] sm:$0xf] }
 0xca0   : > { %11823 = vrcp.f32 %v13679_v1  ;;  %vm3285_vm1 = vmor %vm3283_vm0, %vm3284_vm15  ;;  %v3222_v25 = vand.u32 2147483648, %v13679_v1  ;;  %v3220_v44 = vand.u32 2147483647, %v13679_v1  ;;  %vm3216_vm6 = vweird.f32 %v13679_v1 }
 0xca1   : > { %v3280_v3 = vsub.f32 1.0, %v3279_v0 }
 0xca2   : > { %v3223_v46 = vor.u32 1.1754944e-38, %v3222_v25  ;;  %vm3221_vm8 = vcmp.eq.f32.partialorder %v3220_v44, 8.507059e+37  ;;  %v11197_v25 = vld [vmem:[%s12895_s1 + $0x4] sm:$0xf] }
 0xca3   : > { %v3281_v63 = vmul.f32 %v11822_v43, %v3280_v3  ;;  %v9454_v3 = vor.u32 %v11203_v29, %v9451_v41 }
 0xca5   : > { %v3282_v0 = vadd.f32 %v11822_v43, %v3281_v63  ;;  %3542 = vmatpush.bf16.msrb.mxu1 %v9454_v3  ;;  %v11200_v3 = vld [vmem:[%s12895_s1 + $0x14] sm:$0xf0] }
 0xca6   : > { %v11824_v58 = vpop.eup %11823 }
 0xca7   : > { %v3286_v32 = vsel %vm3285_vm1, %v11822_v43, %v3282_v0  ;;  %v3212_v42 = vmul.f32 %v11824_v58, %v13679_v1  ;;  %v9498_v43 = vor.u32 %v11216_v2, %v9497_v49  ;;  %vm3217_vm3 = vweird.f32 %v11824_v58  ;;  %v9441_v0 = vld [vmem:[%s12895_s1 + $0x20] sm:$0xf]  ;;  %v9491_v49 = vld [vmem:[%s12895_s1 + $0x88] sm:$0xf0]  ;;  %v9433_v2 = vld [vmem:[%s12895_s1 + $0x10] sm:$0xf] }
 0xca8   : > { %v3291_v62 = vsel %vm3288_vm2, %v3290_v57, %v3286_v32  ;;  %vm3218_vm7 = vmor %vm3216_vm6, %vm3217_vm3  ;;  %v9489_v1 = vld [vmem:[%s12895_s1 + $0x80] sm:$0xf]  ;;  %v9442_v28 = vor.u32 %v11202_v27, %v9441_v0  ;;  %v11201_v57 = vld [vmem:[%s12895_s1 + $0x24] sm:$0xf]  ;;  %v9434_v24 = vor.u32 %v11200_v3, %v9433_v2  ;;  %vm6868_vm6 = vcmask 261120  }
 0xca9   : > { %v3213_v61 = vsub.f32 1.0, %v3212_v42  ;;  %v3292_v63 = vmul.f32 %v13638_v38, %v3291_v62  ;;  %3530 = vmatpush.bf16.msra.mxu2 %v9498_v43  ;;  %v9446_v32 = vor.u32 %v11201_v57, %v9443_v48  ;;  %v11213_v42 = vld [vmem:[%s12895_s1 + $0x84] sm:$0xf]  ;;  %v11199_v62 = vld [vmem:[%s12895_s1 + $0x14] sm:$0xf]  ;;  %v9426_v43 = vor.u32 %v11198_v31, %v9425_v39 }
 0xcaa   : > { %3515 = vmatpush.bf16.msrb.mxu0 %v9442_v28 }
 0xcab   : > { %v3214_v59 = vmul.f32 %v11824_v58, %v3213_v61  ;;  %9422 = vmatmul.msk.f32.vlgmr.msrb.gmra.mxu3 %vm1428_vm5, %v3292_v63  ;;  %3543 = vmatpush.bf16.msrb.mxu1 %v9446_v32  ;;  %v9435_v61 = vld [vmem:[%s12895_s1 + $0x18] sm:$0xf0] }
 0xcac   : > { %v9438_v63 = vor.u32 %v11199_v62, %v9435_v61 }
 0xcad   : > { %v3215_v38 = vadd.f32 %v11824_v58, %v3214_v59  ;;  %v9427_v59 = vld [vmem:[%s12895_s1 + $0x8] sm:$0xf0]  ;;  %s8506_s1 = sshll.u32 %s16426_s10, 4  ;;  %s8507_s1 = int_to_ptr.hbm [resolvable:$true] %s8506_s1 }
 0xcae   : > { %3516 = vmatpush.bf16.msrb.mxu0 %v9434_v24  ;;  %v9430_v44 = vor.u32 %v11197_v25, %v9427_v59 }
 0xcaf   : > { %v3219_v45 = vsel %vm3218_vm7, %v11824_v58, %v3215_v38  ;;  %v9490_v58 = vor.u32 %v11214_v60, %v9489_v1  ;;  %3544 = vmatpush.bf16.msrb.mxu1 %v9438_v63 }
 0xcb0   : > { %v3224_v29 = vsel %vm3221_vm8, %v3223_v46, %v3219_v45 }
 0xcb1   : > { %v3225_v41 = vmul.f32 %v13642_v22, %v3224_v29  ;;  %v9494_v22 = vor.u32 %v11213_v42, %v9491_v49  ;;  %3531 = vmatpush.bf16.msra.mxu2 %v9490_v58 }
 0xcb2   : > { %3517 = vmatpush.bf16.msrb.mxu0 %v9426_v43 }
 0xcb3   : > { %9421 = vmatmul.msk.f32.vlgmr.msrb.gmra.mxu2 %vm1428_vm5, %v3225_v41  ;;  %3559 = vmatpush.bf16.msra.mxu3 %v9494_v22 }
 0xcb4   : > { %3545 = vmatpush.bf16.msrb.mxu1 %v9430_v44 }
 0xcb5   : > { %3627 = vmatpush.msrb.mxu2 %v12997_v21 }
 0xcb6   : > { %3590 = vmatpush.msra.mxu0 %v12987_v19 }
 0xcb7   : > { %3628 = vmatpush.msrb.mxu2 %v12992_v20 }
 0xcb8   : > { %3591 = vmatpush.msra.mxu0 %v12982_v18 }
 0xcba   : > { %3592 = vmatpush.msra.mxu0 %v12977_v17 }
 0xcbc   : > { %3593 = vmatpush.msra.mxu0 %v12972_v16 }
 0xcbe   : > { %3594 = vmatpush.msra.mxu0 %v12967_v15 }
 0xcc0   : > { %3595 = vmatpush.msra.mxu0 %v12962_v14 }
 0xcc2   : > { %3596 = vmatpush.msra.mxu0 %v12957_v13 }
 0xcc4   : > { %3597 = vmatpush.msra.mxu0 %v12952_v12 }
 0xcc6   : > { %3598 = vmatpush.msra.mxu0 %v12947_v11 }
 0xcc8   : > { %3599 = vmatpush.msra.mxu0 %v12942_v10 }
 0xcca   : > { %3600 = vmatpush.msra.mxu0 %v12937_v9 }
 0xccc   : > { %3601 = vmatpush.msra.mxu0 %v12932_v8  ;;  %v3570_v8 = vld [vmem:[%s16192_s30] sm:$0x3] }
 0xccd   : > { %v3572_v15 = vperm.slane %v3570_v8, 0  ;;  %v3573_v19 = vperm.slane %v3570_v8, 1 }
 0xcce   : > { %3602 = vmatpush.msra.mxu0 %v12927_v7 }
 0xcd0   : > { %3603 = vmatpush.msra.mxu0 %v12917_v6 }
 0xcd2   : > { %3604 = vmatpush.msra.mxu0 %v12912_v5 }
 0xcd4   : > { %3605 = vmatpush.msra.mxu0 %v12907_v4 }
 0xd2e   : > { %v3313_v18 = vpop.f32.mrf.mxu3 }
 0xd2f   : > { %v3349_v16 = vpack.c.bf16 %v3313_v18, %v13630_v40 }
 0xd31   : > { %3532 = vmatmul.bf16.vlgmr.msra.gmra.mxu2 %v3349_v16  ;;  %3560 = vmatmul.bf16.vlgmr.msra.gmra.mxu3 %v3349_v16 }
 0xd36   : > { %v3246_v12 = vpop.f32.mrf.mxu2 }
 0xd37   : > { %v3348_v10 = vpack.c.bf16 %v3246_v12, %v13632_v23 }
 0xd39   : > { %3518 = vmatmul.bf16.vlgmr.msrb.gmra.mxu0 %v3348_v10  ;;  %3546 = vmatmul.bf16.vlgmr.msrb.gmra.mxu1 %v3348_v10  ;;  %v10535_v10 = vld [vmem:[%s12872_s12 + $0x7a8] sm:$0xf] }
 0xdb4   : > { %v3533_v9 = vpop.f32.mrf.mxu2  ;;  %v3561_v11 = vpop.f32.mrf.mxu3 }
 0xdb6   : > { %v3519_v13 = vpop.f32.mrf.mxu0  ;;  %v3547_v14 = vpop.f32.mrf.mxu1 }
 0xdb7   : > { %v3534_v7 = vadd.f32 %v3533_v9, %v3519_v13  ;;  %v3562_v17 = vadd.f32 %v3561_v11, %v3547_v14  ;;  %v11491_v9 = vld [vmem:[%s12872_s12 + $0x830] sm:$0xf0]  ;;  %v11474_v11 = vld [vmem:[%s12872_s12 + $0x7ac] sm:$0xf]  ;;  %v10537_v13 = vld [vmem:[%s12872_s12 + $0x834] sm:$0xf0] }
 0xdb8   : > { %v10536_v8 = vor.u32 %v11491_v9, %v10535_v10  ;;  %v10543_v14 = vld [vmem:[%s12872_s12 + $0x7b0] sm:$0xf]  ;;  %v9843_v10 = vld [vmem:[%s12872_s12 + $0x238] sm:$0xf]  ;;  %v11317_v9 = vld [vmem:[%s12872_s12 + $0x2c0] sm:$0xf0] }
 0xdb9   : > { %v3566_v6 = vadd.f32 %v3534_v7, %v13472_v47  ;;  %v3567_v5 = vadd.f32 %v3562_v17, %v13474_v56  ;;  %v11492_v7 = vld [vmem:[%s12872_s12 + $0x838] sm:$0xf0] }
 0xdba   : > { %v10544_v17 = vor.u32 %v11492_v7, %v10543_v14  ;;  %5701 = vmatpush.bf16.msra.mxu1 %v10536_v8  ;;  %v9844_v8 = vor.u32 %v11317_v9, %v9843_v10  ;;  %v11281_v14 = vld [vmem:[%s12872_s12 + $0x1a0] sm:$0xf0]  ;;  %v11264_v7 = vld [vmem:[%s12872_s12 + $0x11c] sm:$0xf] }
 0xdbb   : > { %v13753_v20 = vadd.f32 %v3572_v15, %v3566_v6  ;;  %v13755_v4 = vadd.f32 %v3573_v19, %v3567_v5  ;;  %v11456_v6 = vld [vmem:[%s12872_s12 + $0x718] sm:$0xf0]  ;;  %v11439_v5 = vld [vmem:[%s12872_s12 + $0x694] sm:$0xf] }
 0xdbc   : > { %v3535_v40 = vpop.f32.mrf.mxu2  ;;  %v3563_v23 = vpop.f32.mrf.mxu3  ;;  %5757 = vmatpush.bf16.msrb.mxu0 %v10544_v17  ;;  %v9697_v17 = vld [vmem:[%s12872_s12 + $0x1a4] sm:$0xf0] }
 0xdbd   : > { %16193 = vst [vmem:[#allocation62_spill] sm:$0xff] %v13753_v20  ;;  %v3581_v21 = vmul.f32 %v13755_v4, %v13755_v4  ;;  %v3580_v30 = vmul.f32 %v13753_v20, %v13753_v20 }
 0xdbe   : > { %16194 = vst [vmem:[#allocation63_spill] sm:$0xff] %v13755_v4  ;;  %v3521_v38 = vpop.f32.mrf.mxu0  ;;  %v3549_v46 = vpop.f32.mrf.mxu1 }
 0xdbf   : > { %v3536_v45 = vadd.f32 %v3535_v40, %v3521_v38  ;;  %v3564_v29 = vadd.f32 %v3563_v23, %v3549_v46  ;;  %3606 = vmatmul.f32.vlgmr.msra.gmra.mxu0 %v3580_v30  ;;  %9551 = vmatmul.msk.f32.vlgmr.msrb.gmra.mxu2 %vm1373_vm4, %v3581_v21  ;;  %v10397_v40 = vld [vmem:[%s12872_s12 + $0x71c] sm:$0xf0]  ;;  %v10403_v23 = vld [vmem:[%s12872_s12 + $0x698] sm:$0xf]  ;;  %v11457_v30 = vld [vmem:[%s12872_s12 + $0x720] sm:$0xf0] }
 0xdc0   : > { %v10400_v38 = vor.u32 %v11439_v5, %v10397_v40  ;;  %v10404_v46 = vor.u32 %v11457_v30, %v10403_v23  ;;  %v9700_v5 = vor.u32 %v11264_v7, %v9697_v17  ;;  %v10675_v40 = vld [vmem:[%s12872_s12 + $0x8c0] sm:$0xf]  ;;  %v11526_v23 = vld [vmem:[%s12872_s12 + $0x948] sm:$0xf0] }
 0xdc1   : > { %v3568_v47 = vadd.f32 %v3536_v45, %v13481_v26  ;;  %v3569_v56 = vadd.f32 %v3564_v29, %v13483_v55  ;;  %v10255_v45 = vld [vmem:[%s12872_s12 + $0x578] sm:$0xf]  ;;  %v11421_v29 = vld [vmem:[%s12872_s12 + $0x600] sm:$0xf0]  ;;  %v10676_v30 = vor.u32 %v11526_v23, %v10675_v40  ;;  %v10133_v7 = vld [vmem:[%s12872_s12 + $0x4fc] sm:$0xf0] }
 0xdc2   : > { %5758 = vmatpush.bf16.msrb.mxu0 %v10404_v46  ;;  %v11246_v46 = vld [vmem:[%s12872_s12 + $0x88] sm:$0xf0]  ;;  %v11493_v23 = vld [vmem:[%s12872_s12 + $0x840] sm:$0xf0] }
 0xdc3   : > { %v13764_v41 = vadd.f32 %v3572_v15, %v3568_v47  ;;  %v13766_v0 = vadd.f32 %v3573_v19, %v3569_v56  ;;  %v10540_v15 = vor.u32 %v11474_v11, %v10537_v13  ;;  %v10395_v19 = vld [vmem:[%s12872_s12 + $0x690] sm:$0xf]  ;;  %v11404_v47 = vld [vmem:[%s12872_s12 + $0x57c] sm:$0xf]  ;;  %v10256_v56 = vor.u32 %v11421_v29, %v10255_v45  ;;  %v9695_v13 = vld [vmem:[%s12872_s12 + $0x118] sm:$0xf]  ;;  %5722 = vmatpush.bf16.msrb.mxu3 %v10676_v30 }
 0xdc4   : > { %v10396_v21 = vor.u32 %v11456_v6, %v10395_v19  ;;  %v9703_v19 = vld [vmem:[%s12872_s12 + $0x120] sm:$0xf]  ;;  %v11282_v6 = vld [vmem:[%s12872_s12 + $0x1a8] sm:$0xf0]  ;;  %v11229_v45 = vld [vmem:[%s12872_s12 + $0x4] sm:$0xf] }
 0xdc5   : > { %16195 = vst [vmem:[#allocation64_spill] sm:$0xff] %v13764_v41  ;;  %v3582_v27 = vmul.f32 %v13764_v41, %v13764_v41  ;;  %v3583_v1 = vmul.f32 %v13766_v0, %v13766_v0  ;;  %5729 = vmatpush.bf16.msra.mxu2 %v10540_v15  ;;  %v9696_v15 = vor.u32 %v11281_v14, %v9695_v13  ;;  %v11475_v13 = vld [vmem:[%s12872_s12 + $0x7b4] sm:$0xf]  ;;  %v10545_v14 = vld [vmem:[%s12872_s12 + $0x83c] sm:$0xf0] }
 0xdc6   : > { %16196 = vst [vmem:[#allocation65_spill] sm:$0xff] %v13766_v0  ;;  %5702 = vmatpush.bf16.msra.mxu1 %v10396_v21  ;;  %v9704_v21 = vor.u32 %v11282_v6, %v9703_v19  ;;  %v10548_v40 = vor.u32 %v11475_v13, %v10545_v14  ;;  %v11476_v30 = vld [vmem:[%s12872_s12 + $0x7bc] sm:$0xf]  ;;  %v11371_v13 = vld [vmem:[%s12872_s12 + $0x474] sm:$0xf] }
 0xdc7   : > { %3609 = vmatmul.f32.gmra.mxu0 %v3582_v27  ;;  %9552 = vmatmul.msk.f32.gmra.mxu2 %vm1373_vm4, %v3583_v1  ;;  %v10257_v27 = vld [vmem:[%s12872_s12 + $0x604] sm:$0xf0]  ;;  %v10263_v1 = vld [vmem:[%s12872_s12 + $0x580] sm:$0xf] }
 0xdc9   : > { %5730 = vmatpush.bf16.msra.mxu2 %v10400_v38  ;;  %v9555_v38 = vld [vmem:[%s12872_s12] sm:$0xf] }
 0xdca   : > { %5703 = vmatpush.bf16.msra.mxu1 %v10256_v56  ;;  %v9556_v29 = vor.u32 %v11246_v46, %v9555_v38  ;;  %v11509_v56 = vld [vmem:[%s12872_s12 + $0x8c4] sm:$0xf] }
 0xe3c   : > { %v3607_v28 = vpop.f32.mrf.mxu0 }
 0xe42   : > { %v3630_v60 = vpop.f32.mrf.mxu2 }
 0xe43   : > { %v3631_v57 = vadd.f32 %v3630_v60, %v3607_v28  ;;  %v11422_v28 = vld [vmem:[%s12872_s12 + $0x608] sm:$0xf0]  ;;  %v10260_v60 = vor.u32 %v11404_v47, %v10257_v27  ;;  %v9557_v47 = vld [vmem:[%s12872_s12 + $0x8c] sm:$0xf0] }
 0xe44   : > { %v3610_v58 = vpop.f32.mrf.mxu0  ;;  %v10677_v27 = vld [vmem:[%s12872_s12 + $0x94c] sm:$0xf0] }
 0xe45   : > { %v3668_v48 = vadd.f32 1e-06, %v3631_v57  ;;  %v3636_v26 = vand.u32 2147483647, %v3631_v57  ;;  %v10264_v57 = vor.u32 %v11422_v28, %v10263_v1  ;;  %5731 = vmatpush.bf16.msra.mxu2 %v10260_v60  ;;  %v9560_v28 = vor.u32 %v11229_v45, %v9557_v47  ;;  %v10553_v45 = vld [vmem:[%s12872_s12 + $0x844] sm:$0xf0] }
 0xe46   : > { %v10680_v60 = vor.u32 %v11509_v56, %v10677_v27  ;;  %v11494_v47 = vld [vmem:[%s12872_s12 + $0x848] sm:$0xf0] }
 0xe47   : > { %11825 = vrsqrt.f32 %v3668_v48  ;;  %v3638_v55 = vsel %vm1428_vm5, %v3636_v26, 0.0  ;;  %vm3676_vm10 = vweird.f32 %v3668_v48  ;;  %5759 = vmatpush.bf16.msrb.mxu0 %v10264_v57  ;;  %v11386_v26 = vld [vmem:[%s12872_s12 + $0x4e8] sm:$0xf0]  ;;  %v9563_v57 = vld [vmem:[%s12872_s12 + $0x8] sm:$0xf] }
 0xe48   : > { %3639 = vadd.xlane.f32.xlu2 %v3638_v55  ;;  %v11369_v55 = vld [vmem:[%s12872_s12 + $0x464] sm:$0xf]  ;;  %5750 = vmatpush.bf16.msra.mxu3 %v10680_v60 }
 0xe4a   : > { %v3633_v32 = vpop.f32.mrf.mxu2 }
 0xe4b   : > { %v3634_v42 = vadd.f32 %v3633_v32, %v3610_v58  ;;  %v10117_v32 = vld [vmem:[%s12872_s12 + $0x4ec] sm:$0xf0] }
 0xe4d   : > { %v11826_v49 = vpop.eup %11825  ;;  %v3669_v22 = vadd.f32 1e-06, %v3634_v42  ;;  %v3637_v2 = vand.u32 2147483647, %v3634_v42  ;;  %v10123_v42 = vld [vmem:[%s12872_s12 + $0x468] sm:$0xf] }
 0xe4e   : > { %v3671_v3 = vmul.f32 %v11826_v49, %v3668_v48  ;;  %vm3677_vm9 = vweird.f32 %v11826_v49  ;;  %v10115_v48 = vld [vmem:[%s12872_s12 + $0x460] sm:$0xf] }
 0xe4f   : > { %11827 = vrsqrt.f32 %v3669_v22  ;;  %v3641_v62 = vsel %vm1428_vm5, %v3637_v2, 0.0  ;;  %vm3678_vm11 = vmor %vm3676_vm10, %vm3677_vm9  ;;  %vm3686_vm12 = vweird.f32 %v3669_v22  ;;  %v10116_v58 = vor.u32 %v11386_v26, %v10115_v48  ;;  %v11247_v48 = vld [vmem:[%s12872_s12 + $0x90] sm:$0xf0] }
 0xe50   : > { %v3672_v24 = vmul.f32 %v11826_v49, %v3671_v3  ;;  %3642 = vadd.xlane.f32.xlu0 %v3641_v62  ;;  %v9975_v3 = vld [vmem:[%s12872_s12 + $0x348] sm:$0xf]  ;;  %v11351_v62 = vld [vmem:[%s12872_s12 + $0x3d0] sm:$0xf0] }
 0xe51   : > { %5704 = vmatpush.bf16.msra.mxu1 %v10116_v58  ;;  %v10683_v58 = vld [vmem:[%s12872_s12 + $0x8c8] sm:$0xf] }
 0xe52   : > { %v3673_v61 = vmul.f32 0.5, %v3672_v24  ;;  %v11334_v24 = vld [vmem:[%s12872_s12 + $0x34c] sm:$0xf] }
 0xe54   : > { %v3674_v31 = vsub.f32 1.5, %v3673_v61  ;;  %v9976_v61 = vor.u32 %v11351_v62, %v9975_v3 }
 0xe55   : > { %v11828_v63 = vpop.eup %11827 }
 0xe56   : > { %v3681_v39 = vmul.f32 %v11828_v63, %v3669_v22  ;;  %v3675_v59 = vmul.f32 %v11826_v49, %v3674_v31  ;;  %vm3687_vm5 = vweird.f32 %v11828_v63  ;;  %v10120_v22 = vor.u32 %v11369_v55, %v10117_v32  ;;  %v11352_v31 = vld [vmem:[%s12872_s12 + $0x3d8] sm:$0xf0]  ;;  %5705 = vmatpush.bf16.msra.mxu1 %v9976_v61  ;;  %v11527_v32 = vld [vmem:[%s12872_s12 + $0x950] sm:$0xf0] }
 0xe57   : > { %vm3688_vm13 = vmor %vm3686_vm12, %vm3687_vm5  ;;  %v9564_v55 = vor.u32 %v11247_v48, %v9563_v57  ;;  %v10556_v48 = vor.u32 %v11476_v30, %v10553_v45  ;;  %v11353_v30 = vld [vmem:[%s12872_s12 + $0x3e0] sm:$0xf0] }
 0xe58   : > { %v3682_v25 = vmul.f32 %v11828_v63, %v3681_v39  ;;  %v3679_v18 = vsel %vm3678_vm11, %v11826_v49, %v3675_v59  ;;  %v11387_v49 = vld [vmem:[%s12872_s12 + $0x4f0] sm:$0xf0]  ;;  %5732 = vmatpush.bf16.msra.mxu2 %v10120_v22  ;;  %v9983_v39 = vld [vmem:[%s12872_s12 + $0x350] sm:$0xf]  ;;  %v10685_v22 = vld [vmem:[%s12872_s12 + $0x954] sm:$0xf0] }
 0xe59   : > { %v10124_v2 = vor.u32 %v11387_v49, %v10123_v42  ;;  %v9835_v59 = vld [vmem:[%s12872_s12 + $0x230] sm:$0xf]  ;;  %v10684_v42 = vor.u32 %v11527_v32, %v10683_v58  ;;  %v11510_v49 = vld [vmem:[%s12872_s12 + $0x8cc] sm:$0xf]  ;;  %v11441_v32 = vld [vmem:[%s12872_s12 + $0x6a4] sm:$0xf] }
 0xe5a   : > { %v3683_v43 = vmul.f32 0.5, %v3682_v25  ;;  %v10688_v62 = vor.u32 %v11510_v49, %v10685_v22  ;;  %v11458_v58 = vld [vmem:[%s12872_s12 + $0x728] sm:$0xf0]  ;;  %v10413_v49 = vld [vmem:[%s12872_s12 + $0x72c] sm:$0xf0] }
 0xe5b   : > { %5760 = vmatpush.bf16.msrb.mxu0 %v10124_v2  ;;  %v10691_v2 = vld [vmem:[%s12872_s12 + $0x8d0] sm:$0xf]  ;;  %v10419_v22 = vld [vmem:[%s12872_s12 + $0x6a8] sm:$0xf] }
 0xe5c   : > { %v3684_v44 = vsub.f32 1.5, %v3683_v43  ;;  %v9984_v43 = vor.u32 %v11352_v31, %v9983_v39 }
 0xe5e   : > { %v3685_v16 = vmul.f32 %v11828_v63, %v3684_v44  ;;  %v11316_v44 = vld [vmem:[%s12872_s12 + $0x2b8] sm:$0xf0] }
 0xe5f   : > { %5761 = vmatpush.bf16.msrb.mxu0 %v9984_v43 }
 0xe60   : > { %3692 = vperm.xlu2 %11772, %v3679_v18   ;;  %v3689_v12 = vsel %vm3688_vm13, %v11828_v63, %v3685_v16  ;;  %v9977_v63 = vld [vmem:[%s12872_s12 + $0x3d4] sm:$0xf0]  ;;  %v11299_v18 = vld [vmem:[%s12872_s12 + $0x234] sm:$0xf]  ;;  %v9836_v16 = vor.u32 %v11316_v44, %v9835_v59 }
 0xe61   : > { %v9980_v25 = vor.u32 %v11334_v24, %v9977_v63  ;;  %v11528_v24 = vld [vmem:[%s12872_s12 + $0x958] sm:$0xf0] }
 0xe62   : > { %5706 = vmatpush.bf16.msra.mxu1 %v9836_v16  ;;  %v10692_v61 = vor.u32 %v11528_v24, %v10691_v2  ;;  %v11459_v2 = vld [vmem:[%s12872_s12 + $0x730] sm:$0xf0] }
 0xe63   : > { %5733 = vmatpush.bf16.msra.mxu2 %v9980_v25  ;;  %5762 = vmatpush.bf16.msrb.mxu0 %v9844_v8 }
 0xe64   : > { %3697 = vperm.xlu0 %11771, %v3689_v12   ;;  %v9837_v12 = vld [vmem:[%s12872_s12 + $0x2bc] sm:$0xf0] }
 0xe65   : > { %v9840_v11 = vor.u32 %v11299_v18, %v9837_v12 }
 0xe66   : > { %5707 = vmatpush.bf16.msra.mxu1 %v9696_v15 }
 0xe67   : > { %5734 = vmatpush.bf16.msra.mxu2 %v9840_v11  ;;  %5763 = vmatpush.bf16.msrb.mxu0 %v9704_v21  ;;  %v10551_v21 = vld [vmem:[%s12872_s12 + $0x7b8] sm:$0xf] }
 0xe68   : > { %v10552_v60 = vor.u32 %v11493_v23, %v10551_v21  ;;  %v10136_v21 = vor.u32 %v11371_v13, %v10133_v7  ;;  %v9991_v23 = vld [vmem:[%s12872_s12 + $0x358] sm:$0xf]  ;;  %v11248_v13 = vld [vmem:[%s12872_s12 + $0x98] sm:$0xf0]  ;;  %v11231_v7 = vld [vmem:[%s12872_s12 + $0x14] sm:$0xf] }
 0xe6a   : > { %5708 = vmatpush.bf16.msra.mxu1 %v9556_v29  ;;  %v10559_v29 = vld [vmem:[%s12872_s12 + $0x7c0] sm:$0xf] }
 0xe6b   : > { %5735 = vmatpush.bf16.msra.mxu2 %v9700_v5  ;;  %5764 = vmatpush.bf16.msrb.mxu0 %v9564_v55  ;;  %v10411_v55 = vld [vmem:[%s12872_s12 + $0x6a0] sm:$0xf] }
 0xe6c   : > { %v10412_v24 = vor.u32 %v11458_v58, %v10411_v55  ;;  %v11318_v55 = vld [vmem:[%s12872_s12 + $0x2c8] sm:$0xf0]  ;;  %v11301_v58 = vld [vmem:[%s12872_s12 + $0x244] sm:$0xf] }
 0xe6e   : > { %5778 = vmatpush.bf16.msrb.mxu1 %v10684_v42 }
 0xe6f   : > { %5736 = vmatpush.bf16.msra.mxu2 %v9560_v28  ;;  %5834 = vmatpush.bf16.msra.mxu0 %v10692_v61  ;;  %v10405_v28 = vld [vmem:[%s12872_s12 + $0x724] sm:$0xf0]  ;;  %v10416_v61 = vor.u32 %v11441_v32, %v10413_v49 }
 0xe70   : > { %v9859_v49 = vld [vmem:[%s12872_s12 + $0x248] sm:$0xf] }
 0xe73   : > { %5806 = vmatpush.bf16.msrb.mxu2 %v10688_v62  ;;  %v10265_v62 = vld [vmem:[%s12872_s12 + $0x60c] sm:$0xf0] }
 0xebb   : > { %v3640_v1 = vpop.xlane.xlu2 %3639 }
 0xebc   : > { %v3644_v26 = vmul.f32 %v3640_v1, %v13258_v54  ;;  %v11440_v1 = vld [vmem:[%s12872_s12 + $0x69c] sm:$0xf] }
 0xebd   : > { %v10408_v42 = vor.u32 %v11440_v1, %v10405_v28  ;;  %v9845_v1 = vld [vmem:[%s12872_s12 + $0x2c4] sm:$0xf0]  ;;  %v9992_v28 = vor.u32 %v11353_v30, %v9991_v23  ;;  %v11512_v23 = vld [vmem:[%s12872_s12 + $0x8dc] sm:$0xf] }
 0xebe   : > { %v3646_v3 = vadd.f32 1e-06, %v3644_v26  ;;  %v10560_v26 = vor.u32 %v11494_v47, %v10559_v29  ;;  %v9993_v29 = vld [vmem:[%s12872_s12 + $0x3e4] sm:$0xf0]  ;;  %v9999_v47 = vld [vmem:[%s12872_s12 + $0x360] sm:$0xf] }
 0xebf   : > { %v10701_v30 = vld [vmem:[%s12872_s12 + $0x964] sm:$0xf0] }
 0xec0   : > { %11829 = vrsqrt.f32 %v3646_v3  ;;  %vm3654_vm15 = vweird.f32 %v3646_v3 }
 0xec3   : > { %v3643_v63 = vpop.xlane.xlu0 %3642  ;;  %v3693_v11 = vpop.permute.xlu2 %3692 }
 0xec4   : > { %v3645_v39 = vmul.f32 %v3643_v63, %v13258_v54  ;;  %v3705_v15 = vmul.f32 %v3693_v11, %v13755_v4  ;;  %v10420_v63 = vor.u32 %v11459_v2, %v10419_v22  ;;  %v11319_v22 = vld [vmem:[%s12872_s12 + $0x2d0] sm:$0xf0]  ;;  %v11265_v2 = vld [vmem:[%s12872_s12 + $0x124] sm:$0xf] }
 0xec5   : > { %v11507_v4 = vld [vmem:[%s12872_s12 + $0x8b0] sm:$0xf0] }
 0xec6   : > { %v11830_v31 = vpop.eup %11829  ;;  %v3647_v25 = vadd.f32 1e-06, %v3645_v39  ;;  %v10271_v39 = vld [vmem:[%s12872_s12 + $0x588] sm:$0xf] }
 0xec7   : > { %v3649_v43 = vmul.f32 %v11830_v31, %v3646_v3  ;;  %vm3655_vm14 = vweird.f32 %v11830_v31  ;;  %v11405_v3 = vld [vmem:[%s12872_s12 + $0x584] sm:$0xf] }
 0xec8   : > { %11831 = vrsqrt.f32 %v3647_v25  ;;  %vm13837_vm1 = vmor %vm3654_vm15, %vm3655_vm14  ;;  %vm3664_vm2 = vweird.f32 %v3647_v25 }
 0xec9   : > { %v3650_v59 = vmul.f32 %v11830_v31, %v3649_v43  ;;  %v10268_v43 = vor.u32 %v11405_v3, %v10265_v62  ;;  %v9705_v3 = vld [vmem:[%s12872_s12 + $0x1ac] sm:$0xf0] }
 0xecb   : > { %v3651_v44 = vmul.f32 0.5, %v3650_v59  ;;  %v10273_v59 = vld [vmem:[%s12872_s12 + $0x614] sm:$0xf0] }
 0xecd   : > { %v3652_v16 = vsub.f32 1.5, %v3651_v44  ;;  %v10279_v44 = vld [vmem:[%s12872_s12 + $0x590] sm:$0xf] }
 0xece   : > { %v11832_v18 = vpop.eup %11831 }
 0xecf   : > { %v3659_v12 = vmul.f32 %v11832_v18, %v3647_v25  ;;  %v3653_v9 = vmul.f32 %v11830_v31, %v3652_v16  ;;  %vm3665_vm0 = vweird.f32 %v11832_v18  ;;  %v11406_v25 = vld [vmem:[%s12872_s12 + $0x58c] sm:$0xf] }
 0xed0   : > { %vm3666_vm3 = vmor %vm3664_vm2, %vm3665_vm0  ;;  %v11370_v16 = vld [vmem:[%s12872_s12 + $0x46c] sm:$0xf] }
 0xed1   : > { %v3660_v10 = vmul.f32 %v11832_v18, %v3659_v12  ;;  %v3657_v19 = vsel %vm13837_vm1, %v11830_v31, %v3653_v9  ;;  %v11423_v31 = vld [vmem:[%s12872_s12 + $0x610] sm:$0xf0]  ;;  %v10125_v12 = vld [vmem:[%s12872_s12 + $0x4f4] sm:$0xf0]  ;;  %v10276_v9 = vor.u32 %v11406_v25, %v10273_v59  ;;  %v9708_v25 = vor.u32 %v11265_v2, %v9705_v3  ;;  %v9719_v59 = vld [vmem:[%s12872_s12 + $0x130] sm:$0xf] }
 0xed2   : > { %v3704_v56 = vmul.f32 %v3657_v19, %v13753_v20  ;;  %v10128_v14 = vor.u32 %v11370_v16, %v10125_v12  ;;  %v11335_v19 = vld [vmem:[%s12872_s12 + $0x354] sm:$0xf]  ;;  %v9565_v16 = vld [vmem:[%s12872_s12 + $0x94] sm:$0xf0] }
 0xed3   : > { %v3661_v8 = vmul.f32 0.5, %v3660_v10  ;;  %v10272_v10 = vor.u32 %v11423_v31, %v10271_v39  ;;  %v11283_v39 = vld [vmem:[%s12872_s12 + $0x1b0] sm:$0xf0]  ;;  %v11266_v31 = vld [vmem:[%s12872_s12 + $0x12c] sm:$0xf] }
 0xed5   : > { %v3662_v54 = vsub.f32 1.5, %v3661_v8  ;;  %v10131_v8 = vld [vmem:[%s12872_s12 + $0x470] sm:$0xf] }
 0xed6   : > { %v3698_v17 = vpop.permute.xlu0 %3697 }
 0xed7   : > { %v3663_v6 = vmul.f32 %v11832_v18, %v3662_v54  ;;  %v3707_v5 = vmul.f32 %v3698_v17, %v13766_v0  ;;  %v11388_v54 = vld [vmem:[%s12872_s12 + $0x4f8] sm:$0xf0]  ;;  %v11389_v17 = vld [vmem:[%s12872_s12 + $0x500] sm:$0xf0]  ;;  %v10795_v0 = vld [vmem:[%s12872_s12 + $0x938] sm:$0xf] }
 0xed9   : > { %v3667_v38 = vsel %vm3666_vm3, %v11832_v18, %v3663_v6  ;;  %v13848_v46 = vpack.c.bf16 %v3707_v5, %v3705_v15  ;;  %v11424_v18 = vld [vmem:[%s12872_s12 + $0x618] sm:$0xf0]  ;;  %v10139_v15 = vld [vmem:[%s12872_s12 + $0x478] sm:$0xf]  ;;  %v9985_v6 = vld [vmem:[%s12872_s12 + $0x3dc] sm:$0xf0]  ;;  %v10132_v5 = vor.u32 %v11388_v54, %v10131_v8 }
 0xeda   : > { %v3706_v27 = vmul.f32 %v3667_v38, %v13764_v41  ;;  %v10280_v11 = vor.u32 %v11424_v18, %v10279_v44  ;;  %v11336_v38 = vld [vmem:[%s12872_s12 + $0x35c] sm:$0xf]  ;;  %v9988_v45 = vor.u32 %v11335_v19, %v9985_v6  ;;  %v11230_v18 = vld [vmem:[%s12872_s12 + $0xc] sm:$0xf]  ;;  %v9571_v54 = vld [vmem:[%s12872_s12 + $0x10] sm:$0xf] }
 0xedb   : > { %10813 = vmatmul.msk.bf16.vlgmr.msrb.gmra.mxu3 %vm1373_vm4, %v13848_v46  ;;  %v11284_v44 = vld [vmem:[%s12872_s12 + $0x1b8] sm:$0xf0]  ;;  %v11249_v6 = vld [vmem:[%s12872_s12 + $0xa0] sm:$0xf0]  ;;  %v10663_v41 = vld [vmem:[%s12872_s12 + $0x828] sm:$0xf] }
 0xedc   : > { %v13859_v57 = vpack.c.bf16 %v3706_v27, %v3704_v56  ;;  %5785 = vmatpush.bf16.msrb.mxu3 %v10548_v40  ;;  %v10140_v40 = vor.u32 %v11389_v17, %v10139_v15  ;;  %v11354_v56 = vld [vmem:[%s12872_s12 + $0x3e8] sm:$0xf0]  ;;  %v11300_v27 = vld [vmem:[%s12872_s12 + $0x23c] sm:$0xf]  ;;  %v9720_v8 = vor.u32 %v11284_v44, %v9719_v59  ;;  %v9573_v15 = vld [vmem:[%s12872_s12 + $0x9c] sm:$0xf0] }
 0xedd   : > { %v9848_v32 = vor.u32 %v11300_v27, %v9845_v1  ;;  %v9579_v17 = vld [vmem:[%s12872_s12 + $0x18] sm:$0xf]  ;;  %v11530_v1 = vld [vmem:[%s12872_s12 + $0x968] sm:$0xf0]  ;;  %v11461_v59 = vld [vmem:[%s12872_s12 + $0x740] sm:$0xf0] }
 0xede   : > { %5709 = vmatmul.bf16.vlgmr.msra.gmra.mxu1 %v13859_v57  ;;  %5737 = vmatmul.bf16.vlgmr.msra.gmra.mxu2 %v13859_v57  ;;  %v11407_v44 = vld [vmem:[%s12872_s12 + $0x594] sm:$0xf] }
 0xedf   : > { %5765 = vmatmul.bf16.vlgmr.msrb.gmra.mxu0 %v13859_v57  ;;  %5813 = vmatpush.bf16.msra.mxu1 %v10552_v60  ;;  %v9996_v60 = vor.u32 %v11336_v38, %v9993_v29  ;;  %v9576_v38 = vor.u32 %v11231_v7, %v9573_v15  ;;  %v11529_v29 = vld [vmem:[%s12872_s12 + $0x960] sm:$0xf0]  ;;  %v11426_v7 = vld [vmem:[%s12872_s12 + $0x628] sm:$0xf0]  ;;  %v11372_v15 = vld [vmem:[%s12872_s12 + $0x47c] sm:$0xf] }
 0xee0   : > { %5841 = vmatpush.bf16.msra.mxu2 %v10556_v48  ;;  %5869 = vmatpush.bf16.msrb.mxu0 %v10560_v26  ;;  %v10000_v48 = vor.u32 %v11354_v56, %v9999_v47  ;;  %v9851_v26 = vld [vmem:[%s12872_s12 + $0x240] sm:$0xf]  ;;  %v9580_v56 = vor.u32 %v11249_v6, %v9579_v17  ;;  %v10141_v17 = vld [vmem:[%s12872_s12 + $0x504] sm:$0xf0] }
 0xee1   : > { %5786 = vmatpush.bf16.msrb.mxu3 %v10408_v42  ;;  %v9853_v42 = vld [vmem:[%s12872_s12 + $0x2cc] sm:$0xf0]  ;;  %v9852_v62 = vor.u32 %v11318_v55, %v9851_v26  ;;  %v10707_v47 = vld [vmem:[%s12872_s12 + $0x8e0] sm:$0xf]  ;;  %v11478_v26 = vld [vmem:[%s12872_s12 + $0x7cc] sm:$0xf] }
 0xee2   : > { %v10569_v55 = vld [vmem:[%s12872_s12 + $0x854] sm:$0xf0]  ;;  %v10708_v3 = vor.u32 %v11530_v1, %v10707_v47  ;;  %v11337_v47 = vld [vmem:[%s12872_s12 + $0x364] sm:$0xf] }
 0xee3   : > { %5814 = vmatpush.bf16.msra.mxu1 %v10412_v24  ;;  %v9856_v24 = vor.u32 %v11301_v58, %v9853_v42  ;;  %v10575_v58 = vld [vmem:[%s12872_s12 + $0x7d0] sm:$0xf]  ;;  %v11496_v42 = vld [vmem:[%s12872_s12 + $0x858] sm:$0xf0] }
 0xee4   : > { %5842 = vmatpush.bf16.msra.mxu2 %v10416_v61  ;;  %5870 = vmatpush.bf16.msrb.mxu0 %v10420_v63  ;;  %v9860_v61 = vor.u32 %v11319_v22, %v9859_v49  ;;  %v9711_v63 = vld [vmem:[%s12872_s12 + $0x128] sm:$0xf]  ;;  %v11442_v49 = vld [vmem:[%s12872_s12 + $0x6ac] sm:$0xf]  ;;  %v10421_v22 = vld [vmem:[%s12872_s12 + $0x734] sm:$0xf0] }
 0xee5   : > { %5787 = vmatpush.bf16.msrb.mxu3 %v10268_v43  ;;  %v9713_v43 = vld [vmem:[%s12872_s12 + $0x1b4] sm:$0xf0]  ;;  %v9712_v12 = vor.u32 %v11283_v39, %v9711_v63  ;;  %v10576_v63 = vor.u32 %v11496_v42, %v10575_v58  ;;  %v10424_v39 = vor.u32 %v11442_v49, %v10421_v22  ;;  %v11356_v42 = vld [vmem:[%s12872_s12 + $0x3f8] sm:$0xf0]  ;;  %v11302_v49 = vld [vmem:[%s12872_s12 + $0x24c] sm:$0xf] }
 0xee6   : > { %v10009_v58 = vld [vmem:[%s12872_s12 + $0x3f4] sm:$0xf0] }
 0xee7   : > { %5815 = vmatpush.bf16.msra.mxu1 %v10272_v10  ;;  %v11511_v10 = vld [vmem:[%s12872_s12 + $0x8d4] sm:$0xf]  ;;  %v9861_v22 = vld [vmem:[%s12872_s12 + $0x2d4] sm:$0xf0] }
 0xee8   : > { %5843 = vmatpush.bf16.msra.mxu2 %v10276_v9  ;;  %5871 = vmatpush.bf16.msrb.mxu0 %v10280_v11  ;;  %v10693_v9 = vld [vmem:[%s12872_s12 + $0x95c] sm:$0xf0]  ;;  %v9716_v11 = vor.u32 %v11266_v31, %v9713_v43  ;;  %v11443_v31 = vld [vmem:[%s12872_s12 + $0x6b4] sm:$0xf]  ;;  %v10435_v43 = vld [vmem:[%s12872_s12 + $0x6b8] sm:$0xf] }
 0xee9   : > { %5788 = vmatpush.bf16.msrb.mxu3 %v10128_v14  ;;  %v9568_v14 = vor.u32 %v11230_v18, %v9565_v16  ;;  %v10696_v19 = vor.u32 %v11511_v10, %v10693_v9  ;;  %v10281_v18 = vld [vmem:[%s12872_s12 + $0x61c] sm:$0xf0]  ;;  %v10287_v10 = vld [vmem:[%s12872_s12 + $0x598] sm:$0xf]  ;;  %v11425_v9 = vld [vmem:[%s12872_s12 + $0x620] sm:$0xf0] }
 0xeeb   : > { %10814 = vmatmul.msk.bf16.vlgmr.msra.gmra.mxu3 %vm1373_vm4, %v13848_v46  ;;  %5816 = vmatpush.bf16.msra.mxu1 %v10132_v5  ;;  %v11477_v5 = vld [vmem:[%s12872_s12 + $0x7c4] sm:$0xf] }
 0xeec   : > { %5844 = vmatpush.bf16.msra.mxu2 %v10136_v21  ;;  %5872 = vmatpush.bf16.msrb.mxu0 %v10140_v40  ;;  %v10561_v21 = vld [vmem:[%s12872_s12 + $0x84c] sm:$0xf0]  ;;  %v9572_v40 = vor.u32 %v11248_v13, %v9571_v54  ;;  %v11408_v54 = vld [vmem:[%s12872_s12 + $0x59c] sm:$0xf]  ;;  %v10289_v13 = vld [vmem:[%s12872_s12 + $0x624] sm:$0xf0] }
 0xeed   : > { %5789 = vmatpush.bf16.msrb.mxu3 %v9988_v45  ;;  %v10699_v45 = vld [vmem:[%s12872_s12 + $0x8d8] sm:$0xf]  ;;  %v10564_v27 = vor.u32 %v11477_v5, %v10561_v21  ;;  %v10292_v6 = vor.u32 %v11408_v54, %v10289_v13  ;;  %v10147_v5 = vld [vmem:[%s12872_s12 + $0x480] sm:$0xf]  ;;  %v11390_v21 = vld [vmem:[%s12872_s12 + $0x508] sm:$0xf0] }
 0xeee   : > { %10815 = vmatmul.msk.bf16.vlgmr.msrb.gmra.mxu1 %vm1373_vm4, %v13848_v46  ;;  %10816 = vmatmul.msk.bf16.vlgmr.msrb.gmra.mxu2 %vm1373_vm4, %v13848_v46  ;;  %v9729_v54 = vld [vmem:[%s12872_s12 + $0x1c4] sm:$0xf0]  ;;  %v9735_v13 = vld [vmem:[%s12872_s12 + $0x140] sm:$0xf] }
 0xeef   : > { %10817 = vmatmul.msk.bf16.vlgmr.msra.gmra.mxu0 %vm1373_vm4, %v13848_v46  ;;  %5817 = vmatpush.bf16.msra.mxu1 %v9992_v28  ;;  %v10567_v28 = vld [vmem:[%s12872_s12 + $0x7c8] sm:$0xf] }
 0xef0   : > { %5845 = vmatpush.bf16.msra.mxu2 %v9996_v60  ;;  %5873 = vmatpush.bf16.msrb.mxu0 %v10000_v48  ;;  %v11495_v60 = vld [vmem:[%s12872_s12 + $0x850] sm:$0xf0]  ;;  %v10704_v48 = vor.u32 %v11512_v23, %v10701_v30  ;;  %v10144_v23 = vor.u32 %v11372_v15, %v10141_v17  ;;  %v11373_v30 = vld [vmem:[%s12872_s12 + $0x484] sm:$0xf]  ;;  %v9581_v15 = vld [vmem:[%s12872_s12 + $0xa4] sm:$0xf0] }
 0xef1   : > { %5790 = vmatpush.bf16.msrb.mxu3 %v9848_v32  ;;  %v10700_v32 = vor.u32 %v11529_v29, %v10699_v45  ;;  %v10568_v2 = vor.u32 %v11495_v60, %v10567_v28  ;;  %v10155_v45 = vld [vmem:[%s12872_s12 + $0x488] sm:$0xf]  ;;  %v11391_v29 = vld [vmem:[%s12872_s12 + $0x510] sm:$0xf0] }
 0xef2   : > { %v10007_v28 = vld [vmem:[%s12872_s12 + $0x368] sm:$0xf]  ;;  %v11355_v60 = vld [vmem:[%s12872_s12 + $0x3f0] sm:$0xf0] }
 0xef3   : > { %5818 = vmatpush.bf16.msra.mxu1 %v9852_v62  ;;  %v10572_v62 = vor.u32 %v11478_v26, %v10569_v55  ;;  %v11338_v55 = vld [vmem:[%s12872_s12 + $0x36c] sm:$0xf] }
 0xef4   : > { %5846 = vmatpush.bf16.msra.mxu2 %v9856_v24  ;;  %5874 = vmatpush.bf16.msrb.mxu0 %v9860_v61  ;;  %v10427_v24 = vld [vmem:[%s12872_s12 + $0x6b0] sm:$0xf]  ;;  %v11460_v61 = vld [vmem:[%s12872_s12 + $0x738] sm:$0xf0] }
 0xef5   : > { %5791 = vmatpush.bf16.msrb.mxu3 %v9708_v25  ;;  %v10429_v25 = vld [vmem:[%s12872_s12 + $0x73c] sm:$0xf0]  ;;  %v10428_v16 = vor.u32 %v11460_v61, %v10427_v24  ;;  %v11320_v24 = vld [vmem:[%s12872_s12 + $0x2d8] sm:$0xf0] }
 0xef7   : > { %5819 = vmatpush.bf16.msra.mxu1 %v9712_v12  ;;  %v10432_v12 = vor.u32 %v11443_v31, %v10429_v25  ;;  %v9869_v31 = vld [vmem:[%s12872_s12 + $0x2dc] sm:$0xf0]  ;;  %v9875_v25 = vld [vmem:[%s12872_s12 + $0x258] sm:$0xf] }
 0xef8   : > { %5847 = vmatpush.bf16.msra.mxu2 %v9716_v11  ;;  %5875 = vmatpush.bf16.msrb.mxu0 %v9720_v8  ;;  %v10436_v11 = vor.u32 %v11461_v59, %v10435_v43  ;;  %v10284_v8 = vor.u32 %v11407_v44, %v10281_v18  ;;  %v11321_v43 = vld [vmem:[%s12872_s12 + $0x2e0] sm:$0xf0]  ;;  %v11267_v59 = vld [vmem:[%s12872_s12 + $0x134] sm:$0xf]  ;;  %v9721_v44 = vld [vmem:[%s12872_s12 + $0x1bc] sm:$0xf0] }
 0xef9   : > { %5792 = vmatpush.bf16.msrb.mxu3 %v9568_v14  ;;  %v10295_v14 = vld [vmem:[%s12872_s12 + $0x5a0] sm:$0xf] }
 0xefb   : > { %5820 = vmatpush.bf16.msra.mxu1 %v9572_v40  ;;  %v10296_v40 = vor.u32 %v11426_v7, %v10295_v14  ;;  %v11286_v14 = vld [vmem:[%s12872_s12 + $0x1c8] sm:$0xf0]  ;;  %v11232_v7 = vld [vmem:[%s12872_s12 + $0x1c] sm:$0xf] }
 0xefc   : > { %5793 = vmatmul.bf16.vlgmr.msrb.gmra.mxu3 %v13859_v57  ;;  %5848 = vmatpush.bf16.msra.mxu2 %v9576_v38  ;;  %v10149_v38 = vld [vmem:[%s12872_s12 + $0x50c] sm:$0xf0] }
 0xefd   : > { %5862 = vmatpush.bf16.msra.mxu3 %v10696_v19  ;;  %5876 = vmatpush.bf16.msrb.mxu0 %v9580_v56  ;;  %v10288_v19 = vor.u32 %v11425_v9, %v10287_v10  ;;  %v10001_v56 = vld [vmem:[%s12872_s12 + $0x3ec] sm:$0xf0]  ;;  %v10152_v1 = vor.u32 %v11373_v30, %v10149_v38  ;;  %v11285_v10 = vld [vmem:[%s12872_s12 + $0x1c0] sm:$0xf0]  ;;  %v9876_v9 = vor.u32 %v11321_v43, %v9875_v25  ;;  %v11444_v25 = vld [vmem:[%s12872_s12 + $0x6bc] sm:$0xf] }
 0xefe   : > { %5821 = vmatmul.bf16.vlgmr.msra.gmra.mxu1 %v13859_v57  ;;  %v10004_v26 = vor.u32 %v11337_v47, %v10001_v56  ;;  %v9584_v30 = vor.u32 %v11232_v7, %v9581_v15  ;;  %v11233_v38 = vld [vmem:[%s12872_s12 + $0x24] sm:$0xf]  ;;  %v11251_v56 = vld [vmem:[%s12872_s12 + $0xb0] sm:$0xf0]  ;;  %v10437_v43 = vld [vmem:[%s12872_s12 + $0x744] sm:$0xf0] }
 0xeff   : > { %5849 = vmatmul.bf16.vlgmr.msra.gmra.mxu2 %v13859_v57  ;;  %5890 = vmatpush.bf16.msrb.mxu1 %v10700_v32  ;;  %v10015_v32 = vld [vmem:[%s12872_s12 + $0x370] sm:$0xf] }
 0xf00   : > { %5918 = vmatpush.bf16.msrb.mxu2 %v10704_v48  ;;  %5877 = vmatmul.bf16.vlgmr.msrb.gmra.mxu0 %v13859_v57  ;;  %v10156_v48 = vor.u32 %v11391_v29, %v10155_v45  ;;  %v10016_v61 = vor.u32 %v11356_v42, %v10015_v32  ;;  %v9589_v45 = vld [vmem:[%s12872_s12 + $0xac] sm:$0xf0]  ;;  %v9595_v29 = vld [vmem:[%s12872_s12 + $0x28] sm:$0xf] }
 0xf01   : > { %5897 = vmatpush.bf16.msrb.mxu3 %v10564_v27  ;;  %5946 = vmatpush.bf16.msra.mxu0 %v10708_v3  ;;  %v10148_v27 = vor.u32 %v11390_v21, %v10147_v5  ;;  %v10012_v3 = vor.u32 %v11338_v55, %v10009_v58  ;;  %v9587_v21 = vld [vmem:[%s12872_s12 + $0x20] sm:$0xf]  ;;  %v10715_v55 = vld [vmem:[%s12872_s12 + $0x8e8] sm:$0xf]  ;;  %v11531_v58 = vld [vmem:[%s12872_s12 + $0x970] sm:$0xf0]  ;;  %v9596_v42 = vor.u32 %v11251_v56, %v9595_v29 }
 0xf02   : > { %v10723_v32 = vld [vmem:[%s12872_s12 + $0x8f0] sm:$0xf]  ;;  %v10157_v29 = vld [vmem:[%s12872_s12 + $0x514] sm:$0xf0] }
 0xf03   : > { %5925 = vmatpush.bf16.msra.mxu1 %v10568_v2  ;;  %v10008_v2 = vor.u32 %v11355_v60, %v10007_v28  ;;  %v11514_v60 = vld [vmem:[%s12872_s12 + $0x8ec] sm:$0xf]  ;;  %v10297_v7 = vld [vmem:[%s12872_s12 + $0x62c] sm:$0xf0] }
 0xf04   : > { %5953 = vmatpush.bf16.msra.mxu2 %v10572_v62  ;;  %v9867_v62 = vld [vmem:[%s12872_s12 + $0x250] sm:$0xf] }
 0xf05   : > { %5981 = vmatpush.bf16.msrb.mxu0 %v10576_v63  ;;  %5898 = vmatpush.bf16.msrb.mxu3 %v10424_v39  ;;  %v9864_v63 = vor.u32 %v11302_v49, %v9861_v22  ;;  %v11303_v39 = vld [vmem:[%s12872_s12 + $0x254] sm:$0xf]  ;;  %v9868_v18 = vor.u32 %v11320_v24, %v9867_v62  ;;  %v11532_v22 = vld [vmem:[%s12872_s12 + $0x978] sm:$0xf0] }
 0xf06   : > { %v11480_v24 = vld [vmem:[%s12872_s12 + $0x7dc] sm:$0xf] }
 0xf07   : > { %5926 = vmatpush.bf16.msra.mxu1 %v10428_v16  ;;  %v9872_v16 = vor.u32 %v11303_v39, %v9869_v31  ;;  %v10716_v39 = vor.u32 %v11531_v58, %v10715_v55  ;;  %v11498_v31 = vld [vmem:[%s12872_s12 + $0x868] sm:$0xf0]  ;;  %v10171_v55 = vld [vmem:[%s12872_s12 + $0x498] sm:$0xf]  ;;  %v11393_v58 = vld [vmem:[%s12872_s12 + $0x520] sm:$0xf0] }
 0xf08   : > { %5954 = vmatpush.bf16.msra.mxu2 %v10432_v12  ;;  %v9727_v12 = vld [vmem:[%s12872_s12 + $0x138] sm:$0xf] }
 0xf09   : > { %5982 = vmatpush.bf16.msrb.mxu0 %v10436_v11  ;;  %5899 = vmatpush.bf16.msrb.mxu3 %v10284_v8  ;;  %v9724_v11 = vor.u32 %v11267_v59, %v9721_v44  ;;  %v11268_v8 = vld [vmem:[%s12872_s12 + $0x13c] sm:$0xf]  ;;  %v9728_v17 = vor.u32 %v11285_v10, %v9727_v12  ;;  %v10724_v44 = vor.u32 %v11532_v22, %v10723_v32  ;;  %v11462_v12 = vld [vmem:[%s12872_s12 + $0x748] sm:$0xf0]  ;;  %v11339_v32 = vld [vmem:[%s12872_s12 + $0x374] sm:$0xf] }
 0xf0a   : > { %v9732_v5 = vor.u32 %v11268_v8, %v9729_v54  ;;  %v10445_v8 = vld [vmem:[%s12872_s12 + $0x74c] sm:$0xf0]  ;;  %v10451_v54 = vld [vmem:[%s12872_s12 + $0x6c8] sm:$0xf] }
 0xf0b   : > { %5927 = vmatpush.bf16.msra.mxu1 %v10288_v19  ;;  %v11513_v19 = vld [vmem:[%s12872_s12 + $0x8e4] sm:$0xf] }
 0xf0c   : > { %5955 = vmatpush.bf16.msra.mxu2 %v10292_v6  ;;  %10818 = vmatmul.msk.bf16.vlgmr.msra.gmra.mxu3 %vm1373_vm4, %v13848_v46  ;;  %v10709_v6 = vld [vmem:[%s12872_s12 + $0x96c] sm:$0xf0] }
 0xf0d   : > { %5983 = vmatpush.bf16.msrb.mxu0 %v10296_v40  ;;  %5900 = vmatpush.bf16.msrb.mxu3 %v10144_v23  ;;  %v11250_v40 = vld [vmem:[%s12872_s12 + $0xa8] sm:$0xf0]  ;;  %v9736_v23 = vor.u32 %v11286_v14, %v9735_v13  ;;  %v10712_v47 = vor.u32 %v11513_v19, %v10709_v6  ;;  %v11463_v13 = vld [vmem:[%s12872_s12 + $0x750] sm:$0xf0]  ;;  %v11409_v14 = vld [vmem:[%s12872_s12 + $0x5a4] sm:$0xf] }
 0xf0e   : > { %10819 = vmatmul.msk.bf16.vlgmr.msrb.gmra.mxu1 %vm1373_vm4, %v13848_v46  ;;  %v9588_v28 = vor.u32 %v11250_v40, %v9587_v21  ;;  %v10303_v19 = vld [vmem:[%s12872_s12 + $0x5a8] sm:$0xf]  ;;  %v11427_v6 = vld [vmem:[%s12872_s12 + $0x630] sm:$0xf0]  ;;  %v10300_v21 = vor.u32 %v11409_v14, %v10297_v7  ;;  %v11410_v40 = vld [vmem:[%s12872_s12 + $0x5ac] sm:$0xf] }
 0xf0f   : > { %5928 = vmatpush.bf16.msra.mxu1 %v10148_v27  ;;  %10820 = vmatmul.msk.bf16.vlgmr.msrb.gmra.mxu2 %vm1373_vm4, %v13848_v46  ;;  %v11479_v27 = vld [vmem:[%s12872_s12 + $0x7d4] sm:$0xf]  ;;  %v9737_v14 = vld [vmem:[%s12872_s12 + $0x1cc] sm:$0xf0] }
 0xf10   : > { %5956 = vmatpush.bf16.msra.mxu2 %v10152_v1  ;;  %10821 = vmatmul.msk.bf16.vlgmr.msra.gmra.mxu0 %vm1373_vm4, %v13848_v46  ;;  %v10577_v1 = vld [vmem:[%s12872_s12 + $0x85c] sm:$0xf0] }
 0xf11   : > { %5984 = vmatpush.bf16.msrb.mxu0 %v10156_v48  ;;  %5901 = vmatpush.bf16.msrb.mxu3 %v10004_v26  ;;  %v10717_v48 = vld [vmem:[%s12872_s12 + $0x974] sm:$0xf0]  ;;  %v9592_v26 = vor.u32 %v11233_v38, %v9589_v45  ;;  %v10580_v49 = vor.u32 %v11479_v27, %v10577_v1  ;;  %v11428_v38 = vld [vmem:[%s12872_s12 + $0x638] sm:$0xf0]  ;;  %v11374_v45 = vld [vmem:[%s12872_s12 + $0x48c] sm:$0xf] }
 0xf12   : > { %v10720_v62 = vor.u32 %v11514_v60, %v10717_v48  ;;  %v10163_v27 = vld [vmem:[%s12872_s12 + $0x490] sm:$0xf]  ;;  %v11392_v1 = vld [vmem:[%s12872_s12 + $0x518] sm:$0xf0]  ;;  %v10160_v60 = vor.u32 %v11374_v45, %v10157_v29  ;;  %v11375_v48 = vld [vmem:[%s12872_s12 + $0x494] sm:$0xf] }
 0xf13   : > { %5929 = vmatpush.bf16.msra.mxu1 %v10008_v2  ;;  %v10583_v2 = vld [vmem:[%s12872_s12 + $0x7d8] sm:$0xf] }
 0xf14   : > { %5957 = vmatpush.bf16.msra.mxu2 %v10012_v3  ;;  %v11497_v3 = vld [vmem:[%s12872_s12 + $0x860] sm:$0xf0]  ;;  %v9597_v45 = vld [vmem:[%s12872_s12 + $0xb4] sm:$0xf0] }
 0xf15   : > { %5985 = vmatpush.bf16.msrb.mxu0 %v10016_v61  ;;  %5902 = vmatpush.bf16.msrb.mxu3 %v9864_v63  ;;  %v10585_v61 = vld [vmem:[%s12872_s12 + $0x864] sm:$0xf0]  ;;  %v10591_v63 = vld [vmem:[%s12872_s12 + $0x7e0] sm:$0xf]  ;;  %v10584_v59 = vor.u32 %v11497_v3, %v10583_v2  ;;  %v10023_v2 = vld [vmem:[%s12872_s12 + $0x378] sm:$0xf] }
 0xf16   : > { %v10592_v10 = vor.u32 %v11498_v31, %v10591_v63  ;;  %v11357_v3 = vld [vmem:[%s12872_s12 + $0x400] sm:$0xf0]  ;;  %v10025_v63 = vld [vmem:[%s12872_s12 + $0x404] sm:$0xf0]  ;;  %v11358_v31 = vld [vmem:[%s12872_s12 + $0x408] sm:$0xf0] }
 0xf17   : > { %5930 = vmatpush.bf16.msra.mxu1 %v9868_v18  ;;  %v10588_v18 = vor.u32 %v11480_v24, %v10585_v61  ;;  %v11340_v61 = vld [vmem:[%s12872_s12 + $0x37c] sm:$0xf] }
 0xf18   : > { %5958 = vmatpush.bf16.msra.mxu2 %v9872_v16  ;;  %v10443_v16 = vld [vmem:[%s12872_s12 + $0x6c0] sm:$0xf] }
 0xf19   : > { %5986 = vmatpush.bf16.msrb.mxu0 %v9876_v9  ;;  %5903 = vmatpush.bf16.msrb.mxu3 %v9724_v11  ;;  %v10440_v9 = vor.u32 %v11444_v25, %v10437_v43  ;;  %v11445_v11 = vld [vmem:[%s12872_s12 + $0x6c4] sm:$0xf]  ;;  %v10444_v15 = vor.u32 %v11462_v12, %v10443_v16  ;;  %v11304_v25 = vld [vmem:[%s12872_s12 + $0x25c] sm:$0xf]  ;;  %v9877_v43 = vld [vmem:[%s12872_s12 + $0x2e4] sm:$0xf0] }
 0xf1a   : > { %v11322_v16 = vld [vmem:[%s12872_s12 + $0x2e8] sm:$0xf0] }
 0xf1b   : > { %5931 = vmatpush.bf16.msra.mxu1 %v9728_v17  ;;  %v10448_v17 = vor.u32 %v11445_v11, %v10445_v8  ;;  %v9885_v11 = vld [vmem:[%s12872_s12 + $0x2ec] sm:$0xf0]  ;;  %v9891_v8 = vld [vmem:[%s12872_s12 + $0x268] sm:$0xf] }
 0xf1c   : > { %5959 = vmatpush.bf16.msra.mxu2 %v9732_v5  ;;  %v10452_v5 = vor.u32 %v11463_v13, %v10451_v54  ;;  %v11323_v54 = vld [vmem:[%s12872_s12 + $0x2f0] sm:$0xf0]  ;;  %v11269_v13 = vld [vmem:[%s12872_s12 + $0x144] sm:$0xf] }
 0xf1d   : > { %5987 = vmatpush.bf16.msrb.mxu0 %v9736_v23  ;;  %5904 = vmatpush.bf16.msrb.mxu3 %v9584_v30  ;;  %v10305_v23 = vld [vmem:[%s12872_s12 + $0x634] sm:$0xf0]  ;;  %v10311_v30 = vld [vmem:[%s12872_s12 + $0x5b0] sm:$0xf] }
 0xf1e   : > { %v10308_v56 = vor.u32 %v11410_v40, %v10305_v23  ;;  %v9745_v40 = vld [vmem:[%s12872_s12 + $0x1d4] sm:$0xf0]  ;;  %v9751_v23 = vld [vmem:[%s12872_s12 + $0x150] sm:$0xf] }
 0xf1f   : > { %5932 = vmatpush.bf16.msra.mxu1 %v9588_v28  ;;  %v10312_v28 = vor.u32 %v11428_v38, %v10311_v30  ;;  %v11288_v30 = vld [vmem:[%s12872_s12 + $0x1d8] sm:$0xf0]  ;;  %v11234_v38 = vld [vmem:[%s12872_s12 + $0x2c] sm:$0xf] }
 0xf20   : > { %5905 = vmatmul.bf16.vlgmr.msrb.gmra.mxu3 %v13859_v57  ;;  %5960 = vmatpush.bf16.msra.mxu2 %v9592_v26  ;;  %v10165_v26 = vld [vmem:[%s12872_s12 + $0x51c] sm:$0xf0] }
 0xf21   : > { %5974 = vmatpush.bf16.msra.mxu3 %v10712_v47  ;;  %5988 = vmatpush.bf16.msrb.mxu0 %v9596_v42  ;;  %v10304_v47 = vor.u32 %v11427_v6, %v10303_v19  ;;  %v10017_v42 = vld [vmem:[%s12872_s12 + $0x3fc] sm:$0xf0]  ;;  %v10168_v22 = vor.u32 %v11375_v48, %v10165_v26  ;;  %v11287_v19 = vld [vmem:[%s12872_s12 + $0x1d0] sm:$0xf0]  ;;  %v9892_v6 = vor.u32 %v11323_v54, %v9891_v8  ;;  %v11446_v8 = vld [vmem:[%s12872_s12 + $0x6cc] sm:$0xf] }
 0xf22   : > { %5933 = vmatmul.bf16.vlgmr.msra.gmra.mxu1 %v13859_v57  ;;  %v10020_v24 = vor.u32 %v11339_v32, %v10017_v42  ;;  %v9600_v48 = vor.u32 %v11234_v38, %v9597_v45  ;;  %v11235_v26 = vld [vmem:[%s12872_s12 + $0x34] sm:$0xf]  ;;  %v11253_v42 = vld [vmem:[%s12872_s12 + $0xc0] sm:$0xf0]  ;;  %v10453_v54 = vld [vmem:[%s12872_s12 + $0x754] sm:$0xf0] }
 0xf23   : > { %5961 = vmatmul.bf16.vlgmr.msra.gmra.mxu2 %v13859_v57  ;;  %6002 = vmatpush.bf16.msrb.mxu1 %v10716_v39  ;;  %v10031_v39 = vld [vmem:[%s12872_s12 + $0x380] sm:$0xf] }
 0xf24   : > { %6030 = vmatpush.bf16.msrb.mxu2 %v10720_v62  ;;  %5989 = vmatmul.bf16.vlgmr.msrb.gmra.mxu0 %v13859_v57  ;;  %v10172_v62 = vor.u32 %v11393_v58, %v10171_v55  ;;  %v10032_v12 = vor.u32 %v11358_v31, %v10031_v39  ;;  %v9605_v55 = vld [vmem:[%s12872_s12 + $0xbc] sm:$0xf0]  ;;  %v9611_v58 = vld [vmem:[%s12872_s12 + $0x38] sm:$0xf] }
 0xf25   : > { %6009 = vmatpush.bf16.msrb.mxu3 %v10580_v49  ;;  %6058 = vmatpush.bf16.msra.mxu0 %v10724_v44  ;;  %v10164_v49 = vor.u32 %v11392_v1, %v10163_v27  ;;  %v10028_v44 = vor.u32 %v11340_v61, %v10025_v63  ;;  %v9603_v1 = vld [vmem:[%s12872_s12 + $0x30] sm:$0xf]  ;;  %v10731_v61 = vld [vmem:[%s12872_s12 + $0x8f8] sm:$0xf]  ;;  %v11533_v63 = vld [vmem:[%s12872_s12 + $0x980] sm:$0xf0]  ;;  %v9612_v31 = vor.u32 %v11253_v42, %v9611_v58 }
 0xf26   : > { %v10739_v39 = vld [vmem:[%s12872_s12 + $0x900] sm:$0xf]  ;;  %v10173_v58 = vld [vmem:[%s12872_s12 + $0x524] sm:$0xf0] }
 0xf27   : > { %6037 = vmatpush.bf16.msra.mxu1 %v10584_v59  ;;  %v10024_v59 = vor.u32 %v11357_v3, %v10023_v2  ;;  %v11516_v3 = vld [vmem:[%s12872_s12 + $0x8fc] sm:$0xf]  ;;  %v10313_v38 = vld [vmem:[%s12872_s12 + $0x63c] sm:$0xf0] }
 0xf28   : > { %6065 = vmatpush.bf16.msra.mxu2 %v10588_v18  ;;  %v9883_v18 = vld [vmem:[%s12872_s12 + $0x260] sm:$0xf] }
 0xf29   : > { %6093 = vmatpush.bf16.msrb.mxu0 %v10592_v10  ;;  %6010 = vmatpush.bf16.msrb.mxu3 %v10440_v9  ;;  %v9880_v10 = vor.u32 %v11304_v25, %v9877_v43  ;;  %v11305_v9 = vld [vmem:[%s12872_s12 + $0x264] sm:$0xf]  ;;  %v9884_v7 = vor.u32 %v11322_v16, %v9883_v18  ;;  %v11534_v43 = vld [vmem:[%s12872_s12 + $0x988] sm:$0xf0] }
 0xf2a   : > { %v11482_v16 = vld [vmem:[%s12872_s12 + $0x7ec] sm:$0xf] }
 0xf2b   : > { %6038 = vmatpush.bf16.msra.mxu1 %v10444_v15  ;;  %v9888_v15 = vor.u32 %v11305_v9, %v9885_v11  ;;  %v10732_v9 = vor.u32 %v11533_v63, %v10731_v61  ;;  %v11500_v11 = vld [vmem:[%s12872_s12 + $0x878] sm:$0xf0]  ;;  %v10187_v61 = vld [vmem:[%s12872_s12 + $0x4a8] sm:$0xf]  ;;  %v11395_v63 = vld [vmem:[%s12872_s12 + $0x530] sm:$0xf0] }
 0xf2c   : > { %6066 = vmatpush.bf16.msra.mxu2 %v10448_v17  ;;  %v9743_v17 = vld [vmem:[%s12872_s12 + $0x148] sm:$0xf] }
 0xf2d   : > { %6094 = vmatpush.bf16.msrb.mxu0 %v10452_v5  ;;  %6011 = vmatpush.bf16.msrb.mxu3 %v10300_v21  ;;  %v9740_v5 = vor.u32 %v11269_v13, %v9737_v14  ;;  %v11270_v21 = vld [vmem:[%s12872_s12 + $0x14c] sm:$0xf]  ;;  %v9744_v29 = vor.u32 %v11287_v19, %v9743_v17  ;;  %v10740_v14 = vor.u32 %v11534_v43, %v10739_v39  ;;  %v11464_v17 = vld [vmem:[%s12872_s12 + $0x758] sm:$0xf0]  ;;  %v11341_v39 = vld [vmem:[%s12872_s12 + $0x384] sm:$0xf] }
 0xf2e   : > { %v9748_v27 = vor.u32 %v11270_v21, %v9745_v40  ;;  %v10461_v21 = vld [vmem:[%s12872_s12 + $0x75c] sm:$0xf0]  ;;  %v10467_v40 = vld [vmem:[%s12872_s12 + $0x6d8] sm:$0xf] }
 0xf2f   : > { %6039 = vmatpush.bf16.msra.mxu1 %v10304_v47  ;;  %v11515_v47 = vld [vmem:[%s12872_s12 + $0x8f4] sm:$0xf] }
 0xf30   : > { %6067 = vmatpush.bf16.msra.mxu2 %v10308_v56  ;;  %10822 = vmatmul.msk.bf16.vlgmr.msra.gmra.mxu3 %vm1373_vm4, %v13848_v46  ;;  %v10725_v56 = vld [vmem:[%s12872_s12 + $0x97c] sm:$0xf0] }
 0xf31   : > { %6095 = vmatpush.bf16.msrb.mxu0 %v10312_v28  ;;  %6012 = vmatpush.bf16.msrb.mxu3 %v10160_v60  ;;  %v11252_v28 = vld [vmem:[%s12872_s12 + $0xb8] sm:$0xf0]  ;;  %v9752_v60 = vor.u32 %v11288_v30, %v9751_v23  ;;  %v10728_v32 = vor.u32 %v11515_v47, %v10725_v56  ;;  %v11465_v23 = vld [vmem:[%s12872_s12 + $0x760] sm:$0xf0]  ;;  %v11411_v30 = vld [vmem:[%s12872_s12 + $0x5b4] sm:$0xf] }
 0xf32   : > { %10823 = vmatmul.msk.bf16.vlgmr.msrb.gmra.mxu1 %vm1373_vm4, %v13848_v46  ;;  %v9604_v2 = vor.u32 %v11252_v28, %v9603_v1  ;;  %v10319_v47 = vld [vmem:[%s12872_s12 + $0x5b8] sm:$0xf]  ;;  %v11429_v56 = vld [vmem:[%s12872_s12 + $0x640] sm:$0xf0]  ;;  %v10316_v1 = vor.u32 %v11411_v30, %v10313_v38  ;;  %v11412_v28 = vld [vmem:[%s12872_s12 + $0x5bc] sm:$0xf] }
 0xf33   : > { %6040 = vmatpush.bf16.msra.mxu1 %v10164_v49  ;;  %10824 = vmatmul.msk.bf16.vlgmr.msrb.gmra.mxu2 %vm1373_vm4, %v13848_v46  ;;  %v11481_v49 = vld [vmem:[%s12872_s12 + $0x7e4] sm:$0xf]  ;;  %v9753_v30 = vld [vmem:[%s12872_s12 + $0x1dc] sm:$0xf0] }
 0xf34   : > { %6068 = vmatpush.bf16.msra.mxu2 %v10168_v22  ;;  %10825 = vmatmul.msk.bf16.vlgmr.msra.gmra.mxu0 %vm1373_vm4, %v13848_v46  ;;  %v10593_v22 = vld [vmem:[%s12872_s12 + $0x86c] sm:$0xf0] }
 0xf35   : > { %6096 = vmatpush.bf16.msrb.mxu0 %v10172_v62  ;;  %6013 = vmatpush.bf16.msrb.mxu3 %v10020_v24  ;;  %v10733_v62 = vld [vmem:[%s12872_s12 + $0x984] sm:$0xf0]  ;;  %v9608_v24 = vor.u32 %v11235_v26, %v9605_v55  ;;  %v10596_v25 = vor.u32 %v11481_v49, %v10593_v22  ;;  %v11430_v26 = vld [vmem:[%s12872_s12 + $0x648] sm:$0xf0]  ;;  %v11376_v55 = vld [vmem:[%s12872_s12 + $0x49c] sm:$0xf] }
 0xf36   : > { %v10736_v18 = vor.u32 %v11516_v3, %v10733_v62  ;;  %v10179_v49 = vld [vmem:[%s12872_s12 + $0x4a0] sm:$0xf]  ;;  %v11394_v22 = vld [vmem:[%s12872_s12 + $0x528] sm:$0xf0]  ;;  %v10176_v3 = vor.u32 %v11376_v55, %v10173_v58  ;;  %v11377_v62 = vld [vmem:[%s12872_s12 + $0x4a4] sm:$0xf] }
 0xf37   : > { %6041 = vmatpush.bf16.msra.mxu1 %v10024_v59  ;;  %v10599_v59 = vld [vmem:[%s12872_s12 + $0x7e8] sm:$0xf]  ;;  %v11236_v55 = vld [vmem:[%s12872_s12 + $0x3c] sm:$0xf] }
 0xf38   : > { %6069 = vmatpush.bf16.msra.mxu2 %v10028_v44  ;;  %v11499_v44 = vld [vmem:[%s12872_s12 + $0x870] sm:$0xf0]  ;;  %v9613_v58 = vld [vmem:[%s12872_s12 + $0xc4] sm:$0xf0] }
 0xf39   : > { %6097 = vmatpush.bf16.msrb.mxu0 %v10032_v12  ;;  %6014 = vmatpush.bf16.msrb.mxu3 %v9880_v10  ;;  %v10601_v12 = vld [vmem:[%s12872_s12 + $0x874] sm:$0xf0]  ;;  %v10607_v10 = vld [vmem:[%s12872_s12 + $0x7f0] sm:$0xf]  ;;  %v10600_v13 = vor.u32 %v11499_v44, %v10599_v59  ;;  %v10039_v59 = vld [vmem:[%s12872_s12 + $0x388] sm:$0xf] }
 0xf3a   : > { %v10608_v19 = vor.u32 %v11500_v11, %v10607_v10  ;;  %v11359_v44 = vld [vmem:[%s12872_s12 + $0x410] sm:$0xf0]  ;;  %v10041_v10 = vld [vmem:[%s12872_s12 + $0x414] sm:$0xf0]  ;;  %v11360_v11 = vld [vmem:[%s12872_s12 + $0x418] sm:$0xf0] }
 0xf3b   : > { %6042 = vmatpush.bf16.msra.mxu1 %v9884_v7  ;;  %v10604_v7 = vor.u32 %v11482_v16, %v10601_v12  ;;  %v11342_v12 = vld [vmem:[%s12872_s12 + $0x38c] sm:$0xf] }
 0xf3c   : > { %6070 = vmatpush.bf16.msra.mxu2 %v9888_v15  ;;  %v10459_v15 = vld [vmem:[%s12872_s12 + $0x6d0] sm:$0xf] }
 0xf3d   : > { %6098 = vmatpush.bf16.msrb.mxu0 %v9892_v6  ;;  %6015 = vmatpush.bf16.msrb.mxu3 %v9740_v5  ;;  %v10456_v6 = vor.u32 %v11446_v8, %v10453_v54  ;;  %v11447_v5 = vld [vmem:[%s12872_s12 + $0x6d4] sm:$0xf]  ;;  %v10460_v45 = vor.u32 %v11464_v17, %v10459_v15  ;;  %v11306_v8 = vld [vmem:[%s12872_s12 + $0x26c] sm:$0xf]  ;;  %v9893_v54 = vld [vmem:[%s12872_s12 + $0x2f4] sm:$0xf0] }
 0xf3e   : > { %v11324_v15 = vld [vmem:[%s12872_s12 + $0x2f8] sm:$0xf0] }
 0xf3f   : > { %6043 = vmatpush.bf16.msra.mxu1 %v9744_v29  ;;  %v10464_v29 = vor.u32 %v11447_v5, %v10461_v21  ;;  %v9901_v5 = vld [vmem:[%s12872_s12 + $0x2fc] sm:$0xf0]  ;;  %v9907_v21 = vld [vmem:[%s12872_s12 + $0x278] sm:$0xf] }
 0xf40   : > { %6071 = vmatpush.bf16.msra.mxu2 %v9748_v27  ;;  %v10468_v27 = vor.u32 %v11465_v23, %v10467_v40  ;;  %v11325_v40 = vld [vmem:[%s12872_s12 + $0x300] sm:$0xf0]  ;;  %v11271_v23 = vld [vmem:[%s12872_s12 + $0x154] sm:$0xf] }
 0xf41   : > { %6099 = vmatpush.bf16.msrb.mxu0 %v9752_v60  ;;  %6016 = vmatpush.bf16.msrb.mxu3 %v9600_v48  ;;  %v10321_v60 = vld [vmem:[%s12872_s12 + $0x644] sm:$0xf0]  ;;  %v10327_v48 = vld [vmem:[%s12872_s12 + $0x5c0] sm:$0xf] }
 0xf42   : > { %v10324_v42 = vor.u32 %v11412_v28, %v10321_v60  ;;  %v9761_v28 = vld [vmem:[%s12872_s12 + $0x1e4] sm:$0xf0]  ;;  %v9767_v60 = vld [vmem:[%s12872_s12 + $0x160] sm:$0xf] }
 0xf43   : > { %6044 = vmatpush.bf16.msra.mxu1 %v9604_v2  ;;  %v10328_v2 = vor.u32 %v11430_v26, %v10327_v48  ;;  %v14170_v48 = vld [vmem:[%s12874_s2] sm:$0xff]  ;;  %v11290_v26 = vld [vmem:[%s12872_s12 + $0x1e8] sm:$0xf0] }
 0xf44   : > { %6017 = vmatmul.bf16.vlgmr.msrb.gmra.mxu3 %v13859_v57  ;;  %6072 = vmatpush.bf16.msra.mxu2 %v9608_v24  ;;  %v10181_v24 = vld [vmem:[%s12872_s12 + $0x52c] sm:$0xf0] }
 0xf45   : > { %6086 = vmatpush.bf16.msra.mxu3 %v10728_v32  ;;  %6100 = vmatpush.bf16.msrb.mxu0 %v9612_v31  ;;  %v10320_v32 = vor.u32 %v11429_v56, %v10319_v47  ;;  %v10033_v31 = vld [vmem:[%s12872_s12 + $0x40c] sm:$0xf0]  ;;  %v10184_v43 = vor.u32 %v11377_v62, %v10181_v24  ;;  %v11289_v47 = vld [vmem:[%s12872_s12 + $0x1e0] sm:$0xf0]  ;;  %v11272_v56 = vld [vmem:[%s12872_s12 + $0x15c] sm:$0xf]  ;;  %v9768_v24 = vor.u32 %v11290_v26, %v9767_v60 }
 0xf46   : > { %6045 = vmatmul.bf16.vlgmr.msra.gmra.mxu1 %v13859_v57  ;;  %v10036_v16 = vor.u32 %v11341_v39, %v10033_v31  ;;  %v11254_v62 = vld [vmem:[%s12872_s12 + $0xc8] sm:$0xf0]  ;;  %v9621_v39 = vld [vmem:[%s12872_s12 + $0xcc] sm:$0xf0]  ;;  %v9627_v31 = vld [vmem:[%s12872_s12 + $0x48] sm:$0xf] }
 0xf47   : > { %6073 = vmatmul.bf16.vlgmr.msra.gmra.mxu2 %v13859_v57  ;;  %6114 = vmatpush.bf16.msrb.mxu1 %v10732_v9  ;;  %v10047_v9 = vld [vmem:[%s12872_s12 + $0x390] sm:$0xf]  ;;  %v10475_v60 = vld [vmem:[%s12872_s12 + $0x6e0] sm:$0xf]  ;;  %v11466_v26 = vld [vmem:[%s12872_s12 + $0x768] sm:$0xf0] }
 0xf48   : > { %6142 = vmatpush.bf16.msrb.mxu2 %v10736_v18  ;;  %6101 = vmatmul.bf16.vlgmr.msrb.gmra.mxu0 %v13859_v57  ;;  %v10188_v18 = vor.u32 %v11395_v63, %v10187_v61  ;;  %v10048_v17 = vor.u32 %v11360_v11, %v10047_v9  ;;  %v9616_v61 = vor.u32 %v11236_v55, %v9613_v58  ;;  %v11237_v63 = vld [vmem:[%s12872_s12 + $0x44] sm:$0xf]  ;;  %v10747_v11 = vld [vmem:[%s12872_s12 + $0x908] sm:$0xf] }
 0xf49   : > { %6121 = vmatpush.bf16.msrb.mxu3 %v10596_v25  ;;  %6170 = vmatpush.bf16.msra.mxu0 %v10740_v14  ;;  %v10180_v25 = vor.u32 %v11394_v22, %v10179_v49  ;;  %v10044_v14 = vor.u32 %v11342_v12, %v10041_v10  ;;  %v10741_v49 = vld [vmem:[%s12872_s12 + $0x98c] sm:$0xf0]  ;;  %v9764_v22 = vor.u32 %v11272_v56, %v9761_v28  ;;  %v10749_v12 = vld [vmem:[%s12872_s12 + $0x994] sm:$0xf0] }
 0xf4a   : > { %v9624_v9 = vor.u32 %v11237_v63, %v9621_v39  ;;  %v10476_v63 = vor.u32 %v11466_v26, %v10475_v60  ;;  %v4046_v39 = vperm.slane %v14170_v48, 2 }
 0xf4b   : > { %6149 = vmatpush.bf16.msra.mxu1 %v10600_v13  ;;  %v10040_v13 = vor.u32 %v11359_v44, %v10039_v59  ;;  %v11483_v59 = vld [vmem:[%s12872_s12 + $0x7f4] sm:$0xf]  ;;  %v10609_v44 = vld [vmem:[%s12872_s12 + $0x87c] sm:$0xf0] }
 0xf4c   : > { %6177 = vmatpush.bf16.msra.mxu2 %v10604_v7  ;;  %v9899_v7 = vld [vmem:[%s12872_s12 + $0x270] sm:$0xf] }
 0xf4d   : > { %6205 = vmatpush.bf16.msrb.mxu0 %v10608_v19  ;;  %6122 = vmatpush.bf16.msrb.mxu3 %v10456_v6  ;;  %v9896_v19 = vor.u32 %v11306_v8, %v9893_v54  ;;  %v11307_v6 = vld [vmem:[%s12872_s12 + $0x274] sm:$0xf]  ;;  %v9900_v38 = vor.u32 %v11324_v15, %v9899_v7  ;;  %v10755_v54 = vld [vmem:[%s12872_s12 + $0x910] sm:$0xf]  ;;  %v10612_v15 = vor.u32 %v11483_v59, %v10609_v44  ;;  %v10335_v59 = vld [vmem:[%s12872_s12 + $0x5c8] sm:$0xf] }
 0xf4e   : > { %v11535_v8 = vld [vmem:[%s12872_s12 + $0x990] sm:$0xf0] }
 0xf4f   : > { %6150 = vmatpush.bf16.msra.mxu1 %v10460_v45  ;;  %v9904_v45 = vor.u32 %v11307_v6, %v9901_v5  ;;  %v11501_v6 = vld [vmem:[%s12872_s12 + $0x880] sm:$0xf0]  ;;  %v11431_v44 = vld [vmem:[%s12872_s12 + $0x650] sm:$0xf0] }
 0xf50   : > { %6178 = vmatpush.bf16.msra.mxu2 %v10464_v29  ;;  %v9759_v29 = vld [vmem:[%s12872_s12 + $0x158] sm:$0xf] }
 0xf51   : > { %6206 = vmatpush.bf16.msrb.mxu0 %v10468_v27  ;;  %6123 = vmatpush.bf16.msrb.mxu3 %v10316_v1  ;;  %v9908_v27 = vor.u32 %v11325_v40, %v9907_v21  ;;  %v9756_v1 = vor.u32 %v11271_v23, %v9753_v30  ;;  %v11484_v21 = vld [vmem:[%s12872_s12 + $0x7fc] sm:$0xf]  ;;  %v10617_v40 = vld [vmem:[%s12872_s12 + $0x884] sm:$0xf0]  ;;  %v10623_v23 = vld [vmem:[%s12872_s12 + $0x800] sm:$0xf] }
 0xf52   : > { %v10620_v28 = vor.u32 %v11484_v21, %v10617_v40 }
 0xf53   : > { %6151 = vmatpush.bf16.msra.mxu1 %v10320_v32  ;;  %v9760_v32 = vor.u32 %v11289_v47, %v9759_v29  ;;  %v11448_v29 = vld [vmem:[%s12872_s12 + $0x6dc] sm:$0xf]  ;;  %v10469_v47 = vld [vmem:[%s12872_s12 + $0x764] sm:$0xf0] }
 0xf54   : > { %6179 = vmatpush.bf16.msra.mxu2 %v10324_v42  ;;  %10826 = vmatmul.msk.bf16.vlgmr.msra.gmra.mxu3 %vm1373_vm4, %v13848_v46  ;;  %v11517_v42 = vld [vmem:[%s12872_s12 + $0x904] sm:$0xf]  ;;  %v10472_v58 = vor.u32 %v11448_v29, %v10469_v47  ;;  %v11343_v47 = vld [vmem:[%s12872_s12 + $0x394] sm:$0xf] }
 0xf55   : > { %6207 = vmatpush.bf16.msrb.mxu0 %v10328_v2  ;;  %6124 = vmatpush.bf16.msrb.mxu3 %v10176_v3  ;;  %v4044_v2 = vperm.slane %v14170_v48, 0  ;;  %v9619_v3 = vld [vmem:[%s12872_s12 + $0x40] sm:$0xf]  ;;  %v11397_v29 = vld [vmem:[%s12872_s12 + $0x540] sm:$0xf0] }
 0xf56   : > { %10827 = vmatmul.msk.bf16.vlgmr.msrb.gmra.mxu1 %vm1373_vm4, %v13848_v46 }
 0xf57   : > { %6152 = vmatpush.bf16.msra.mxu1 %v10180_v25  ;;  %10828 = vmatmul.msk.bf16.vlgmr.msrb.gmra.mxu2 %vm1373_vm4, %v13848_v46  ;;  %v10744_v25 = vor.u32 %v11517_v42, %v10741_v49  ;;  %v11449_v42 = vld [vmem:[%s12872_s12 + $0x6e4] sm:$0xf]  ;;  %v10477_v49 = vld [vmem:[%s12872_s12 + $0x76c] sm:$0xf0] }
 0xf58   : > { %6180 = vmatpush.bf16.msra.mxu2 %v10184_v43  ;;  %10829 = vmatmul.msk.bf16.vlgmr.msra.gmra.mxu0 %vm1373_vm4, %v13848_v46  ;;  %v11255_v43 = vld [vmem:[%s12872_s12 + $0xd0] sm:$0xf0] }
 0xf59   : > { %6208 = vmatpush.bf16.msrb.mxu0 %v10188_v18  ;;  %6125 = vmatpush.bf16.msrb.mxu3 %v10036_v16  ;;  %v9620_v18 = vor.u32 %v11254_v62, %v9619_v3  ;;  %v11518_v16 = vld [vmem:[%s12872_s12 + $0x90c] sm:$0xf]  ;;  %v9628_v7 = vor.u32 %v11255_v43, %v9627_v31  ;;  %v11467_v3 = vld [vmem:[%s12872_s12 + $0x770] sm:$0xf0]  ;;  %v11413_v62 = vld [vmem:[%s12872_s12 + $0x5c4] sm:$0xf]  ;;  %v10480_v43 = vor.u32 %v11449_v42, %v10477_v49 }
 0xf5a   : > { %v10752_v5 = vor.u32 %v11518_v16, %v10749_v12  ;;  %v11414_v12 = vld [vmem:[%s12872_s12 + $0x5cc] sm:$0xf] }
 0xf5b   : > { %6153 = vmatpush.bf16.msra.mxu1 %v10040_v13  ;;  %v5710_v10 = vpop.f32.mrf.mxu1 }
 0xf5c   : > { %6181 = vmatpush.bf16.msra.mxu2 %v10044_v14  ;;  %v5711_v13 = vadd.f32 %v5710_v10, %v4044_v2  ;;  %v14193_v14 = vpop.f32.mrf.mxu0  ;;  %v10337_v10 = vld [vmem:[%s12872_s12 + $0x654] sm:$0xf0] }
 0xf5d   : > { %6209 = vmatpush.bf16.msrb.mxu0 %v10048_v17  ;;  %6126 = vmatpush.bf16.msrb.mxu3 %v9896_v19  ;;  %v11536_v17 = vld [vmem:[%s12872_s12 + $0x998] sm:$0xf0]  ;;  %v10615_v19 = vld [vmem:[%s12872_s12 + $0x7f8] sm:$0xf] }
 0xf5e   : > { %v5724_v30 = vpop.f32.mrf.mxu3 }
 0xf5f   : > { %6154 = vmatpush.bf16.msra.mxu1 %v9900_v38  ;;  %v10748_v38 = vor.u32 %v11535_v8, %v10747_v11  ;;  %v14205_v56 = vadd.f32 %v5724_v30, %v5711_v13  ;;  %v11432_v8 = vld [vmem:[%s12872_s12 + $0x658] sm:$0xf0]  ;;  %v10197_v30 = vld [vmem:[%s12872_s12 + $0x53c] sm:$0xf0] }
 0xf60   : > { %6182 = vmatpush.bf16.msra.mxu2 %v9904_v45  ;;  %v11502_v45 = vld [vmem:[%s12872_s12 + $0x888] sm:$0xf0] }
 0xf61   : > { %6210 = vmatpush.bf16.msrb.mxu0 %v9908_v27  ;;  %6127 = vmatpush.bf16.msrb.mxu3 %v9756_v1  ;;  %v10616_v27 = vor.u32 %v11501_v6, %v10615_v19  ;;  %v10756_v1 = vor.u32 %v11536_v17, %v10755_v54  ;;  %v10624_v55 = vor.u32 %v11502_v45, %v10623_v23  ;;  %v11378_v54 = vld [vmem:[%s12872_s12 + $0x4ac] sm:$0xf]  ;;  %v10195_v19 = vld [vmem:[%s12872_s12 + $0x4b0] sm:$0xf]  ;;  %v11396_v6 = vld [vmem:[%s12872_s12 + $0x538] sm:$0xf0] }
 0xf62   : > { %v10340_v17 = vor.u32 %v11414_v12, %v10337_v10  ;;  %v11379_v23 = vld [vmem:[%s12872_s12 + $0x4b4] sm:$0xf]  ;;  %v5767_v45 = vadd.f32 %v14193_v14, %v4046_v39  ;;  %v11361_v14 = vld [vmem:[%s12872_s12 + $0x420] sm:$0xf0] }
 0xf63   : > { %6155 = vmatpush.bf16.msra.mxu1 %v9760_v32  ;;  %v5738_v32 = vpop.f32.mrf.mxu2 }
 0xf64   : > { %6183 = vmatpush.bf16.msra.mxu2 %v9764_v22  ;;  %v10483_v22 = vld [vmem:[%s12872_s12 + $0x6e8] sm:$0xf] }
 0xf65   : > { %6211 = vmatpush.bf16.msrb.mxu0 %v9768_v24  ;;  %6128 = vmatpush.bf16.msrb.mxu3 %v9616_v61  ;;  %v10329_v24 = vld [vmem:[%s12872_s12 + $0x64c] sm:$0xf0]  ;;  %v5712_v61 = vpop.f32.mrf.mxu1 }
 0xf66   : > { %v5713_v31 = vadd.f32 %v5712_v61, %v4044_v2  ;;  %v10332_v16 = vor.u32 %v11413_v62, %v10329_v24  ;;  %v5726_v11 = vpop.f32.mrf.mxu3  ;;  %v10189_v2 = vld [vmem:[%s12872_s12 + $0x534] sm:$0xf0]  ;;  %v10057_v62 = vld [vmem:[%s12872_s12 + $0x424] sm:$0xf0]  ;;  %v10063_v24 = vld [vmem:[%s12872_s12 + $0x3a0] sm:$0xf] }
 0xf67   : > { %6156 = vmatpush.bf16.msra.mxu1 %v9620_v18  ;;  %v10484_v18 = vor.u32 %v11467_v3, %v10483_v22  ;;  %v10192_v21 = vor.u32 %v11378_v54, %v10189_v2  ;;  %v11344_v3 = vld [vmem:[%s12872_s12 + $0x39c] sm:$0xf]  ;;  %v9923_v54 = vld [vmem:[%s12872_s12 + $0x288] sm:$0xf] }
 0xf68   : > { %6129 = vmatmul.bf16.vlgmr.msrb.gmra.mxu3 %v13859_v57  ;;  %6184 = vmatpush.bf16.msra.mxu2 %v9624_v9  ;;  %v10343_v9 = vld [vmem:[%s12872_s12 + $0x5d0] sm:$0xf]  ;;  %v14231_v13 = vadd.f32 %v5726_v11, %v5713_v31  ;;  %v11308_v31 = vld [vmem:[%s12872_s12 + $0x27c] sm:$0xf]  ;;  %v11309_v11 = vld [vmem:[%s12872_s12 + $0x284] sm:$0xf] }
 0xf69   : > { %6198 = vmatpush.bf16.msra.mxu3 %v10744_v25  ;;  %6212 = vmatpush.bf16.msrb.mxu0 %v9628_v7  ;;  %v14221_v25 = vpop.f32.mrf.mxu0  ;;  %v10336_v7 = vor.u32 %v11431_v44, %v10335_v59  ;;  %v10060_v44 = vor.u32 %v11344_v3, %v10057_v62  ;;  %v4048_v3 = vperm.slane %v14170_v48, 4  ;;  %v9635_v62 = vld [vmem:[%s12872_s12 + $0x50] sm:$0xf] }
 0xf6a   : > { %6157 = vmatmul.bf16.vlgmr.msra.gmra.mxu1 %v13859_v57  ;;  %v5769_v2 = vadd.f32 %v14221_v25, %v4046_v39 }
 0xf6b   : > { %6185 = vmatmul.bf16.vlgmr.msra.gmra.mxu2 %v13859_v57  ;;  %6226 = vmatpush.bf16.msrb.mxu1 %v10748_v38  ;;  %v5740_v40 = vpop.f32.mrf.mxu2  ;;  %v10203_v38 = vld [vmem:[%s12872_s12 + $0x4b8] sm:$0xf] }
 0xf6c   : > { %6254 = vmatpush.bf16.msrb.mxu2 %v10752_v5  ;;  %6213 = vmatmul.bf16.vlgmr.msrb.gmra.mxu0 %v13859_v57  ;;  %v10344_v5 = vor.u32 %v11432_v8, %v10343_v9  ;;  %v10204_v49 = vor.u32 %v11397_v29, %v10203_v38  ;;  %v9917_v8 = vld [vmem:[%s12872_s12 + $0x30c] sm:$0xf0] }
 0xf6d   : > { %6233 = vmatpush.bf16.msrb.mxu3 %v10612_v15  ;;  %6282 = vmatpush.bf16.msra.mxu0 %v10756_v1  ;;  %v4045_v15 = vperm.slane %v14170_v48, 1  ;;  %v5780_v1 = vpop.f32.mrf.mxu1 }
 0xf6e   : > { %v14245_v60 = vadd.f32 %v5780_v1, %v5767_v45  ;;  %v5752_v61 = vpop.f32.mrf.mxu3  ;;  %v9783_v1 = vld [vmem:[%s12872_s12 + $0x170] sm:$0xf] }
 0xf6f   : > { %6261 = vmatpush.bf16.msra.mxu1 %v10616_v27  ;;  %v10049_v27 = vld [vmem:[%s12872_s12 + $0x41c] sm:$0xf0]  ;;  %v5739_v42 = vadd.f32 %v5738_v32, %v4045_v15  ;;  %v5741_v38 = vadd.f32 %v5740_v40, %v4045_v15  ;;  %v11519_v40 = vld [vmem:[%s12872_s12 + $0x914] sm:$0xf] }
 0xf70   : > { %6289 = vmatpush.bf16.msra.mxu2 %v10620_v28  ;;  %v10196_v28 = vor.u32 %v11396_v6, %v10195_v19  ;;  %v10052_v22 = vor.u32 %v11343_v47, %v10049_v27  ;;  %v9769_v19 = vld [vmem:[%s12872_s12 + $0x1ec] sm:$0xf0]  ;;  %v11274_v47 = vld [vmem:[%s12872_s12 + $0x16c] sm:$0xf]  ;;  %v9777_v27 = vld [vmem:[%s12872_s12 + $0x1f4] sm:$0xf0] }
 0xf71   : > { %6317 = vmatpush.bf16.msrb.mxu0 %v10624_v55  ;;  %6234 = vmatpush.bf16.msrb.mxu3 %v10472_v58  ;;  %v14247_v26 = vpop.f32.mrf.mxu0  ;;  %v10200_v55 = vor.u32 %v11379_v23, %v10197_v30  ;;  %v10055_v58 = vld [vmem:[%s12872_s12 + $0x398] sm:$0xf]  ;;  %v14261_v32 = vadd.f32 %v5752_v61, %v5739_v42  ;;  %v9775_v23 = vld [vmem:[%s12872_s12 + $0x168] sm:$0xf]  ;;  %v11291_v30 = vld [vmem:[%s12872_s12 + $0x1f0] sm:$0xf0] }
 0xf72   : > { %v10056_v59 = vor.u32 %v11361_v14, %v10055_v58  ;;  %v11238_v58 = vld [vmem:[%s12872_s12 + $0x4c] sm:$0xf]  ;;  %v9629_v14 = vld [vmem:[%s12872_s12 + $0xd4] sm:$0xf0]  ;;  %v9776_v15 = vor.u32 %v11291_v30, %v9775_v23 }
 0xf73   : > { %6262 = vmatpush.bf16.msra.mxu1 %v10476_v63  ;;  %v11362_v63 = vld [vmem:[%s12872_s12 + $0x428] sm:$0xf0]  ;;  %v14265_v9 = vpop.f32.mrf.mxu2 }
 0xf74   : > { %6290 = vmatpush.bf16.msra.mxu2 %v10480_v43  ;;  %v9909_v43 = vld [vmem:[%s12872_s12 + $0x304] sm:$0xf0]  ;;  %v10064_v12 = vor.u32 %v11362_v63, %v10063_v24  ;;  %v11256_v24 = vld [vmem:[%s12872_s12 + $0xd8] sm:$0xf0]  ;;  %v9632_v63 = vor.u32 %v11238_v58, %v9629_v14  ;;  %v10639_v58 = vld [vmem:[%s12872_s12 + $0x810] sm:$0xf] }
 0xf75   : > { %6318 = vmatpush.bf16.msrb.mxu0 %v10484_v18  ;;  %6235 = vmatpush.bf16.msrb.mxu3 %v10332_v16  ;;  %v9915_v18 = vld [vmem:[%s12872_s12 + $0x280] sm:$0xf]  ;;  %v11326_v16 = vld [vmem:[%s12872_s12 + $0x308] sm:$0xf0]  ;;  %v9912_v10 = vor.u32 %v11308_v31, %v9909_v43  ;;  %v5782_v6 = vpop.f32.mrf.mxu1  ;;  %v11239_v43 = vld [vmem:[%s12872_s12 + $0x54] sm:$0xf] }
 0xf76   : > { %v14282_v39 = vadd.f32 %v5782_v6, %v5769_v2  ;;  %v11520_v2 = vld [vmem:[%s12872_s12 + $0x91c] sm:$0xf]  ;;  %v10763_v6 = vld [vmem:[%s12872_s12 + $0x918] sm:$0xf] }
 0xf77   : > { %6263 = vmatpush.bf16.msra.mxu1 %v10336_v7  ;;  %v11327_v7 = vld [vmem:[%s12872_s12 + $0x310] sm:$0xf0] }
 0xf78   : > { %6291 = vmatpush.bf16.msra.mxu2 %v10340_v17  ;;  %10830 = vmatmul.msk.bf16.vlgmr.msra.gmra.mxu3 %vm1373_vm4, %v13848_v46  ;;  %v11273_v17 = vld [vmem:[%s12872_s12 + $0x164] sm:$0xf]  ;;  %v9924_v45 = vor.u32 %v11327_v7, %v9923_v54  ;;  %v4047_v54 = vperm.slane %v14170_v48, 3  ;;  %v10765_v7 = vld [vmem:[%s12872_s12 + $0x9a4] sm:$0xf0] }
 0xf79   : > { %6319 = vmatpush.bf16.msrb.mxu0 %v10344_v5  ;;  %6236 = vmatpush.bf16.msrb.mxu3 %v10192_v21  ;;  %v9916_v5 = vor.u32 %v11326_v16, %v9915_v18  ;;  %v14284_v25 = vpop.f32.mrf.mxu0  ;;  %v9920_v21 = vor.u32 %v11309_v11, %v9917_v8  ;;  %v9772_v29 = vor.u32 %v11273_v17, %v9769_v19  ;;  %v11257_v16 = vld [vmem:[%s12872_s12 + $0xe0] sm:$0xf0] }
 0xf7a   : > { %10831 = vmatmul.msk.bf16.vlgmr.msrb.gmra.mxu1 %vm1373_vm4, %v13848_v46  ;;  %v9636_v8 = vor.u32 %v11256_v24, %v9635_v62 }
 0xf7b   : > { %6264 = vmatpush.bf16.msra.mxu1 %v10196_v28  ;;  %10832 = vmatmul.msk.bf16.vlgmr.msrb.gmra.mxu2 %vm1373_vm4, %v13848_v46  ;;  %v5754_v28 = vpop.f32.mrf.mxu3  ;;  %v14303_v31 = vpop.f32.mrf.mxu2 }
 0xf7c   : > { %6292 = vmatpush.bf16.msra.mxu2 %v10200_v55  ;;  %10833 = vmatmul.msk.bf16.vlgmr.msra.gmra.mxu0 %vm1373_vm4, %v13848_v46  ;;  %v11292_v55 = vld [vmem:[%s12872_s12 + $0x1f8] sm:$0xf0]  ;;  %v14296_v42 = vadd.f32 %v5754_v28, %v5741_v38  ;;  %v11486_v28 = vld [vmem:[%s12872_s12 + $0x80c] sm:$0xf] }
 0xf7d   : > { %6320 = vmatpush.bf16.msrb.mxu0 %v10204_v49  ;;  %6237 = vmatpush.bf16.msrb.mxu3 %v10052_v22  ;;  %v10757_v49 = vld [vmem:[%s12872_s12 + $0x99c] sm:$0xf0]  ;;  %v9780_v22 = vor.u32 %v11274_v47, %v9777_v27  ;;  %v9784_v61 = vor.u32 %v11292_v55, %v9783_v1  ;;  %v5822_v11 = vpop.f32.mrf.mxu1  ;;  %v11503_v47 = vld [vmem:[%s12872_s12 + $0x890] sm:$0xf0]  ;;  %v10768_v1 = vor.u32 %v11520_v2, %v10765_v7  ;;  %v10633_v55 = vld [vmem:[%s12872_s12 + $0x894] sm:$0xf0] }
 0xf7e   : > { %v10760_v18 = vor.u32 %v11519_v40, %v10757_v49  ;;  %v5823_v17 = vadd.f32 %v5822_v11, %v4048_v3  ;;  %v11504_v40 = vld [vmem:[%s12872_s12 + $0x898] sm:$0xf0]  ;;  %v11450_v49 = vld [vmem:[%s12872_s12 + $0x6ec] sm:$0xf]  ;;  %v10499_v11 = vld [vmem:[%s12872_s12 + $0x6f8] sm:$0xf] }
 0xf7f   : > { %6265 = vmatpush.bf16.msra.mxu1 %v10056_v59  ;;  %v9637_v59 = vld [vmem:[%s12872_s12 + $0xdc] sm:$0xf0]  ;;  %v11469_v2 = vld [vmem:[%s12872_s12 + $0x780] sm:$0xf0]  ;;  %v11415_v7 = vld [vmem:[%s12872_s12 + $0x5d4] sm:$0xf] }
 0xf80   : > { %6293 = vmatpush.bf16.msra.mxu2 %v10060_v44  ;;  %v9643_v44 = vld [vmem:[%s12872_s12 + $0x58] sm:$0xf]  ;;  %v9640_v19 = vor.u32 %v11239_v43, %v9637_v59  ;;  %v14325_v27 = vadd.f32 %v14247_v26, %v5823_v17  ;;  %v11468_v43 = vld [vmem:[%s12872_s12 + $0x778] sm:$0xf0] }
 0xf81   : > { %6321 = vmatpush.bf16.msrb.mxu0 %v10064_v12  ;;  %6238 = vmatpush.bf16.msrb.mxu3 %v9912_v10  ;;  %v11485_v12 = vld [vmem:[%s12872_s12 + $0x804] sm:$0xf]  ;;  %v10625_v10 = vld [vmem:[%s12872_s12 + $0x88c] sm:$0xf0]  ;;  %v14319_v23 = vpop.f32.mrf.mxu0  ;;  %v9644_v30 = vor.u32 %v11257_v16, %v9643_v44  ;;  %v10640_v44 = vor.u32 %v11504_v40, %v10639_v58  ;;  %v11434_v58 = vld [vmem:[%s12872_s12 + $0x668] sm:$0xf0] }
 0xf82   : > { %v10628_v38 = vor.u32 %v11485_v12, %v10625_v10  ;;  %v11451_v12 = vld [vmem:[%s12872_s12 + $0x6f4] sm:$0xf]  ;;  %v10493_v10 = vld [vmem:[%s12872_s12 + $0x77c] sm:$0xf0] }
 0xf83   : > { %6266 = vmatpush.bf16.msra.mxu1 %v9916_v5  ;;  %v11537_v5 = vld [vmem:[%s12872_s12 + $0x9a0] sm:$0xf0]  ;;  %v5794_v14 = vpop.f32.mrf.mxu3  ;;  %v14342_v16 = vpop.f32.mrf.mxu2 }
 0xf84   : > { %6294 = vmatpush.bf16.msra.mxu2 %v9920_v21  ;;  %v10771_v21 = vld [vmem:[%s12872_s12 + $0x920] sm:$0xf]  ;;  %v5795_v26 = vadd.f32 %v5794_v14, %v4047_v54  ;;  %v11380_v14 = vld [vmem:[%s12872_s12 + $0x4bc] sm:$0xf] }
 0xf85   : > { %6322 = vmatpush.bf16.msrb.mxu0 %v9924_v45  ;;  %6239 = vmatpush.bf16.msrb.mxu3 %v9772_v29  ;;  %v11538_v45 = vld [vmem:[%s12872_s12 + $0x9a8] sm:$0xf0]  ;;  %v10631_v29 = vld [vmem:[%s12872_s12 + $0x808] sm:$0xf] }
 0xf86   : > { %v10632_v62 = vor.u32 %v11503_v47, %v10631_v29  ;;  %v10772_v24 = vor.u32 %v11538_v45, %v10771_v21  ;;  %v14339_v59 = vadd.f32 %v14265_v9, %v5795_v26  ;;  %v10345_v9 = vld [vmem:[%s12872_s12 + $0x65c] sm:$0xf0]  ;;  %v10496_v21 = vor.u32 %v11451_v12, %v10493_v10  ;;  %v11416_v47 = vld [vmem:[%s12872_s12 + $0x5dc] sm:$0xf]  ;;  %v11399_v10 = vld [vmem:[%s12872_s12 + $0x550] sm:$0xf0] }
 0xf87   : > { %6267 = vmatpush.bf16.msra.mxu1 %v9776_v15  ;;  %v10764_v15 = vor.u32 %v11537_v5, %v10763_v6  ;;  %v4050_v6 = vperm.slane %v14170_v48, 6  ;;  %v10348_v29 = vor.u32 %v11415_v7, %v10345_v9  ;;  %v10211_v26 = vld [vmem:[%s12872_s12 + $0x4c0] sm:$0xf] }
 0xf88   : > { %6295 = vmatpush.bf16.msra.mxu2 %v9780_v22  ;;  %v10485_v22 = vld [vmem:[%s12872_s12 + $0x774] sm:$0xf0]  ;;  %16199 = vst [vmem:[#allocation66_spill] sm:$0xff] %v14339_v59 }
 0xf89   : > { %6323 = vmatpush.bf16.msrb.mxu0 %v9784_v61  ;;  %6240 = vmatpush.bf16.msrb.mxu3 %v9632_v63  ;;  %v10636_v61 = vor.u32 %v11486_v28, %v10633_v55  ;;  %v10491_v63 = vld [vmem:[%s12872_s12 + $0x6f0] sm:$0xf]  ;;  %v14355_v5 = vpop.f32.mrf.mxu0  ;;  %v10359_v28 = vld [vmem:[%s12872_s12 + $0x5e0] sm:$0xf]  ;;  %v5879_v12 = vadd.f32 %v14319_v23, %v4050_v6  ;;  %v11363_v23 = vld [vmem:[%s12872_s12 + $0x430] sm:$0xf0] }
 0xf8b   : > { %6268 = vmatpush.bf16.msra.mxu1 %v9636_v8  ;;  %v5824_v8 = vpop.f32.mrf.mxu1  ;;  %v5796_v55 = vpop.f32.mrf.mxu3 }
 0xf8c   : > { %6241 = vmatmul.bf16.vlgmr.msrb.gmra.mxu3 %v13859_v57  ;;  %6296 = vmatpush.bf16.msra.mxu2 %v9640_v19  ;;  %v5825_v17 = vadd.f32 %v5824_v8, %v4048_v3  ;;  %v10492_v19 = vor.u32 %v11468_v43, %v10491_v63  ;;  %v10500_v3 = vor.u32 %v11469_v2, %v10499_v11  ;;  %v5852_v43 = vpop.f32.mrf.mxu2  ;;  %v11345_v11 = vld [vmem:[%s12872_s12 + $0x3a4] sm:$0xf]  ;;  %v10065_v8 = vld [vmem:[%s12872_s12 + $0x42c] sm:$0xf0] }
 0xf8d   : > { %6310 = vmatpush.bf16.msra.mxu3 %v10760_v18  ;;  %6324 = vmatpush.bf16.msrb.mxu0 %v9644_v30  ;;  %v10488_v18 = vor.u32 %v11450_v49, %v10485_v22  ;;  %v10351_v30 = vld [vmem:[%s12872_s12 + $0x5d8] sm:$0xf]  ;;  %v5797_v40 = vadd.f32 %v5796_v55, %v4047_v54  ;;  %v4049_v49 = vperm.slane %v14170_v48, 5  ;;  %v11381_v54 = vld [vmem:[%s12872_s12 + $0x4c4] sm:$0xf] }
 0xf8e   : > { %6269 = vmatmul.bf16.vlgmr.msra.gmra.mxu1 %v13859_v57  ;;  %v14360_v45 = vadd.f32 %v14284_v25, %v5825_v17  ;;  %v11310_v55 = vld [vmem:[%s12872_s12 + $0x28c] sm:$0xf] }
 0xf8f   : > { %6297 = vmatmul.bf16.vlgmr.msra.gmra.mxu2 %v13859_v57  ;;  %6338 = vmatpush.bf16.msrb.mxu1 %v10764_v15  ;;  %v10205_v15 = vld [vmem:[%s12872_s12 + $0x544] sm:$0xf0] }
 0xf90   : > { %6366 = vmatpush.bf16.msrb.mxu2 %v10768_v1  ;;  %6325 = vmatmul.bf16.vlgmr.msrb.gmra.mxu0 %v13859_v57  ;;  %v10353_v1 = vld [vmem:[%s12872_s12 + $0x664] sm:$0xf0]  ;;  %v10208_v63 = vor.u32 %v11380_v14, %v10205_v15 }
 0xf91   : > { %6345 = vmatpush.bf16.msrb.mxu3 %v10628_v38  ;;  %6394 = vmatpush.bf16.msra.mxu0 %v10772_v24  ;;  %v11433_v38 = vld [vmem:[%s12872_s12 + $0x660] sm:$0xf0]  ;;  %v10356_v22 = vor.u32 %v11416_v47, %v10353_v1  ;;  %v14374_v24 = vadd.f32 %v14303_v31, %v5797_v40  ;;  %v14387_v9 = vpop.f32.mrf.mxu0  ;;  %v10079_v47 = vld [vmem:[%s12872_s12 + $0x3b0] sm:$0xf] }
 0xf92   : > { %v10352_v25 = vor.u32 %v11433_v38, %v10351_v30  ;;  %v10068_v38 = vor.u32 %v11345_v11, %v10065_v8  ;;  %v9931_v40 = vld [vmem:[%s12872_s12 + $0x290] sm:$0xf] }
 0xf93   : > { %6373 = vmatpush.bf16.msra.mxu1 %v10632_v62  ;;  %v11398_v62 = vld [vmem:[%s12872_s12 + $0x548] sm:$0xf0]  ;;  %16200 = vst [vmem:[#allocation67_spill] sm:$0xff] %v14374_v24  ;;  %v5892_v31 = vpop.f32.mrf.mxu1  ;;  %v5864_v1 = vpop.f32.mrf.mxu3  ;;  %v9685_v24 = vld [vmem:[%s12872_s12 + $0x10c] sm:$0xf0] }
 0xf94   : > { %6401 = vmatpush.bf16.msra.mxu2 %v10636_v61  ;;  %v10360_v61 = vor.u32 %v11434_v58, %v10359_v28  ;;  %v10212_v2 = vor.u32 %v11398_v62, %v10211_v26  ;;  %v14385_v7 = vadd.f32 %v5892_v31, %v5879_v12  ;;  %v11364_v28 = vld [vmem:[%s12872_s12 + $0x438] sm:$0xf0]  ;;  %v9925_v58 = vld [vmem:[%s12872_s12 + $0x314] sm:$0xf0]  ;;  %v14406_v62 = vpop.f32.mrf.mxu2  ;;  %v11275_v12 = vld [vmem:[%s12872_s12 + $0x174] sm:$0xf] }
 0xf95   : > { %6429 = vmatpush.bf16.msrb.mxu0 %v10640_v44  ;;  %6346 = vmatpush.bf16.msrb.mxu3 %v10488_v18  ;;  %v10213_v44 = vld [vmem:[%s12872_s12 + $0x54c] sm:$0xf0]  ;;  %v10219_v18 = vld [vmem:[%s12872_s12 + $0x4c8] sm:$0xf]  ;;  %v9928_v26 = vor.u32 %v11310_v55, %v9925_v58 }
 0xf96   : > { %v10216_v17 = vor.u32 %v11381_v54, %v10213_v44  ;;  %v10220_v30 = vor.u32 %v11399_v10, %v10219_v18  ;;  %v9939_v54 = vld [vmem:[%s12872_s12 + $0x298] sm:$0xf]  ;;  %v5881_v44 = vadd.f32 %v14355_v5, %v4050_v6  ;;  %v11329_v18 = vld [vmem:[%s12872_s12 + $0x320] sm:$0xf0]  ;;  %v9785_v10 = vld [vmem:[%s12872_s12 + $0x1fc] sm:$0xf0] }
 0xf97   : > { %6374 = vmatpush.bf16.msra.mxu1 %v10492_v19  ;;  %v10071_v19 = vld [vmem:[%s12872_s12 + $0x3a8] sm:$0xf] }
 0xf98   : > { %6402 = vmatpush.bf16.msra.mxu2 %v10496_v21  ;;  %v5851_v21 = vadd.f32 %v14342_v16, %v4049_v49  ;;  %v10072_v14 = vor.u32 %v11363_v23, %v10071_v19  ;;  %v11276_v19 = vld [vmem:[%s12872_s12 + $0x17c] sm:$0xf]  ;;  %v5853_v23 = vadd.f32 %v5852_v43, %v4049_v49  ;;  %v9645_v55 = vld [vmem:[%s12872_s12 + $0xe4] sm:$0xf0]  ;;  %v11521_v43 = vld [vmem:[%s12872_s12 + $0x924] sm:$0xf] }
 0xf99   : > { %6430 = vmatpush.bf16.msrb.mxu0 %v10500_v3  ;;  %6347 = vmatpush.bf16.msrb.mxu3 %v10348_v29  ;;  %v11346_v3 = vld [vmem:[%s12872_s12 + $0x3ac] sm:$0xf]  ;;  %v10073_v29 = vld [vmem:[%s12872_s12 + $0x434] sm:$0xf0]  ;;  %v14425_v5 = vpop.f32.mrf.mxu0 }
 0xf9a   : > { %v14402_v16 = vadd.f32 %v5864_v1, %v5851_v21  ;;  %v10076_v15 = vor.u32 %v11346_v3, %v10073_v29  ;;  %v9940_v21 = vor.u32 %v11329_v18, %v9939_v54  ;;  %v9799_v3 = vld [vmem:[%s12872_s12 + $0x180] sm:$0xf]  ;;  %v11294_v1 = vld [vmem:[%s12872_s12 + $0x208] sm:$0xf0]  ;;  %v11241_v54 = vld [vmem:[%s12872_s12 + $0x64] sm:$0xf] }
 0xf9b   : > { %6375 = vmatpush.bf16.msra.mxu1 %v10352_v25  ;;  %v11328_v25 = vld [vmem:[%s12872_s12 + $0x318] sm:$0xf0]  ;;  %v5894_v11 = vpop.f32.mrf.mxu1  ;;  %v9659_v18 = vld [vmem:[%s12872_s12 + $0x68] sm:$0xf] }
 0xf9c   : > { %6403 = vmatpush.bf16.msra.mxu2 %v10356_v22  ;;  %10834 = vmatmul.msk.bf16.vlgmr.msra.gmra.mxu3 %vm1373_vm4, %v13848_v46  ;;  %v10080_v22 = vor.u32 %v11364_v28, %v10079_v47  ;;  %v9932_v8 = vor.u32 %v11328_v25, %v9931_v40  ;;  %v14423_v6 = vadd.f32 %v5894_v11, %v5881_v44  ;;  %v14435_v29 = vld [vmem:[%s12874_s2 + $0x8] sm:$0xff]  ;;  %v5866_v47 = vpop.f32.mrf.mxu3  ;;  %v9653_v44 = vld [vmem:[%s12872_s12 + $0xec] sm:$0xf0]  ;;  %v11487_v11 = vld [vmem:[%s12872_s12 + $0x814] sm:$0xf] }
 0xf9d   : > { %6431 = vmatpush.bf16.msrb.mxu0 %v10360_v61  ;;  %6348 = vmatpush.bf16.msrb.mxu3 %v10208_v63  ;;  %v11311_v61 = vld [vmem:[%s12872_s12 + $0x294] sm:$0xf]  ;;  %v9933_v63 = vld [vmem:[%s12872_s12 + $0x31c] sm:$0xf0]  ;;  %16201 = vst [vmem:[#allocation68_spill] sm:$0xff] %v14435_v29  ;;  %v14440_v58 = vadd.f32 %v5866_v47, %v5853_v23  ;;  %v4052_v40 = vperm.slane %v14435_v29, 0 }
 0xf9e   : > { %10835 = vmatmul.msk.bf16.vlgmr.msrb.gmra.mxu1 %vm1373_vm4, %v13848_v46  ;;  %v9936_v31 = vor.u32 %v11311_v61, %v9933_v63  ;;  %v11240_v28 = vld [vmem:[%s12872_s12 + $0x5c] sm:$0xf]  ;;  %v9651_v25 = vld [vmem:[%s12872_s12 + $0x60] sm:$0xf]  ;;  %v14447_v63 = vpop.f32.mrf.mxu2  ;;  %v10781_v23 = vld [vmem:[%s12872_s12 + $0x9b4] sm:$0xf0] }
 0xf9f   : > { %6376 = vmatpush.bf16.msra.mxu1 %v10212_v2  ;;  %10836 = vmatmul.msk.bf16.vlgmr.msrb.gmra.mxu2 %vm1373_vm4, %v13848_v46  ;;  %v9791_v2 = vld [vmem:[%s12872_s12 + $0x178] sm:$0xf]  ;;  %v9648_v61 = vor.u32 %v11240_v28, %v9645_v55  ;;  %v10787_v47 = vld [vmem:[%s12872_s12 + $0x930] sm:$0xf] }
 0xfa0   : > { %6404 = vmatpush.bf16.msra.mxu2 %v10216_v17  ;;  %10837 = vmatmul.msk.bf16.vlgmr.msra.gmra.mxu0 %vm1373_vm4, %v13848_v46  ;;  %v11293_v17 = vld [vmem:[%s12872_s12 + $0x200] sm:$0xf0] }
 0xfa1   : > { %6432 = vmatpush.bf16.msrb.mxu0 %v10220_v30  ;;  %6349 = vmatpush.bf16.msrb.mxu3 %v10068_v38  ;;  %v9788_v30 = vor.u32 %v11275_v12, %v9785_v10  ;;  %v9793_v38 = vld [vmem:[%s12872_s12 + $0x204] sm:$0xf0]  ;;  %v9792_v49 = vor.u32 %v11293_v17, %v9791_v2  ;;  %v11259_v10 = vld [vmem:[%s12872_s12 + $0xf0] sm:$0xf0]  ;;  %v4051_v17 = vperm.slane %v14170_v48, 7 }
 0xfa2   : > { %v9660_v28 = vor.u32 %v11259_v10, %v9659_v18  ;;  %v11452_v18 = vld [vmem:[%s12872_s12 + $0x6fc] sm:$0xf]  ;;  %v10501_v10 = vld [vmem:[%s12872_s12 + $0x784] sm:$0xf0] }
 0xfa3   : > { %6377 = vmatpush.bf16.msra.mxu1 %v10072_v14  ;;  %v10773_v14 = vld [vmem:[%s12872_s12 + $0x9ac] sm:$0xf0] }
 0xfa4   : > { %6405 = vmatpush.bf16.msra.mxu2 %v10076_v15  ;;  %v9796_v15 = vor.u32 %v11276_v19, %v9793_v38  ;;  %v10776_v12 = vor.u32 %v11521_v43, %v10773_v14  ;;  %v11522_v19 = vld [vmem:[%s12872_s12 + $0x92c] sm:$0xf]  ;;  %v10779_v38 = vld [vmem:[%s12872_s12 + $0x928] sm:$0xf]  ;;  %v10647_v43 = vld [vmem:[%s12872_s12 + $0x818] sm:$0xf] }
 0xfa5   : > { %6433 = vmatpush.bf16.msrb.mxu0 %v10080_v22  ;;  %6350 = vmatpush.bf16.msrb.mxu3 %v9928_v26  ;;  %v11258_v22 = vld [vmem:[%s12872_s12 + $0xe8] sm:$0xf0]  ;;  %v9800_v26 = vor.u32 %v11294_v1, %v9799_v3  ;;  %v11539_v3 = vld [vmem:[%s12872_s12 + $0x9b0] sm:$0xf0]  ;;  %v14463_v1 = vpop.f32.mrf.mxu0  ;;  %v11505_v14 = vld [vmem:[%s12872_s12 + $0x8a0] sm:$0xf0] }
 0xfa6   : > { %v9652_v2 = vor.u32 %v11258_v22, %v9651_v25  ;;  %v10784_v25 = vor.u32 %v11522_v19, %v10781_v23  ;;  %v11488_v22 = vld [vmem:[%s12872_s12 + $0x81c] sm:$0xf]  ;;  %v11470_v19 = vld [vmem:[%s12872_s12 + $0x788] sm:$0xf0] }
 0xfa7   : > { %6378 = vmatpush.bf16.msra.mxu1 %v9932_v8  ;;  %v10641_v8 = vld [vmem:[%s12872_s12 + $0x89c] sm:$0xf0] }
 0xfa8   : > { %6406 = vmatpush.bf16.msra.mxu2 %v9936_v31  ;;  %v5934_v31 = vpop.f32.mrf.mxu1  ;;  %v10644_v55 = vor.u32 %v11487_v11, %v10641_v8 }
 0xfa9   : > { %6434 = vmatpush.bf16.msrb.mxu0 %v9940_v21  ;;  %6351 = vmatpush.bf16.msrb.mxu3 %v9788_v30  ;;  %v5935_v21 = vadd.f32 %v5934_v31, %v4052_v40  ;;  %v9656_v30 = vor.u32 %v11241_v54, %v9653_v44  ;;  %v10649_v54 = vld [vmem:[%s12872_s12 + $0x8a4] sm:$0xf0]  ;;  %v10780_v44 = vor.u32 %v11539_v3, %v10779_v38  ;;  %v11506_v31 = vld [vmem:[%s12872_s12 + $0x8a8] sm:$0xf0]  ;;  %v14486_v38 = vpop.f32.mrf.mxu2  ;;  %v11453_v3 = vld [vmem:[%s12872_s12 + $0x704] sm:$0xf] }
 0xfaa   : > { %v10652_v8 = vor.u32 %v11488_v22, %v10649_v54  ;;  %v4054_v22 = vperm.slane %v14435_v29, 2 }
 0xfab   : > { %6379 = vmatpush.bf16.msra.mxu1 %v9792_v49  ;;  %v11540_v49 = vld [vmem:[%s12872_s12 + $0x9b8] sm:$0xf0] }
 0xfac   : > { %6407 = vmatpush.bf16.msra.mxu2 %v9796_v15  ;;  %v14469_v15 = vadd.f32 %v14387_v9, %v5935_v21  ;;  %v10788_v11 = vor.u32 %v11540_v49, %v10787_v47  ;;  %v11471_v49 = vld [vmem:[%s12872_s12 + $0x790] sm:$0xf0] }
 0xfad   : > { %6435 = vmatpush.bf16.msrb.mxu0 %v9800_v26  ;;  %6352 = vmatpush.bf16.msrb.mxu3 %v9648_v61  ;;  %v10655_v26 = vld [vmem:[%s12872_s12 + $0x820] sm:$0xf]  ;;  %v5906_v61 = vpop.f32.mrf.mxu3  ;;  %v14499_v54 = vpop.f32.mrf.mxu0 }
 0xfae   : > { %v5907_v9 = vadd.f32 %v5906_v61, %v4051_v17  ;;  %v10656_v21 = vor.u32 %v11506_v31, %v10655_v26  ;;  %v10367_v61 = vld [vmem:[%s12872_s12 + $0x5e8] sm:$0xf] }
 0xfaf   : > { %6380 = vmatpush.bf16.msra.mxu1 %v9652_v2  ;;  %v10507_v2 = vld [vmem:[%s12872_s12 + $0x700] sm:$0xf] }
 0xfb0   : > { %6353 = vmatmul.bf16.vlgmr.msrb.gmra.mxu3 %v13859_v57  ;;  %6408 = vmatpush.bf16.msra.mxu2 %v9656_v30  ;;  %v14483_v23 = vadd.f32 %v14406_v62, %v5907_v9  ;;  %v10504_v30 = vor.u32 %v11452_v18, %v10501_v10  ;;  %v5936_v47 = vpop.f32.mrf.mxu1  ;;  %v10361_v62 = vld [vmem:[%s12872_s12 + $0x66c] sm:$0xf0]  ;;  %v11418_v10 = vld [vmem:[%s12872_s12 + $0x5ec] sm:$0xf]  ;;  %v10369_v9 = vld [vmem:[%s12872_s12 + $0x674] sm:$0xf0] }
 0xfb1   : > { %6422 = vmatpush.bf16.msra.mxu3 %v10776_v12  ;;  %v10648_v12 = vor.u32 %v11505_v14, %v10647_v43  ;;  %6436 = vmatpush.bf16.msrb.mxu0 %v9660_v28  ;;  %v10509_v28 = vld [vmem:[%s12872_s12 + $0x78c] sm:$0xf0]  ;;  %v11417_v43 = vld [vmem:[%s12872_s12 + $0x5e4] sm:$0xf]  ;;  %v5937_v14 = vadd.f32 %v5936_v47, %v4052_v40  ;;  %v5964_v48 = vpop.f32.mrf.mxu2 }
 0xfb2   : > { %6381 = vmatmul.bf16.vlgmr.msra.gmra.mxu1 %v13859_v57  ;;  %v10512_v26 = vor.u32 %v11453_v3, %v10509_v28  ;;  %v10364_v18 = vor.u32 %v11417_v43, %v10361_v62  ;;  %v10372_v3 = vor.u32 %v11418_v10, %v10369_v9  ;;  %v10227_v28 = vld [vmem:[%s12872_s12 + $0x4d0] sm:$0xf]  ;;  %v10229_v62 = vld [vmem:[%s12872_s12 + $0x55c] sm:$0xf0] }
 0xfb3   : > { %6409 = vmatmul.bf16.vlgmr.msra.gmra.mxu2 %v13859_v57  ;;  %6450 = vmatpush.bf16.msrb.mxu1 %v10780_v44  ;;  %v11435_v44 = vld [vmem:[%s12872_s12 + $0x670] sm:$0xf0]  ;;  %v14504_v31 = vadd.f32 %v14425_v5, %v5937_v14  ;;  %v10235_v14 = vld [vmem:[%s12872_s12 + $0x4d8] sm:$0xf] }
 0xfb4   : > { %6478 = vmatpush.bf16.msrb.mxu2 %v10784_v25  ;;  %6437 = vmatmul.bf16.vlgmr.msrb.gmra.mxu0 %v13859_v57  ;;  %v10508_v25 = vor.u32 %v11470_v19, %v10507_v2  ;;  %v11382_v2 = vld [vmem:[%s12872_s12 + $0x4cc] sm:$0xf]  ;;  %v10221_v19 = vld [vmem:[%s12872_s12 + $0x554] sm:$0xf0]  ;;  %v10368_v5 = vor.u32 %v11435_v44, %v10367_v61  ;;  %v11347_v61 = vld [vmem:[%s12872_s12 + $0x3b4] sm:$0xf] }
 0xfb5   : > { %6457 = vmatpush.bf16.msrb.mxu3 %v10644_v55  ;;  %v10515_v55 = vld [vmem:[%s12872_s12 + $0x708] sm:$0xf]  ;;  %6506 = vmatpush.bf16.msra.mxu0 %v10788_v11  ;;  %v5908_v11 = vpop.f32.mrf.mxu3  ;;  %v10224_v43 = vor.u32 %v11382_v2, %v10221_v19  ;;  %v10081_v44 = vld [vmem:[%s12872_s12 + $0x43c] sm:$0xf0]  ;;  %v14531_v10 = vpop.f32.mrf.mxu0  ;;  %v11348_v19 = vld [vmem:[%s12872_s12 + $0x3bc] sm:$0xf] }
 0xfb6   : > { %v10516_v40 = vor.u32 %v11471_v49, %v10515_v55  ;;  %v11400_v55 = vld [vmem:[%s12872_s12 + $0x558] sm:$0xf0]  ;;  %v10084_v2 = vor.u32 %v11347_v61, %v10081_v44  ;;  %v11313_v44 = vld [vmem:[%s12872_s12 + $0x2a4] sm:$0xf] }
 0xfb7   : > { %6485 = vmatpush.bf16.msra.mxu1 %v10648_v12  ;;  %v10375_v12 = vld [vmem:[%s12872_s12 + $0x5f0] sm:$0xf] }
 0xfb8   : > { %6513 = vmatpush.bf16.msra.mxu2 %v10652_v8  ;;  %v11436_v8 = vld [vmem:[%s12872_s12 + $0x678] sm:$0xf0] }
 0xfb9   : > { %6541 = vmatpush.bf16.msrb.mxu0 %v10656_v21  ;;  %6458 = vmatpush.bf16.msrb.mxu3 %v10504_v30  ;;  %v5909_v21 = vadd.f32 %v5908_v11, %v4051_v17  ;;  %v4053_v30 = vperm.slane %v14435_v29, 1  ;;  %v10376_v49 = vor.u32 %v11436_v8, %v10375_v12  ;;  %v11383_v17 = vld [vmem:[%s12872_s12 + $0x4d4] sm:$0xf]  ;;  %v10087_v12 = vld [vmem:[%s12872_s12 + $0x3b8] sm:$0xf]  ;;  %v14550_v61 = vpop.f32.mrf.mxu2 }
 0xfba   : > { %v10232_v9 = vor.u32 %v11383_v17, %v10229_v62  ;;  %v9941_v17 = vld [vmem:[%s12872_s12 + $0x324] sm:$0xf0]  ;;  %v9947_v62 = vld [vmem:[%s12872_s12 + $0x2a0] sm:$0xf]  ;;  %16203 = vst [vmem:[#allocation70_spill] sm:$0xff] %v14550_v61 }
 0xfbb   : > { %6486 = vmatpush.bf16.msra.mxu1 %v10508_v25  ;;  %v14518_v47 = vadd.f32 %v14447_v63, %v5909_v21  ;;  %v5991_v25 = vadd.f32 %v14463_v1, %v4054_v22  ;;  %v6004_v63 = vpop.f32.mrf.mxu1  ;;  %v11365_v1 = vld [vmem:[%s12872_s12 + $0x440] sm:$0xf0]  ;;  %v5963_v11 = vadd.f32 %v14486_v38, %v4053_v30  ;;  %v10089_v21 = vld [vmem:[%s12872_s12 + $0x444] sm:$0xf0] }
 0xfbc   : > { %6514 = vmatpush.bf16.msra.mxu2 %v10512_v26  ;;  %v11401_v26 = vld [vmem:[%s12872_s12 + $0x560] sm:$0xf0] }
 0xfbd   : > { %6542 = vmatpush.bf16.msrb.mxu0 %v10516_v40  ;;  %6459 = vmatpush.bf16.msrb.mxu3 %v10364_v18  ;;  %16202 = vst [vmem:[#allocation69_spill] sm:$0xff] %v14518_v47  ;;  %v10228_v40 = vor.u32 %v11400_v55, %v10227_v28  ;;  %v14529_v18 = vadd.f32 %v6004_v63, %v5991_v25  ;;  %v11366_v28 = vld [vmem:[%s12872_s12 + $0x448] sm:$0xf0]  ;;  %v11312_v55 = vld [vmem:[%s12872_s12 + $0x29c] sm:$0xf] }
 0xfbe   : > { %v10236_v8 = vor.u32 %v11401_v26, %v10235_v14  ;;  %v11330_v14 = vld [vmem:[%s12872_s12 + $0x328] sm:$0xf0]  ;;  %v9944_v26 = vor.u32 %v11312_v55, %v9941_v17  ;;  %v9949_v63 = vld [vmem:[%s12872_s12 + $0x32c] sm:$0xf0]  ;;  %v11543_v47 = vld [vmem:[%s12872_s12 + $0x9d0] sm:$0xf0] }
 0xfbf   : > { %6487 = vmatpush.bf16.msra.mxu1 %v10368_v5  ;;  %v10095_v5 = vld [vmem:[%s12872_s12 + $0x3c0] sm:$0xf]  ;;  %v11278_v17 = vld [vmem:[%s12872_s12 + $0x18c] sm:$0xf] }
 0xfc0   : > { %6515 = vmatpush.bf16.msra.mxu2 %v10372_v3  ;;  %v5976_v3 = vpop.f32.mrf.mxu3  ;;  %10838 = vmatmul.msk.bf16.vlgmr.msra.gmra.mxu3 %vm1373_vm4, %v13848_v46  ;;  %v10096_v25 = vor.u32 %v11366_v28, %v10095_v5  ;;  %v11295_v5 = vld [vmem:[%s12872_s12 + $0x210] sm:$0xf0] }
 0xfc1   : > { %6543 = vmatpush.bf16.msrb.mxu0 %v10376_v49  ;;  %6460 = vmatpush.bf16.msrb.mxu3 %v10224_v43  ;;  %v14546_v38 = vadd.f32 %v5976_v3, %v5963_v11  ;;  %v10088_v49 = vor.u32 %v11365_v1, %v10087_v12  ;;  %v10092_v43 = vor.u32 %v11348_v19, %v10089_v21  ;;  %v11331_v12 = vld [vmem:[%s12872_s12 + $0x330] sm:$0xf0]  ;;  %v11277_v1 = vld [vmem:[%s12872_s12 + $0x184] sm:$0xf]  ;;  %v9801_v11 = vld [vmem:[%s12872_s12 + $0x20c] sm:$0xf0] }
 0xfc2   : > { %10839 = vmatmul.msk.bf16.vlgmr.msrb.gmra.mxu1 %vm1373_vm4, %v13848_v46  ;;  %v9952_v19 = vor.u32 %v11313_v44, %v9949_v63  ;;  %v9807_v21 = vld [vmem:[%s12872_s12 + $0x188] sm:$0xf]  ;;  %v5965_v3 = vadd.f32 %v5964_v48, %v4053_v30  ;;  %v9804_v55 = vor.u32 %v11277_v1, %v9801_v11  ;;  %v9661_v44 = vld [vmem:[%s12872_s12 + $0xf4] sm:$0xf0]  ;;  %v11523_v48 = vld [vmem:[%s12872_s12 + $0x934] sm:$0xf] }
 0xfc3   : > { %6488 = vmatpush.bf16.msra.mxu1 %v10228_v40  ;;  %v9955_v40 = vld [vmem:[%s12872_s12 + $0x2a8] sm:$0xf]  ;;  %10840 = vmatmul.msk.bf16.vlgmr.msrb.gmra.mxu2 %vm1373_vm4, %v13848_v46  ;;  %v9808_v30 = vor.u32 %v11295_v5, %v9807_v21  ;;  %v11260_v1 = vld [vmem:[%s12872_s12 + $0xf8] sm:$0xf0]  ;;  %v11243_v21 = vld [vmem:[%s12872_s12 + $0x74] sm:$0xf] }
 0xfc4   : > { %6516 = vmatpush.bf16.msra.mxu2 %v10232_v9  ;;  %v5993_v9 = vadd.f32 %v14499_v54, %v4054_v22  ;;  %10841 = vmatmul.msk.bf16.vlgmr.msra.gmra.mxu0 %vm1373_vm4, %v13848_v46  ;;  %v14569_v54 = vpop.f32.mrf.mxu0  ;;  %v9956_v28 = vor.u32 %v11331_v12, %v9955_v40  ;;  %v9667_v12 = vld [vmem:[%s12872_s12 + $0x70] sm:$0xf]  ;;  %v9669_v5 = vld [vmem:[%s12872_s12 + $0xfc] sm:$0xf0] }
 0xfc5   : > { %6544 = vmatpush.bf16.msrb.mxu0 %v10236_v8  ;;  %6461 = vmatpush.bf16.msrb.mxu3 %v10084_v2  ;;  %v6006_v8 = vpop.f32.mrf.mxu1  ;;  %v9948_v2 = vor.u32 %v11330_v14, %v9947_v62  ;;  %16204 = vst [vmem:[#allocation71_spill] sm:$0xff] %v14569_v54  ;;  %v11296_v14 = vld [vmem:[%s12872_s12 + $0x218] sm:$0xf0]  ;;  %v10251_v54 = vld [vmem:[%s12872_s12 + $0x4e8] sm:$0xf] }
 0xfc6   : > { %v14567_v22 = vadd.f32 %v6006_v8, %v5993_v9  ;;  %v11242_v9 = vld [vmem:[%s12872_s12 + $0x6c] sm:$0xf] }
 0xfc7   : > { %6489 = vmatpush.bf16.msra.mxu1 %v10088_v49  ;;  %v9809_v49 = vld [vmem:[%s12872_s12 + $0x214] sm:$0xf0]  ;;  %v9664_v8 = vor.u32 %v11242_v9, %v9661_v44  ;;  %v9672_v44 = vor.u32 %v11243_v21, %v9669_v5  ;;  %v11490_v5 = vld [vmem:[%s12872_s12 + $0x82c] sm:$0xf] }
 0xfc8   : > { %6517 = vmatpush.bf16.msra.mxu2 %v10092_v43  ;;  %v9815_v43 = vld [vmem:[%s12872_s12 + $0x190] sm:$0xf]  ;;  %v5978_v62 = vpop.f32.mrf.mxu3 }
 0xfc9   : > { %6545 = vmatpush.bf16.msrb.mxu0 %v10096_v25  ;;  %6462 = vmatpush.bf16.msrb.mxu3 %v9944_v26  ;;  %v14581_v63 = vadd.f32 %v5978_v62, %v5965_v3  ;;  %v10789_v25 = vld [vmem:[%s12872_s12 + $0x9bc] sm:$0xf0]  ;;  %v9812_v26 = vor.u32 %v11278_v17, %v9809_v49  ;;  %v9816_v11 = vor.u32 %v11296_v14, %v9815_v43  ;;  %v11261_v17 = vld [vmem:[%s12872_s12 + $0x100] sm:$0xf0]  ;;  %v10657_v62 = vld [vmem:[%s12872_s12 + $0x8ac] sm:$0xf0] }
 0xfca   : > { %v10792_v3 = vor.u32 %v11523_v48, %v10789_v25  ;;  %v11489_v49 = vld [vmem:[%s12872_s12 + $0x824] sm:$0xf]  ;;  %v10797_v43 = vld [vmem:[%s12872_s12 + $0x9c4] sm:$0xf0]  ;;  %v16207_v14 = vperm.slane %v14435_v29, 4 }
 0xfcb   : > { %6490 = vmatpush.bf16.msra.mxu1 %v9948_v2  ;;  %16205 = vst [vmem:[#allocation72_spill] sm:$0xff] %v14581_v63  ;;  %v14588_v2 = vpop.f32.mrf.mxu2  ;;  %v11541_v48 = vld [vmem:[%s12872_s12 + $0x9c0] sm:$0xf0]  ;;  %v10803_v25 = vld [vmem:[%s12872_s12 + $0x940] sm:$0xf] }
 0xfcc   : > { %6518 = vmatpush.bf16.msra.mxu2 %v9952_v19  ;;  %16206 = vst [vmem:[#allocation73_spill] sm:$0xff] %v14588_v2  ;;  %v9675_v19 = vld [vmem:[%s12872_s12 + $0x78] sm:$0xf]  ;;  %v10796_v20 = vor.u32 %v11541_v48, %v10795_v0  ;;  %v11455_v48 = vld [vmem:[%s12872_s12 + $0x714] sm:$0xf] }
 0xfcd   : > { %6546 = vmatpush.bf16.msrb.mxu0 %v9956_v28  ;;  %6463 = vmatpush.bf16.msrb.mxu3 %v9804_v55  ;;  %v6046_v40 = vpop.f32.mrf.mxu1  ;;  %v9668_v28 = vor.u32 %v11260_v1, %v9667_v12  ;;  %v11524_v55 = vld [vmem:[%s12872_s12 + $0x93c] sm:$0xf]  ;;  %v9676_v12 = vor.u32 %v11261_v17, %v9675_v19  ;;  %v10660_v1 = vor.u32 %v11489_v49, %v10657_v62  ;;  %v11454_v17 = vld [vmem:[%s12872_s12 + $0x70c] sm:$0xf]  ;;  %v10517_v49 = vld [vmem:[%s12872_s12 + $0x794] sm:$0xf0] }
 0xfce   : > { %v6047_v9 = vadd.f32 %v6046_v40, %v16207_v14  ;;  %v10800_v21 = vor.u32 %v11524_v55, %v10797_v43  ;;  %v10665_v14 = vld [vmem:[%s12872_s12 + $0x8b4] sm:$0xf0]  ;;  %v11508_v19 = vld [vmem:[%s12872_s12 + $0x8b8] sm:$0xf0]  ;;  %v10520_v43 = vor.u32 %v11454_v17, %v10517_v49  ;;  %v10385_v49 = vld [vmem:[%s12872_s12 + $0x684] sm:$0xf0] }
 0xfcf   : > { %6491 = vmatpush.bf16.msra.mxu1 %v9808_v30  ;;  %v14603_v30 = vpop.f32.mrf.mxu0  ;;  %v10668_v62 = vor.u32 %v11490_v5, %v10665_v14  ;;  %v11472_v55 = vld [vmem:[%s12872_s12 + $0x798] sm:$0xf0]  ;;  %v10383_v5 = vld [vmem:[%s12872_s12 + $0x5f8] sm:$0xf]  ;;  %v11437_v14 = vld [vmem:[%s12872_s12 + $0x680] sm:$0xf0] }
 0xfd0   : > { %6519 = vmatpush.bf16.msra.mxu2 %v9812_v26  ;;  %v11542_v26 = vld [vmem:[%s12872_s12 + $0x9c8] sm:$0xf0]  ;;  %v14609_v40 = vadd.f32 %v14531_v10, %v6047_v9  ;;  %v10664_v10 = vor.u32 %v11507_v4, %v10663_v41  ;;  %v10531_v4 = vld [vmem:[%s12872_s12 + $0x718] sm:$0xf]  ;;  %v11420_v17 = vld [vmem:[%s12872_s12 + $0x5fc] sm:$0xf] }
 0xfd1   : > { %6547 = vmatpush.bf16.msrb.mxu0 %v9816_v11  ;;  %6464 = vmatpush.bf16.msrb.mxu3 %v9664_v8  ;;  %v10671_v11 = vld [vmem:[%s12872_s12 + $0x830] sm:$0xf]  ;;  %v14614_v8 = vpop.f32.mrf.mxu3  ;;  %v9965_v2 = vld [vmem:[%s12872_s12 + $0x33c] sm:$0xf0]  ;;  %v10811_v63 = vld [vmem:[%s12872_s12 + $0x948] sm:$0xf] }
 0xfd2   : > { %16208 = vst [vmem:[#allocation74_spill] sm:$0xff] %v14614_v8  ;;  %v10672_v0 = vor.u32 %v11508_v19, %v10671_v11 }
 0xfd3   : > { %6492 = vmatpush.bf16.msra.mxu1 %v9668_v28  ;;  %v10523_v28 = vld [vmem:[%s12872_s12 + $0x710] sm:$0xf]  ;;  %v14623_v9 = vpop.f32.mrf.mxu2 }
 0xfd4   : > { %6465 = vmatmul.bf16.vlgmr.msrb.gmra.mxu3 %v13859_v57  ;;  %6520 = vmatpush.bf16.msra.mxu2 %v9672_v44  ;;  %v10525_v44 = vld [vmem:[%s12872_s12 + $0x79c] sm:$0xf0] }
 0xfd5   : > { %6534 = vmatpush.bf16.msra.mxu3 %v10792_v3  ;;  %6548 = vmatpush.bf16.msrb.mxu0 %v9676_v12  ;;  %v10804_v3 = vor.u32 %v11542_v26, %v10803_v25  ;;  %v14629_v41 = vpop.f32.mrf.mxu1  ;;  %v11473_v25 = vld [vmem:[%s12872_s12 + $0x7a0] sm:$0xf0]  ;;  %v11419_v12 = vld [vmem:[%s12872_s12 + $0x5f4] sm:$0xf]  ;;  %v10524_v26 = vor.u32 %v11472_v55, %v10523_v28  ;;  %v10237_v55 = vld [vmem:[%s12872_s12 + $0x564] sm:$0xf0] }
 0xfd6   : > { %6493 = vmatmul.bf16.vlgmr.msra.gmra.mxu1 %v13859_v57  ;;  %16209 = vst [vmem:[#allocation75_spill] sm:$0xff] %v14629_v41  ;;  %v10532_v11 = vor.u32 %v11473_v25, %v10531_v4  ;;  %v11403_v41 = vld [vmem:[%s12872_s12 + $0x570] sm:$0xf0] }
 0xfd7   : > { %6521 = vmatmul.bf16.vlgmr.msra.gmra.mxu2 %v13859_v57  ;;  %6562 = vmatpush.bf16.msrb.mxu1 %v10796_v20  ;;  %v10528_v20 = vor.u32 %v11455_v48, %v10525_v44  ;;  %v10243_v48 = vld [vmem:[%s12872_s12 + $0x4e0] sm:$0xf]  ;;  %v11402_v44 = vld [vmem:[%s12872_s12 + $0x568] sm:$0xf0] }
 0xfd8   : > { %6590 = vmatpush.bf16.msrb.mxu2 %v10800_v21  ;;  %6549 = vmatmul.bf16.vlgmr.msrb.gmra.mxu0 %v13859_v57  ;;  %v14635_v21 = vpop.f32.mrf.mxu0 }
 0xfd9   : > { %6569 = vmatpush.bf16.msrb.mxu3 %v10660_v1  ;;  %v10377_v1 = vld [vmem:[%s12872_s12 + $0x67c] sm:$0xf0]  ;;  %6618 = vmatpush.bf16.msra.mxu0 %v10804_v3  ;;  %16210 = vst [vmem:[#allocation76_spill] sm:$0xff] %v14635_v21  ;;  %v14642_v28 = vpop.f32.mrf.mxu3  ;;  %v11438_v3 = vld [vmem:[%s12872_s12 + $0x688] sm:$0xf0] }
 0xfda   : > { %v10380_v19 = vor.u32 %v11419_v12, %v10377_v1  ;;  %16211 = vst [vmem:[#allocation77_spill] sm:$0xff] %v14642_v28  ;;  %v11385_v1 = vld [vmem:[%s12872_s12 + $0x4e4] sm:$0xf]  ;;  %v10245_v21 = vld [vmem:[%s12872_s12 + $0x56c] sm:$0xf0] }
 0xfdb   : > { %6597 = vmatpush.bf16.msra.mxu1 %v10664_v10  ;;  %v10391_v10 = vld [vmem:[%s12872_s12 + $0x600] sm:$0xf]  ;;  %v14649_v12 = vpop.f32.mrf.mxu2 }
 0xfdc   : > { %6625 = vmatpush.bf16.msra.mxu2 %v10668_v62  ;;  %v11384_v62 = vld [vmem:[%s12872_s12 + $0x4dc] sm:$0xf]  ;;  %v10392_v4 = vor.u32 %v11438_v3, %v10391_v10  ;;  %16212 = vst [vmem:[#allocation78_spill] sm:$0xff] %v14649_v12  ;;  %v10252_v10 = vor.u32 %v11403_v41, %v10251_v54  ;;  %v9963_v41 = vld [vmem:[%s12872_s12 + $0x2b0] sm:$0xf] }
 0xfdd   : > { %6653 = vmatpush.bf16.msrb.mxu0 %v10672_v0  ;;  %6570 = vmatpush.bf16.msrb.mxu3 %v10520_v43  ;;  %v10384_v0 = vor.u32 %v11437_v14, %v10383_v5  ;;  %v10388_v43 = vor.u32 %v11420_v17, %v10385_v49  ;;  %v10240_v25 = vor.u32 %v11384_v62, %v10237_v55  ;;  %v14657_v5 = vpop.f32.mrf.mxu1  ;;  %v10103_v17 = vld [vmem:[%s12872_s12 + $0x3c8] sm:$0xf]  ;;  %v11367_v49 = vld [vmem:[%s12872_s12 + $0x450] sm:$0xf0]  ;;  %v11350_v62 = vld [vmem:[%s12872_s12 + $0x3cc] sm:$0xf] }
 0xfde   : > { %v10244_v14 = vor.u32 %v11402_v44, %v10243_v48  ;;  %v10105_v55 = vld [vmem:[%s12872_s12 + $0x454] sm:$0xf0]  ;;  %v11368_v48 = vld [vmem:[%s12872_s12 + $0x458] sm:$0xf0]  ;;  %v9831_v28 = vld [vmem:[%s12872_s12 + $0x1a0] sm:$0xf] }
 0xfdf   : > { %6598 = vmatpush.bf16.msra.mxu1 %v10524_v26  ;;  %v11349_v26 = vld [vmem:[%s12872_s12 + $0x3c4] sm:$0xf]  ;;  %v9957_v44 = vld [vmem:[%s12872_s12 + $0x334] sm:$0xf0]  ;;  %v10108_v54 = vor.u32 %v11350_v62, %v10105_v55 }
 0xfe0   : > { %6626 = vmatpush.bf16.msra.mxu2 %v10528_v20  ;;  %v10097_v20 = vld [vmem:[%s12872_s12 + $0x44c] sm:$0xf0] }
 0xfe1   : > { %6654 = vmatpush.bf16.msrb.mxu0 %v10532_v11  ;;  %6571 = vmatpush.bf16.msrb.mxu3 %v10380_v19  ;;  %v14659_v11 = vpop.f32.mrf.mxu0  ;;  %v10248_v19 = vor.u32 %v11385_v1, %v10245_v21  ;;  %v10100_v3 = vor.u32 %v11349_v26, %v10097_v20  ;;  %v14666_v12 = vpop.f32.mrf.mxu3  ;;  %v10104_v21 = vor.u32 %v11367_v49, %v10103_v17  ;;  %v11315_v20 = vld [vmem:[%s12872_s12 + $0x2b4] sm:$0xf]  ;;  %v9817_v49 = vld [vmem:[%s12872_s12 + $0x21c] sm:$0xf0] }
 0xfe2   : > { %v11279_v17 = vld [vmem:[%s12872_s12 + $0x194] sm:$0xf]  ;;  %v9968_v55 = vor.u32 %v11315_v20, %v9965_v2  ;;  %v9677_v2 = vld [vmem:[%s12872_s12 + $0x104] sm:$0xf0] }
 0xfe3   : > { %6599 = vmatpush.bf16.msra.mxu1 %v10384_v0  ;;  %v10111_v0 = vld [vmem:[%s12872_s12 + $0x3d0] sm:$0xf]  ;;  %v14675_v26 = vpop.f32.mrf.mxu2 }
 0xfe4   : > { %6627 = vmatpush.bf16.msra.mxu2 %v10388_v43  ;;  %v11314_v43 = vld [vmem:[%s12872_s12 + $0x2ac] sm:$0xf]  ;;  %10842 = vmatmul.msk.bf16.vlgmr.msra.gmra.mxu3 %vm1373_vm4, %v13848_v46 }
 0xfe5   : > { %6655 = vmatpush.bf16.msrb.mxu0 %v10392_v4  ;;  %6572 = vmatpush.bf16.msrb.mxu3 %v10240_v25  ;;  %v11332_v4 = vld [vmem:[%s12872_s12 + $0x338] sm:$0xf0]  ;;  %v10112_v25 = vor.u32 %v11368_v48, %v10111_v0  ;;  %v9960_v1 = vor.u32 %v11314_v43, %v9957_v44  ;;  %v9823_v0 = vld [vmem:[%s12872_s12 + $0x198] sm:$0xf]  ;;  %v11297_v48 = vld [vmem:[%s12872_s12 + $0x220] sm:$0xf0] }
 0xfe6   : > { %10843 = vmatmul.msk.bf16.vlgmr.msrb.gmra.mxu1 %vm1373_vm4, %v13848_v46  ;;  %v11280_v43 = vld [vmem:[%s12872_s12 + $0x19c] sm:$0xf]  ;;  %v9824_v20 = vor.u32 %v11297_v48, %v9823_v0  ;;  %v9691_v0 = vld [vmem:[%s12872_s12 + $0x88] sm:$0xf]  ;;  %v11263_v48 = vld [vmem:[%s12872_s12 + $0x110] sm:$0xf0] }
 0xfe7   : > { %6600 = vmatpush.bf16.msra.mxu1 %v10244_v14  ;;  %v9971_v14 = vld [vmem:[%s12872_s12 + $0x2b8] sm:$0xf]  ;;  %10844 = vmatmul.msk.bf16.vlgmr.msrb.gmra.mxu2 %vm1373_vm4, %v13848_v46 }
 0xfe8   : > { %6628 = vmatpush.bf16.msra.mxu2 %v10248_v19  ;;  %v11333_v19 = vld [vmem:[%s12872_s12 + $0x340] sm:$0xf0]  ;;  %10845 = vmatmul.msk.bf16.vlgmr.msra.gmra.mxu0 %vm1373_vm4, %v13848_v46 }
 0xfe9   : > { %6656 = vmatpush.bf16.msrb.mxu0 %v10252_v10  ;;  %6573 = vmatpush.bf16.msrb.mxu3 %v10100_v3  ;;  %v14689_v10 = vpop.f32.mrf.mxu1  ;;  %v9964_v3 = vor.u32 %v11332_v4, %v9963_v41  ;;  %v14691_v62 = vpop.f32.mrf.mxu0  ;;  %v9972_v44 = vor.u32 %v11333_v19, %v9971_v14  ;;  %v14699_v41 = vld [vmem:[%s12874_s2 + $0x10] sm:$0xff] }
 0xfea   : > { %16213 = vst [vmem:[#allocation79_spill] sm:$0xff] %v14689_v10  ;;  %v9825_v10 = vld [vmem:[%s12872_s12 + $0x224] sm:$0xf0]  ;;  %v11298_v4 = vld [vmem:[%s12872_s12 + $0x228] sm:$0xf0]  ;;  %v16072_v19 = vperm.slane %v14699_v41, 0 }
 0xfeb   : > { %6601 = vmatpush.bf16.msra.mxu1 %v10104_v21  ;;  %16214 = vst [vmem:[#allocation80_spill] sm:$0xff] %v14691_v62  ;;  %v9820_v21 = vor.u32 %v11279_v17, %v9817_v49  ;;  %v11244_v62 = vld [vmem:[%s12872_s12 + $0x7c] sm:$0xf]  ;;  %v9828_v14 = vor.u32 %v11280_v43, %v9825_v10  ;;  %v9683_v17 = vld [vmem:[%s12872_s12 + $0x80] sm:$0xf]  ;;  %v14711_v8 = vpop.f32.mrf.mxu2 }
 0xfec   : > { %6629 = vmatpush.bf16.msra.mxu2 %v10108_v54  ;;  %16215 = vst [vmem:[#allocation81_spill] sm:$0xff] %v14699_v41  ;;  %v14701_v54 = vpop.f32.mrf.mxu3  ;;  %v11262_v49 = vld [vmem:[%s12872_s12 + $0x108] sm:$0xf0]  ;;  %v9680_v61 = vor.u32 %v11244_v62, %v9677_v2 }
 0xfed   : > { %6657 = vmatpush.bf16.msrb.mxu0 %v10112_v25  ;;  %6574 = vmatpush.bf16.msrb.mxu3 %v9960_v1  ;;  %16216 = vst [vmem:[#allocation82_spill] sm:$0xff] %v14701_v54  ;;  %v11525_v25 = vld [vmem:[%s12872_s12 + $0x944] sm:$0xf]  ;;  %v10805_v1 = vld [vmem:[%s12872_s12 + $0x9cc] sm:$0xf0]  ;;  %v9832_v54 = vor.u32 %v11298_v4, %v9831_v28  ;;  %v9684_v10 = vor.u32 %v11262_v49, %v9683_v17  ;;  %v16073_v28 = vperm.slane %v14435_v29, 7 }
 0xfee   : > { %16217 = vst [vmem:[#allocation83_spill] sm:$0xff] %v14711_v8  ;;  %v10808_v59 = vor.u32 %v11525_v25, %v10805_v1  ;;  %v10812_v4 = vor.u32 %v11543_v47, %v10811_v63  ;;  %v16226_v1 = vld [vmem:[#allocation60_spill] sm:$0xff]  ;;  %v16229_v49 = vld [vmem:[#allocation59_spill] sm:$0xff] }
 0xfef   : > { %6602 = vmatpush.bf16.msra.mxu1 %v9964_v3  ;;  %v11245_v3 = vld [vmem:[%s12872_s12 + $0x84] sm:$0xf] }
 0xff0   : > { %6630 = vmatpush.bf16.msra.mxu2 %v9968_v55 }
 0xff1   : > { %6658 = vmatpush.bf16.msrb.mxu0 %v9972_v44  ;;  %6575 = vmatpush.bf16.msrb.mxu3 %v9820_v21  ;;  %v6158_v55 = vpop.f32.mrf.mxu1  ;;  %v9688_v44 = vor.u32 %v11245_v3, %v9685_v24  ;;  %v14722_v62 = vpop.f32.mrf.mxu0  ;;  %v9692_v21 = vor.u32 %v11263_v48, %v9691_v0  ;;  %v16230_v3 = vld [vmem:[#allocation46_spill] sm:$0xff] }
 0xff2   : > { %v6159_v43 = vadd.f32 %v6158_v55, %v16072_v19  ;;  %16218 = vst [vmem:[#allocation84_spill] sm:$0xff] %v14722_v62  ;;  %v16231_v0 = vld [vmem:[#allocation58_spill] sm:$0xff]  ;;  %v16232_v55 = vld [vmem:[#allocation45_spill] sm:$0xff]  ;;  %v16240_v19 = vld [vmem:[#allocation55_spill] sm:$0xff] }
 0xff3   : > { %6603 = vmatpush.bf16.msra.mxu1 %v9824_v20  ;;  %v14734_v47 = vpop.f32.mrf.mxu2 }
 0xff4   : > { %6631 = vmatpush.bf16.msra.mxu2 %v9828_v14  ;;  %v14725_v2 = vadd.f32 %v14659_v11, %v6159_v43  ;;  %v6130_v20 = vpop.f32.mrf.mxu3  ;;  %16219 = vst [vmem:[#allocation85_spill] sm:$0xff] %v14734_v47  ;;  %v16227_v14 = vld [vmem:[#allocation47_spill] sm:$0xff] }
 0xff5   : > { %6659 = vmatpush.bf16.msrb.mxu0 %v9832_v54  ;;  %6576 = vmatpush.bf16.msrb.mxu3 %v9680_v61  ;;  %v6131_v24 = vadd.f32 %v6130_v20, %v16073_v28  ;;  %v16225_v54 = vld [vmem:[#allocation48_spill] sm:$0xff]  ;;  %v16241_v28 = vld [vmem:[#allocation42_spill] sm:$0xff] }
 0xff7   : > { %6604 = vmatpush.bf16.msra.mxu1 %v9684_v10  ;;  %v14731_v61 = vadd.f32 %v14675_v26, %v6131_v24  ;;  %v16233_v10 = vld [vmem:[#allocation57_spill] sm:$0xff]  ;;  %v16239_v24 = vld [vmem:[#allocation43_spill] sm:$0xff] }
 0xff8   : > { %6577 = vmatmul.bf16.vlgmr.msrb.gmra.mxu3 %v13859_v57  ;;  %6632 = vmatpush.bf16.msra.mxu2 %v9688_v44 }
 0xff9   : > { %6646 = vmatpush.bf16.msra.mxu3 %v10808_v59  ;;  %6660 = vmatpush.bf16.msrb.mxu0 %v9692_v21  ;;  %v14738_v59 = vpop.f32.mrf.mxu1  ;;  %v14742_v63 = vpop.f32.mrf.mxu0  ;;  %v16236_v21 = vld [vmem:[#allocation44_spill] sm:$0xff] }
 0xffa   : > { %6605 = vmatmul.bf16.vlgmr.msra.gmra.mxu1 %v13859_v57  ;;  %16220 = vst [vmem:[#allocation86_spill] sm:$0xff] %v14738_v59  ;;  %v16246_v59 = vld [vmem:[#allocation40_spill] sm:$0xff] }
 0xffb   : > { %6674 = vmatpush.bf16.msrb.mxu1 %v10812_v4  ;;  %6633 = vmatmul.bf16.vlgmr.msra.gmra.mxu2 %v13859_v57  ;;  %16221 = vst [vmem:[#allocation87_spill] sm:$0xff] %v14742_v63  ;;  %v14751_v26 = vpop.f32.mrf.mxu2  ;;  %v16237_v4 = vld [vmem:[#allocation56_spill] sm:$0xff]  ;;  %v16242_v63 = vld [vmem:[#allocation54_spill] sm:$0xff] }
 0xffc   : > { %6661 = vmatmul.bf16.vlgmr.msrb.gmra.mxu0 %v13859_v57  ;;  %6744 = vmatpush.msrb.mxu2 %v13157_v53  ;;  %v14746_v11 = vpop.f32.mrf.mxu3  ;;  %16223 = vst [vmem:[#allocation89_spill] sm:$0xff] %v14751_v26  ;;  %v16077_v26 = vperm.slane %v14699_v41, 3 }
 0xffd   : > { %6721 = vmatpush.msrb.mxu3 %v13077_v37  ;;  %16222 = vst [vmem:[#allocation88_spill] sm:$0xff] %v14746_v11  ;;  %v16249_v11 = vld [vmem:[#allocation39_spill] sm:$0xff] }
 0xffe   : > { %6745 = vmatpush.msrb.mxu2 %v13152_v52 }
 0xfff   : > { %6722 = vmatpush.msrb.mxu3 %v13072_v36 }
0x1000   : > { %6746 = vmatpush.msrb.mxu2 %v13147_v51 }
0x1001   : > { %6723 = vmatpush.msrb.mxu3 %v13067_v35  ;;  %v14755_v57 = vpop.f32.mrf.mxu1  ;;  %v6284_v25 = vpop.f32.mrf.mxu0 }
0x1002   : > { %6747 = vmatpush.msrb.mxu2 %v13142_v50  ;;  %16224 = vst [vmem:[#allocation90_spill] sm:$0xff] %v14755_v57 }
0x1003   : > { %6724 = vmatpush.msrb.mxu3 %v13062_v34  ;;  %v6256_v48 = vpop.f32.mrf.mxu2 }
0x1004   : > { %6748 = vmatpush.msrb.mxu2 %v16226_v1  ;;  %v14760_v17 = vpop.f32.mrf.mxu3 }
0x1005   : > { %6725 = vmatpush.msrb.mxu3 %v13057_v33  ;;  %16228 = vst [vmem:[#allocation48_spill] sm:$0xff] %v14760_v17  ;;  %v16247_v17 = vld [vmem:[#allocation52_spill] sm:$0xff] }
0x1006   : > { %6749 = vmatpush.msrb.mxu2 %v16229_v49 }
0x1007   : > { %6726 = vmatpush.msrb.mxu3 %v16225_v54 }
0x1008   : > { %10846 = vmatmul.msk.bf16.vlgmr.msra.gmra.mxu3 %vm1373_vm4, %v13848_v46  ;;  %6750 = vmatpush.msrb.mxu2 %v16231_v0 }
0x1009   : > { %6727 = vmatpush.msrb.mxu3 %v16227_v14  ;;  %v14771_v43 = vpop.f32.mrf.mxu1  ;;  %v14773_v44 = vpop.f32.mrf.mxu0 }
0x100a   : > { %10847 = vmatmul.msk.bf16.vlgmr.msrb.gmra.mxu1 %vm1373_vm4, %v13848_v46  ;;  %6751 = vmatpush.msrb.mxu2 %v16233_v10  ;;  %16234 = vst [vmem:[#allocation47_spill] sm:$0xff] %v14771_v43  ;;  %v16076_v46 = vperm.slane %v14699_v41, 4  ;;  %v16244_v43 = vld [vmem:[#allocation41_spill] sm:$0xff] }
0x100b   : > { %6728 = vmatpush.msrb.mxu3 %v16230_v3  ;;  %16235 = vst [vmem:[#allocation46_spill] sm:$0xff] %v14773_v44  ;;  %v14784_v57 = vpop.f32.mrf.mxu2  ;;  %v16245_v44 = vld [vmem:[#allocation53_spill] sm:$0xff] }
0x100c   : > { %6752 = vmatpush.msrb.mxu2 %v16237_v4  ;;  %v14777_v20 = vpop.f32.mrf.mxu3  ;;  %16243 = vst [vmem:[#allocation44_spill] sm:$0xff] %v14784_v57  ;;  %v16250_v57 = vld [vmem:[#allocation51_spill] sm:$0xff] }
0x100d   : > { %6729 = vmatpush.msrb.mxu3 %v16232_v55  ;;  %16238 = vst [vmem:[#allocation45_spill] sm:$0xff] %v14777_v20 }
0x100e   : > { %6753 = vmatpush.msrb.mxu2 %v16240_v19 }
0x100f   : > { %6730 = vmatpush.msrb.mxu3 %v16236_v21 }
0x1010   : > { %6754 = vmatpush.msrb.mxu2 %v16242_v63 }
0x1011   : > { %6731 = vmatpush.msrb.mxu3 %v16239_v24  ;;  %v6270_v62 = vpop.f32.mrf.mxu1  ;;  %v14793_v47 = vpop.f32.mrf.mxu0  ;;  %v16254_v24 = vld [vmem:[#allocation49_spill] sm:$0xff] }
0x1012   : > { %6755 = vmatpush.msrb.mxu2 %v16245_v44  ;;  %v6271_v20 = vadd.f32 %v6270_v62, %v16076_v46  ;;  %16248 = vst [vmem:[#allocation91_spill] sm:$0xff] %v14793_v47  ;;  %v16252_v62 = vld [vmem:[#allocation50_spill] sm:$0xff] }
0x1013   : > { %6732 = vmatpush.msrb.mxu3 %v16241_v28  ;;  %v16251_v28 = vld [vmem:[#allocation38_spill] sm:$0xff] }
0x1014   : > { %6756 = vmatpush.msrb.mxu2 %v16247_v17  ;;  %v14795_v8 = vadd.f32 %v6284_v25, %v6271_v20  ;;  %v6242_v29 = vpop.f32.mrf.mxu3 }
0x1015   : > { %6733 = vmatpush.msrb.mxu3 %v16244_v43  ;;  %v6243_v43 = vadd.f32 %v6242_v29, %v16077_v26 }
0x1016   : > { %6757 = vmatpush.msrb.mxu2 %v16250_v57 }
0x1017   : > { %6734 = vmatpush.msrb.mxu3 %v16246_v59  ;;  %v14803_v46 = vadd.f32 %v6256_v48, %v6243_v43  ;;  %v14805_v59 = vpop.f32.mrf.mxu2 }
0x1018   : > { %6758 = vmatpush.msrb.mxu2 %v16252_v62  ;;  %16253 = vst [vmem:[#allocation39_spill] sm:$0xff] %v14805_v59 }
0x1019   : > { %6735 = vmatpush.msrb.mxu3 %v16249_v11  ;;  %v14808_v25 = vpop.f32.mrf.mxu1  ;;  %v14811_v20 = vpop.f32.mrf.mxu0 }
0x101a   : > { %6759 = vmatpush.msrb.mxu2 %v16254_v24  ;;  %16255 = vst [vmem:[#allocation38_spill] sm:$0xff] %v14808_v25 }
0x101b   : > { %6736 = vmatpush.msrb.mxu3 %v16251_v28  ;;  %16256 = vst [vmem:[#allocation92_spill] sm:$0xff] %v14811_v20 }
0x101c   : > { %6927 = vmatpush.msra.mxu2 %v13157_v53  ;;  %v14814_v47 = vpop.f32.mrf.mxu3 }
0x101d   : > { %16257 = vst [vmem:[#allocation93_spill] sm:$0xff] %v14814_v47 }
0x101e   : > { %6928 = vmatpush.msra.mxu2 %v13152_v52 }
0x101f   : > { %v14818_v29 = vpop.f32.mrf.mxu2 }
0x1020   : > { %6929 = vmatpush.msra.mxu2 %v13147_v51  ;;  %16258 = vst [vmem:[#allocation94_spill] sm:$0xff] %v14818_v29  ;;  %v14835_v29 = vld [vmem:[%s12874_s2 + $0x18] sm:$0xff] }
0x1021   : > { %v14821_v48 = vpop.f32.mrf.mxu1  ;;  %v6396_v43 = vpop.f32.mrf.mxu0  ;;  %16263 = vst [vmem:[#allocation99_spill] sm:$0xff] %v14835_v29 }
0x1022   : > { %6930 = vmatpush.msra.mxu2 %v13142_v50  ;;  %16259 = vst [vmem:[#allocation95_spill] sm:$0xff] %v14821_v48 }
0x1024   : > { %6931 = vmatpush.msra.mxu2 %v16226_v1  ;;  %v14824_v26 = vpop.f32.mrf.mxu3 }
0x1025   : > { %16260 = vst [vmem:[#allocation96_spill] sm:$0xff] %v14824_v26  ;;  %v16083_v26 = vperm.slane %v14835_v29, 0 }
0x1026   : > { %6932 = vmatpush.msra.mxu2 %v16229_v49 }
0x1027   : > { %v6368_v20 = vpop.f32.mrf.mxu2 }
0x1028   : > { %6933 = vmatpush.msra.mxu2 %v16231_v0 }
0x1029   : > { %v14829_v25 = vpop.f32.mrf.mxu1  ;;  %v14831_v59 = vpop.f32.mrf.mxu0 }
0x102a   : > { %6934 = vmatpush.msra.mxu2 %v16233_v10  ;;  %16261 = vst [vmem:[#allocation97_spill] sm:$0xff] %v14829_v25  ;;  %v16086_v25 = vperm.slane %v14699_v41, 7 }
0x102b   : > { %16262 = vst [vmem:[#allocation98_spill] sm:$0xff] %v14831_v59 }
0x102c   : > { %6935 = vmatpush.msra.mxu2 %v16237_v4  ;;  %v14837_v48 = vpop.f32.mrf.mxu3 }
0x102d   : > { %16264 = vst [vmem:[#allocation100_spill] sm:$0xff] %v14837_v48 }
0x102e   : > { %6936 = vmatpush.msra.mxu2 %v16240_v19 }
0x102f   : > { %v14842_v47 = vpop.f32.mrf.mxu2 }
0x1030   : > { %6937 = vmatpush.msra.mxu2 %v16242_v63  ;;  %16265 = vst [vmem:[#allocation101_spill] sm:$0xff] %v14842_v47 }
0x1031   : > { %v6382_v4 = vpop.f32.mrf.mxu1  ;;  %v14849_v19 = vpop.f32.mrf.mxu0 }
0x1032   : > { %6938 = vmatpush.msra.mxu2 %v16245_v44  ;;  %v6383_v59 = vadd.f32 %v6382_v4, %v16083_v26  ;;  %16266 = vst [vmem:[#allocation102_spill] sm:$0xff] %v14849_v19 }
0x1034   : > { %6939 = vmatpush.msra.mxu2 %v16247_v17  ;;  %v14851_v48 = vadd.f32 %v6396_v43, %v6383_v59  ;;  %v6354_v63 = vpop.f32.mrf.mxu3 }
0x1035   : > { %v6355_v47 = vadd.f32 %v6354_v63, %v16086_v25 }
0x1036   : > { %6940 = vmatpush.msra.mxu2 %v16250_v57 }
0x1037   : > { %v14857_v17 = vadd.f32 %v6368_v20, %v6355_v47  ;;  %v14859_v44 = vpop.f32.mrf.mxu2 }
0x1038   : > { %6941 = vmatpush.msra.mxu2 %v16252_v62  ;;  %16267 = vst [vmem:[#allocation103_spill] sm:$0xff] %v14859_v44 }
0x1039   : > { %v14861_v4 = vpop.f32.mrf.mxu1  ;;  %v14863_v26 = vpop.f32.mrf.mxu0 }
0x103a   : > { %6942 = vmatpush.msra.mxu2 %v16254_v24  ;;  %16268 = vst [vmem:[#allocation104_spill] sm:$0xff] %v14861_v4  ;;  %v16090_v4 = vperm.slane %v14835_v29, 4 }
0x103b   : > { %16269 = vst [vmem:[#allocation105_spill] sm:$0xff] %v14863_v26 }
0x103c   : > { %v14865_v57 = vpop.f32.mrf.mxu3 }
0x103d   : > { %16270 = vst [vmem:[#allocation106_spill] sm:$0xff] %v14865_v57 }
0x103f   : > { %v14867_v59 = vpop.f32.mrf.mxu2 }
0x1040   : > { %16271 = vst [vmem:[#allocation107_spill] sm:$0xff] %v14867_v59 }
0x1041   : > { %v14869_v43 = vpop.f32.mrf.mxu1  ;;  %v6508_v19 = vpop.f32.mrf.mxu0 }
0x1042   : > { %16272 = vst [vmem:[#allocation108_spill] sm:$0xff] %v14869_v43  ;;  %v16092_v43 = vperm.slane %v14835_v29, 3 }
0x1044   : > { %v14871_v62 = vpop.f32.mrf.mxu3 }
0x1045   : > { %16273 = vst [vmem:[#allocation109_spill] sm:$0xff] %v14871_v62 }
0x1047   : > { %v6480_v63 = vpop.f32.mrf.mxu2 }
0x1049   : > { %v14873_v25 = vpop.f32.mrf.mxu1  ;;  %v14875_v47 = vpop.f32.mrf.mxu0 }
0x104a   : > { %16274 = vst [vmem:[#allocation110_spill] sm:$0xff] %v14873_v25 }
0x104b   : > { %16275 = vst [vmem:[#allocation111_spill] sm:$0xff] %v14875_v47 }
0x104c   : > { %v14877_v20 = vpop.f32.mrf.mxu3 }
0x104d   : > { %16276 = vst [vmem:[#allocation112_spill] sm:$0xff] %v14877_v20 }
0x104f   : > { %v14880_v44 = vpop.f32.mrf.mxu2 }
0x1050   : > { %16277 = vst [vmem:[#allocation113_spill] sm:$0xff] %v14880_v44 }
0x1053   : > { %v6494_v26 = vpop.f32.mrf.mxu1 }
0x1054   : > { %v6495_v59 = vadd.f32 %v6494_v26, %v16090_v4 }
0x1055   : > { %v14885_v62 = vpop.f32.mrf.mxu0 }
0x1056   : > { %v6509_v57 = vadd.f32 %v6508_v19, %v6495_v59  ;;  %16278 = vst [vmem:[#allocation114_spill] sm:$0xff] %v14885_v62 }
0x1057   : > { %v6466_v41 = vpop.f32.mrf.mxu3 }
0x1058   : > { %v6467_v47 = vadd.f32 %v6466_v41, %v16092_v43 }
0x105a   : > { %v14889_v25 = vadd.f32 %v6480_v63, %v6467_v47  ;;  %v14891_v20 = vpop.f32.mrf.mxu2  ;;  %v14908_v63 = vld [vmem:[%s12874_s2 + $0x20] sm:$0x7] }
0x105b   : > { %16279 = vst [vmem:[#allocation115_spill] sm:$0xff] %v14891_v20  ;;  %v14893_v44 = vpop.f32.mrf.mxu1  ;;  %v4076_v43 = vperm.slane %v14908_v63, 0 }
0x105c   : > { %16280 = vst [vmem:[#allocation116_spill] sm:$0xff] %v14893_v44  ;;  %v14914_v44 = vld [vmem:[%s12874_s2 + $0x8] sm:$0xff] }
0x105d   : > { %v14897_v26 = vpop.f32.mrf.mxu0 }
0x105e   : > { %16282 = vst [vmem:[#allocation118_spill] sm:$0xff] %v14897_v26  ;;  %v16099_v26 = vperm.slane %v14914_v44, 6 }
0x105f   : > { %v14895_v24 = vpop.f32.mrf.mxu3 }
0x1060   : > { %16281 = vst [vmem:[#allocation117_spill] sm:$0xff] %v14895_v24 }
0x1062   : > { %v14899_v4 = vpop.f32.mrf.mxu2 }
0x1063   : > { %16283 = vst [vmem:[#allocation119_spill] sm:$0xff] %v14899_v4  ;;  %v14901_v19 = vpop.f32.mrf.mxu1 }
0x1064   : > { %16284 = vst [vmem:[#allocation120_spill] sm:$0xff] %v14901_v19  ;;  %v16098_v19 = vperm.slane %v14835_v29, 7 }
0x1065   : > { %v6620_v62 = vpop.f32.mrf.mxu0 }
0x1067   : > { %v14903_v59 = vpop.f32.mrf.mxu3 }
0x1068   : > { %16285 = vst [vmem:[#allocation121_spill] sm:$0xff] %v14903_v59 }
0x106a   : > { %v6592_v41 = vpop.f32.mrf.mxu2 }
0x106b   : > { %v14905_v10 = vpop.f32.mrf.mxu1 }
0x106c   : > { %16286 = vst [vmem:[#allocation122_spill] sm:$0xff] %v14905_v10  ;;  %v6103_v10 = vadd.f32 %v14603_v30, %v16099_v26 }
0x106d   : > { %v6622_v20 = vpop.f32.mrf.mxu0 }
0x106e   : > { %v6117_v0 = vadd.f32 %v14657_v5, %v6103_v10 }
0x106f   : > { %v14910_v47 = vpop.f32.mrf.mxu3 }
0x1070   : > { %16287 = vst [vmem:[#allocation123_spill] sm:$0xff] %v14910_v47 }
0x1072   : > { %v14924_v47 = vpop.f32.mrf.mxu2 }
0x1073   : > { %16289 = vst [vmem:[#allocation125_spill] sm:$0xff] %v14924_v47  ;;  %v10862_v47 = vld [vmem:[%s12922_s14 + $0x108] sm:$0xf0] }
0x1077   : > { %v6606_v4 = vpop.f32.mrf.mxu1 }
0x1078   : > { %v6607_v24 = vadd.f32 %v6606_v4, %v4076_v43 }
0x107a   : > { %v14921_v59 = vadd.f32 %v6620_v62, %v6607_v24  ;;  %v10870_v62 = vld [vmem:[%s12922_s14 + $0x118] sm:$0xf0] }
0x107b   : > { %v6578_v49 = vpop.f32.mrf.mxu3 }
0x107c   : > { %16288 = vst [vmem:[#allocation124_spill] sm:$0xff] %v14921_v59  ;;  %v6579_v1 = vadd.f32 %v6578_v49, %v16098_v19  ;;  %v6717_v50 = vmul.f32 %v14921_v59, %v14205_v56  ;;  %v14932_v4 = vmul.f32 %v14921_v59, %v14245_v60  ;;  %v14936_v30 = vmul.f32 %v14921_v59, %v14325_v27 }
0x107d   : > { %v14940_v5 = vmul.f32 %v14921_v59, %v14385_v7  ;;  %v14944_v49 = vmul.f32 %v14921_v59, %v14469_v15  ;;  %v14948_v56 = vmul.f32 %v14921_v59, %v14529_v18  ;;  %v14952_v60 = vmul.f32 %v14921_v59, %v14609_v40 }
0x107e   : > { %v6593_v10 = vadd.f32 %v6592_v41, %v6579_v1  ;;  %6737 = vmatmul.f32.vlgmr.msrb.gmra.mxu3 %v6717_v50  ;;  %v14955_v27 = vmul.f32 %v14921_v59, %v6117_v0  ;;  %v14959_v7 = vmul.f32 %v14921_v59, %v14725_v2  ;;  %v14963_v15 = vmul.f32 %v14921_v59, %v14795_v8  ;;  %v6662_v1 = vpop.f32.mrf.mxu0  ;;  %v11578_v0 = vld [vmem:[%s12922_s14 + $0x114] sm:$0xf] }
0x107f   : > { %v6608_v24 = vpop.f32.mrf.mxu1  ;;  %v14967_v18 = vmul.f32 %v14921_v59, %v14851_v48  ;;  %v14970_v50 = vmul.f32 %v14921_v59, %v6509_v57  ;;  %v4078_v2 = vperm.slane %v14908_v63, 2  ;;  %v10873_v19 = vor.u32 %v11578_v0, %v10870_v62 }
0x1080   : > { %16290 = vst [vmem:[#allocation126_spill] sm:$0xff] %v14955_v27  ;;  %v6609_v40 = vadd.f32 %v6608_v24, %v4076_v43  ;;  %v6634_v43 = vpop.f32.mrf.mxu2  ;;  %v11576_v24 = vld [vmem:[%s12922_s14 + $0x104] sm:$0xf]  ;;  %v16102_v0 = vperm.slane %v14914_v44, 5 }
0x1081   : > { %16291 = vst [vmem:[#allocation127_spill] sm:$0xff] %v14959_v7  ;;  %6892 = vmatpush.bf16.msra.mxu3 %v10873_v19  ;;  %v4077_v19 = vperm.slane %v14908_v63, 1 }
0x1082   : > { %16292 = vst [vmem:[#allocation128_spill] sm:$0xff] %v14963_v15  ;;  %v14975_v41 = vadd.f32 %v6622_v20, %v6609_v40 }
0x1083   : > { %16293 = vst [vmem:[#allocation129_spill] sm:$0xff] %v14967_v18  ;;  %v14977_v8 = vpop.f32.mrf.mxu3 }
0x1084   : > { %16294 = vst [vmem:[#allocation130_spill] sm:$0xff] %v14970_v50  ;;  %v6719_v26 = vmul.f32 %v14975_v41, %v14231_v13  ;;  %v14983_v48 = vmul.f32 %v14975_v41, %v14282_v39  ;;  %v14987_v57 = vmul.f32 %v14975_v41, %v14360_v45  ;;  %v14993_v20 = vmul.f32 %v14975_v41, %v14423_v6 }
0x1085   : > { %16295 = vst [vmem:[#allocation131_spill] sm:$0xff] %v14975_v41  ;;  %v14997_v40 = vmul.f32 %v14975_v41, %v14504_v31  ;;  %v15001_v13 = vmul.f32 %v14975_v41, %v14567_v22  ;;  %v6663_v39 = vadd.f32 %v6662_v1, %v4078_v2  ;;  %v10865_v45 = vor.u32 %v11576_v24, %v10862_v47 }
0x1086   : > { %16296 = vst [vmem:[#allocation132_spill] sm:$0xff] %v14977_v8  ;;  %6740 = vmatmul.f32.gmra.mxu3 %v6719_v26  ;;  %v6635_v6 = vadd.f32 %v6634_v43, %v4077_v19  ;;  %v6075_v31 = vadd.f32 %v14623_v9, %v16102_v0  ;;  %v6664_v18 = vpop.f32.mrf.mxu0  ;;  %v16308_v0 = vld [vmem:[#allocation42_spill] sm:$0xff] }
0x1087   : > { %v6676_v62 = vpop.f32.mrf.mxu1  ;;  %6893 = vmatpush.bf16.msra.mxu3 %v10865_v45  ;;  %v6665_v26 = vadd.f32 %v6664_v18, %v4078_v2 }
0x1088   : > { %v6677_v8 = vadd.f32 %v6676_v62, %v6663_v39  ;;  %v6089_v63 = vadd.f32 %v14666_v12, %v6075_v31  ;;  %v6636_v24 = vpop.f32.mrf.mxu2 }
0x108a   : > { %v6787_v50 = vmul.f32 0.044715, %v6677_v8 }
0x108b   : > { %v6648_v29 = vpop.f32.mrf.mxu3 }
0x108c   : > { %v6789_v22 = vmul.f32 %v6787_v50, %v6677_v8  ;;  %v15008_v15 = vadd.f32 %v6648_v29, %v6635_v6 }
0x108e   : > { %16297 = vst [vmem:[#allocation133_spill] sm:$0xff] %v15008_v15  ;;  %v6791_v47 = vmul.f32 %v6789_v22, %v6677_v8  ;;  %v6718_v1 = vmul.f32 %v15008_v15, %v14261_v32  ;;  %v15015_v43 = vmul.f32 %v15008_v15, %v14402_v16  ;;  %v15019_v9 = vmul.f32 %v15008_v15, %v14483_v23 }
0x108f   : > { %v6678_v39 = vpop.f32.mrf.mxu1  ;;  %v15023_v29 = vmul.f32 %v15008_v15, %v14546_v38  ;;  %v15026_v12 = vmul.f32 %v15008_v15, %v6089_v63  ;;  %v15030_v32 = vmul.f32 %v15008_v15, %v14731_v61  ;;  %v15034_v16 = vmul.f32 %v15008_v15, %v14803_v46 }
0x1090   : > { %v6793_v18 = vadd.f32 %v6791_v47, %v6677_v8  ;;  %v6679_v50 = vadd.f32 %v6678_v39, %v6665_v26  ;;  %6760 = vmatmul.f32.vlgmr.msrb.gmra.mxu2 %v6718_v1  ;;  %v15038_v23 = vmul.f32 %v15008_v15, %v14857_v17  ;;  %v6637_v38 = vadd.f32 %v6636_v24, %v4077_v19  ;;  %v16303_v19 = vld [vmem:[#allocation69_spill] sm:$0xff]  ;;  %v16304_v26 = vld [vmem:[#allocation72_spill] sm:$0xff] }
0x1091   : > { %16298 = vst [vmem:[#allocation134_spill] sm:$0xff] %v15030_v32  ;;  %v15042_v45 = vmul.f32 %v15008_v15, %v14889_v25  ;;  %v15045_v6 = vmul.f32 %v15008_v15, %v6593_v10 }
0x1092   : > { %16299 = vst [vmem:[#allocation135_spill] sm:$0xff] %v15034_v16  ;;  %v6788_v2 = vmul.f32 0.044715, %v6679_v50  ;;  %v6795_v61 = vmul.f32 0.7978846, %v6793_v18 }
0x1093   : > { %16300 = vst [vmem:[#allocation136_spill] sm:$0xff] %v15038_v23  ;;  %v6650_v62 = vpop.f32.mrf.mxu3 }
0x1094   : > { %16301 = vst [vmem:[#allocation137_spill] sm:$0xff] %v15042_v45  ;;  %v6790_v31 = vmul.f32 %v6788_v2, %v6679_v50  ;;  %v15047_v22 = vadd.f32 %v6650_v62, %v6637_v38  ;;  %11833 = vtanh.f32 %v6795_v61  ;;  %v6785_v38 = vmul.f32 0.5, %v6677_v8 }
0x1095   : > { %16302 = vst [vmem:[#allocation138_spill] sm:$0xff] %v15045_v6  ;;  %v6786_v2 = vmul.f32 0.5, %v6679_v50 }
0x1096   : > { %v6792_v46 = vmul.f32 %v6790_v31, %v6679_v50  ;;  %v6720_v63 = vmul.f32 %v15047_v22, %v14296_v42  ;;  %v15053_v17 = vmul.f32 %v15047_v22, %v14440_v58  ;;  %v15057_v25 = vmul.f32 %v15047_v22, %v16303_v19  ;;  %v16305_v42 = vld [vmem:[#allocation66_spill] sm:$0xff] }
0x1097   : > { %v15061_v10 = vmul.f32 %v15047_v22, %v16304_v26  ;;  %v6901_v58 = vmul.f32 %v15008_v15, %v16305_v42  ;;  %v16306_v26 = vld [vmem:[#allocation67_spill] sm:$0xff] }
0x1098   : > { %v6794_v47 = vadd.f32 %v6792_v46, %v6679_v50  ;;  %6763 = vmatmul.f32.gmra.mxu2 %v6720_v63  ;;  %v6903_v61 = vmul.f32 %v15047_v22, %v16306_v26  ;;  %v11544_v63 = vld [vmem:[%s12922_s14 + $0x4] sm:$0xf]  ;;  %v10850_v50 = vld [vmem:[%s12922_s14] sm:$0xf]  ;;  %v11577_v26 = vld [vmem:[%s12922_s14 + $0x104] sm:$0xf0] }
0x109a   : > { %v6796_v1 = vmul.f32 0.7978846, %v6794_v47  ;;  %v11834_v24 = vpop.eup %11833  ;;  %v10852_v47 = vld [vmem:[%s12922_s14 + $0x8] sm:$0xf0] }
0x109b   : > { %v6799_v39 = vadd.f32 1.0, %v11834_v24  ;;  %v11545_v24 = vld [vmem:[%s12922_s14 + $0x4] sm:$0xf0] }
0x109c   : > { %11835 = vtanh.f32 %v6796_v1  ;;  %v10855_v1 = vor.u32 %v11544_v63, %v10852_v47  ;;  %v10851_v42 = vor.u32 %v11545_v24, %v10850_v50  ;;  %v16307_v24 = vld [vmem:[#allocation43_spill] sm:$0xff] }
0x109d   : > { %v6801_v31 = vmul.f32 %v6799_v39, %v6785_v38  ;;  %v10868_v38 = vld [vmem:[%s12922_s14 + $0x110] sm:$0xf] }
0x109e   : > { %6841 = vmatpush.bf16.msra.mxu0 %v10855_v1  ;;  %6827 = vmatpush.bf16.msra.mxu1 %v10851_v42 }
0x10a0   : > { %6943 = vmatmul.f32.vlgmr.msra.gmra.mxu2 %v6901_v58 }
0x10a2   : > { %v11836_v18 = vpop.eup %11835  ;;  %6904 = vmatpush.msrb.mxu0 %v13077_v37 }
0x10a3   : > { %v6800_v62 = vadd.f32 1.0, %v11836_v18 }
0x10a4   : > { %6905 = vmatpush.msrb.mxu0 %v13072_v36 }
0x10a5   : > { %v6802_v19 = vmul.f32 %v6800_v62, %v6786_v2  ;;  %v11579_v2 = vld [vmem:[%s12922_s14 + $0x114] sm:$0xf0]  ;;  %v10860_v62 = vld [vmem:[%s12922_s14 + $0x100] sm:$0xf] }
0x10a6   : > { %6906 = vmatpush.msrb.mxu0 %v13067_v35  ;;  %v10861_v63 = vor.u32 %v11577_v26, %v10860_v62 }
0x10a7   : > { %v15067_v46 = vpack.c.bf16 %v6802_v19, %v6801_v31  ;;  %v10869_v19 = vor.u32 %v11579_v2, %v10868_v38  ;;  %v16309_v38 = vld [vmem:[#allocation41_spill] sm:$0xff] }
0x10a8   : > { %6946 = vmatmul.f32.gmra.mxu2 %v6903_v61  ;;  %6907 = vmatpush.msrb.mxu0 %v13062_v34 }
0x10a9   : > { %10875 = vmatmul.msk.bf16.vlgmr.msra.gmra.mxu3 %vm6868_vm6, %v15067_v46  ;;  %6878 = vmatpush.bf16.msrb.mxu1 %v10869_v19 }
0x10aa   : > { %6908 = vmatpush.msrb.mxu0 %v13057_v33 }
0x10ac   : > { %6909 = vmatpush.msrb.mxu0 %v16225_v54 }
0x10ad   : > { %6879 = vmatpush.bf16.msrb.mxu1 %v10861_v63 }
0x10ae   : > { %6910 = vmatpush.msrb.mxu0 %v16227_v14 }
0x10b0   : > { %6911 = vmatpush.msrb.mxu0 %v16230_v3 }
0x10b2   : > { %6912 = vmatpush.msrb.mxu0 %v16232_v55 }
0x10b4   : > { %6913 = vmatpush.msrb.mxu0 %v16236_v21 }
0x10b6   : > { %6914 = vmatpush.msrb.mxu0 %v16307_v24 }
0x10b8   : > { %6915 = vmatpush.msrb.mxu0 %v16308_v0 }
0x10ba   : > { %6916 = vmatpush.msrb.mxu0 %v16309_v38 }
0x1101   : > { %v6738_v8 = vpop.f32.mrf.mxu3 }
0x1109   : > { %v6741_v47 = vpop.f32.mrf.mxu3 }
0x1113   : > { %v6761_v58 = vpop.f32.mrf.mxu2 }
0x1114   : > { %v6762_v39 = vadd.f32 %v6761_v58, %v6738_v8 }
0x1116   : > { %v6769_v18 = vmul.f32 0.044715, %v6762_v39  ;;  %v6767_v63 = vmul.f32 0.5, %v6762_v39 }
0x1118   : > { %v6771_v31 = vmul.f32 %v6769_v18, %v6762_v39 }
0x111a   : > { %v6773_v61 = vmul.f32 %v6771_v31, %v6762_v39  ;;  %v16310_v31 = vld [vmem:[#allocation40_spill] sm:$0xff] }
0x111b   : > { %v6764_v1 = vpop.f32.mrf.mxu2  ;;  %6917 = vmatpush.msrb.mxu0 %v16310_v31 }
0x111c   : > { %v6775_v8 = vadd.f32 %v6773_v61, %v6762_v39  ;;  %v6765_v50 = vadd.f32 %v6764_v1, %v6741_v47 }
0x111d   : > { %6918 = vmatpush.msrb.mxu0 %v16249_v11 }
0x111e   : > { %v6777_v42 = vmul.f32 0.7978846, %v6775_v8  ;;  %v6770_v58 = vmul.f32 0.044715, %v6765_v50  ;;  %v6768_v8 = vmul.f32 0.5, %v6765_v50 }
0x111f   : > { %6919 = vmatpush.msrb.mxu0 %v16251_v28 }
0x1120   : > { %v6772_v18 = vmul.f32 %v6770_v58, %v6765_v50  ;;  %11837 = vtanh.f32 %v6777_v42 }
0x1122   : > { %v6774_v2 = vmul.f32 %v6772_v18, %v6765_v50 }
0x1123   : > { %v6944_v6 = vpop.f32.mrf.mxu2 }
0x1124   : > { %v6776_v62 = vadd.f32 %v6774_v2, %v6765_v50 }
0x1126   : > { %v6778_v19 = vmul.f32 0.7978846, %v6776_v62  ;;  %v11838_v26 = vpop.eup %11837 }
0x1127   : > { %v6781_v61 = vadd.f32 1.0, %v11838_v26  ;;  %v11547_v26 = vld [vmem:[%s12922_s14 + $0x14] sm:$0xf0] }
0x1128   : > { %11839 = vtanh.f32 %v6778_v19  ;;  %v10878_v19 = vld [vmem:[%s12922_s14 + $0x10] sm:$0xf] }
0x1129   : > { %v15095_v1 = vmul.f32 %v6781_v61, %v6767_v63  ;;  %v11546_v61 = vld [vmem:[%s12922_s14 + $0x14] sm:$0xf]  ;;  %v10879_v63 = vor.u32 %v11547_v26, %v10878_v19 }
0x112a   : > { %v16319_v19 = vld [vmem:[#allocation53_spill] sm:$0xff]  ;;  %v16320_v26 = vld [vmem:[#allocation52_spill] sm:$0xff] }
0x112b   : > { %v6804_v18 = vmul.f32 %v15095_v1, %v6762_v39  ;;  %v6947_v16 = vpop.f32.mrf.mxu2 }
0x112e   : > { %v11840_v47 = vpop.eup %11839 }
0x112f   : > { %v6782_v42 = vadd.f32 1.0, %v11840_v47  ;;  %v10880_v47 = vld [vmem:[%s12922_s14 + $0x18] sm:$0xf0] }
0x1130   : > { %v10883_v39 = vor.u32 %v11546_v61, %v10880_v47  ;;  %v16323_v47 = vld [vmem:[#allocation50_spill] sm:$0xff] }
0x1131   : > { %v15097_v58 = vmul.f32 %v6782_v42, %v6768_v8  ;;  %v16315_v8 = vld [vmem:[#allocation57_spill] sm:$0xff]  ;;  %v16316_v42 = vld [vmem:[#allocation56_spill] sm:$0xff] }
0x1132   : > { %6987 = vmatpush.bf16.msrb.mxu3 %v10883_v39  ;;  %v16324_v39 = vld [vmem:[#allocation49_spill] sm:$0xff] }
0x1133   : > { %v6805_v2 = vmul.f32 %v15097_v58, %v6765_v50  ;;  %v16314_v50 = vld [vmem:[#allocation58_spill] sm:$0xff] }
0x1135   : > { %v6806_v62 = vpack.c.bf16 %v6805_v2, %v6804_v18  ;;  %v16317_v2 = vld [vmem:[#allocation55_spill] sm:$0xff] }
0x1136   : > { %7025 = vmatpush.msra.mxu3 %v13157_v53 }
0x1137   : > { %10856 = vmatmul.msk.bf16.vlgmr.msra.gmra.mxu1 %vm1373_vm4, %v6806_v62  ;;  %10857 = vmatmul.msk.bf16.vlgmr.msra.gmra.mxu0 %vm1373_vm4, %v6806_v62  ;;  %v16318_v62 = vld [vmem:[#allocation54_spill] sm:$0xff] }
0x1138   : > { %6973 = vmatpush.bf16.msra.mxu1 %v10879_v63  ;;  %7026 = vmatpush.msra.mxu3 %v13152_v52  ;;  %v16322_v63 = vld [vmem:[#allocation51_spill] sm:$0xff] }
0x113a   : > { %7027 = vmatpush.msra.mxu3 %v13147_v51 }
0x1147   : > { %10874 = vmatmul.msk.bf16.vlgmr.msrb.gmra.mxu1 %vm6868_vm6, %v15067_v46  ;;  %6920 = vmatmul.f32.vlgmr.msrb.gmra.mxu0 %v14932_v4  ;;  %v16311_v4 = vld [vmem:[#allocation61_spill] sm:$0xff]  ;;  %v16313_v46 = vld [vmem:[#allocation59_spill] sm:$0xff] }
0x1148   : > { %7002 = vmatpush.msrb.mxu1 %v13077_v37  ;;  %7028 = vmatpush.msra.mxu3 %v16311_v4 }
0x114a   : > { %7003 = vmatpush.msrb.mxu1 %v13072_v36 }
0x114c   : > { %7004 = vmatpush.msrb.mxu1 %v13067_v35 }
0x114e   : > { %7005 = vmatpush.msrb.mxu1 %v13062_v34 }
0x114f   : > { %6923 = vmatmul.f32.gmra.mxu0 %v14983_v48  ;;  %v16312_v48 = vld [vmem:[#allocation60_spill] sm:$0xff] }
0x1150   : > { %7006 = vmatpush.msrb.mxu1 %v13057_v33  ;;  %7029 = vmatpush.msra.mxu3 %v16312_v48 }
0x1152   : > { %7007 = vmatpush.msrb.mxu1 %v16225_v54  ;;  %7030 = vmatpush.msra.mxu3 %v16313_v46 }
0x1154   : > { %7008 = vmatpush.msrb.mxu1 %v16227_v14  ;;  %7031 = vmatpush.msra.mxu3 %v16314_v50 }
0x1156   : > { %7009 = vmatpush.msrb.mxu1 %v16230_v3  ;;  %7032 = vmatpush.msra.mxu3 %v16315_v8 }
0x1158   : > { %7010 = vmatpush.msrb.mxu1 %v16232_v55  ;;  %7033 = vmatpush.msra.mxu3 %v16316_v42 }
0x115a   : > { %7011 = vmatpush.msrb.mxu1 %v16236_v21  ;;  %7034 = vmatpush.msra.mxu3 %v16317_v2 }
0x115c   : > { %7012 = vmatpush.msrb.mxu1 %v16307_v24  ;;  %7035 = vmatpush.msra.mxu3 %v16318_v62 }
0x115e   : > { %7013 = vmatpush.msrb.mxu1 %v16308_v0  ;;  %7036 = vmatpush.msra.mxu3 %v16319_v19 }
0x1160   : > { %7014 = vmatpush.msrb.mxu1 %v16309_v38  ;;  %7037 = vmatpush.msra.mxu3 %v16320_v26 }
0x1162   : > { %7015 = vmatpush.msrb.mxu1 %v16310_v31  ;;  %7038 = vmatpush.msra.mxu3 %v16322_v63 }
0x1164   : > { %7016 = vmatpush.msrb.mxu1 %v16249_v11  ;;  %7039 = vmatpush.msra.mxu3 %v16323_v47 }
0x1166   : > { %7017 = vmatpush.msrb.mxu1 %v16251_v28  ;;  %7040 = vmatpush.msra.mxu3 %v16324_v39 }
0x11b4   : > { %v15130_v18 = vpop.f32.mrf.mxu0 }
0x11bc   : > { %v15140_v61 = vpop.f32.mrf.mxu0 }
0x11bd   : > { %16321 = vst [vmem:[#allocation69_spill] sm:$0xff] %v15140_v61 }
0x11c4   : > { %v6921_v45 = vpop.f32.mrf.mxu0 }
0x11c5   : > { %v6945_v23 = vadd.f32 %v6944_v6, %v6921_v45  ;;  %v6829_v45 = vpop.f32.mrf.mxu1  ;;  %v11549_v6 = vld [vmem:[%s12922_s14 + $0x24] sm:$0xf0] }
0x11c7   : > { %v6950_v32 = vmul.f32 %v6945_v23, %v15095_v1  ;;  %v10888_v23 = vld [vmem:[%s12922_s14 + $0x20] sm:$0xf] }
0x11cc   : > { %v6924_v59 = vpop.f32.mrf.mxu0 }
0x11cd   : > { %v6948_v7 = vadd.f32 %v6947_v16, %v6924_v59  ;;  %v15155_v59 = vpop.f32.mrf.mxu1 }
0x11cf   : > { %v6951_v27 = vmul.f32 %v6948_v7, %v15097_v58  ;;  %v11548_v7 = vld [vmem:[%s12922_s14 + $0x24] sm:$0xf] }
0x11d1   : > { %v6952_v61 = vpack.c.bf16 %v6951_v27, %v6950_v32  ;;  %v10889_v27 = vor.u32 %v11549_v6, %v10888_v23  ;;  %v10890_v32 = vld [vmem:[%s12922_s14 + $0x28] sm:$0xf0] }
0x11d2   : > { %v10893_v41 = vor.u32 %v11548_v7, %v10890_v32 }
0x11d3   : > { %10884 = vmatmul.msk.bf16.vlgmr.msra.gmra.mxu1 %vm1373_vm4, %v6952_v61  ;;  %10885 = vmatmul.msk.bf16.vlgmr.msrb.gmra.mxu3 %vm1373_vm4, %v6952_v61  ;;  %v6895_v61 = vpop.f32.mrf.mxu3 }
0x11d4   : > { %7071 = vmatpush.bf16.msra.mxu0 %v10889_v27  ;;  %7085 = vmatpush.bf16.msrb.mxu2 %v10893_v41  ;;  %v6896_v23 = vadd.f32 %v6895_v61, %v15130_v18 }
0x11d5   : > { %v6881_v16 = vpop.f32.mrf.mxu1 }
0x11d8   : > { %7100 = vmatpush.msrb.mxu0 %v13077_v37  ;;  %7123 = vmatpush.msra.mxu2 %v13157_v53 }
0x11da   : > { %7101 = vmatpush.msrb.mxu0 %v13072_v36  ;;  %7124 = vmatpush.msra.mxu2 %v13152_v52 }
0x11db   : > { %v15173_v41 = vpop.f32.mrf.mxu3 }
0x11dc   : > { %7102 = vmatpush.msrb.mxu0 %v13067_v35  ;;  %7125 = vmatpush.msra.mxu2 %v13147_v51  ;;  %16325 = vst [vmem:[#allocation72_spill] sm:$0xff] %v15173_v41 }
0x11de   : > { %7103 = vmatpush.msrb.mxu0 %v13062_v34  ;;  %7126 = vmatpush.msra.mxu2 %v16311_v4 }
0x11e0   : > { %7104 = vmatpush.msrb.mxu0 %v13057_v33  ;;  %7127 = vmatpush.msra.mxu2 %v16312_v48 }
0x11e2   : > { %7105 = vmatpush.msrb.mxu0 %v16225_v54  ;;  %7128 = vmatpush.msra.mxu2 %v16313_v46 }
0x11e3   : > { %7018 = vmatmul.f32.vlgmr.msrb.gmra.mxu1 %v14936_v30  ;;  %7041 = vmatmul.f32.vlgmr.msra.gmra.mxu3 %v15015_v43  ;;  %v15165_v30 = vpop.f32.mrf.mxu1 }
0x11e4   : > { %7106 = vmatpush.msrb.mxu0 %v16227_v14  ;;  %7129 = vmatpush.msra.mxu2 %v16314_v50 }
0x11e6   : > { %7107 = vmatpush.msrb.mxu0 %v16230_v3  ;;  %7130 = vmatpush.msra.mxu2 %v16315_v8 }
0x11e8   : > { %7108 = vmatpush.msrb.mxu0 %v16232_v55  ;;  %7131 = vmatpush.msra.mxu2 %v16316_v42 }
0x11ea   : > { %7109 = vmatpush.msrb.mxu0 %v16236_v21  ;;  %7132 = vmatpush.msra.mxu2 %v16317_v2 }
0x11eb   : > { %7021 = vmatmul.f32.gmra.mxu1 %v14987_v57  ;;  %7044 = vmatmul.f32.gmra.mxu3 %v15053_v17  ;;  %v6882_v57 = vadd.f32 %v6881_v16, %v6829_v45 }
0x11ec   : > { %7110 = vmatpush.msrb.mxu0 %v16307_v24  ;;  %7133 = vmatpush.msra.mxu2 %v16318_v62 }
0x11ee   : > { %7111 = vmatpush.msrb.mxu0 %v16308_v0  ;;  %7134 = vmatpush.msra.mxu2 %v16319_v19 }
0x11f0   : > { %7112 = vmatpush.msrb.mxu0 %v16309_v38  ;;  %7135 = vmatpush.msra.mxu2 %v16320_v26 }
0x11f2   : > { %7113 = vmatpush.msrb.mxu0 %v16310_v31  ;;  %7136 = vmatpush.msra.mxu2 %v16322_v63 }
0x11f4   : > { %7114 = vmatpush.msrb.mxu0 %v16249_v11  ;;  %7137 = vmatpush.msra.mxu2 %v16323_v47 }
0x11f6   : > { %7115 = vmatpush.msrb.mxu0 %v16251_v28  ;;  %7138 = vmatpush.msra.mxu2 %v16324_v39 }
0x1250   : > { %v6975_v43 = vpop.f32.mrf.mxu1 }
0x1251   : > { %v6994_v17 = vadd.f32 %v6975_v43, %v6882_v57 }
0x1256   : > { %v6989_v6 = vpop.f32.mrf.mxu3 }
0x1257   : > { %v6995_v45 = vadd.f32 %v6989_v6, %v6896_v23 }
0x1258   : > { %v15188_v16 = vpop.f32.mrf.mxu1 }
0x125e   : > { %v15194_v18 = vpop.f32.mrf.mxu3 }
0x125f   : > { %16326 = vst [vmem:[#allocation66_spill] sm:$0xff] %v15194_v18 }
0x1260   : > { %v7019_v7 = vpop.f32.mrf.mxu1 }
0x1266   : > { %v7042_v27 = vpop.f32.mrf.mxu3 }
0x1267   : > { %v7043_v32 = vadd.f32 %v7042_v27, %v7019_v7  ;;  %v10898_v7 = vld [vmem:[%s12922_s14 + $0x30] sm:$0xf]  ;;  %v11551_v27 = vld [vmem:[%s12922_s14 + $0x34] sm:$0xf0] }
0x1268   : > { %v7022_v61 = vpop.f32.mrf.mxu1 }
0x1269   : > { %v7048_v23 = vmul.f32 %v7043_v32, %v15095_v1  ;;  %v10900_v32 = vld [vmem:[%s12922_s14 + $0x38] sm:$0xf0] }
0x126e   : > { %v7045_v57 = vpop.f32.mrf.mxu3 }
0x126f   : > { %v7046_v43 = vadd.f32 %v7045_v57, %v7022_v61  ;;  %v11550_v61 = vld [vmem:[%s12922_s14 + $0x34] sm:$0xf]  ;;  %v10899_v57 = vor.u32 %v11551_v27, %v10898_v7 }
0x1270   : > { %v10903_v41 = vor.u32 %v11550_v61, %v10900_v32  ;;  %v10908_v32 = vld [vmem:[%s12922_s14 + $0x40] sm:$0xf] }
0x1271   : > { %v7049_v6 = vmul.f32 %v7046_v43, %v15097_v58  ;;  %7169 = vmatpush.bf16.msra.mxu1 %v10899_v57 }
0x1272   : > { %7183 = vmatpush.bf16.msrb.mxu3 %v10903_v41 }
0x1273   : > { %v7050_v18 = vpack.c.bf16 %v7049_v6, %v7048_v23 }
0x1275   : > { %10894 = vmatmul.msk.bf16.vlgmr.msra.gmra.mxu0 %vm1373_vm4, %v7050_v18  ;;  %10895 = vmatmul.msk.bf16.vlgmr.msrb.gmra.mxu2 %vm1373_vm4, %v7050_v18 }
0x1276   : > { %7198 = vmatpush.msrb.mxu1 %v13077_v37  ;;  %7221 = vmatpush.msra.mxu3 %v13157_v53 }
0x1278   : > { %7199 = vmatpush.msrb.mxu1 %v13072_v36  ;;  %7222 = vmatpush.msra.mxu3 %v13152_v52 }
0x127a   : > { %7200 = vmatpush.msrb.mxu1 %v13067_v35  ;;  %7223 = vmatpush.msra.mxu3 %v13147_v51 }
0x127c   : > { %7201 = vmatpush.msrb.mxu1 %v13062_v34  ;;  %7224 = vmatpush.msra.mxu3 %v16311_v4 }
0x127e   : > { %7202 = vmatpush.msrb.mxu1 %v13057_v33  ;;  %7225 = vmatpush.msra.mxu3 %v16312_v48 }
0x1280   : > { %7203 = vmatpush.msrb.mxu1 %v16225_v54  ;;  %7226 = vmatpush.msra.mxu3 %v16313_v46 }
0x1282   : > { %7204 = vmatpush.msrb.mxu1 %v16227_v14  ;;  %7227 = vmatpush.msra.mxu3 %v16314_v50 }
0x1284   : > { %7205 = vmatpush.msrb.mxu1 %v16230_v3  ;;  %7228 = vmatpush.msra.mxu3 %v16315_v8 }
0x1285   : > { %7116 = vmatmul.f32.vlgmr.msrb.gmra.mxu0 %v14940_v5  ;;  %7139 = vmatmul.f32.vlgmr.msra.gmra.mxu2 %v15019_v9 }
0x1286   : > { %7206 = vmatpush.msrb.mxu1 %v16232_v55  ;;  %7229 = vmatpush.msra.mxu3 %v16316_v42 }
0x1288   : > { %7207 = vmatpush.msrb.mxu1 %v16236_v21  ;;  %7230 = vmatpush.msra.mxu3 %v16317_v2 }
0x128a   : > { %7208 = vmatpush.msrb.mxu1 %v16307_v24  ;;  %7231 = vmatpush.msra.mxu3 %v16318_v62 }
0x128c   : > { %7209 = vmatpush.msrb.mxu1 %v16308_v0  ;;  %7232 = vmatpush.msra.mxu3 %v16319_v19 }
0x128d   : > { %7119 = vmatmul.f32.gmra.mxu0 %v14993_v20  ;;  %7142 = vmatmul.f32.gmra.mxu2 %v15057_v25 }
0x128e   : > { %7210 = vmatpush.msrb.mxu1 %v16309_v38  ;;  %7233 = vmatpush.msra.mxu3 %v16320_v26 }
0x1290   : > { %7211 = vmatpush.msrb.mxu1 %v16310_v31  ;;  %7234 = vmatpush.msra.mxu3 %v16322_v63 }
0x1292   : > { %7212 = vmatpush.msrb.mxu1 %v16249_v11  ;;  %7235 = vmatpush.msra.mxu3 %v16323_v47 }
0x1294   : > { %7213 = vmatpush.msrb.mxu1 %v16251_v28  ;;  %7236 = vmatpush.msra.mxu3 %v16324_v39 }
0x12f2   : > { %v7073_v5 = vpop.f32.mrf.mxu0 }
0x12f3   : > { %v7092_v20 = vadd.f32 %v7073_v5, %v6994_v17  ;;  %v11553_v5 = vld [vmem:[%s12922_s14 + $0x44] sm:$0xf0] }
0x12f8   : > { %v7087_v9 = vpop.f32.mrf.mxu2 }
0x12f9   : > { %v7093_v25 = vadd.f32 %v7087_v9, %v6995_v45  ;;  %v11552_v9 = vld [vmem:[%s12922_s14 + $0x44] sm:$0xf] }
0x12fa   : > { %v15236_v41 = vpop.f32.mrf.mxu0 }
0x1300   : > { %v15242_v17 = vpop.f32.mrf.mxu2 }
0x1302   : > { %v7117_v45 = vpop.f32.mrf.mxu0 }
0x1308   : > { %v7140_v18 = vpop.f32.mrf.mxu2 }
0x1309   : > { %v7141_v43 = vadd.f32 %v7140_v18, %v7117_v45  ;;  %v10909_v45 = vor.u32 %v11553_v5, %v10908_v32  ;;  %v10910_v18 = vld [vmem:[%s12922_s14 + $0x48] sm:$0xf0] }
0x130a   : > { %v7120_v23 = vpop.f32.mrf.mxu0 }
0x130b   : > { %v7146_v27 = vmul.f32 %v7141_v43, %v15095_v1  ;;  %v10913_v43 = vor.u32 %v11552_v9, %v10910_v18  ;;  %7267 = vmatpush.bf16.msra.mxu0 %v10909_v45  ;;  %v4055_v45 = vperm.slane %v14914_v44, 3  ;;  %v16328_v18 = vld [vmem:[#allocation74_spill] sm:$0xff] }
0x130d   : > { %7281 = vmatpush.bf16.msrb.mxu2 %v10913_v43  ;;  %v6019_v43 = vadd.f32 %v16328_v18, %v4055_v45 }
0x130f   : > { %7296 = vmatpush.msrb.mxu0 %v13077_v37 }
0x1310   : > { %v7143_v6 = vpop.f32.mrf.mxu2 }
0x1311   : > { %v7144_v7 = vadd.f32 %v7143_v6, %v7120_v23  ;;  %7319 = vmatpush.msra.mxu2 %v13157_v53  ;;  %7297 = vmatpush.msrb.mxu0 %v13072_v36 }
0x1313   : > { %v7147_v61 = vmul.f32 %v7144_v7, %v15097_v58  ;;  %7320 = vmatpush.msra.mxu2 %v13152_v52  ;;  %7298 = vmatpush.msrb.mxu0 %v13067_v35 }
0x1315   : > { %v7148_v57 = vpack.c.bf16 %v7147_v61, %v7146_v27  ;;  %7321 = vmatpush.msra.mxu2 %v13147_v51  ;;  %7299 = vmatpush.msrb.mxu0 %v13062_v34 }
0x1317   : > { %10904 = vmatmul.msk.bf16.vlgmr.msra.gmra.mxu1 %vm1373_vm4, %v7148_v57  ;;  %10905 = vmatmul.msk.bf16.vlgmr.msrb.gmra.mxu3 %vm1373_vm4, %v7148_v57 }
0x1318   : > { %7322 = vmatpush.msra.mxu2 %v16311_v4  ;;  %7300 = vmatpush.msrb.mxu0 %v13057_v33 }
0x131a   : > { %7323 = vmatpush.msra.mxu2 %v16312_v48  ;;  %7301 = vmatpush.msrb.mxu0 %v16225_v54 }
0x131c   : > { %7324 = vmatpush.msra.mxu2 %v16313_v46  ;;  %7302 = vmatpush.msrb.mxu0 %v16227_v14 }
0x131e   : > { %7325 = vmatpush.msra.mxu2 %v16314_v50  ;;  %7303 = vmatpush.msrb.mxu0 %v16230_v3 }
0x1320   : > { %7326 = vmatpush.msra.mxu2 %v16315_v8  ;;  %7304 = vmatpush.msrb.mxu0 %v16232_v55 }
0x1322   : > { %7327 = vmatpush.msra.mxu2 %v16316_v42  ;;  %7305 = vmatpush.msrb.mxu0 %v16236_v21 }
0x1324   : > { %7328 = vmatpush.msra.mxu2 %v16317_v2  ;;  %7306 = vmatpush.msrb.mxu0 %v16307_v24 }
0x1326   : > { %7329 = vmatpush.msra.mxu2 %v16318_v62  ;;  %7307 = vmatpush.msrb.mxu0 %v16308_v0 }
0x1327   : > { %7214 = vmatmul.f32.vlgmr.msrb.gmra.mxu1 %v14944_v49  ;;  %7237 = vmatmul.f32.vlgmr.msra.gmra.mxu3 %v15023_v29 }
0x1328   : > { %7330 = vmatpush.msra.mxu2 %v16319_v19  ;;  %7308 = vmatpush.msrb.mxu0 %v16309_v38 }
0x132a   : > { %7331 = vmatpush.msra.mxu2 %v16320_v26  ;;  %7309 = vmatpush.msrb.mxu0 %v16310_v31 }
0x132c   : > { %7332 = vmatpush.msra.mxu2 %v16322_v63  ;;  %7310 = vmatpush.msrb.mxu0 %v16249_v11 }
0x132e   : > { %7333 = vmatpush.msra.mxu2 %v16323_v47  ;;  %7311 = vmatpush.msrb.mxu0 %v16251_v28 }
0x132f   : > { %7217 = vmatmul.f32.gmra.mxu1 %v14997_v40  ;;  %7240 = vmatmul.f32.gmra.mxu3 %v15061_v10 }
0x1330   : > { %7334 = vmatpush.msra.mxu2 %v16324_v39 }
0x1394   : > { %v7171_v49 = vpop.f32.mrf.mxu1 }
0x1395   : > { %v15275_v40 = vadd.f32 %v7171_v49, %v7092_v20  ;;  %v16329_v49 = vld [vmem:[#allocation70_spill] sm:$0xff] }
0x139a   : > { %v7185_v29 = vpop.f32.mrf.mxu3 }
0x139b   : > { %v15283_v10 = vadd.f32 %v7185_v29, %v7093_v25  ;;  %v6033_v29 = vadd.f32 %v16329_v49, %v6019_v43 }
0x139c   : > { %v15288_v20 = vpop.f32.mrf.mxu1 }
0x13a2   : > { %v15294_v23 = vpop.f32.mrf.mxu3 }
0x13a3   : > { %16327 = vst [vmem:[#allocation67_spill] sm:$0xff] %v15294_v23  ;;  %v10920_v23 = vld [vmem:[%s12922_s14 + $0x58] sm:$0xf0] }
0x13a4   : > { %v7215_v25 = vpop.f32.mrf.mxu1 }
0x13aa   : > { %v7238_v6 = vpop.f32.mrf.mxu3 }
0x13ab   : > { %v7239_v7 = vadd.f32 %v7238_v6, %v7215_v25  ;;  %v7293_v25 = vmul.f32 %v15008_v15, %v6033_v29  ;;  %v16330_v6 = vld [vmem:[#allocation77_spill] sm:$0xff]  ;;  %v10930_v15 = vld [vmem:[%s12922_s14 + $0x68] sm:$0xf0] }
0x13ac   : > { %v7218_v27 = vpop.f32.mrf.mxu1 }
0x13ad   : > { %v7244_v32 = vmul.f32 %v7239_v7, %v15095_v1  ;;  %v6021_v7 = vadd.f32 %v16330_v6, %v4055_v45 }
0x13b2   : > { %v7241_v61 = vpop.f32.mrf.mxu3 }
0x13b3   : > { %v7242_v57 = vadd.f32 %v7241_v61, %v7218_v27  ;;  %v16331_v27 = vld [vmem:[#allocation73_spill] sm:$0xff] }
0x13b4   : > { %v6035_v61 = vadd.f32 %v16331_v27, %v6021_v7 }
0x13b5   : > { %v7245_v5 = vmul.f32 %v7242_v57, %v15097_v58 }
0x13b6   : > { %v7295_v57 = vmul.f32 %v15047_v22, %v6035_v61 }
0x13b7   : > { %v7246_v9 = vpack.c.bf16 %v7245_v5, %v7244_v32  ;;  %v10918_v32 = vld [vmem:[%s12922_s14 + $0x50] sm:$0xf]  ;;  %v11555_v5 = vld [vmem:[%s12922_s14 + $0x54] sm:$0xf0] }
0x13b8   : > { %v10919_v18 = vor.u32 %v11555_v5, %v10918_v32  ;;  %v16332_v5 = vld [vmem:[#allocation68_spill] sm:$0xff] }
0x13b9   : > { %10914 = vmatmul.msk.bf16.vlgmr.msra.gmra.mxu0 %vm1373_vm4, %v7246_v9  ;;  %10915 = vmatmul.msk.bf16.vlgmr.msrb.gmra.mxu2 %vm1373_vm4, %v7246_v9  ;;  %v11554_v9 = vld [vmem:[%s12922_s14 + $0x54] sm:$0xf] }
0x13ba   : > { %v10923_v43 = vor.u32 %v11554_v9, %v10920_v23  ;;  %7365 = vmatpush.bf16.msra.mxu1 %v10919_v18  ;;  %v16333_v9 = vperm.slane %v16332_v5, 4  ;;  %v16334_v18 = vld [vmem:[#allocation75_spill] sm:$0xff] }
0x13bc   : > { %7379 = vmatpush.bf16.msrb.mxu3 %v10923_v43  ;;  %v6049_v43 = vadd.f32 %v16334_v18, %v16333_v9  ;;  %v11557_v9 = vld [vmem:[%s12922_s14 + $0x64] sm:$0xf0]  ;;  %v11556_v18 = vld [vmem:[%s12922_s14 + $0x64] sm:$0xf] }
0x13be   : > { %7394 = vmatpush.msrb.mxu1 %v13077_v37 }
0x13c0   : > { %7417 = vmatpush.msra.mxu3 %v13157_v53  ;;  %7395 = vmatpush.msrb.mxu1 %v13072_v36 }
0x13c2   : > { %7418 = vmatpush.msra.mxu3 %v13152_v52  ;;  %7396 = vmatpush.msrb.mxu1 %v13067_v35 }
0x13c4   : > { %7419 = vmatpush.msra.mxu3 %v13147_v51  ;;  %7397 = vmatpush.msrb.mxu1 %v13062_v34 }
0x13c6   : > { %7420 = vmatpush.msra.mxu3 %v16311_v4  ;;  %7398 = vmatpush.msrb.mxu1 %v13057_v33 }
0x13c8   : > { %7421 = vmatpush.msra.mxu3 %v16312_v48  ;;  %7399 = vmatpush.msrb.mxu1 %v16225_v54 }
0x13c9   : > { %7312 = vmatmul.f32.vlgmr.msrb.gmra.mxu0 %v14948_v56  ;;  %7335 = vmatmul.f32.vlgmr.msra.gmra.mxu2 %v7293_v25 }
0x13ca   : > { %7422 = vmatpush.msra.mxu3 %v16313_v46  ;;  %7400 = vmatpush.msrb.mxu1 %v16227_v14 }
0x13cc   : > { %7423 = vmatpush.msra.mxu3 %v16314_v50  ;;  %7401 = vmatpush.msrb.mxu1 %v16230_v3 }
0x13ce   : > { %7424 = vmatpush.msra.mxu3 %v16315_v8  ;;  %7402 = vmatpush.msrb.mxu1 %v16232_v55 }
0x13d0   : > { %7425 = vmatpush.msra.mxu3 %v16316_v42  ;;  %7403 = vmatpush.msrb.mxu1 %v16236_v21 }
0x13d1   : > { %7315 = vmatmul.f32.gmra.mxu0 %v15001_v13  ;;  %7338 = vmatmul.f32.gmra.mxu2 %v7295_v57 }
0x13d2   : > { %7426 = vmatpush.msra.mxu3 %v16317_v2  ;;  %7404 = vmatpush.msrb.mxu1 %v16307_v24 }
0x13d4   : > { %7427 = vmatpush.msra.mxu3 %v16318_v62  ;;  %7405 = vmatpush.msrb.mxu1 %v16308_v0 }
0x13d6   : > { %7428 = vmatpush.msra.mxu3 %v16319_v19  ;;  %7406 = vmatpush.msrb.mxu1 %v16309_v38 }
0x13d8   : > { %7429 = vmatpush.msra.mxu3 %v16320_v26  ;;  %7407 = vmatpush.msrb.mxu1 %v16310_v31 }
0x13da   : > { %7430 = vmatpush.msra.mxu3 %v16322_v63  ;;  %7408 = vmatpush.msrb.mxu1 %v16249_v11 }
0x13dc   : > { %7431 = vmatpush.msra.mxu3 %v16323_v47  ;;  %7409 = vmatpush.msrb.mxu1 %v16251_v28 }
0x13de   : > { %7432 = vmatpush.msra.mxu3 %v16324_v39 }
0x1436   : > { %v7269_v56 = vpop.f32.mrf.mxu0 }
0x1437   : > { %v15333_v13 = vadd.f32 %v7269_v56, %v15275_v40  ;;  %v16335_v56 = vperm.slane %v14914_v44, 5 }
0x143c   : > { %v7283_v23 = vpop.f32.mrf.mxu2 }
0x143d   : > { %v15342_v45 = vadd.f32 %v7283_v23, %v15283_v10  ;;  %v16336_v23 = vld [vmem:[#allocation78_spill] sm:$0xff] }
0x143e   : > { %v15347_v40 = vpop.f32.mrf.mxu0 }
0x1444   : > { %v15353_v49 = vpop.f32.mrf.mxu2 }
0x1446   : > { %v7313_v10 = vpop.f32.mrf.mxu0 }
0x144c   : > { %v7336_v29 = vpop.f32.mrf.mxu2 }
0x144d   : > { %v7337_v25 = vadd.f32 %v7336_v29, %v7313_v10  ;;  %v6077_v10 = vadd.f32 %v16336_v23, %v16335_v56  ;;  %v16337_v29 = vld [vmem:[#allocation71_spill] sm:$0xff] }
0x144e   : > { %v7316_v6 = vpop.f32.mrf.mxu0 }
0x144f   : > { %v7342_v61 = vmul.f32 %v7337_v25, %v15095_v1  ;;  %v6063_v25 = vadd.f32 %v16337_v29, %v6049_v43 }
0x1454   : > { %v7339_v7 = vpop.f32.mrf.mxu2 }
0x1455   : > { %v7340_v27 = vadd.f32 %v7339_v7, %v7316_v6  ;;  %v16338_v6 = vld [vmem:[#allocation82_spill] sm:$0xff] }
0x1456   : > { %v6091_v7 = vadd.f32 %v16338_v6, %v6077_v10 }
0x1457   : > { %v7343_v57 = vmul.f32 %v7340_v27, %v15097_v58  ;;  %v16339_v27 = vld [vmem:[#allocation131_spill] sm:$0xff] }
0x1459   : > { %v7344_v32 = vpack.c.bf16 %v7343_v57, %v7342_v61  ;;  %v7392_v61 = vmul.f32 %v16339_v27, %v6063_v25  ;;  %v7393_v57 = vmul.f32 %v15047_v22, %v6091_v7 }
0x145b   : > { %10924 = vmatmul.msk.bf16.vlgmr.msra.gmra.mxu1 %vm1373_vm4, %v7344_v32  ;;  %10925 = vmatmul.msk.bf16.vlgmr.msrb.gmra.mxu3 %vm1373_vm4, %v7344_v32  ;;  %v10928_v32 = vld [vmem:[%s12922_s14 + $0x60] sm:$0xf] }
0x146b   : > { %7410 = vmatmul.f32.vlgmr.msrb.gmra.mxu1 %v14952_v60  ;;  %7433 = vmatmul.f32.vlgmr.msra.gmra.mxu3 %v15026_v12  ;;  %v10929_v60 = vor.u32 %v11557_v9, %v10928_v32  ;;  %v10933_v12 = vor.u32 %v11556_v18, %v10930_v15  ;;  %v6884_v15 = vadd.f32 %v15165_v30, %v15155_v59  ;;  %v16340_v59 = vld [vmem:[#allocation69_spill] sm:$0xff]  ;;  %v16341_v30 = vld [vmem:[#allocation72_spill] sm:$0xff]  ;;  %v16343_v32 = vld [vmem:[#allocation67_spill] sm:$0xff] }
0x146c   : > { %v6898_v29 = vadd.f32 %v16341_v30, %v16340_v59  ;;  %v16344_v30 = vperm.slane %v16332_v5, 7  ;;  %v10938_v5 = vld [vmem:[%s12922_s14 + $0x70] sm:$0xf] }
0x146d   : > { %7463 = vmatpush.bf16.msra.mxu0 %v10929_v60  ;;  %7477 = vmatpush.bf16.msrb.mxu2 %v10933_v12  ;;  %v6996_v56 = vadd.f32 %v15188_v16, %v6884_v15 }
0x146f   : > { %v7094_v10 = vadd.f32 %v15236_v41, %v6996_v56 }
0x1471   : > { %7492 = vmatpush.msrb.mxu0 %v13077_v37  ;;  %7515 = vmatpush.msra.mxu2 %v13157_v53  ;;  %v7192_v25 = vadd.f32 %v15288_v20, %v7094_v10 }
0x1473   : > { %7413 = vmatmul.f32.gmra.mxu1 %v7392_v61  ;;  %7436 = vmatmul.f32.gmra.mxu3 %v7393_v57  ;;  %v7290_v7 = vadd.f32 %v15347_v40, %v7192_v25 }
0x1474   : > { %7493 = vmatpush.msrb.mxu0 %v13072_v36  ;;  %7516 = vmatpush.msra.mxu2 %v13152_v52 }
0x1476   : > { %7494 = vmatpush.msrb.mxu0 %v13067_v35  ;;  %7517 = vmatpush.msra.mxu2 %v13147_v51 }
0x1478   : > { %7495 = vmatpush.msrb.mxu0 %v13062_v34  ;;  %7518 = vmatpush.msra.mxu2 %v16311_v4 }
0x147a   : > { %7496 = vmatpush.msrb.mxu0 %v13057_v33  ;;  %7519 = vmatpush.msra.mxu2 %v16312_v48 }
0x147c   : > { %7497 = vmatpush.msrb.mxu0 %v16225_v54  ;;  %7520 = vmatpush.msra.mxu2 %v16313_v46 }
0x147e   : > { %7498 = vmatpush.msrb.mxu0 %v16227_v14  ;;  %7521 = vmatpush.msra.mxu2 %v16314_v50 }
0x1480   : > { %7499 = vmatpush.msrb.mxu0 %v16230_v3  ;;  %7522 = vmatpush.msra.mxu2 %v16315_v8 }
0x1482   : > { %7500 = vmatpush.msrb.mxu0 %v16232_v55  ;;  %7523 = vmatpush.msra.mxu2 %v16316_v42 }
0x1484   : > { %7501 = vmatpush.msrb.mxu0 %v16236_v21  ;;  %7524 = vmatpush.msra.mxu2 %v16317_v2 }
0x1486   : > { %7502 = vmatpush.msrb.mxu0 %v16307_v24  ;;  %7525 = vmatpush.msra.mxu2 %v16318_v62 }
0x1488   : > { %7503 = vmatpush.msrb.mxu0 %v16308_v0  ;;  %7526 = vmatpush.msra.mxu2 %v16319_v19 }
0x148a   : > { %7504 = vmatpush.msrb.mxu0 %v16309_v38  ;;  %7527 = vmatpush.msra.mxu2 %v16320_v26 }
0x148c   : > { %7505 = vmatpush.msrb.mxu0 %v16310_v31  ;;  %7528 = vmatpush.msra.mxu2 %v16322_v63 }
0x148e   : > { %7506 = vmatpush.msrb.mxu0 %v16249_v11  ;;  %7529 = vmatpush.msra.mxu2 %v16323_v47 }
0x1490   : > { %7507 = vmatpush.msrb.mxu0 %v16251_v28  ;;  %7530 = vmatpush.msra.mxu2 %v16324_v39 }
0x14d8   : > { %v7367_v43 = vpop.f32.mrf.mxu1 }
0x14d9   : > { %v15398_v23 = vadd.f32 %v7367_v43, %v15333_v13  ;;  %v16342_v13 = vld [vmem:[#allocation66_spill] sm:$0xff] }
0x14da   : > { %v6997_v6 = vadd.f32 %v16342_v13, %v6898_v29  ;;  %v16345_v29 = vld [vmem:[#allocation88_spill] sm:$0xff]  ;;  %v16347_v13 = vld [vmem:[#allocation134_spill] sm:$0xff] }
0x14db   : > { %v6133_v25 = vadd.f32 %v16345_v29, %v16344_v30 }
0x14dc   : > { %v7095_v57 = vadd.f32 %v15242_v17, %v6997_v6  ;;  %v16348_v6 = vperm.slane %v14914_v44, 6 }
0x14de   : > { %v7381_v16 = vpop.f32.mrf.mxu3  ;;  %v7193_v9 = vadd.f32 %v16343_v32, %v7095_v57  ;;  %v16350_v57 = vld [vmem:[#allocation79_spill] sm:$0xff] }
0x14df   : > { %v15413_v41 = vadd.f32 %v7381_v16, %v15342_v45  ;;  %v16346_v16 = vld [vmem:[#allocation126_spill] sm:$0xff] }
0x14e0   : > { %v7369_v61 = vpop.f32.mrf.mxu1  ;;  %v7291_v45 = vadd.f32 %v15353_v49, %v7193_v9  ;;  %v16351_v9 = vld [vmem:[#allocation83_spill] sm:$0xff] }
0x14e1   : > { %v15418_v20 = vadd.f32 %v7369_v61, %v7290_v7  ;;  %v16349_v7 = vld [vmem:[#allocation76_spill] sm:$0xff] }
0x14e2   : > { %v6105_v61 = vadd.f32 %v16349_v7, %v16348_v6 }
0x14e4   : > { %v6119_v32 = vadd.f32 %v16350_v57, %v6105_v61 }
0x14e6   : > { %v7383_v40 = vpop.f32.mrf.mxu3 }
0x14e7   : > { %v15428_v17 = vadd.f32 %v7383_v40, %v7291_v45  ;;  %v6147_v45 = vadd.f32 %v16351_v9, %v6133_v25  ;;  %v7490_v40 = vmul.f32 %v16339_v27, %v6119_v32  ;;  %v15504_v32 = vld [vmem:[%s12874_s2 + $0x10] sm:$0xff] }
0x14e8   : > { %v7411_v18 = vpop.f32.mrf.mxu1  ;;  %v4061_v9 = vperm.slane %v15504_v32, 1 }
0x14ee   : > { %v7434_v60 = vpop.f32.mrf.mxu3 }
0x14ef   : > { %v7435_v49 = vadd.f32 %v7434_v60, %v7411_v18  ;;  %v7491_v18 = vmul.f32 %v15047_v22, %v6147_v45  ;;  %v11559_v60 = vld [vmem:[%s12922_s14 + $0x74] sm:$0xf0] }
0x14f0   : > { %v7414_v12 = vpop.f32.mrf.mxu1  ;;  %v16352_v45 = vld [vmem:[#allocation85_spill] sm:$0xff] }
0x14f1   : > { %v7440_v56 = vmul.f32 %v7435_v49, %v15095_v1  ;;  %v11558_v49 = vld [vmem:[%s12922_s14 + $0x74] sm:$0xf] }
0x14f6   : > { %v7437_v15 = vpop.f32.mrf.mxu3 }
0x14f7   : > { %v7438_v43 = vadd.f32 %v7437_v15, %v7414_v12  ;;  %v10939_v12 = vor.u32 %v11559_v60, %v10938_v5  ;;  %v10940_v15 = vld [vmem:[%s12922_s14 + $0x78] sm:$0xf0] }
0x14f8   : > { %v16354_v60 = vld [vmem:[#allocation133_spill] sm:$0xff] }
0x14f9   : > { %v7441_v10 = vmul.f32 %v7438_v43, %v15097_v58  ;;  %v10943_v43 = vor.u32 %v11558_v49, %v10940_v15  ;;  %7561 = vmatpush.bf16.msra.mxu1 %v10939_v12  ;;  %v16355_v12 = vld [vmem:[#allocation81_spill] sm:$0xff] }
0x14fa   : > { %v16356_v15 = vperm.slane %v16355_v12, 0 }
0x14fb   : > { %v7442_v59 = vpack.c.bf16 %v7441_v10, %v7440_v56  ;;  %7575 = vmatpush.bf16.msrb.mxu3 %v10943_v43  ;;  %v16357_v43 = vld [vmem:[#allocation86_spill] sm:$0xff] }
0x14fd   : > { %10934 = vmatmul.msk.bf16.vlgmr.msra.gmra.mxu0 %vm1373_vm4, %v7442_v59  ;;  %10935 = vmatmul.msk.bf16.vlgmr.msrb.gmra.mxu2 %vm1373_vm4, %v7442_v59 }
0x14fe   : > { %7590 = vmatpush.msrb.mxu1 %v13077_v37 }
0x14ff   : > { %7613 = vmatpush.msra.mxu3 %v13157_v53 }
0x1500   : > { %7591 = vmatpush.msrb.mxu1 %v13072_v36 }
0x1501   : > { %7614 = vmatpush.msra.mxu3 %v13152_v52 }
0x1502   : > { %7592 = vmatpush.msrb.mxu1 %v13067_v35 }
0x1503   : > { %7615 = vmatpush.msra.mxu3 %v13147_v51 }
0x1504   : > { %7593 = vmatpush.msrb.mxu1 %v13062_v34 }
0x1505   : > { %7616 = vmatpush.msra.mxu3 %v16311_v4 }
0x1506   : > { %7594 = vmatpush.msrb.mxu1 %v13057_v33 }
0x1507   : > { %7617 = vmatpush.msra.mxu3 %v16312_v48 }
0x1508   : > { %7595 = vmatpush.msrb.mxu1 %v16225_v54 }
0x1509   : > { %7618 = vmatpush.msra.mxu3 %v16313_v46 }
0x150a   : > { %7596 = vmatpush.msrb.mxu1 %v16227_v14 }
0x150b   : > { %7619 = vmatpush.msra.mxu3 %v16314_v50 }
0x150c   : > { %7597 = vmatpush.msrb.mxu1 %v16230_v3 }
0x150d   : > { %7508 = vmatmul.f32.vlgmr.msrb.gmra.mxu0 %v16346_v16  ;;  %7531 = vmatmul.f32.vlgmr.msra.gmra.mxu2 %v16347_v13 }
0x150e   : > { %7620 = vmatpush.msra.mxu3 %v16315_v8  ;;  %7598 = vmatpush.msrb.mxu1 %v16232_v55 }
0x1510   : > { %7621 = vmatpush.msra.mxu3 %v16316_v42  ;;  %7599 = vmatpush.msrb.mxu1 %v16236_v21 }
0x1512   : > { %7622 = vmatpush.msra.mxu3 %v16317_v2  ;;  %7600 = vmatpush.msrb.mxu1 %v16307_v24 }
0x1514   : > { %7623 = vmatpush.msra.mxu3 %v16318_v62  ;;  %7601 = vmatpush.msrb.mxu1 %v16308_v0 }
0x1515   : > { %7511 = vmatmul.f32.gmra.mxu0 %v7490_v40  ;;  %7534 = vmatmul.f32.gmra.mxu2 %v7491_v18  ;;  %v6187_v40 = vadd.f32 %v16352_v45, %v4061_v9  ;;  %v16353_v18 = vld [vmem:[#allocation48_spill] sm:$0xff] }
0x1516   : > { %7624 = vmatpush.msra.mxu3 %v16319_v19  ;;  %7602 = vmatpush.msrb.mxu1 %v16309_v38 }
0x1517   : > { %v6201_v5 = vadd.f32 %v16353_v18, %v6187_v40  ;;  %v10950_v40 = vld [vmem:[%s12922_s14 + $0x88] sm:$0xf0] }
0x1518   : > { %7625 = vmatpush.msra.mxu3 %v16320_v26  ;;  %7603 = vmatpush.msrb.mxu1 %v16310_v31 }
0x1519   : > { %v7587_v49 = vmul.f32 %v16354_v60, %v6201_v5 }
0x151a   : > { %7626 = vmatpush.msra.mxu3 %v16322_v63  ;;  %7604 = vmatpush.msrb.mxu1 %v16249_v11 }
0x151c   : > { %7627 = vmatpush.msra.mxu3 %v16323_v47  ;;  %7605 = vmatpush.msrb.mxu1 %v16251_v28 }
0x151e   : > { %7628 = vmatpush.msra.mxu3 %v16324_v39 }
0x157a   : > { %v7465_v44 = vpop.f32.mrf.mxu0 }
0x157b   : > { %v15469_v56 = vadd.f32 %v7465_v44, %v15398_v23  ;;  %v6161_v44 = vadd.f32 %v16357_v43, %v16356_v15 }
0x1580   : > { %v7479_v10 = vpop.f32.mrf.mxu2 }
0x1581   : > { %v15478_v59 = vadd.f32 %v7479_v10, %v15413_v41  ;;  %v16358_v10 = vld [vmem:[#allocation127_spill] sm:$0xff] }
0x1582   : > { %v7467_v23 = vpop.f32.mrf.mxu0 }
0x1583   : > { %v15483_v30 = vadd.f32 %v7467_v23, %v15418_v20  ;;  %v16359_v23 = vld [vmem:[#allocation89_spill] sm:$0xff] }
0x1588   : > { %v7481_v41 = vpop.f32.mrf.mxu2 }
0x1589   : > { %v15492_v29 = vadd.f32 %v7481_v41, %v15428_v17  ;;  %v6189_v41 = vadd.f32 %v16359_v23, %v4061_v9 }
0x158a   : > { %v7509_v20 = vpop.f32.mrf.mxu0 }
0x1590   : > { %v7532_v25 = vpop.f32.mrf.mxu2 }
0x1591   : > { %v7533_v16 = vadd.f32 %v7532_v25, %v7509_v20  ;;  %v16360_v20 = vld [vmem:[#allocation80_spill] sm:$0xff] }
0x1592   : > { %v7512_v13 = vpop.f32.mrf.mxu0  ;;  %v6175_v25 = vadd.f32 %v16360_v20, %v6161_v44 }
0x1593   : > { %v7538_v17 = vmul.f32 %v7533_v16, %v15095_v1  ;;  %v16361_v16 = vld [vmem:[#allocation45_spill] sm:$0xff] }
0x1598   : > { %v7535_v6 = vpop.f32.mrf.mxu2 }
0x1599   : > { %v7536_v7 = vadd.f32 %v7535_v6, %v7512_v13  ;;  %v6203_v13 = vadd.f32 %v16361_v16, %v6189_v41  ;;  %v7588_v6 = vmul.f32 %v16339_v27, %v6175_v25 }
0x159b   : > { %v7539_v61 = vmul.f32 %v7536_v7, %v15097_v58  ;;  %v7589_v7 = vmul.f32 %v15047_v22, %v6203_v13 }
0x159d   : > { %v7540_v57 = vpack.c.bf16 %v7539_v61, %v7538_v17  ;;  %v10948_v17 = vld [vmem:[%s12922_s14 + $0x80] sm:$0xf]  ;;  %v11561_v61 = vld [vmem:[%s12922_s14 + $0x84] sm:$0xf0] }
0x159e   : > { %v10949_v45 = vor.u32 %v11561_v61, %v10948_v17  ;;  %v16363_v61 = vld [vmem:[#allocation90_spill] sm:$0xff] }
0x159f   : > { %10944 = vmatmul.msk.bf16.vlgmr.msra.gmra.mxu1 %vm1373_vm4, %v7540_v57  ;;  %10945 = vmatmul.msk.bf16.vlgmr.msrb.gmra.mxu3 %vm1373_vm4, %v7540_v57  ;;  %v11560_v57 = vld [vmem:[%s12922_s14 + $0x84] sm:$0xf] }
0x15a0   : > { %v10953_v18 = vor.u32 %v11560_v57, %v10950_v40  ;;  %7659 = vmatpush.bf16.msra.mxu0 %v10949_v45  ;;  %v16364_v45 = vld [vmem:[#allocation124_spill] sm:$0xff] }
0x15a2   : > { %7673 = vmatpush.bf16.msrb.mxu2 %v10953_v18  ;;  %v16365_v18 = vperm.slane %v16355_v12, 3 }
0x15a4   : > { %7688 = vmatpush.msrb.mxu0 %v13077_v37 }
0x15a6   : > { %7711 = vmatpush.msra.mxu2 %v13157_v53  ;;  %7689 = vmatpush.msrb.mxu0 %v13072_v36 }
0x15a8   : > { %7712 = vmatpush.msra.mxu2 %v13152_v52  ;;  %7690 = vmatpush.msrb.mxu0 %v13067_v35 }
0x15aa   : > { %7713 = vmatpush.msra.mxu2 %v13147_v51  ;;  %7691 = vmatpush.msrb.mxu0 %v13062_v34 }
0x15ac   : > { %7714 = vmatpush.msra.mxu2 %v16311_v4  ;;  %7692 = vmatpush.msrb.mxu0 %v13057_v33 }
0x15ae   : > { %7715 = vmatpush.msra.mxu2 %v16312_v48  ;;  %7693 = vmatpush.msrb.mxu0 %v16225_v54 }
0x15af   : > { %7606 = vmatmul.f32.vlgmr.msrb.gmra.mxu1 %v16358_v10  ;;  %7629 = vmatmul.f32.vlgmr.msra.gmra.mxu3 %v7587_v49 }
0x15b0   : > { %7716 = vmatpush.msra.mxu2 %v16313_v46  ;;  %7694 = vmatpush.msrb.mxu0 %v16227_v14 }
0x15b2   : > { %7717 = vmatpush.msra.mxu2 %v16314_v50  ;;  %7695 = vmatpush.msrb.mxu0 %v16230_v3 }
0x15b4   : > { %7718 = vmatpush.msra.mxu2 %v16315_v8  ;;  %7696 = vmatpush.msrb.mxu0 %v16232_v55 }
0x15b6   : > { %7719 = vmatpush.msra.mxu2 %v16316_v42  ;;  %7697 = vmatpush.msrb.mxu0 %v16236_v21 }
0x15b7   : > { %7609 = vmatmul.f32.gmra.mxu1 %v7588_v6  ;;  %7632 = vmatmul.f32.gmra.mxu3 %v7589_v7  ;;  %v4062_v6 = vperm.slane %v15504_v32, 2  ;;  %v16362_v7 = vld [vmem:[#allocation84_spill] sm:$0xff] }
0x15b8   : > { %7720 = vmatpush.msra.mxu2 %v16317_v2  ;;  %7698 = vmatpush.msrb.mxu0 %v16307_v24 }
0x15b9   : > { %v6215_v17 = vadd.f32 %v16362_v7, %v4062_v6  ;;  %v11562_v7 = vld [vmem:[%s12922_s14 + $0x94] sm:$0xf] }
0x15ba   : > { %7721 = vmatpush.msra.mxu2 %v16318_v62  ;;  %7699 = vmatpush.msrb.mxu0 %v16308_v0 }
0x15bb   : > { %v6229_v57 = vadd.f32 %v16363_v61, %v6215_v17  ;;  %v10960_v61 = vld [vmem:[%s12922_s14 + $0x98] sm:$0xf0] }
0x15bc   : > { %7722 = vmatpush.msra.mxu2 %v16319_v19  ;;  %7700 = vmatpush.msrb.mxu0 %v16309_v38 }
0x15bd   : > { %v7684_v40 = vmul.f32 %v16364_v45, %v6229_v57  ;;  %v10963_v57 = vor.u32 %v11562_v7, %v10960_v61  ;;  %v16372_v7 = vld [vmem:[#allocation96_spill] sm:$0xff] }
0x15be   : > { %7723 = vmatpush.msra.mxu2 %v16320_v26  ;;  %7701 = vmatpush.msrb.mxu0 %v16310_v31 }
0x15bf   : > { %7771 = vmatpush.bf16.msrb.mxu3 %v10963_v57  ;;  %v16373_v57 = vperm.slane %v16355_v12, 4 }
0x15c0   : > { %7724 = vmatpush.msra.mxu2 %v16322_v63  ;;  %7702 = vmatpush.msrb.mxu0 %v16249_v11 }
0x15c2   : > { %7725 = vmatpush.msra.mxu2 %v16323_v47  ;;  %7703 = vmatpush.msrb.mxu0 %v16251_v28 }
0x15c3   : > { %7809 = vmatpush.msra.mxu3 %v13157_v53 }
0x15c4   : > { %7726 = vmatpush.msra.mxu2 %v16324_v39 }
0x15c5   : > { %7810 = vmatpush.msra.mxu3 %v13152_v52 }
0x15c7   : > { %7811 = vmatpush.msra.mxu3 %v13147_v51 }
0x15c9   : > { %7812 = vmatpush.msra.mxu3 %v16311_v4 }
0x15cb   : > { %7813 = vmatpush.msra.mxu3 %v16312_v48 }
0x15cd   : > { %7814 = vmatpush.msra.mxu3 %v16313_v46 }
0x15cf   : > { %7815 = vmatpush.msra.mxu3 %v16314_v50 }
0x15d1   : > { %7816 = vmatpush.msra.mxu3 %v16315_v8 }
0x15d3   : > { %7817 = vmatpush.msra.mxu3 %v16316_v42 }
0x15d5   : > { %7818 = vmatpush.msra.mxu3 %v16317_v2 }
0x15d7   : > { %7819 = vmatpush.msra.mxu3 %v16318_v62 }
0x15d9   : > { %7820 = vmatpush.msra.mxu3 %v16319_v19 }
0x15db   : > { %7821 = vmatpush.msra.mxu3 %v16320_v26 }
0x15dd   : > { %7822 = vmatpush.msra.mxu3 %v16322_v63 }
0x15df   : > { %7823 = vmatpush.msra.mxu3 %v16323_v47 }
0x15e1   : > { %7824 = vmatpush.msra.mxu3 %v16324_v39 }
0x161c   : > { %v7563_v9 = vpop.f32.mrf.mxu1 }
0x161d   : > { %v15537_v5 = vadd.f32 %v7563_v9, %v15469_v56  ;;  %v16366_v9 = vld [vmem:[#allocation93_spill] sm:$0xff] }
0x1622   : > { %v7577_v49 = vpop.f32.mrf.mxu3 }
0x1623   : > { %v15546_v15 = vadd.f32 %v7577_v49, %v15478_v59  ;;  %v6245_v49 = vadd.f32 %v16366_v9, %v16365_v18 }
0x1624   : > { %v7565_v56 = vpop.f32.mrf.mxu1 }
0x1625   : > { %v15551_v43 = vadd.f32 %v7565_v56, %v15483_v30  ;;  %v16367_v56 = vld [vmem:[#allocation135_spill] sm:$0xff] }
0x162a   : > { %v7579_v59 = vpop.f32.mrf.mxu3 }
0x162b   : > { %v15560_v44 = vadd.f32 %v7579_v59, %v15492_v29  ;;  %v16368_v59 = vld [vmem:[#allocation87_spill] sm:$0xff] }
0x162c   : > { %v7607_v30 = vpop.f32.mrf.mxu1 }
0x1632   : > { %v7630_v10 = vpop.f32.mrf.mxu3 }
0x1633   : > { %v7631_v23 = vadd.f32 %v7630_v10, %v7607_v30  ;;  %v6217_v30 = vadd.f32 %v16368_v59, %v4062_v6  ;;  %v16369_v10 = vld [vmem:[#allocation47_spill] sm:$0xff] }
0x1634   : > { %v7610_v41 = vpop.f32.mrf.mxu1 }
0x1635   : > { %v7636_v16 = vmul.f32 %v7631_v23, %v15095_v1  ;;  %v6231_v23 = vadd.f32 %v16369_v10, %v6217_v30 }
0x163a   : > { %v7633_v20 = vpop.f32.mrf.mxu3 }
0x163b   : > { %v7634_v25 = vadd.f32 %v7633_v20, %v7610_v41  ;;  %v16370_v41 = vld [vmem:[#allocation44_spill] sm:$0xff] }
0x163c   : > { %v6259_v20 = vadd.f32 %v16370_v41, %v6245_v49 }
0x163d   : > { %v7637_v29 = vmul.f32 %v7634_v25, %v15097_v58  ;;  %v7686_v25 = vmul.f32 %v16339_v27, %v6231_v23 }
0x163f   : > { %v7638_v13 = vpack.c.bf16 %v7637_v29, %v7636_v16  ;;  %v7687_v16 = vmul.f32 %v15047_v22, %v6259_v20  ;;  %v10958_v29 = vld [vmem:[%s12922_s14 + $0x90] sm:$0xf] }
0x1641   : > { %10954 = vmatmul.msk.bf16.vlgmr.msra.gmra.mxu0 %vm1373_vm4, %v7638_v13  ;;  %10955 = vmatmul.msk.bf16.vlgmr.msrb.gmra.mxu2 %vm1373_vm4, %v7638_v13  ;;  %v11563_v13 = vld [vmem:[%s12922_s14 + $0x94] sm:$0xf0] }
0x1642   : > { %v10959_v17 = vor.u32 %v11563_v13, %v10958_v29  ;;  %v16371_v29 = vld [vmem:[#allocation39_spill] sm:$0xff] }
0x1644   : > { %7757 = vmatpush.bf16.msra.mxu1 %v10959_v17 }
0x1648   : > { %7786 = vmatpush.msrb.mxu1 %v13077_v37 }
0x164a   : > { %7787 = vmatpush.msrb.mxu1 %v13072_v36 }
0x164c   : > { %7788 = vmatpush.msrb.mxu1 %v13067_v35 }
0x164e   : > { %7789 = vmatpush.msrb.mxu1 %v13062_v34 }
0x1650   : > { %7790 = vmatpush.msrb.mxu1 %v13057_v33 }
0x1651   : > { %7704 = vmatmul.f32.vlgmr.msrb.gmra.mxu0 %v7684_v40  ;;  %7727 = vmatmul.f32.vlgmr.msra.gmra.mxu2 %v16367_v56 }
0x1652   : > { %7791 = vmatpush.msrb.mxu1 %v16225_v54 }
0x1654   : > { %7792 = vmatpush.msrb.mxu1 %v16227_v14 }
0x1656   : > { %7793 = vmatpush.msrb.mxu1 %v16230_v3 }
0x1658   : > { %7794 = vmatpush.msrb.mxu1 %v16232_v55 }
0x1659   : > { %7707 = vmatmul.f32.gmra.mxu0 %v7686_v25  ;;  %7730 = vmatmul.f32.gmra.mxu2 %v7687_v16  ;;  %v4065_v16 = vperm.slane %v15504_v32, 5 }
0x165a   : > { %7795 = vmatpush.msrb.mxu1 %v16236_v21 }
0x165b   : > { %v6299_v13 = vadd.f32 %v16371_v29, %v4065_v16  ;;  %v11564_v29 = vld [vmem:[%s12922_s14 + $0xa4] sm:$0xf] }
0x165c   : > { %7796 = vmatpush.msrb.mxu1 %v16307_v24 }
0x165d   : > { %v6313_v17 = vadd.f32 %v16372_v7, %v6299_v13  ;;  %v10970_v7 = vld [vmem:[%s12922_s14 + $0xa8] sm:$0xf0] }
0x165e   : > { %7797 = vmatpush.msrb.mxu1 %v16308_v0 }
0x165f   : > { %v7783_v61 = vmul.f32 %v16354_v60, %v6313_v17  ;;  %v10973_v17 = vor.u32 %v11564_v29, %v10970_v7  ;;  %v16380_v29 = vld [vmem:[#allocation95_spill] sm:$0xff] }
0x1660   : > { %7798 = vmatpush.msrb.mxu1 %v16309_v38 }
0x1661   : > { %7869 = vmatpush.bf16.msrb.mxu2 %v10973_v17  ;;  %v16381_v17 = vperm.slane %v16355_v12, 7  ;;  %v11566_v12 = vld [vmem:[%s12922_s14 + $0xb4] sm:$0xf] }
0x1662   : > { %7799 = vmatpush.msrb.mxu1 %v16310_v31 }
0x1664   : > { %7800 = vmatpush.msrb.mxu1 %v16249_v11 }
0x1665   : > { %7907 = vmatpush.msra.mxu2 %v13157_v53 }
0x1666   : > { %7801 = vmatpush.msrb.mxu1 %v16251_v28 }
0x1667   : > { %7908 = vmatpush.msra.mxu2 %v13152_v52 }
0x1669   : > { %7909 = vmatpush.msra.mxu2 %v13147_v51 }
0x166b   : > { %7910 = vmatpush.msra.mxu2 %v16311_v4 }
0x166d   : > { %7911 = vmatpush.msra.mxu2 %v16312_v48 }
0x166f   : > { %7912 = vmatpush.msra.mxu2 %v16313_v46 }
0x1671   : > { %7913 = vmatpush.msra.mxu2 %v16314_v50 }
0x1673   : > { %7914 = vmatpush.msra.mxu2 %v16315_v8 }
0x1675   : > { %7915 = vmatpush.msra.mxu2 %v16316_v42 }
0x1677   : > { %7916 = vmatpush.msra.mxu2 %v16317_v2 }
0x1679   : > { %7917 = vmatpush.msra.mxu2 %v16318_v62 }
0x167b   : > { %7918 = vmatpush.msra.mxu2 %v16319_v19 }
0x167d   : > { %7919 = vmatpush.msra.mxu2 %v16320_v26 }
0x167f   : > { %7920 = vmatpush.msra.mxu2 %v16322_v63 }
0x1681   : > { %7921 = vmatpush.msra.mxu2 %v16323_v47 }
0x1683   : > { %7922 = vmatpush.msra.mxu2 %v16324_v39 }
0x16be   : > { %v7661_v6 = vpop.f32.mrf.mxu0 }
0x16bf   : > { %v15602_v40 = vadd.f32 %v7661_v6, %v15537_v5  ;;  %v16374_v6 = vld [vmem:[#allocation38_spill] sm:$0xff] }
0x16c4   : > { %v7675_v18 = vpop.f32.mrf.mxu2 }
0x16c5   : > { %v15611_v9 = vadd.f32 %v7675_v18, %v15546_v15  ;;  %v6273_v18 = vadd.f32 %v16374_v6, %v16373_v57 }
0x16c6   : > { %v7663_v5 = vpop.f32.mrf.mxu0 }
0x16c7   : > { %v15616_v49 = vadd.f32 %v7663_v5, %v15551_v43  ;;  %v16375_v5 = vld [vmem:[#allocation128_spill] sm:$0xff] }
0x16cc   : > { %v7677_v15 = vpop.f32.mrf.mxu2 }
0x16cd   : > { %v15625_v56 = vadd.f32 %v7677_v15, %v15560_v44  ;;  %v16376_v15 = vld [vmem:[#allocation94_spill] sm:$0xff] }
0x16ce   : > { %v7705_v43 = vpop.f32.mrf.mxu0 }
0x16d4   : > { %v7728_v59 = vpop.f32.mrf.mxu2 }
0x16d5   : > { %v7729_v30 = vadd.f32 %v7728_v59, %v7705_v43  ;;  %v6301_v43 = vadd.f32 %v16376_v15, %v4065_v16  ;;  %v16377_v59 = vld [vmem:[#allocation46_spill] sm:$0xff] }
0x16d6   : > { %v7708_v10 = vpop.f32.mrf.mxu0 }
0x16d7   : > { %v7734_v20 = vmul.f32 %v7729_v30, %v15095_v1  ;;  %v6287_v30 = vadd.f32 %v16377_v59, %v6273_v18 }
0x16dc   : > { %v7731_v23 = vpop.f32.mrf.mxu2 }
0x16dd   : > { %v7732_v41 = vadd.f32 %v7731_v23, %v7708_v10  ;;  %v16378_v10 = vld [vmem:[#allocation100_spill] sm:$0xff] }
0x16de   : > { %v6315_v23 = vadd.f32 %v16378_v10, %v6301_v43 }
0x16df   : > { %v7735_v44 = vmul.f32 %v7732_v41, %v15097_v58  ;;  %v7784_v41 = vmul.f32 %v16339_v27, %v6287_v30 }
0x16e1   : > { %v7736_v25 = vpack.c.bf16 %v7735_v44, %v7734_v20  ;;  %v7785_v20 = vmul.f32 %v15047_v22, %v6315_v23  ;;  %v10968_v44 = vld [vmem:[%s12922_s14 + $0xa0] sm:$0xf] }
0x16e3   : > { %10964 = vmatmul.msk.bf16.vlgmr.msra.gmra.mxu1 %vm1373_vm4, %v7736_v25  ;;  %10965 = vmatmul.msk.bf16.vlgmr.msrb.gmra.mxu3 %vm1373_vm4, %v7736_v25  ;;  %v11565_v25 = vld [vmem:[%s12922_s14 + $0xa4] sm:$0xf0] }
0x16e4   : > { %v10969_v13 = vor.u32 %v11565_v25, %v10968_v44  ;;  %v16379_v44 = vld [vmem:[#allocation91_spill] sm:$0xff] }
0x16e6   : > { %7855 = vmatpush.bf16.msra.mxu0 %v10969_v13 }
0x16ea   : > { %7884 = vmatpush.msrb.mxu0 %v13077_v37 }
0x16ec   : > { %7885 = vmatpush.msrb.mxu0 %v13072_v36 }
0x16ee   : > { %7886 = vmatpush.msrb.mxu0 %v13067_v35 }
0x16f0   : > { %7887 = vmatpush.msrb.mxu0 %v13062_v34 }
0x16f2   : > { %7888 = vmatpush.msrb.mxu0 %v13057_v33 }
0x16f3   : > { %7802 = vmatmul.f32.vlgmr.msrb.gmra.mxu1 %v16375_v5  ;;  %7825 = vmatmul.f32.vlgmr.msra.gmra.mxu3 %v7783_v61 }
0x16f4   : > { %7889 = vmatpush.msrb.mxu0 %v16225_v54 }
0x16f6   : > { %7890 = vmatpush.msrb.mxu0 %v16227_v14 }
0x16f8   : > { %7891 = vmatpush.msrb.mxu0 %v16230_v3 }
0x16fa   : > { %7892 = vmatpush.msrb.mxu0 %v16232_v55 }
0x16fb   : > { %7805 = vmatmul.f32.gmra.mxu1 %v7784_v41  ;;  %7828 = vmatmul.f32.gmra.mxu3 %v7785_v20  ;;  %v4066_v20 = vperm.slane %v15504_v32, 6  ;;  %v16386_v32 = vld [vmem:[#allocation101_spill] sm:$0xff] }
0x16fc   : > { %7893 = vmatpush.msrb.mxu0 %v16236_v21 }
0x16fd   : > { %v6327_v25 = vadd.f32 %v16379_v44, %v4066_v20  ;;  %v10980_v44 = vld [vmem:[%s12922_s14 + $0xb8] sm:$0xf0] }
0x16fe   : > { %7894 = vmatpush.msrb.mxu0 %v16307_v24 }
0x16ff   : > { %v6341_v13 = vadd.f32 %v16380_v29, %v6327_v25  ;;  %v10983_v25 = vor.u32 %v11566_v12, %v10980_v44  ;;  %v16389_v44 = vld [vmem:[#allocation99_spill] sm:$0xff] }
0x1700   : > { %7895 = vmatpush.msrb.mxu0 %v16308_v0 }
0x1701   : > { %v7880_v7 = vmul.f32 %v16364_v45, %v6341_v13  ;;  %7967 = vmatpush.bf16.msrb.mxu3 %v10983_v25  ;;  %v16390_v25 = vperm.slane %v16389_v44, 0 }
0x1702   : > { %7896 = vmatpush.msrb.mxu0 %v16309_v38 }
0x1704   : > { %7897 = vmatpush.msrb.mxu0 %v16310_v31 }
0x1705   : > { %8005 = vmatpush.msra.mxu3 %v13157_v53 }
0x1706   : > { %7898 = vmatpush.msrb.mxu0 %v16249_v11 }
0x1707   : > { %8006 = vmatpush.msra.mxu3 %v13152_v52 }
0x1708   : > { %7899 = vmatpush.msrb.mxu0 %v16251_v28 }
0x1709   : > { %8007 = vmatpush.msra.mxu3 %v13147_v51 }
0x170b   : > { %8008 = vmatpush.msra.mxu3 %v16311_v4 }
0x170d   : > { %8009 = vmatpush.msra.mxu3 %v16312_v48 }
0x170f   : > { %8010 = vmatpush.msra.mxu3 %v16313_v46 }
0x1711   : > { %8011 = vmatpush.msra.mxu3 %v16314_v50 }
0x1713   : > { %8012 = vmatpush.msra.mxu3 %v16315_v8 }
0x1715   : > { %8013 = vmatpush.msra.mxu3 %v16316_v42 }
0x1717   : > { %8014 = vmatpush.msra.mxu3 %v16317_v2 }
0x1719   : > { %8015 = vmatpush.msra.mxu3 %v16318_v62 }
0x171b   : > { %8016 = vmatpush.msra.mxu3 %v16319_v19 }
0x171d   : > { %8017 = vmatpush.msra.mxu3 %v16320_v26 }
0x171f   : > { %8018 = vmatpush.msra.mxu3 %v16322_v63 }
0x1721   : > { %8019 = vmatpush.msra.mxu3 %v16323_v47 }
0x1723   : > { %8020 = vmatpush.msra.mxu3 %v16324_v39 }
0x1760   : > { %v7759_v16 = vpop.f32.mrf.mxu1 }
0x1761   : > { %v15667_v61 = vadd.f32 %v7759_v16, %v15602_v40  ;;  %v16382_v16 = vld [vmem:[#allocation106_spill] sm:$0xff] }
0x1766   : > { %v7773_v57 = vpop.f32.mrf.mxu3 }
0x1767   : > { %v15676_v6 = vadd.f32 %v7773_v57, %v15611_v9  ;;  %v6357_v57 = vadd.f32 %v16382_v16, %v16381_v17 }
0x1768   : > { %v7761_v40 = vpop.f32.mrf.mxu1 }
0x1769   : > { %v15681_v18 = vadd.f32 %v7761_v40, %v15616_v49  ;;  %v16383_v40 = vld [vmem:[#allocation136_spill] sm:$0xff] }
0x176e   : > { %v7775_v9 = vpop.f32.mrf.mxu3 }
0x176f   : > { %v15690_v5 = vadd.f32 %v7775_v9, %v15625_v56  ;;  %v16384_v9 = vld [vmem:[#allocation92_spill] sm:$0xff] }
0x1770   : > { %v7803_v49 = vpop.f32.mrf.mxu1 }
0x1776   : > { %v7826_v15 = vpop.f32.mrf.mxu3 }
0x1777   : > { %v7827_v43 = vadd.f32 %v7826_v15, %v7803_v49  ;;  %v6329_v49 = vadd.f32 %v16384_v9, %v4066_v20  ;;  %v16385_v15 = vld [vmem:[#allocation97_spill] sm:$0xff] }
0x1778   : > { %v7806_v59 = vpop.f32.mrf.mxu1 }
0x1779   : > { %v7832_v23 = vmul.f32 %v7827_v43, %v15095_v1  ;;  %v6343_v43 = vadd.f32 %v16385_v15, %v6329_v49 }
0x177e   : > { %v7829_v30 = vpop.f32.mrf.mxu3 }
0x177f   : > { %v7830_v10 = vadd.f32 %v7829_v30, %v7806_v59  ;;  %v6371_v59 = vadd.f32 %v16386_v32, %v6357_v57  ;;  %v7882_v30 = vmul.f32 %v16339_v27, %v6343_v43 }
0x1781   : > { %v7833_v56 = vmul.f32 %v7830_v10, %v15097_v58  ;;  %v7883_v10 = vmul.f32 %v15047_v22, %v6371_v59  ;;  %v15767_v59 = vld [vmem:[%s12874_s2 + $0x18] sm:$0xff] }
0x1783   : > { %v7834_v41 = vpack.c.bf16 %v7833_v56, %v7832_v23  ;;  %v10978_v23 = vld [vmem:[%s12922_s14 + $0xb0] sm:$0xf]  ;;  %v11567_v56 = vld [vmem:[%s12922_s14 + $0xb4] sm:$0xf0] }
0x1785   : > { %10974 = vmatmul.msk.bf16.vlgmr.msra.gmra.mxu0 %vm1373_vm4, %v7834_v41  ;;  %10975 = vmatmul.msk.bf16.vlgmr.msrb.gmra.mxu2 %vm1373_vm4, %v7834_v41  ;;  %v10979_v41 = vor.u32 %v11567_v56, %v10978_v23  ;;  %v16388_v56 = vld [vmem:[#allocation109_spill] sm:$0xff] }
0x1787   : > { %7953 = vmatpush.bf16.msra.mxu1 %v10979_v41 }
0x178b   : > { %7982 = vmatpush.msrb.mxu1 %v13077_v37 }
0x178d   : > { %7983 = vmatpush.msrb.mxu1 %v13072_v36 }
0x178f   : > { %7984 = vmatpush.msrb.mxu1 %v13067_v35 }
0x1791   : > { %7985 = vmatpush.msrb.mxu1 %v13062_v34 }
0x1793   : > { %7986 = vmatpush.msrb.mxu1 %v13057_v33 }
0x1795   : > { %7900 = vmatmul.f32.vlgmr.msrb.gmra.mxu0 %v7880_v7  ;;  %7923 = vmatmul.f32.vlgmr.msra.gmra.mxu2 %v16383_v40 }
0x1796   : > { %7987 = vmatpush.msrb.mxu1 %v16225_v54 }
0x1798   : > { %7988 = vmatpush.msrb.mxu1 %v16227_v14 }
0x179a   : > { %7989 = vmatpush.msrb.mxu1 %v16230_v3 }
0x179c   : > { %7990 = vmatpush.msrb.mxu1 %v16232_v55 }
0x179d   : > { %7903 = vmatmul.f32.gmra.mxu0 %v7882_v30  ;;  %7926 = vmatmul.f32.gmra.mxu2 %v7883_v10  ;;  %v4069_v30 = vperm.slane %v15767_v59, 1  ;;  %v16387_v10 = vld [vmem:[#allocation103_spill] sm:$0xff] }
0x179e   : > { %7991 = vmatpush.msrb.mxu1 %v16236_v21 }
0x179f   : > { %v6411_v23 = vadd.f32 %v16387_v10, %v4069_v30  ;;  %v11568_v10 = vld [vmem:[%s12922_s14 + $0xc4] sm:$0xf] }
0x17a0   : > { %7992 = vmatpush.msrb.mxu1 %v16307_v24 }
0x17a1   : > { %v6425_v12 = vadd.f32 %v16388_v56, %v6411_v23  ;;  %v10990_v56 = vld [vmem:[%s12922_s14 + $0xc8] sm:$0xf0] }
0x17a2   : > { %7993 = vmatpush.msrb.mxu1 %v16308_v0 }
0x17a3   : > { %v7979_v41 = vmul.f32 %v16354_v60, %v6425_v12  ;;  %v10993_v12 = vor.u32 %v11568_v10, %v10990_v56  ;;  %v16397_v10 = vld [vmem:[#allocation108_spill] sm:$0xff] }
0x17a4   : > { %7994 = vmatpush.msrb.mxu1 %v16309_v38 }
0x17a5   : > { %8065 = vmatpush.bf16.msrb.mxu2 %v10993_v12  ;;  %v16398_v12 = vperm.slane %v16389_v44, 3 }
0x17a6   : > { %7995 = vmatpush.msrb.mxu1 %v16310_v31 }
0x17a8   : > { %7996 = vmatpush.msrb.mxu1 %v16249_v11 }
0x17a9   : > { %8103 = vmatpush.msra.mxu2 %v13157_v53 }
0x17aa   : > { %7997 = vmatpush.msrb.mxu1 %v16251_v28 }
0x17ab   : > { %8104 = vmatpush.msra.mxu2 %v13152_v52 }
0x17ad   : > { %8105 = vmatpush.msra.mxu2 %v13147_v51 }
0x17af   : > { %8106 = vmatpush.msra.mxu2 %v16311_v4 }
0x17b1   : > { %8107 = vmatpush.msra.mxu2 %v16312_v48 }
0x17b3   : > { %8108 = vmatpush.msra.mxu2 %v16313_v46 }
0x17b5   : > { %8109 = vmatpush.msra.mxu2 %v16314_v50 }
0x17b7   : > { %8110 = vmatpush.msra.mxu2 %v16315_v8 }
0x17b9   : > { %8111 = vmatpush.msra.mxu2 %v16316_v42 }
0x17bb   : > { %8112 = vmatpush.msra.mxu2 %v16317_v2 }
0x17bd   : > { %8113 = vmatpush.msra.mxu2 %v16318_v62 }
0x17bf   : > { %8114 = vmatpush.msra.mxu2 %v16319_v19 }
0x17c1   : > { %8115 = vmatpush.msra.mxu2 %v16320_v26 }
0x17c3   : > { %8116 = vmatpush.msra.mxu2 %v16322_v63 }
0x17c5   : > { %8117 = vmatpush.msra.mxu2 %v16323_v47 }
0x17c7   : > { %8118 = vmatpush.msra.mxu2 %v16324_v39 }
0x1802   : > { %v7857_v20 = vpop.f32.mrf.mxu0 }
0x1803   : > { %v15732_v29 = vadd.f32 %v7857_v20, %v15667_v61  ;;  %v16391_v20 = vld [vmem:[#allocation104_spill] sm:$0xff] }
0x1808   : > { %v7871_v13 = vpop.f32.mrf.mxu2 }
0x1809   : > { %v15741_v7 = vadd.f32 %v7871_v13, %v15676_v6  ;;  %v6385_v13 = vadd.f32 %v16391_v20, %v16390_v25 }
0x180a   : > { %v7859_v61 = vpop.f32.mrf.mxu0 }
0x180b   : > { %v15746_v17 = vadd.f32 %v7859_v61, %v15681_v18  ;;  %v16392_v61 = vld [vmem:[#allocation129_spill] sm:$0xff] }
0x1810   : > { %v7873_v6 = vpop.f32.mrf.mxu2 }
0x1811   : > { %v15755_v16 = vadd.f32 %v7873_v6, %v15690_v5  ;;  %v16393_v6 = vld [vmem:[#allocation107_spill] sm:$0xff] }
0x1812   : > { %v7901_v18 = vpop.f32.mrf.mxu0 }
0x1818   : > { %v7924_v57 = vpop.f32.mrf.mxu2 }
0x1819   : > { %v7925_v40 = vadd.f32 %v7924_v57, %v7901_v18  ;;  %v6413_v18 = vadd.f32 %v16393_v6, %v4069_v30  ;;  %v16394_v57 = vld [vmem:[#allocation98_spill] sm:$0xff] }
0x181a   : > { %v7904_v9 = vpop.f32.mrf.mxu0 }
0x181b   : > { %v7930_v5 = vmul.f32 %v7925_v40, %v15095_v1  ;;  %v6399_v40 = vadd.f32 %v16394_v57, %v6385_v13 }
0x1820   : > { %v7927_v49 = vpop.f32.mrf.mxu2 }
0x1821   : > { %v7928_v15 = vadd.f32 %v7927_v49, %v7904_v9  ;;  %v16395_v9 = vld [vmem:[#allocation112_spill] sm:$0xff] }
0x1822   : > { %v6427_v49 = vadd.f32 %v16395_v9, %v6413_v18 }
0x1823   : > { %v7931_v43 = vmul.f32 %v7928_v15, %v15097_v58  ;;  %v7980_v15 = vmul.f32 %v16339_v27, %v6399_v40 }
0x1825   : > { %v7932_v32 = vpack.c.bf16 %v7931_v43, %v7930_v5  ;;  %v7981_v5 = vmul.f32 %v15047_v22, %v6427_v49  ;;  %v10988_v43 = vld [vmem:[%s12922_s14 + $0xc0] sm:$0xf] }
0x1827   : > { %10984 = vmatmul.msk.bf16.vlgmr.msra.gmra.mxu1 %vm1373_vm4, %v7932_v32  ;;  %10985 = vmatmul.msk.bf16.vlgmr.msrb.gmra.mxu3 %vm1373_vm4, %v7932_v32  ;;  %v11569_v32 = vld [vmem:[%s12922_s14 + $0xc4] sm:$0xf0] }
0x1828   : > { %v10989_v23 = vor.u32 %v11569_v32, %v10988_v43  ;;  %v16396_v43 = vld [vmem:[#allocation102_spill] sm:$0xff] }
0x182a   : > { %8051 = vmatpush.bf16.msra.mxu0 %v10989_v23 }
0x182e   : > { %8080 = vmatpush.msrb.mxu0 %v13077_v37 }
0x1830   : > { %8081 = vmatpush.msrb.mxu0 %v13072_v36 }
0x1832   : > { %8082 = vmatpush.msrb.mxu0 %v13067_v35 }
0x1834   : > { %8083 = vmatpush.msrb.mxu0 %v13062_v34 }
0x1836   : > { %8084 = vmatpush.msrb.mxu0 %v13057_v33 }
0x1837   : > { %7998 = vmatmul.f32.vlgmr.msrb.gmra.mxu1 %v16392_v61  ;;  %8021 = vmatmul.f32.vlgmr.msra.gmra.mxu3 %v7979_v41 }
0x1838   : > { %8085 = vmatpush.msrb.mxu0 %v16225_v54 }
0x183a   : > { %8086 = vmatpush.msrb.mxu0 %v16227_v14 }
0x183c   : > { %8087 = vmatpush.msrb.mxu0 %v16230_v3 }
0x183e   : > { %8088 = vmatpush.msrb.mxu0 %v16232_v55 }
0x183f   : > { %8001 = vmatmul.f32.gmra.mxu1 %v7980_v15  ;;  %8024 = vmatmul.f32.gmra.mxu3 %v7981_v5  ;;  %v4070_v5 = vperm.slane %v15767_v59, 2 }
0x1840   : > { %8089 = vmatpush.msrb.mxu0 %v16236_v21 }
0x1841   : > { %v6439_v32 = vadd.f32 %v16396_v43, %v4070_v5  ;;  %v11570_v43 = vld [vmem:[%s12922_s14 + $0xd4] sm:$0xf] }
0x1842   : > { %8090 = vmatpush.msrb.mxu0 %v16307_v24 }
0x1843   : > { %v6453_v23 = vadd.f32 %v16397_v10, %v6439_v32  ;;  %v11000_v10 = vld [vmem:[%s12922_s14 + $0xd8] sm:$0xf0] }
0x1844   : > { %8091 = vmatpush.msrb.mxu0 %v16308_v0 }
0x1845   : > { %v8076_v56 = vmul.f32 %v16364_v45, %v6453_v23  ;;  %v11003_v23 = vor.u32 %v11570_v43, %v11000_v10  ;;  %v16405_v43 = vld [vmem:[#allocation121_spill] sm:$0xff] }
0x1846   : > { %8092 = vmatpush.msrb.mxu0 %v16309_v38 }
0x1847   : > { %8163 = vmatpush.bf16.msrb.mxu3 %v11003_v23  ;;  %v16406_v23 = vperm.slane %v16389_v44, 4 }
0x1848   : > { %8093 = vmatpush.msrb.mxu0 %v16310_v31 }
0x184a   : > { %8094 = vmatpush.msrb.mxu0 %v16249_v11 }
0x184b   : > { %8201 = vmatpush.msra.mxu3 %v13157_v53 }
0x184c   : > { %8095 = vmatpush.msrb.mxu0 %v16251_v28 }
0x184d   : > { %8202 = vmatpush.msra.mxu3 %v13152_v52 }
0x184f   : > { %8203 = vmatpush.msra.mxu3 %v13147_v51 }
0x1851   : > { %8204 = vmatpush.msra.mxu3 %v16311_v4 }
0x1853   : > { %8205 = vmatpush.msra.mxu3 %v16312_v48 }
0x1855   : > { %8206 = vmatpush.msra.mxu3 %v16313_v46 }
0x1857   : > { %8207 = vmatpush.msra.mxu3 %v16314_v50 }
0x1859   : > { %8208 = vmatpush.msra.mxu3 %v16315_v8 }
0x185b   : > { %8209 = vmatpush.msra.mxu3 %v16316_v42 }
0x185d   : > { %8210 = vmatpush.msra.mxu3 %v16317_v2 }
0x185f   : > { %8211 = vmatpush.msra.mxu3 %v16318_v62 }
0x1861   : > { %8212 = vmatpush.msra.mxu3 %v16319_v19 }
0x1863   : > { %8213 = vmatpush.msra.mxu3 %v16320_v26 }
0x1865   : > { %8214 = vmatpush.msra.mxu3 %v16322_v63 }
0x1867   : > { %8215 = vmatpush.msra.mxu3 %v16323_v47 }
0x1869   : > { %8216 = vmatpush.msra.mxu3 %v16324_v39 }
0x18a4   : > { %v7955_v30 = vpop.f32.mrf.mxu1 }
0x18a5   : > { %v15800_v41 = vadd.f32 %v7955_v30, %v15732_v29  ;;  %v16399_v30 = vld [vmem:[#allocation117_spill] sm:$0xff] }
0x18aa   : > { %v7969_v25 = vpop.f32.mrf.mxu3 }
0x18ab   : > { %v15809_v20 = vadd.f32 %v7969_v25, %v15741_v7  ;;  %v6469_v25 = vadd.f32 %v16399_v30, %v16398_v12 }
0x18ac   : > { %v7957_v29 = vpop.f32.mrf.mxu1 }
0x18ad   : > { %v15814_v13 = vadd.f32 %v7957_v29, %v15746_v17  ;;  %v16400_v29 = vld [vmem:[#allocation137_spill] sm:$0xff] }
0x18b2   : > { %v7971_v7 = vpop.f32.mrf.mxu3 }
0x18b3   : > { %v15823_v61 = vadd.f32 %v7971_v7, %v15755_v16  ;;  %v16401_v7 = vld [vmem:[#allocation105_spill] sm:$0xff] }
0x18b4   : > { %v7999_v17 = vpop.f32.mrf.mxu1 }
0x18ba   : > { %v8022_v6 = vpop.f32.mrf.mxu3 }
0x18bb   : > { %v8023_v18 = vadd.f32 %v8022_v6, %v7999_v17  ;;  %v6441_v17 = vadd.f32 %v16401_v7, %v4070_v5  ;;  %v16402_v6 = vld [vmem:[#allocation110_spill] sm:$0xff] }
0x18bc   : > { %v8002_v57 = vpop.f32.mrf.mxu1 }
0x18bd   : > { %v8028_v49 = vmul.f32 %v8023_v18, %v15095_v1  ;;  %v6455_v18 = vadd.f32 %v16402_v6, %v6441_v17 }
0x18c2   : > { %v8025_v40 = vpop.f32.mrf.mxu3 }
0x18c3   : > { %v8026_v9 = vadd.f32 %v8025_v40, %v8002_v57  ;;  %v16403_v57 = vld [vmem:[#allocation113_spill] sm:$0xff] }
0x18c4   : > { %v6483_v40 = vadd.f32 %v16403_v57, %v6469_v25 }
0x18c5   : > { %v8029_v16 = vmul.f32 %v8026_v9, %v15097_v58  ;;  %v8078_v9 = vmul.f32 %v16339_v27, %v6455_v18 }
0x18c7   : > { %v8030_v15 = vpack.c.bf16 %v8029_v16, %v8028_v49  ;;  %v8079_v49 = vmul.f32 %v15047_v22, %v6483_v40  ;;  %v10998_v16 = vld [vmem:[%s12922_s14 + $0xd0] sm:$0xf] }
0x18c9   : > { %10994 = vmatmul.msk.bf16.vlgmr.msra.gmra.mxu0 %vm1373_vm4, %v8030_v15  ;;  %10995 = vmatmul.msk.bf16.vlgmr.msrb.gmra.mxu2 %vm1373_vm4, %v8030_v15  ;;  %v11571_v15 = vld [vmem:[%s12922_s14 + $0xd4] sm:$0xf0] }
0x18ca   : > { %v10999_v32 = vor.u32 %v11571_v15, %v10998_v16  ;;  %v16404_v16 = vld [vmem:[#allocation115_spill] sm:$0xff] }
0x18cc   : > { %8149 = vmatpush.bf16.msra.mxu1 %v10999_v32 }
0x18d0   : > { %8178 = vmatpush.msrb.mxu1 %v13077_v37 }
0x18d2   : > { %8179 = vmatpush.msrb.mxu1 %v13072_v36 }
0x18d4   : > { %8180 = vmatpush.msrb.mxu1 %v13067_v35 }
0x18d6   : > { %8181 = vmatpush.msrb.mxu1 %v13062_v34 }
0x18d8   : > { %8182 = vmatpush.msrb.mxu1 %v13057_v33 }
0x18d9   : > { %8096 = vmatmul.f32.vlgmr.msrb.gmra.mxu0 %v8076_v56  ;;  %8119 = vmatmul.f32.vlgmr.msra.gmra.mxu2 %v16400_v29 }
0x18da   : > { %8183 = vmatpush.msrb.mxu1 %v16225_v54 }
0x18dc   : > { %8184 = vmatpush.msrb.mxu1 %v16227_v14 }
0x18de   : > { %8185 = vmatpush.msrb.mxu1 %v16230_v3 }
0x18e0   : > { %8186 = vmatpush.msrb.mxu1 %v16232_v55 }
0x18e1   : > { %8099 = vmatmul.f32.gmra.mxu0 %v8078_v9  ;;  %8122 = vmatmul.f32.gmra.mxu2 %v8079_v49  ;;  %v4073_v49 = vperm.slane %v15767_v59, 5 }
0x18e2   : > { %8187 = vmatpush.msrb.mxu1 %v16236_v21 }
0x18e3   : > { %v6523_v15 = vadd.f32 %v16404_v16, %v4073_v49 }
0x18e4   : > { %8188 = vmatpush.msrb.mxu1 %v16307_v24 }
0x18e5   : > { %v6537_v32 = vadd.f32 %v16405_v43, %v6523_v15  ;;  %v11010_v15 = vld [vmem:[%s12922_s14 + $0xe8] sm:$0xf0] }
0x18e6   : > { %8189 = vmatpush.msrb.mxu1 %v16308_v0 }
0x18e7   : > { %v8175_v10 = vmul.f32 %v16354_v60, %v6537_v32  ;;  %v11008_v60 = vld [vmem:[%s12922_s14 + $0xe0] sm:$0xf] }
0x18e8   : > { %8190 = vmatpush.msrb.mxu1 %v16309_v38 }
0x18ea   : > { %8191 = vmatpush.msrb.mxu1 %v16310_v31 }
0x18ec   : > { %8192 = vmatpush.msrb.mxu1 %v16249_v11 }
0x18ee   : > { %8193 = vmatpush.msrb.mxu1 %v16251_v28 }
0x1946   : > { %v8053_v5 = vpop.f32.mrf.mxu0 }
0x1947   : > { %v15865_v56 = vadd.f32 %v8053_v5, %v15800_v41  ;;  %v16407_v5 = vld [vmem:[#allocation116_spill] sm:$0xff] }
0x194c   : > { %v8067_v12 = vpop.f32.mrf.mxu2 }
0x194d   : > { %v15874_v30 = vadd.f32 %v8067_v12, %v15809_v20  ;;  %v6497_v12 = vadd.f32 %v16407_v5, %v16406_v23  ;;  %v11587_v5 = vld [vmem:[#allocation21 + $0x38] sm:$0xff] }
0x194e   : > { %v8055_v41 = vpop.f32.mrf.mxu0 }
0x194f   : > { %v15879_v25 = vadd.f32 %v8055_v41, %v15814_v13  ;;  %v16408_v41 = vld [vmem:[#allocation130_spill] sm:$0xff] }
0x1954   : > { %v8069_v20 = vpop.f32.mrf.mxu2 }
0x1955   : > { %v15888_v29 = vadd.f32 %v8069_v20, %v15823_v61  ;;  %v16409_v20 = vld [vmem:[#allocation119_spill] sm:$0xff] }
0x1956   : > { %v8097_v13 = vpop.f32.mrf.mxu0 }
0x195c   : > { %v8120_v7 = vpop.f32.mrf.mxu2 }
0x195d   : > { %v8121_v17 = vadd.f32 %v8120_v7, %v8097_v13  ;;  %v6525_v13 = vadd.f32 %v16409_v20, %v4073_v49  ;;  %v16410_v7 = vld [vmem:[#allocation111_spill] sm:$0xff]  ;;  %v11574_v49 = vld [vmem:[%s12922_s14 + $0xf4] sm:$0xf] }
0x195e   : > { %v8100_v6 = vpop.f32.mrf.mxu0  ;;  %v11586_v20 = vld [vmem:[#allocation21 + $0x30] sm:$0xff] }
0x195f   : > { %v8126_v40 = vmul.f32 %v8121_v17, %v15095_v1  ;;  %v6511_v17 = vadd.f32 %v16410_v7, %v6497_v12 }
0x1964   : > { %v8123_v18 = vpop.f32.mrf.mxu2 }
0x1965   : > { %v8124_v57 = vadd.f32 %v8123_v18, %v8100_v6  ;;  %v16411_v6 = vld [vmem:[#allocation123_spill] sm:$0xff] }
0x1966   : > { %v6539_v18 = vadd.f32 %v16411_v6, %v6525_v13  ;;  %v11584_v6 = vld [vmem:[#allocation21 + $0x20] sm:$0xff] }
0x1967   : > { %v8127_v61 = vmul.f32 %v8124_v57, %v15097_v58  ;;  %v8176_v57 = vmul.f32 %v16339_v27, %v6511_v17 }
0x1969   : > { %v8128_v9 = vpack.c.bf16 %v8127_v61, %v8126_v40  ;;  %v8177_v40 = vmul.f32 %v15047_v22, %v6539_v18  ;;  %v11573_v61 = vld [vmem:[%s12922_s14 + $0xe4] sm:$0xf0] }
0x196a   : > { %v11009_v16 = vor.u32 %v11573_v61, %v11008_v60 }
0x196b   : > { %11004 = vmatmul.msk.bf16.vlgmr.msra.gmra.mxu1 %vm1373_vm4, %v8128_v9  ;;  %11005 = vmatmul.msk.bf16.vlgmr.msrb.gmra.mxu3 %vm1373_vm4, %v8128_v9  ;;  %v11572_v9 = vld [vmem:[%s12922_s14 + $0xe4] sm:$0xf] }
0x196c   : > { %v11013_v43 = vor.u32 %v11572_v9, %v11010_v15  ;;  %8247 = vmatpush.bf16.msra.mxu0 %v11009_v16 }
0x196e   : > { %8261 = vmatpush.bf16.msrb.mxu2 %v11013_v43 }
0x1970   : > { %8276 = vmatpush.msrb.mxu0 %v13077_v37 }
0x1972   : > { %8299 = vmatpush.msra.mxu2 %v13157_v53  ;;  %8277 = vmatpush.msrb.mxu0 %v13072_v36 }
0x1974   : > { %8300 = vmatpush.msra.mxu2 %v13152_v52  ;;  %8278 = vmatpush.msrb.mxu0 %v13067_v35 }
0x1976   : > { %8301 = vmatpush.msra.mxu2 %v13147_v51  ;;  %8279 = vmatpush.msrb.mxu0 %v13062_v34 }
0x1978   : > { %8302 = vmatpush.msra.mxu2 %v16311_v4  ;;  %8280 = vmatpush.msrb.mxu0 %v13057_v33 }
0x197a   : > { %8303 = vmatpush.msra.mxu2 %v16312_v48  ;;  %8281 = vmatpush.msrb.mxu0 %v16225_v54  ;;  %v16413_v48 = vld [vmem:[#allocation120_spill] sm:$0xff] }
0x197b   : > { %8194 = vmatmul.f32.vlgmr.msrb.gmra.mxu1 %v16408_v41  ;;  %8217 = vmatmul.f32.vlgmr.msra.gmra.mxu3 %v8175_v10  ;;  %v11020_v10 = vld [vmem:[%s12922_s14 + $0xf8] sm:$0xf0] }
0x197c   : > { %8304 = vmatpush.msra.mxu2 %v16313_v46  ;;  %8282 = vmatpush.msrb.mxu0 %v16227_v14  ;;  %v11023_v23 = vor.u32 %v11574_v49, %v11020_v10 }
0x197e   : > { %8305 = vmatpush.msra.mxu2 %v16314_v50  ;;  %8283 = vmatpush.msrb.mxu0 %v16230_v3 }
0x197f   : > { %8359 = vmatpush.bf16.msrb.mxu3 %v11023_v23 }
0x1980   : > { %8306 = vmatpush.msra.mxu2 %v16315_v8  ;;  %8284 = vmatpush.msrb.mxu0 %v16232_v55  ;;  %v16414_v8 = vperm.slane %v16389_v44, 7 }
0x1982   : > { %8307 = vmatpush.msra.mxu2 %v16316_v42  ;;  %8285 = vmatpush.msrb.mxu0 %v16236_v21  ;;  %v16415_v42 = vld [vmem:[#allocation132_spill] sm:$0xff] }
0x1983   : > { %8197 = vmatmul.f32.gmra.mxu1 %v8176_v57  ;;  %8220 = vmatmul.f32.gmra.mxu3 %v8177_v40 }
0x1984   : > { %8308 = vmatpush.msra.mxu2 %v16317_v2  ;;  %8286 = vmatpush.msrb.mxu0 %v16307_v24  ;;  %v6581_v2 = vadd.f32 %v16415_v42, %v16414_v8  ;;  %v16424_v42 = vld [vmem:[#allocation65_spill] sm:$0xff] }
0x1986   : > { %8309 = vmatpush.msra.mxu2 %v16318_v62  ;;  %8287 = vmatpush.msrb.mxu0 %v16308_v0  ;;  %v16416_v62 = vld [vmem:[#allocation138_spill] sm:$0xff] }
0x1988   : > { %8310 = vmatpush.msra.mxu2 %v16319_v19  ;;  %8288 = vmatpush.msrb.mxu0 %v16309_v38  ;;  %v16417_v19 = vld [vmem:[#allocation118_spill] sm:$0xff] }
0x198a   : > { %8311 = vmatpush.msra.mxu2 %v16320_v26  ;;  %8289 = vmatpush.msrb.mxu0 %v16310_v31 }
0x198c   : > { %8312 = vmatpush.msra.mxu2 %v16322_v63  ;;  %8290 = vmatpush.msrb.mxu0 %v16249_v11  ;;  %v4074_v11 = vperm.slane %v15767_v59, 6  ;;  %v16418_v63 = vld [vmem:[#allocation122_spill] sm:$0xff] }
0x198e   : > { %8313 = vmatpush.msra.mxu2 %v16323_v47  ;;  %8291 = vmatpush.msrb.mxu0 %v16251_v28  ;;  %v16412_v28 = vld [vmem:[#allocation114_spill] sm:$0xff]  ;;  %v6553_v26 = vadd.f32 %v16417_v19, %v4074_v11 }
0x198f   : > { %v6551_v4 = vadd.f32 %v16412_v28, %v4074_v11  ;;  %v16423_v28 = vld [vmem:[#allocation64_spill] sm:$0xff] }
0x1990   : > { %8314 = vmatpush.msra.mxu2 %v16324_v39  ;;  %v6567_v47 = vadd.f32 %v16418_v63, %v6553_v26  ;;  %v16419_v39 = vld [vmem:[#allocation125_spill] sm:$0xff]  ;;  %v11774_v63 = vld [vmem:[#allocation22] ss:$0 sm:$0xff] }
0x1991   : > { %v6565_v46 = vadd.f32 %v16413_v48, %v6551_v4  ;;  %v6595_v59 = vadd.f32 %v16419_v39, %v6581_v2 }
0x1993   : > { %v8272_v50 = vmul.f32 %v16364_v45, %v6565_v46 }
0x19e8   : > { %v8151_v37 = vpop.f32.mrf.mxu1 }
0x19e9   : > { %v8170_v36 = vadd.f32 %v8151_v37, %v15865_v56  ;;  %v8274_v56 = vmul.f32 %v16339_v27, %v6567_v47  ;;  %v11583_v37 = vld [vmem:[#allocation21 + $0x18] sm:$0xff] }
0x19ee   : > { %v8165_v33 = vpop.f32.mrf.mxu3 }
0x19ef   : > { %v8171_v34 = vadd.f32 %v8165_v33, %v15874_v30  ;;  %v8275_v30 = vmul.f32 %v15047_v22, %v6595_v59  ;;  %v11585_v22 = vld [vmem:[#allocation21 + $0x28] sm:$0xff] }
0x19f0   : > { %v8153_v35 = vpop.f32.mrf.mxu1  ;;  %v11581_v33 = vld [vmem:[#allocation21 + $0x8] sm:$0xff] }
0x19f1   : > { %v8172_v51 = vadd.f32 %v8153_v35, %v15879_v25  ;;  %v11018_v25 = vld [vmem:[%s12922_s14 + $0xf0] sm:$0xf]  ;;  %v11588_v35 = vld [vmem:[#allocation21 + $0x40] sm:$0xff] }
0x19f2   : > { %8490 = vmatpush.bf16.msra.mxu3 %v11588_v35 }
0x19f6   : > { %v8167_v52 = vpop.f32.mrf.mxu3 }
0x19f7   : > { %v8173_v53 = vadd.f32 %v8167_v52, %v15888_v29  ;;  %v11575_v29 = vld [vmem:[%s12922_s14 + $0xf4] sm:$0xf0]  ;;  %s12434_s14 = smov 128  }
0x19f8   : > { %v8195_v54 = vpop.f32.mrf.mxu1  ;;  %v11019_v32 = vor.u32 %v11575_v29, %v11018_v25 }
0x19fa   : > { %8345 = vmatpush.bf16.msra.mxu1 %v11019_v32 }
0x19fe   : > { %v8218_v14 = vpop.f32.mrf.mxu3  ;;  %8469 = vmatpush.bf16.msrb.mxu1 %v11587_v5 }
0x19ff   : > { %v8219_v3 = vadd.f32 %v8218_v14, %v8195_v54 }
0x1a00   : > { %v8198_v55 = vpop.f32.mrf.mxu1 }
0x1a01   : > { %v8224_v24 = vmul.f32 %v8219_v3, %v15095_v1 }
0x1a02   : > { %8470 = vmatpush.bf16.msrb.mxu1 %v11586_v20 }
0x1a06   : > { %v8221_v21 = vpop.f32.mrf.mxu3  ;;  %8471 = vmatpush.bf16.msrb.mxu1 %v11585_v22 }
0x1a07   : > { %v8222_v0 = vadd.f32 %v8221_v21, %v8198_v55 }
0x1a09   : > { %v8225_v38 = vmul.f32 %v8222_v0, %v15097_v58 }
0x1a0a   : > { %8472 = vmatpush.bf16.msrb.mxu1 %v11584_v6 }
0x1a0b   : > { %v8226_v31 = vpack.c.bf16 %v8225_v38, %v8224_v24  ;;  %v16422_v24 = vld [vmem:[#allocation63_spill] sm:$0xff] }
0x1a0d   : > { %11014 = vmatmul.msk.bf16.vlgmr.msra.gmra.mxu0 %vm1373_vm4, %v8226_v31  ;;  %11015 = vmatmul.msk.bf16.vlgmr.msrb.gmra.mxu2 %vm1373_vm4, %v8226_v31 }
0x1a0e   : > { %8473 = vmatpush.bf16.msrb.mxu1 %v11583_v37 }
0x1a1d   : > { %8292 = vmatmul.f32.vlgmr.msrb.gmra.mxu0 %v8272_v50  ;;  %8315 = vmatmul.f32.vlgmr.msra.gmra.mxu2 %v16416_v62 }
0x1a25   : > { %8295 = vmatmul.f32.gmra.mxu0 %v8274_v56  ;;  %8318 = vmatmul.f32.gmra.mxu2 %v8275_v30 }
0x1a8a   : > { %v8249_v45 = vpop.f32.mrf.mxu0 }
0x1a8b   : > { %v8268_v44 = vadd.f32 %v8249_v45, %v8170_v36  ;;  %v11582_v36 = vld [vmem:[#allocation21 + $0x10] sm:$0xff] }
0x1a8c   : > { %8474 = vmatpush.bf16.msrb.mxu1 %v11582_v36 }
0x1a90   : > { %v8263_v12 = vpop.f32.mrf.mxu2  ;;  %8475 = vmatpush.bf16.msrb.mxu1 %v11581_v33 }
0x1a91   : > { %v8269_v41 = vadd.f32 %v8263_v12, %v8171_v34  ;;  %v11580_v34 = vld [vmem:[#allocation21] sm:$0xff] }
0x1a92   : > { %v8251_v27 = vpop.f32.mrf.mxu0 }
0x1a93   : > { %v8270_v13 = vadd.f32 %v8251_v27, %v8172_v51  ;;  %v8374_v51 = vld [vmem:[%s16420_s8] sm:$0x3] }
0x1a94   : > { %8476 = vmatpush.bf16.msrb.mxu1 %v11580_v34  ;;  %v8377_v21 = vperm.slane %v8374_v51, 1 }
0x1a98   : > { %v8265_v7 = vpop.f32.mrf.mxu2 }
0x1a99   : > { %v8271_v17 = vadd.f32 %v8265_v7, %v8173_v53  ;;  %v16421_v53 = vld [vmem:[#allocation62_spill] sm:$0xff] }
0x1a9a   : > { %v8293_v18 = vpop.f32.mrf.mxu0 }
0x1aa0   : > { %v8316_v57 = vpop.f32.mrf.mxu2 }
0x1aa1   : > { %v8317_v40 = vadd.f32 %v8316_v57, %v8293_v18 }
0x1aa2   : > { %v8296_v60 = vpop.f32.mrf.mxu0 }
0x1aa3   : > { %v8322_v16 = vmul.f32 %v8317_v40, %v15095_v1 }
0x1aa8   : > { %v8319_v61 = vpop.f32.mrf.mxu2 }
0x1aa9   : > { %v8320_v9 = vadd.f32 %v8319_v61, %v8296_v60 }
0x1aab   : > { %v8323_v15 = vmul.f32 %v8320_v9, %v15097_v58  ;;  %v8376_v58 = vperm.slane %v8374_v51, 0 }
0x1aad   : > { %v8324_v43 = vpack.c.bf16 %v8323_v15, %v8322_v16 }
0x1aaf   : > { %11024 = vmatmul.msk.bf16.vlgmr.msra.gmra.mxu1 %vm1373_vm4, %v8324_v43  ;;  %11025 = vmatmul.msk.bf16.vlgmr.msrb.gmra.mxu3 %vm1373_vm4, %v8324_v43 }
0x1b2c   : > { %v8347_v1 = vpop.f32.mrf.mxu1 }
0x1b2d   : > { %v8366_v52 = vadd.f32 %v8347_v1, %v8268_v44 }
0x1b2f   : > { %v8370_v54 = vadd.f32 %v8366_v52, %v16421_v53 }
0x1b31   : > { %v8380_v14 = vadd.f32 %v8376_v58, %v8370_v54 }
0x1b32   : > { %v8361_v3 = vpop.f32.mrf.mxu3 }
0x1b33   : > { %8384 = vst [vmem:[#allocation2] sm:$0xff] %v8380_v14  ;;  %v8367_v55 = vadd.f32 %v8361_v3, %v8269_v41 }
0x1b34   : > { %v8349_v0 = vpop.f32.mrf.mxu1 }
0x1b35   : > { %v8371_v38 = vadd.f32 %v8367_v55, %v16422_v24  ;;  %v8368_v31 = vadd.f32 %v8349_v0, %v8270_v13 }
0x1b37   : > { %v8381_v11 = vadd.f32 %v8377_v21, %v8371_v38  ;;  %v8372_v4 = vadd.f32 %v8368_v31, %v16423_v28 }
0x1b39   : > { %8385 = vst.msk [vmem:[#allocation2 + $0x8] sm:$0xff] %vm1373_vm4, %v8381_v11  ;;  %v8382_v48 = vadd.f32 %v8376_v58, %v8372_v4 }
0x1b3a   : > { %v8363_v46 = vpop.f32.mrf.mxu3 }
0x1b3b   : > { %8386 = vst [vmem:[#allocation2 + $0x10] sm:$0xff] %v8382_v48  ;;  %v8406_v50 = vpack.c.bf16 %v8382_v48, %v8380_v14  ;;  %v8369_v8 = vadd.f32 %v8363_v46, %v8271_v17 }
0x1b3d   : > { %v8373_v2 = vadd.f32 %v8369_v8, %v16424_v42  ;;  %8477 = vmatmul.bf16.vlgmr.msrb.gmra.mxu1 %v8406_v50 }
0x1b3f   : > { %v8383_v62 = vadd.f32 %v8377_v21, %v8373_v2 }
0x1b41   : > { %8387 = vst.msk [vmem:[#allocation2 + $0x18] sm:$0xff] %vm1373_vm4, %v8383_v62  ;;  %v8407_v19 = vpack.c.bf16 %v8383_v62, %v8381_v11 }
0x1b43   : > { %11062 = vmatmul.msk.bf16.vlgmr.msra.gmra.mxu3 %vm1373_vm4, %v8407_v19 }
0x1bba   : > { %v8478_v26 = vpop.f32.mrf.mxu1 }
0x1bbb   : > { %v8479_v47 = vadd.f32 %v11774_v63, %v8478_v26 }
0x1bc2   : > { %v8480_v56 = vpop.f32.mrf.mxu1 }
0x1bc3   : > { %v8481_v30 = vadd.f32 %v11774_v63, %v8480_v56 }
0x1bc6   : > { %v8492_v39 = vpop.f32.mrf.mxu3 }
0x1bc7   : > { %v8493_v59 = vadd.f32 %v8492_v39, %v8479_v47 }
0x1bc9   : > { %8497 = vst [vmem:[#allocation23] sm:$0xff] %v8493_v59 }
0x1bce   : > { %v8494_v45 = vpop.f32.mrf.mxu3 }
0x1bcf   : > { %v8495_v44 = vadd.f32 %v8494_v45, %v8481_v30 }
0x1bd1   : > { %8498 = vst [vmem:[#allocation23 + $0x8] sm:$0xff] %v8495_v44 }
0x1bd2   : > { %11651 = dma.vmem_to_hbm [thread:$0]  (%p11717_p1), %s8505_s11, 256, %s8507_s1, [#allocation5], %s12434_s14, %s12434_s14, %s12435_s19  }
0x1bd3   : > { %12397 = dma.done.wait (%p11717_p1), [#allocation5], 256  }
0x1bd4   : > { %12399 = vsyncadd (%p11717_p1), [#allocation5], 4294967040 }
0x1bd5 PF: > { %s16427_s30 = sld [smem:[#allocation36_spill]] }
0x1bd6   : > { %s16428_s3 = sld [smem:[#allocation31_spill]] }
0x1bd7   : > { %s16429_s28 = sld [smem:[#allocation32_spill]] }
0x1bd8   : > { %s16430_s29 = sld [smem:[#allocation37_spill]] }
0x1bdb   : > { %p33_p4 = scmp.ge.s32.totalorder %s16427_s30, 4  }
0x1bdd   :  { %35 = sbr.rel (!%p33_p4) target bundleno = 25 (0x19), region = 283 }
0x1be2   :  { %8523 = vsyncpa [#allocation4], 1 }
0x1be3   :  { %8525 = vsyncpa [#allocation4 + $0x1], 1 }
0x1be4   :  { %8526 = vsyncpa [#allocation7], 1 }
0x1be5   :  { %8527 = vsyncpa [#allocation10], 1 }
0x1be6   :  { %8528 = vsyncpa [#allocation5], 1 }
0x1be7   :  { %8530 = vsyncpa [#allocation5 + $0x1], 1 }

</bundles_post_ra>
